<compile_context>
chip_gen: v5e
topology: v5e:2x2
jax: 0.10.0
libtpu: 0.0.40
codegen_flags: <defaults>
</compile_context>

<pallas_src>
import math

import jax
import jax.numpy as jnp
from jax import lax
from jax.experimental import pallas as pl
from jax.experimental.pallas import tpu as pltpu


def _round_up(n, m):
    return ((n + m - 1) // m) * m


# ------------------------------ fused kernel --------------------------------

def _net2net_kernel(p1_ref, w1_ref, b1_ref, w2_ref, b2_ref,
                    fw1_ref, fb1_ref, fw2_ref, fb2_ref, fw3_ref, fb3_ref,
                    o_ref, y1_ref, p2_ref, z_ref):
    """Whole Net2Net forward (eval mode) in one kernel.

    p1_ref : [4*2*2*6*PWB, 25] bf16  conv1 im2col patches; rows ordered
             (q1=pool pos, ry, rx, ph', pw'*B + b) with (ry,rx) the parity of the
             pooled 12x12 grid position and PWB = 6*B rounded up to 8 (padded rows).
    w1_ref : [25, 10]  bf16   conv1 weight, rows (kh,kw).
    w2_ref : [250, 20] f32    conv2 weight (bf16-rounded values), rows (kh,kw,c_in).
    fw1_ref: [320, 50] bf16   fc1 weight, rows permuted to (h, w, c).
    fw2_ref: [50, 20]  bf16   fc2 weight.   fw3_ref: [20, 2] bf16  fc3 weight.
    b*_ref : [1, N]    f32    biases.
    o_ref  : [B, 2]    f32    log_softmax output.
    y1_ref : [2, 2, 6, PWB, 10] f32 scratch  (parity-split pooled conv1 output).
    p2_ref : [4, 4, 4*B, 250]   f32 scratch  (conv2 im2col patches).
    z_ref  : [B, 320]  bf16 scratch          (flattened fc input).
    """
    bf = jnp.bfloat16
    f32 = jnp.float32
    B = o_ref.shape[0]
    PWB = y1_ref.shape[3]            # 6*B padded up to a multiple of 8
    R1 = 2 * 2 * 6 * PWB             # rows of the (padded) pooled conv1 output
    M2 = 16 * B                      # rows of the pooled conv2 output

    # --- conv1: all four 2x2 pool positions in ONE matmul, then a 3-op VPU max ---
    y = jnp.dot(p1_ref[...], w1_ref[...], preferred_element_type=f32)   # [4*R1, 10]
    y1 = y[0:R1, :]
    for q in range(1, 4):
        y1 = jnp.maximum(y1, y[q * R1:(q + 1) * R1, :])
    # bias commutes with the max; relu after pool (matches PyTorch order).
    y1 = jnp.maximum(y1 + b1_ref[...], 0.0)
    # Round to bf16 values (matches a bf16 MXU operand) but keep f32 storage so all
    # following relayouts stay on clean (8,128) f32 tiles.
    y1 = y1.astype(bf).astype(f32)                                       # [R1, 10]

    # Scatter into the parity-split layout y1_ref[ry, rx, ph', pw'*B + b, c]
    # (12x12 pooled-grid position == (2*ph' + ry, 2*pw' + rx)).
    for ry in range(2):
        for rx in range(2):
            for ph in range(6):
                r0 = ((ry * 2 + rx) * 6 + ph) * PWB
                y1_ref[ry, rx, ph, :, :] = y1[r0:r0 + PWB, :]

    # --- conv2 im2col built entirely in VMEM (no HBM round trip, no XLA glue) ---
    # p2_ref[q2, ph2, pw2*B + b, t*10 + c] = y1[b, 2*ph2 + dy + kh, 2*pw2 + dx + kw, c]
    for dy in range(2):
        for dx in range(2):
            q2 = dy * 2 + dx
            for kh in range(5):
                for kw in range(5):
                    t = kh * 5 + kw
                    ay, ry = divmod(dy + kh, 2)
                    ax, rx = divmod(dx + kw, 2)
                    s = ax * B
                    p2_ref[q2, :, :, t * 10:(t + 1) * 10] = (
                        y1_ref[ry, rx, ay:ay + 4, s:s + 4 * B, :])

    # --- conv2: one matmul over all four pool positions, VPU max, bias, relu ---
    p2 = p2_ref[...].reshape(4 * M2, 250)        # layout-preserving collapse (8-row tiles)
    yc = jnp.dot(p2, w2_ref[...], preferred_element_type=f32)            # [4*M2, 20]
    y2 = yc[0:M2, :]
    for q in range(1, 4):
        y2 = jnp.maximum(y2, yc[q * M2:(q + 1) * M2, :])
    y2 = jnp.maximum(y2 + b2_ref[...], 0.0).astype(bf)                   # [M2, 20]

    # --- flatten to [B, 320]; column order (h, w, c) matches pre-permuted fc1 weight ---
    for p in range(16):
        z_ref[:, p * 20:(p + 1) * 20] = y2[p * B:(p + 1) * B, :]
    z = z_ref[...]

    # --- fc1+relu -> (dropout = identity, eval) -> fc2 -> fc3 -> log_softmax ---
    h = jnp.dot(z, fw1_ref[...], preferred_element_type=f32) + fb1_ref[...]
    h = jnp.maximum(h, 0.0)
    h = jnp.dot(h.astype(bf), fw2_ref[...], preferred_element_type=f32) + fb2_ref[...]
    yl = jnp.dot(h.astype(bf), fw3_ref[...], preferred_element_type=f32) + fb3_ref[...]
    m = jnp.max(yl, axis=-1, keepdims=True)
    lse = m + jnp.log(jnp.sum(jnp.exp(yl - m), axis=-1, keepdims=True))
    o_ref[...] = (yl - lse).astype(o_ref.dtype)


def net2net_fused(p1, w1t, b1, w2t, b2, fw1t, fb1, fw2t, fb2, fw3t, fb3, B, PWB):
    args = (p1, w1t, b1, w2t, b2, fw1t, fb1, fw2t, fb2, fw3t, fb3)

    def full(a):
        nd = a.ndim
        return pl.BlockSpec(a.shape, lambda i, nd=nd: (0,) * nd)

    return pl.pallas_call(
        _net2net_kernel,
        out_shape=jax.ShapeDtypeStruct((B, 2), jnp.float32),
        grid=(1,),
        in_specs=[full(a) for a in args],
        out_specs=pl.BlockSpec((B, 2), lambda i: (0, 0)),
        scratch_shapes=[
            pltpu.VMEM((2, 2, 6, PWB, 10), jnp.float32),   # pooled conv1 output (parity split)
            pltpu.VMEM((4, 4, 4 * B, 250), jnp.float32),   # conv2 im2col patches
            pltpu.VMEM((B, 320), jnp.bfloat16),            # flattened fc input
        ],
        compiler_params=pltpu.CompilerParams(dimension_semantics=("arbitrary",)),
        cost_estimate=pl.CostEstimate(flops=2_200_000, transcendentals=8,
                                      bytes_accessed=150_000),
    )(*args)


# ------------------------------- JAX glue -----------------------------------

def build_conv1_patches(x, B, PWB):
    """x: [B, 1, 28, 28] -> p1 [4*2*2*6*PWB, 25] bf16.

    Rows ordered (q1 = 2*dy1+dx1, ry, rx, ph', pw'*B + b) with padding rows (zeros)
    so the pw'*B + b axis has extent PWB; columns ordered (kh, kw).
    p1 value = x[b, 4*ph' + 2*ry + dy1 + kh, 4*pw' + 2*rx + dx1 + kw].
    """
    xb = x[:, 0, :, :].astype(jnp.bfloat16)                           # [B, 28, 28]
    taps = [xb[:, kh:kh + 24, kw:kw + 24] for kh in range(5) for kw in range(5)]
    t = jnp.stack(taps, axis=-1)                                      # [B, 24, 24, 25]
    t = t.reshape(B, 6, 2, 2, 6, 2, 2, 25)      # (b, ph', ry, dy1, pw', rx, dx1, tap)
    t = t.transpose(3, 6, 2, 5, 1, 4, 0, 7)     # (dy1, dx1, ry, rx, ph', pw', b, tap)
    t = t.reshape(4, 2, 2, 6, 6 * B, 25)
    t = jnp.pad(t, ((0, 0), (0, 0), (0, 0), (0, 0), (0, PWB - 6 * B), (0, 0)))
    return t.reshape(4 * 2 * 2 * 6 * PWB, 25)


def prepare_params(params):
    """One-time weight prep: flatten/transpose/permute + dtype rounding."""
    (w1, b1, w2, b2, fw1, fb1, fw2, fb2, fw3, fb3) = params
    bf = jnp.bfloat16
    f32 = jnp.float32
    w1t = w1.reshape(10, 25).T.astype(bf)                              # [25, 10]  rows (kh,kw)
    # conv2 patch columns are ordered (kh, kw, c_in); store bf16-rounded values in f32.
    w2t = (w2.transpose(2, 3, 1, 0).reshape(250, 20)
           .astype(bf).astype(f32))                                    # [250, 20]
    # PyTorch flattens conv2's output as (c, h, w); the kernel emits (h, w, c).
    fw1t = (fw1.reshape(50, 20, 4, 4).transpose(2, 3, 1, 0)
            .reshape(320, 50).astype(bf))                              # [320, 50]
    fw2t = fw2.T.astype(bf)                                            # [50, 20]
    fw3t = fw3.T.astype(bf)                                            # [20, 2]
    return (w1t, b1.reshape(1, -1), w2t, b2.reshape(1, -1),
            fw1t, fb1.reshape(1, -1), fw2t, fb2.reshape(1, -1),
            fw3t, fb3.reshape(1, -1))


def net2net_forward(x, prepared):
    (w1t, b1, w2t, b2, fw1t, fb1, fw2t, fb2, fw3t, fb3) = prepared
    assert x.shape[1:] == (1, 28, 28), "geometry hardcoded for MNIST-shaped input"
    B = x.shape[0]
    PWB = _round_up(6 * B, 8)
    p1 = build_conv1_patches(x, B, PWB)
    return net2net_fused(p1, w1t, b1, w2t, b2,
                         fw1t, fb1, fw2t, fb2, fw3t, fb3, B, PWB)


# --------------------------- pure-JAX reference -----------------------------

def _maxpool2(y):
    B, C, H, W = y.shape
    return y.reshape(B, C, H // 2, 2, W // 2, 2).max(axis=(3, 5))


def ref_forward(x, params):
    (w1, b1, w2, b2, fw1, fb1, fw2, fb2, fw3, fb3) = params
    dn = ("NCHW", "OIHW", "NCHW")
    bf = jnp.bfloat16
    y = lax.conv_general_dilated(x.astype(bf), w1.astype(bf), (1, 1), "VALID",
                                 dimension_numbers=dn,
                                 preferred_element_type=jnp.float32)
    y = y + b1[None, :, None, None]
    y = jnp.maximum(_maxpool2(y), 0.0)
    y = lax.conv_general_dilated(y.astype(bf), w2.astype(bf), (1, 1), "VALID",
                                 dimension_numbers=dn,
                                 preferred_element_type=jnp.float32)
    y = y + b2[None, :, None, None]
    y = jnp.maximum(_maxpool2(y), 0.0)
    y = y.reshape(y.shape[0], -1)
    y = jnp.maximum(jnp.dot(y.astype(bf), fw1.T.astype(bf),
                            preferred_element_type=jnp.float32) + fb1, 0.0)
    y = jnp.dot(y.astype(bf), fw2.T.astype(bf),
                preferred_element_type=jnp.float32) + fb2
    y = jnp.dot(y.astype(bf), fw3.T.astype(bf),
                preferred_element_type=jnp.float32) + fb3
    return jax.nn.log_softmax(y, axis=1)


# ---------------------------------- main ------------------------------------

def _init(k, shape, fan_in):
    bound = 1.0 / math.sqrt(fan_in)
    return jax.random.uniform(k, shape, jnp.float32, -bound, bound)


if __name__ == "__main__":
    key = jax.random.PRNGKey(0)
    ks = jax.random.split(key, 11)

    w1 = _init(ks[0], (10, 1, 5, 5), 1 * 5 * 5)
    b1 = _init(ks[1], (10,), 1 * 5 * 5)
    w2 = _init(ks[2], (20, 10, 5, 5), 10 * 5 * 5)
    b2 = _init(ks[3], (20,), 10 * 5 * 5)
    fw1 = _init(ks[4], (50, 320), 320)
    fb1 = _init(ks[5], (50,), 320)
    fw2 = _init(ks[6], (20, 50), 50)
    fb2 = _init(ks[7], (20,), 50)
    fw3 = _init(ks[8], (2, 20), 20)
    fb3 = _init(ks[9], (2,), 20)
    params = (w1, b1, w2, b2, fw1, fb1, fw2, fb2, fw3, fb3)
    prepared = prepare_params(params)   # one-time weight transforms (not per step)

    # MNIST-shaped input implied by fc1's in_features=320 (= 20*4*4 from 28x28).
    x = jax.random.normal(ks[10], (2, 1, 28, 28), jnp.float32)

    fwd = jax.jit(net2net_forward)
    out = jax.block_until_ready(fwd(x, prepared))
    ref = jax.block_until_ready(ref_forward(x, params))

    assert out.shape == (2, 2), out.shape
    assert jnp.allclose(jnp.sum(jnp.exp(out), axis=1), 1.0, atol=1e-4)
    assert jnp.allclose(out, ref, atol=2e-3, rtol=2e-3), (out, ref)
    print("KERNEL_OK")
</pallas_src>

<mosaic_0001>
module attributes {stable_mosaic.version = 11 : i64} {
  func.func @_net2net_kernel(%arg0: i32, %arg1: memref<1536x25xbf16, #tpu.memory_space<vmem>>, %arg2: memref<25x10xbf16, #tpu.memory_space<vmem>>, %arg3: memref<1x10xf32, #tpu.memory_space<vmem>>, %arg4: memref<250x20xf32, #tpu.memory_space<vmem>>, %arg5: memref<1x20xf32, #tpu.memory_space<vmem>>, %arg6: memref<320x50xbf16, #tpu.memory_space<vmem>>, %arg7: memref<1x50xf32, #tpu.memory_space<vmem>>, %arg8: memref<50x20xbf16, #tpu.memory_space<vmem>>, %arg9: memref<1x20xf32, #tpu.memory_space<vmem>>, %arg10: memref<20x2xbf16, #tpu.memory_space<vmem>>, %arg11: memref<1x2xf32, #tpu.memory_space<vmem>>, %arg12: memref<2x2xf32, #tpu.memory_space<vmem>>, %arg13: memref<2x2x6x16x10xf32, #tpu.memory_space<vmem>>, %arg14: memref<4x4x8x250xf32, #tpu.memory_space<vmem>>, %arg15: memref<2x320xbf16, #tpu.memory_space<vmem>>) attributes {dimension_semantics = [#tpu.dimension_semantics<arbitrary>], iteration_bounds = array<i64: 1>, scalar_prefetch = 0 : i64, scratch_operands = 3 : i64, tpu.core_type = #tpu.core_type<tc>, window_params = [{pipeline_mode = #tpu.pipeline_mode<synchronous>, transform_indices = @transform_0, window_bounds = array<i64: 1536, 25>}, {pipeline_mode = #tpu.pipeline_mode<synchronous>, transform_indices = @transform_1, window_bounds = array<i64: 25, 10>}, {pipeline_mode = #tpu.pipeline_mode<synchronous>, transform_indices = @transform_2, window_bounds = array<i64: 1, 10>}, {pipeline_mode = #tpu.pipeline_mode<synchronous>, transform_indices = @transform_3, window_bounds = array<i64: 250, 20>}, {pipeline_mode = #tpu.pipeline_mode<synchronous>, transform_indices = @transform_4, window_bounds = array<i64: 1, 20>}, {pipeline_mode = #tpu.pipeline_mode<synchronous>, transform_indices = @transform_5, window_bounds = array<i64: 320, 50>}, {pipeline_mode = #tpu.pipeline_mode<synchronous>, transform_indices = @transform_6, window_bounds = array<i64: 1, 50>}, {pipeline_mode = #tpu.pipeline_mode<synchronous>, transform_indices = @transform_7, window_bounds = array<i64: 50, 20>}, {pipeline_mode = #tpu.pipeline_mode<synchronous>, transform_indices = @transform_8, window_bounds = array<i64: 1, 20>}, {pipeline_mode = #tpu.pipeline_mode<synchronous>, transform_indices = @transform_9, window_bounds = array<i64: 20, 2>}, {pipeline_mode = #tpu.pipeline_mode<synchronous>, transform_indices = @transform_10, window_bounds = array<i64: 1, 2>}, {pipeline_mode = #tpu.pipeline_mode<synchronous>, transform_indices = @transform_11, window_bounds = array<i64: 2, 2>}]} {
    %c0 = arith.constant 0 : index
    %c0_0 = arith.constant 0 : index
    %0 = vector.load %arg1[%c0, %c0_0] : memref<1536x25xbf16, #tpu.memory_space<vmem>>, vector<1536x25xbf16>
    %c0_1 = arith.constant 0 : index
    %c0_2 = arith.constant 0 : index
    %1 = vector.load %arg2[%c0_1, %c0_2] : memref<25x10xbf16, #tpu.memory_space<vmem>>, vector<25x10xbf16>
    %cst = arith.constant dense<0.000000e+00> : vector<1536x10xf32>
    %2 = tpu.matmul %0, %1, %cst {dimension_numbers = #tpu.dot_dimension_numbers<[1], [0], [0], [1], [0, 0, 1, 1], [], []>} : vector<1536x25xbf16>, vector<25x10xbf16>, vector<1536x10xf32> -> vector<1536x10xf32>
    %3 = vector.extract_strided_slice %2 {offsets = [0, 0], sizes = [384, 10], strides = [1, 1]} : vector<1536x10xf32> to vector<384x10xf32>
    %4 = vector.extract_strided_slice %2 {offsets = [384, 0], sizes = [384, 10], strides = [1, 1]} : vector<1536x10xf32> to vector<384x10xf32>
    %5 = arith.maximumf %3, %4 : vector<384x10xf32>
    %6 = vector.extract_strided_slice %2 {offsets = [768, 0], sizes = [384, 10], strides = [1, 1]} : vector<1536x10xf32> to vector<384x10xf32>
    %7 = arith.maximumf %5, %6 : vector<384x10xf32>
    %8 = vector.extract_strided_slice %2 {offsets = [1152, 0], sizes = [384, 10], strides = [1, 1]} : vector<1536x10xf32> to vector<384x10xf32>
    %9 = arith.maximumf %7, %8 : vector<384x10xf32>
    %c0_3 = arith.constant 0 : index
    %c0_4 = arith.constant 0 : index
    %10 = vector.load %arg3[%c0_3, %c0_4] : memref<1x10xf32, #tpu.memory_space<vmem>>, vector<1x10xf32>
    %11 = vector.broadcast %10 : vector<1x10xf32> to vector<384x10xf32>
    %12 = arith.addf %9, %11 : vector<384x10xf32>
    %cst_5 = arith.constant 0.000000e+00 : f32
    %13 = vector.broadcast %cst_5 : f32 to vector<384x10xf32>
    %14 = arith.maximumf %12, %13 : vector<384x10xf32>
    %15 = arith.truncf %14 : vector<384x10xf32> to vector<384x10xbf16>
    %16 = arith.extf %15 : vector<384x10xbf16> to vector<384x10xf32>
    %17 = vector.extract_strided_slice %16 {offsets = [0, 0], sizes = [16, 10], strides = [1, 1]} : vector<384x10xf32> to vector<16x10xf32>
    %c0_6 = arith.constant 0 : index
    %c0_7 = arith.constant 0 : index
    %c0_8 = arith.constant 0 : index
    %c0_9 = arith.constant 0 : index
    %c0_10 = arith.constant 0 : index
    %18 = vector.load %arg13[%c0_6, %c0_7, %c0_8, %c0_9, %c0_10] : memref<2x2x6x16x10xf32, #tpu.memory_space<vmem>>, vector<1x1x1x16x10xf32>
    %19 = vector.shape_cast %18 : vector<1x1x1x16x10xf32> to vector<16x10xf32>
    %20 = vector.shape_cast %17 : vector<16x10xf32> to vector<1x1x1x16x10xf32>
    tpu.vector_store %arg13[%c0_6, %c0_7, %c0_8, %c0_9, %c0_10], %20 {strides = array<i32>} : memref<2x2x6x16x10xf32, #tpu.memory_space<vmem>>, vector<1x1x1x16x10xf32>,
    %21 = vector.extract_strided_slice %16 {offsets = [16, 0], sizes = [16, 10], strides = [1, 1]} : vector<384x10xf32> to vector<16x10xf32>
    %c0_11 = arith.constant 0 : index
    %c0_12 = arith.constant 0 : index
    %c1 = arith.constant 1 : index
    %c0_13 = arith.constant 0 : index
    %c0_14 = arith.constant 0 : index
    %22 = vector.load %arg13[%c0_11, %c0_12, %c1, %c0_13, %c0_14] : memref<2x2x6x16x10xf32, #tpu.memory_space<vmem>>, vector<1x1x1x16x10xf32>
    %23 = vector.shape_cast %22 : vector<1x1x1x16x10xf32> to vector<16x10xf32>
    %24 = vector.shape_cast %21 : vector<16x10xf32> to vector<1x1x1x16x10xf32>
    tpu.vector_store %arg13[%c0_11, %c0_12, %c1, %c0_13, %c0_14], %24 {strides = array<i32>} : memref<2x2x6x16x10xf32, #tpu.memory_space<vmem>>, vector<1x1x1x16x10xf32>,
    %25 = vector.extract_strided_slice %16 {offsets = [32, 0], sizes = [16, 10], strides = [1, 1]} : vector<384x10xf32> to vector<16x10xf32>
    %c0_15 = arith.constant 0 : index
    %c0_16 = arith.constant 0 : index
    %c2 = arith.constant 2 : index
    %c0_17 = arith.constant 0 : index
    %c0_18 = arith.constant 0 : index
    %26 = vector.load %arg13[%c0_15, %c0_16, %c2, %c0_17, %c0_18] : memref<2x2x6x16x10xf32, #tpu.memory_space<vmem>>, vector<1x1x1x16x10xf32>
    %27 = vector.shape_cast %26 : vector<1x1x1x16x10xf32> to vector<16x10xf32>
    %28 = vector.shape_cast %25 : vector<16x10xf32> to vector<1x1x1x16x10xf32>
    tpu.vector_store %arg13[%c0_15, %c0_16, %c2, %c0_17, %c0_18], %28 {strides = array<i32>} : memref<2x2x6x16x10xf32, #tpu.memory_space<vmem>>, vector<1x1x1x16x10xf32>,
    %29 = vector.extract_strided_slice %16 {offsets = [48, 0], sizes = [16, 10], strides = [1, 1]} : vector<384x10xf32> to vector<16x10xf32>
    %c0_19 = arith.constant 0 : index
    %c0_20 = arith.constant 0 : index
    %c3 = arith.constant 3 : index
    %c0_21 = arith.constant 0 : index
    %c0_22 = arith.constant 0 : index
    %30 = vector.load %arg13[%c0_19, %c0_20, %c3, %c0_21, %c0_22] : memref<2x2x6x16x10xf32, #tpu.memory_space<vmem>>, vector<1x1x1x16x10xf32>
    %31 = vector.shape_cast %30 : vector<1x1x1x16x10xf32> to vector<16x10xf32>
    %32 = vector.shape_cast %29 : vector<16x10xf32> to vector<1x1x1x16x10xf32>
    tpu.vector_store %arg13[%c0_19, %c0_20, %c3, %c0_21, %c0_22], %32 {strides = array<i32>} : memref<2x2x6x16x10xf32, #tpu.memory_space<vmem>>, vector<1x1x1x16x10xf32>,
    %33 = vector.extract_strided_slice %16 {offsets = [64, 0], sizes = [16, 10], strides = [1, 1]} : vector<384x10xf32> to vector<16x10xf32>
    %c0_23 = arith.constant 0 : index
    %c0_24 = arith.constant 0 : index
    %c4 = arith.constant 4 : index
    %c0_25 = arith.constant 0 : index
    %c0_26 = arith.constant 0 : index
    %34 = vector.load %arg13[%c0_23, %c0_24, %c4, %c0_25, %c0_26] : memref<2x2x6x16x10xf32, #tpu.memory_space<vmem>>, vector<1x1x1x16x10xf32>
    %35 = vector.shape_cast %34 : vector<1x1x1x16x10xf32> to vector<16x10xf32>
    %36 = vector.shape_cast %33 : vector<16x10xf32> to vector<1x1x1x16x10xf32>
    tpu.vector_store %arg13[%c0_23, %c0_24, %c4, %c0_25, %c0_26], %36 {strides = array<i32>} : memref<2x2x6x16x10xf32, #tpu.memory_space<vmem>>, vector<1x1x1x16x10xf32>,
    %37 = vector.extract_strided_slice %16 {offsets = [80, 0], sizes = [16, 10], strides = [1, 1]} : vector<384x10xf32> to vector<16x10xf32>
    %c0_27 = arith.constant 0 : index
    %c0_28 = arith.constant 0 : index
    %c5 = arith.constant 5 : index
    %c0_29 = arith.constant 0 : index
    %c0_30 = arith.constant 0 : index
    %38 = vector.load %arg13[%c0_27, %c0_28, %c5, %c0_29, %c0_30] : memref<2x2x6x16x10xf32, #tpu.memory_space<vmem>>, vector<1x1x1x16x10xf32>
    %39 = vector.shape_cast %38 : vector<1x1x1x16x10xf32> to vector<16x10xf32>
    %40 = vector.shape_cast %37 : vector<16x10xf32> to vector<1x1x1x16x10xf32>
    tpu.vector_store %arg13[%c0_27, %c0_28, %c5, %c0_29, %c0_30], %40 {strides = array<i32>} : memref<2x2x6x16x10xf32, #tpu.memory_space<vmem>>, vector<1x1x1x16x10xf32>,
    %41 = vector.extract_strided_slice %16 {offsets = [96, 0], sizes = [16, 10], strides = [1, 1]} : vector<384x10xf32> to vector<16x10xf32>
    %c0_31 = arith.constant 0 : index
    %c1_32 = arith.constant 1 : index
    %c0_33 = arith.constant 0 : index
    %c0_34 = arith.constant 0 : index
    %c0_35 = arith.constant 0 : index
    %42 = vector.load %arg13[%c0_31, %c1_32, %c0_33, %c0_34, %c0_35] : memref<2x2x6x16x10xf32, #tpu.memory_space<vmem>>, vector<1x1x1x16x10xf32>
    %43 = vector.shape_cast %42 : vector<1x1x1x16x10xf32> to vector<16x10xf32>
    %44 = vector.shape_cast %41 : vector<16x10xf32> to vector<1x1x1x16x10xf32>
    tpu.vector_store %arg13[%c0_31, %c1_32, %c0_33, %c0_34, %c0_35], %44 {strides = array<i32>} : memref<2x2x6x16x10xf32, #tpu.memory_space<vmem>>, vector<1x1x1x16x10xf32>,
    %45 = vector.extract_strided_slice %16 {offsets = [112, 0], sizes = [16, 10], strides = [1, 1]} : vector<384x10xf32> to vector<16x10xf32>
    %c0_36 = arith.constant 0 : index
    %c1_37 = arith.constant 1 : index
    %c1_38 = arith.constant 1 : index
    %c0_39 = arith.constant 0 : index
    %c0_40 = arith.constant 0 : index
    %46 = vector.load %arg13[%c0_36, %c1_37, %c1_38, %c0_39, %c0_40] : memref<2x2x6x16x10xf32, #tpu.memory_space<vmem>>, vector<1x1x1x16x10xf32>
    %47 = vector.shape_cast %46 : vector<1x1x1x16x10xf32> to vector<16x10xf32>
    %48 = vector.shape_cast %45 : vector<16x10xf32> to vector<1x1x1x16x10xf32>
    tpu.vector_store %arg13[%c0_36, %c1_37, %c1_38, %c0_39, %c0_40], %48 {strides = array<i32>} : memref<2x2x6x16x10xf32, #tpu.memory_space<vmem>>, vector<1x1x1x16x10xf32>,
    %49 = vector.extract_strided_slice %16 {offsets = [128, 0], sizes = [16, 10], strides = [1, 1]} : vector<384x10xf32> to vector<16x10xf32>
    %c0_41 = arith.constant 0 : index
    %c1_42 = arith.constant 1 : index
    %c2_43 = arith.constant 2 : index
    %c0_44 = arith.constant 0 : index
    %c0_45 = arith.constant 0 : index
    %50 = vector.load %arg13[%c0_41, %c1_42, %c2_43, %c0_44, %c0_45] : memref<2x2x6x16x10xf32, #tpu.memory_space<vmem>>, vector<1x1x1x16x10xf32>
    %51 = vector.shape_cast %50 : vector<1x1x1x16x10xf32> to vector<16x10xf32>
    %52 = vector.shape_cast %49 : vector<16x10xf32> to vector<1x1x1x16x10xf32>
    tpu.vector_store %arg13[%c0_41, %c1_42, %c2_43, %c0_44, %c0_45], %52 {strides = array<i32>} : memref<2x2x6x16x10xf32, #tpu.memory_space<vmem>>, vector<1x1x1x16x10xf32>,
    %53 = vector.extract_strided_slice %16 {offsets = [144, 0], sizes = [16, 10], strides = [1, 1]} : vector<384x10xf32> to vector<16x10xf32>
    %c0_46 = arith.constant 0 : index
    %c1_47 = arith.constant 1 : index
    %c3_48 = arith.constant 3 : index
    %c0_49 = arith.constant 0 : index
    %c0_50 = arith.constant 0 : index
    %54 = vector.load %arg13[%c0_46, %c1_47, %c3_48, %c0_49, %c0_50] : memref<2x2x6x16x10xf32, #tpu.memory_space<vmem>>, vector<1x1x1x16x10xf32>
    %55 = vector.shape_cast %54 : vector<1x1x1x16x10xf32> to vector<16x10xf32>
    %56 = vector.shape_cast %53 : vector<16x10xf32> to vector<1x1x1x16x10xf32>
    tpu.vector_store %arg13[%c0_46, %c1_47, %c3_48, %c0_49, %c0_50], %56 {strides = array<i32>} : memref<2x2x6x16x10xf32, #tpu.memory_space<vmem>>, vector<1x1x1x16x10xf32>,
    %57 = vector.extract_strided_slice %16 {offsets = [160, 0], sizes = [16, 10], strides = [1, 1]} : vector<384x10xf32> to vector<16x10xf32>
    %c0_51 = arith.constant 0 : index
    %c1_52 = arith.constant 1 : index
    %c4_53 = arith.constant 4 : index
    %c0_54 = arith.constant 0 : index
    %c0_55 = arith.constant 0 : index
    %58 = vector.load %arg13[%c0_51, %c1_52, %c4_53, %c0_54, %c0_55] : memref<2x2x6x16x10xf32, #tpu.memory_space<vmem>>, vector<1x1x1x16x10xf32>
    %59 = vector.shape_cast %58 : vector<1x1x1x16x10xf32> to vector<16x10xf32>
    %60 = vector.shape_cast %57 : vector<16x10xf32> to vector<1x1x1x16x10xf32>
    tpu.vector_store %arg13[%c0_51, %c1_52, %c4_53, %c0_54, %c0_55], %60 {strides = array<i32>} : memref<2x2x6x16x10xf32, #tpu.memory_space<vmem>>, vector<1x1x1x16x10xf32>,
    %61 = vector.extract_strided_slice %16 {offsets = [176, 0], sizes = [16, 10], strides = [1, 1]} : vector<384x10xf32> to vector<16x10xf32>
    %c0_56 = arith.constant 0 : index
    %c1_57 = arith.constant 1 : index
    %c5_58 = arith.constant 5 : index
    %c0_59 = arith.constant 0 : index
    %c0_60 = arith.constant 0 : index
    %62 = vector.load %arg13[%c0_56, %c1_57, %c5_58, %c0_59, %c0_60] : memref<2x2x6x16x10xf32, #tpu.memory_space<vmem>>, vector<1x1x1x16x10xf32>
    %63 = vector.shape_cast %62 : vector<1x1x1x16x10xf32> to vector<16x10xf32>
    %64 = vector.shape_cast %61 : vector<16x10xf32> to vector<1x1x1x16x10xf32>
    tpu.vector_store %arg13[%c0_56, %c1_57, %c5_58, %c0_59, %c0_60], %64 {strides = array<i32>} : memref<2x2x6x16x10xf32, #tpu.memory_space<vmem>>, vector<1x1x1x16x10xf32>,
    %65 = vector.extract_strided_slice %16 {offsets = [192, 0], sizes = [16, 10], strides = [1, 1]} : vector<384x10xf32> to vector<16x10xf32>
    %c1_61 = arith.constant 1 : index
    %c0_62 = arith.constant 0 : index
    %c0_63 = arith.constant 0 : index
    %c0_64 = arith.constant 0 : index
    %c0_65 = arith.constant 0 : index
    %66 = vector.load %arg13[%c1_61, %c0_62, %c0_63, %c0_64, %c0_65] : memref<2x2x6x16x10xf32, #tpu.memory_space<vmem>>, vector<1x1x1x16x10xf32>
    %67 = vector.shape_cast %66 : vector<1x1x1x16x10xf32> to vector<16x10xf32>
    %68 = vector.shape_cast %65 : vector<16x10xf32> to vector<1x1x1x16x10xf32>
    tpu.vector_store %arg13[%c1_61, %c0_62, %c0_63, %c0_64, %c0_65], %68 {strides = array<i32>} : memref<2x2x6x16x10xf32, #tpu.memory_space<vmem>>, vector<1x1x1x16x10xf32>,
    %69 = vector.extract_strided_slice %16 {offsets = [208, 0], sizes = [16, 10], strides = [1, 1]} : vector<384x10xf32> to vector<16x10xf32>
    %c1_66 = arith.constant 1 : index
    %c0_67 = arith.constant 0 : index
    %c1_68 = arith.constant 1 : index
    %c0_69 = arith.constant 0 : index
    %c0_70 = arith.constant 0 : index
    %70 = vector.load %arg13[%c1_66, %c0_67, %c1_68, %c0_69, %c0_70] : memref<2x2x6x16x10xf32, #tpu.memory_space<vmem>>, vector<1x1x1x16x10xf32>
    %71 = vector.shape_cast %70 : vector<1x1x1x16x10xf32> to vector<16x10xf32>
    %72 = vector.shape_cast %69 : vector<16x10xf32> to vector<1x1x1x16x10xf32>
    tpu.vector_store %arg13[%c1_66, %c0_67, %c1_68, %c0_69, %c0_70], %72 {strides = array<i32>} : memref<2x2x6x16x10xf32, #tpu.memory_space<vmem>>, vector<1x1x1x16x10xf32>,
    %73 = vector.extract_strided_slice %16 {offsets = [224, 0], sizes = [16, 10], strides = [1, 1]} : vector<384x10xf32> to vector<16x10xf32>
    %c1_71 = arith.constant 1 : index
    %c0_72 = arith.constant 0 : index
    %c2_73 = arith.constant 2 : index
    %c0_74 = arith.constant 0 : index
    %c0_75 = arith.constant 0 : index
    %74 = vector.load %arg13[%c1_71, %c0_72, %c2_73, %c0_74, %c0_75] : memref<2x2x6x16x10xf32, #tpu.memory_space<vmem>>, vector<1x1x1x16x10xf32>
    %75 = vector.shape_cast %74 : vector<1x1x1x16x10xf32> to vector<16x10xf32>
    %76 = vector.shape_cast %73 : vector<16x10xf32> to vector<1x1x1x16x10xf32>
    tpu.vector_store %arg13[%c1_71, %c0_72, %c2_73, %c0_74, %c0_75], %76 {strides = array<i32>} : memref<2x2x6x16x10xf32, #tpu.memory_space<vmem>>, vector<1x1x1x16x10xf32>,
    %77 = vector.extract_strided_slice %16 {offsets = [240, 0], sizes = [16, 10], strides = [1, 1]} : vector<384x10xf32> to vector<16x10xf32>
    %c1_76 = arith.constant 1 : index
    %c0_77 = arith.constant 0 : index
    %c3_78 = arith.constant 3 : index
    %c0_79 = arith.constant 0 : index
    %c0_80 = arith.constant 0 : index
    %78 = vector.load %arg13[%c1_76, %c0_77, %c3_78, %c0_79, %c0_80] : memref<2x2x6x16x10xf32, #tpu.memory_space<vmem>>, vector<1x1x1x16x10xf32>
    %79 = vector.shape_cast %78 : vector<1x1x1x16x10xf32> to vector<16x10xf32>
    %80 = vector.shape_cast %77 : vector<16x10xf32> to vector<1x1x1x16x10xf32>
    tpu.vector_store %arg13[%c1_76, %c0_77, %c3_78, %c0_79, %c0_80], %80 {strides = array<i32>} : memref<2x2x6x16x10xf32, #tpu.memory_space<vmem>>, vector<1x1x1x16x10xf32>,
    %81 = vector.extract_strided_slice %16 {offsets = [256, 0], sizes = [16, 10], strides = [1, 1]} : vector<384x10xf32> to vector<16x10xf32>
    %c1_81 = arith.constant 1 : index
    %c0_82 = arith.constant 0 : index
    %c4_83 = arith.constant 4 : index
    %c0_84 = arith.constant 0 : index
    %c0_85 = arith.constant 0 : index
    %82 = vector.load %arg13[%c1_81, %c0_82, %c4_83, %c0_84, %c0_85] : memref<2x2x6x16x10xf32, #tpu.memory_space<vmem>>, vector<1x1x1x16x10xf32>
    %83 = vector.shape_cast %82 : vector<1x1x1x16x10xf32> to vector<16x10xf32>
    %84 = vector.shape_cast %81 : vector<16x10xf32> to vector<1x1x1x16x10xf32>
    tpu.vector_store %arg13[%c1_81, %c0_82, %c4_83, %c0_84, %c0_85], %84 {strides = array<i32>} : memref<2x2x6x16x10xf32, #tpu.memory_space<vmem>>, vector<1x1x1x16x10xf32>,
    %85 = vector.extract_strided_slice %16 {offsets = [272, 0], sizes = [16, 10], strides = [1, 1]} : vector<384x10xf32> to vector<16x10xf32>
    %c1_86 = arith.constant 1 : index
    %c0_87 = arith.constant 0 : index
    %c5_88 = arith.constant 5 : index
    %c0_89 = arith.constant 0 : index
    %c0_90 = arith.constant 0 : index
    %86 = vector.load %arg13[%c1_86, %c0_87, %c5_88, %c0_89, %c0_90] : memref<2x2x6x16x10xf32, #tpu.memory_space<vmem>>, vector<1x1x1x16x10xf32>
    %87 = vector.shape_cast %86 : vector<1x1x1x16x10xf32> to vector<16x10xf32>
    %88 = vector.shape_cast %85 : vector<16x10xf32> to vector<1x1x1x16x10xf32>
    tpu.vector_store %arg13[%c1_86, %c0_87, %c5_88, %c0_89, %c0_90], %88 {strides = array<i32>} : memref<2x2x6x16x10xf32, #tpu.memory_space<vmem>>, vector<1x1x1x16x10xf32>,
    %89 = vector.extract_strided_slice %16 {offsets = [288, 0], sizes = [16, 10], strides = [1, 1]} : vector<384x10xf32> to vector<16x10xf32>
    %c1_91 = arith.constant 1 : index
    %c1_92 = arith.constant 1 : index
    %c0_93 = arith.constant 0 : index
    %c0_94 = arith.constant 0 : index
    %c0_95 = arith.constant 0 : index
    %90 = vector.load %arg13[%c1_91, %c1_92, %c0_93, %c0_94, %c0_95] : memref<2x2x6x16x10xf32, #tpu.memory_space<vmem>>, vector<1x1x1x16x10xf32>
    %91 = vector.shape_cast %90 : vector<1x1x1x16x10xf32> to vector<16x10xf32>
    %92 = vector.shape_cast %89 : vector<16x10xf32> to vector<1x1x1x16x10xf32>
    tpu.vector_store %arg13[%c1_91, %c1_92, %c0_93, %c0_94, %c0_95], %92 {strides = array<i32>} : memref<2x2x6x16x10xf32, #tpu.memory_space<vmem>>, vector<1x1x1x16x10xf32>,
    %93 = vector.extract_strided_slice %16 {offsets = [304, 0], sizes = [16, 10], strides = [1, 1]} : vector<384x10xf32> to vector<16x10xf32>
    %c1_96 = arith.constant 1 : index
    %c1_97 = arith.constant 1 : index
    %c1_98 = arith.constant 1 : index
    %c0_99 = arith.constant 0 : index
    %c0_100 = arith.constant 0 : index
    %94 = vector.load %arg13[%c1_96, %c1_97, %c1_98, %c0_99, %c0_100] : memref<2x2x6x16x10xf32, #tpu.memory_space<vmem>>, vector<1x1x1x16x10xf32>
    %95 = vector.shape_cast %94 : vector<1x1x1x16x10xf32> to vector<16x10xf32>
    %96 = vector.shape_cast %93 : vector<16x10xf32> to vector<1x1x1x16x10xf32>
    tpu.vector_store %arg13[%c1_96, %c1_97, %c1_98, %c0_99, %c0_100], %96 {strides = array<i32>} : memref<2x2x6x16x10xf32, #tpu.memory_space<vmem>>, vector<1x1x1x16x10xf32>,
    %97 = vector.extract_strided_slice %16 {offsets = [320, 0], sizes = [16, 10], strides = [1, 1]} : vector<384x10xf32> to vector<16x10xf32>
    %c1_101 = arith.constant 1 : index
    %c1_102 = arith.constant 1 : index
    %c2_103 = arith.constant 2 : index
    %c0_104 = arith.constant 0 : index
    %c0_105 = arith.constant 0 : index
    %98 = vector.load %arg13[%c1_101, %c1_102, %c2_103, %c0_104, %c0_105] : memref<2x2x6x16x10xf32, #tpu.memory_space<vmem>>, vector<1x1x1x16x10xf32>
    %99 = vector.shape_cast %98 : vector<1x1x1x16x10xf32> to vector<16x10xf32>
    %100 = vector.shape_cast %97 : vector<16x10xf32> to vector<1x1x1x16x10xf32>
    tpu.vector_store %arg13[%c1_101, %c1_102, %c2_103, %c0_104, %c0_105], %100 {strides = array<i32>} : memref<2x2x6x16x10xf32, #tpu.memory_space<vmem>>, vector<1x1x1x16x10xf32>,
    %101 = vector.extract_strided_slice %16 {offsets = [336, 0], sizes = [16, 10], strides = [1, 1]} : vector<384x10xf32> to vector<16x10xf32>
    %c1_106 = arith.constant 1 : index
    %c1_107 = arith.constant 1 : index
    %c3_108 = arith.constant 3 : index
    %c0_109 = arith.constant 0 : index
    %c0_110 = arith.constant 0 : index
    %102 = vector.load %arg13[%c1_106, %c1_107, %c3_108, %c0_109, %c0_110] : memref<2x2x6x16x10xf32, #tpu.memory_space<vmem>>, vector<1x1x1x16x10xf32>
    %103 = vector.shape_cast %102 : vector<1x1x1x16x10xf32> to vector<16x10xf32>
    %104 = vector.shape_cast %101 : vector<16x10xf32> to vector<1x1x1x16x10xf32>
    tpu.vector_store %arg13[%c1_106, %c1_107, %c3_108, %c0_109, %c0_110], %104 {strides = array<i32>} : memref<2x2x6x16x10xf32, #tpu.memory_space<vmem>>, vector<1x1x1x16x10xf32>,
    %105 = vector.extract_strided_slice %16 {offsets = [352, 0], sizes = [16, 10], strides = [1, 1]} : vector<384x10xf32> to vector<16x10xf32>
    %c1_111 = arith.constant 1 : index
    %c1_112 = arith.constant 1 : index
    %c4_113 = arith.constant 4 : index
    %c0_114 = arith.constant 0 : index
    %c0_115 = arith.constant 0 : index
    %106 = vector.load %arg13[%c1_111, %c1_112, %c4_113, %c0_114, %c0_115] : memref<2x2x6x16x10xf32, #tpu.memory_space<vmem>>, vector<1x1x1x16x10xf32>
    %107 = vector.shape_cast %106 : vector<1x1x1x16x10xf32> to vector<16x10xf32>
    %108 = vector.shape_cast %105 : vector<16x10xf32> to vector<1x1x1x16x10xf32>
    tpu.vector_store %arg13[%c1_111, %c1_112, %c4_113, %c0_114, %c0_115], %108 {strides = array<i32>} : memref<2x2x6x16x10xf32, #tpu.memory_space<vmem>>, vector<1x1x1x16x10xf32>,
    %109 = vector.extract_strided_slice %16 {offsets = [368, 0], sizes = [16, 10], strides = [1, 1]} : vector<384x10xf32> to vector<16x10xf32>
    %c1_116 = arith.constant 1 : index
    %c1_117 = arith.constant 1 : index
    %c5_118 = arith.constant 5 : index
    %c0_119 = arith.constant 0 : index
    %c0_120 = arith.constant 0 : index
    %110 = vector.load %arg13[%c1_116, %c1_117, %c5_118, %c0_119, %c0_120] : memref<2x2x6x16x10xf32, #tpu.memory_space<vmem>>, vector<1x1x1x16x10xf32>
    %111 = vector.shape_cast %110 : vector<1x1x1x16x10xf32> to vector<16x10xf32>
    %112 = vector.shape_cast %109 : vector<16x10xf32> to vector<1x1x1x16x10xf32>
    tpu.vector_store %arg13[%c1_116, %c1_117, %c5_118, %c0_119, %c0_120], %112 {strides = array<i32>} : memref<2x2x6x16x10xf32, #tpu.memory_space<vmem>>, vector<1x1x1x16x10xf32>,
    %c0_121 = arith.constant 0 : index
    %c0_122 = arith.constant 0 : index
    %c0_123 = arith.constant 0 : index
    %c0_124 = arith.constant 0 : index
    %c0_125 = arith.constant 0 : index
    %113 = vector.load %arg13[%c0_121, %c0_122, %c0_123, %c0_124, %c0_125] : memref<2x2x6x16x10xf32, #tpu.memory_space<vmem>>, vector<1x1x4x8x10xf32>
    %114 = vector.shape_cast %113 : vector<1x1x4x8x10xf32> to vector<4x8x10xf32>
    %c0_126 = arith.constant 0 : index
    %c0_127 = arith.constant 0 : index
    %c0_128 = arith.constant 0 : index
    %c0_129 = arith.constant 0 : index
    %115 = vector.load %arg14[%c0_126, %c0_127, %c0_128, %c0_129] : memref<4x4x8x250xf32, #tpu.memory_space<vmem>>, vector<1x4x8x10xf32>
    %116 = vector.shape_cast %115 : vector<1x4x8x10xf32> to vector<4x8x10xf32>
    %117 = vector.shape_cast %114 : vector<4x8x10xf32> to vector<1x4x8x10xf32>
    tpu.vector_store %arg14[%c0_126, %c0_127, %c0_128, %c0_129], %117 {strides = array<i32>} : memref<4x4x8x250xf32, #tpu.memory_space<vmem>>, vector<1x4x8x10xf32>,
    %c0_130 = arith.constant 0 : index
    %c1_131 = arith.constant 1 : index
    %c0_132 = arith.constant 0 : index
    %c0_133 = arith.constant 0 : index
    %c0_134 = arith.constant 0 : index
    %118 = vector.load %arg13[%c0_130, %c1_131, %c0_132, %c0_133, %c0_134] : memref<2x2x6x16x10xf32, #tpu.memory_space<vmem>>, vector<1x1x4x8x10xf32>
    %119 = vector.shape_cast %118 : vector<1x1x4x8x10xf32> to vector<4x8x10xf32>
    %c0_135 = arith.constant 0 : index
    %c0_136 = arith.constant 0 : index
    %c0_137 = arith.constant 0 : index
    %c10 = arith.constant 10 : index
    %120 = vector.load %arg14[%c0_135, %c0_136, %c0_137, %c10] : memref<4x4x8x250xf32, #tpu.memory_space<vmem>>, vector<1x4x8x10xf32>
    %121 = vector.shape_cast %120 : vector<1x4x8x10xf32> to vector<4x8x10xf32>
    %122 = vector.shape_cast %119 : vector<4x8x10xf32> to vector<1x4x8x10xf32>
    tpu.vector_store %arg14[%c0_135, %c0_136, %c0_137, %c10], %122 {strides = array<i32>} : memref<4x4x8x250xf32, #tpu.memory_space<vmem>>, vector<1x4x8x10xf32>,
    %c0_138 = arith.constant 0 : index
    %c0_139 = arith.constant 0 : index
    %c0_140 = arith.constant 0 : index
    %c2_141 = arith.constant 2 : index
    %c0_142 = arith.constant 0 : index
    %123 = vector.load %arg13[%c0_138, %c0_139, %c0_140, %c2_141, %c0_142] : memref<2x2x6x16x10xf32, #tpu.memory_space<vmem>>, vector<1x1x4x8x10xf32>
    %124 = vector.shape_cast %123 : vector<1x1x4x8x10xf32> to vector<4x8x10xf32>
    %c0_143 = arith.constant 0 : index
    %c0_144 = arith.constant 0 : index
    %c0_145 = arith.constant 0 : index
    %c20 = arith.constant 20 : index
    %125 = vector.load %arg14[%c0_143, %c0_144, %c0_145, %c20] : memref<4x4x8x250xf32, #tpu.memory_space<vmem>>, vector<1x4x8x10xf32>
    %126 = vector.shape_cast %125 : vector<1x4x8x10xf32> to vector<4x8x10xf32>
    %127 = vector.shape_cast %124 : vector<4x8x10xf32> to vector<1x4x8x10xf32>
    tpu.vector_store %arg14[%c0_143, %c0_144, %c0_145, %c20], %127 {strides = array<i32>} : memref<4x4x8x250xf32, #tpu.memory_space<vmem>>, vector<1x4x8x10xf32>,
    %c0_146 = arith.constant 0 : index
    %c1_147 = arith.constant 1 : index
    %c0_148 = arith.constant 0 : index
    %c2_149 = arith.constant 2 : index
    %c0_150 = arith.constant 0 : index
    %128 = vector.load %arg13[%c0_146, %c1_147, %c0_148, %c2_149, %c0_150] : memref<2x2x6x16x10xf32, #tpu.memory_space<vmem>>, vector<1x1x4x8x10xf32>
    %129 = vector.shape_cast %128 : vector<1x1x4x8x10xf32> to vector<4x8x10xf32>
    %c0_151 = arith.constant 0 : index
    %c0_152 = arith.constant 0 : index
    %c0_153 = arith.constant 0 : index
    %c30 = arith.constant 30 : index
    %130 = vector.load %arg14[%c0_151, %c0_152, %c0_153, %c30] : memref<4x4x8x250xf32, #tpu.memory_space<vmem>>, vector<1x4x8x10xf32>
    %131 = vector.shape_cast %130 : vector<1x4x8x10xf32> to vector<4x8x10xf32>
    %132 = vector.shape_cast %129 : vector<4x8x10xf32> to vector<1x4x8x10xf32>
    tpu.vector_store %arg14[%c0_151, %c0_152, %c0_153, %c30], %132 {strides = array<i32>} : memref<4x4x8x250xf32, #tpu.memory_space<vmem>>, vector<1x4x8x10xf32>,
    %c0_154 = arith.constant 0 : index
    %c0_155 = arith.constant 0 : index
    %c0_156 = arith.constant 0 : index
    %c4_157 = arith.constant 4 : index
    %c0_158 = arith.constant 0 : index
    %133 = vector.load %arg13[%c0_154, %c0_155, %c0_156, %c4_157, %c0_158] : memref<2x2x6x16x10xf32, #tpu.memory_space<vmem>>, vector<1x1x4x8x10xf32>
    %134 = vector.shape_cast %133 : vector<1x1x4x8x10xf32> to vector<4x8x10xf32>
    %c0_159 = arith.constant 0 : index
    %c0_160 = arith.constant 0 : index
    %c0_161 = arith.constant 0 : index
    %c40 = arith.constant 40 : index
    %135 = vector.load %arg14[%c0_159, %c0_160, %c0_161, %c40] : memref<4x4x8x250xf32, #tpu.memory_space<vmem>>, vector<1x4x8x10xf32>
    %136 = vector.shape_cast %135 : vector<1x4x8x10xf32> to vector<4x8x10xf32>
    %137 = vector.shape_cast %134 : vector<4x8x10xf32> to vector<1x4x8x10xf32>
    tpu.vector_store %arg14[%c0_159, %c0_160, %c0_161, %c40], %137 {strides = array<i32>} : memref<4x4x8x250xf32, #tpu.memory_space<vmem>>, vector<1x4x8x10xf32>,
    %c1_162 = arith.constant 1 : index
    %c0_163 = arith.constant 0 : index
    %c0_164 = arith.constant 0 : index
    %c0_165 = arith.constant 0 : index
    %c0_166 = arith.constant 0 : index
    %138 = vector.load %arg13[%c1_162, %c0_163, %c0_164, %c0_165, %c0_166] : memref<2x2x6x16x10xf32, #tpu.memory_space<vmem>>, vector<1x1x4x8x10xf32>
    %139 = vector.shape_cast %138 : vector<1x1x4x8x10xf32> to vector<4x8x10xf32>
    %c0_167 = arith.constant 0 : index
    %c0_168 = arith.constant 0 : index
    %c0_169 = arith.constant 0 : index
    %c50 = arith.constant 50 : index
    %140 = vector.load %arg14[%c0_167, %c0_168, %c0_169, %c50] : memref<4x4x8x250xf32, #tpu.memory_space<vmem>>, vector<1x4x8x10xf32>
    %141 = vector.shape_cast %140 : vector<1x4x8x10xf32> to vector<4x8x10xf32>
    %142 = vector.shape_cast %139 : vector<4x8x10xf32> to vector<1x4x8x10xf32>
    tpu.vector_store %arg14[%c0_167, %c0_168, %c0_169, %c50], %142 {strides = array<i32>} : memref<4x4x8x250xf32, #tpu.memory_space<vmem>>, vector<1x4x8x10xf32>,
    %c1_170 = arith.constant 1 : index
    %c1_171 = arith.constant 1 : index
    %c0_172 = arith.constant 0 : index
    %c0_173 = arith.constant 0 : index
    %c0_174 = arith.constant 0 : index
    %143 = vector.load %arg13[%c1_170, %c1_171, %c0_172, %c0_173, %c0_174] : memref<2x2x6x16x10xf32, #tpu.memory_space<vmem>>, vector<1x1x4x8x10xf32>
    %144 = vector.shape_cast %143 : vector<1x1x4x8x10xf32> to vector<4x8x10xf32>
    %c0_175 = arith.constant 0 : index
    %c0_176 = arith.constant 0 : index
    %c0_177 = arith.constant 0 : index
    %c60 = arith.constant 60 : index
    %145 = vector.load %arg14[%c0_175, %c0_176, %c0_177, %c60] : memref<4x4x8x250xf32, #tpu.memory_space<vmem>>, vector<1x4x8x10xf32>
    %146 = vector.shape_cast %145 : vector<1x4x8x10xf32> to vector<4x8x10xf32>
    %147 = vector.shape_cast %144 : vector<4x8x10xf32> to vector<1x4x8x10xf32>
    tpu.vector_store %arg14[%c0_175, %c0_176, %c0_177, %c60], %147 {strides = array<i32>} : memref<4x4x8x250xf32, #tpu.memory_space<vmem>>, vector<1x4x8x10xf32>,
    %c1_178 = arith.constant 1 : index
    %c0_179 = arith.constant 0 : index
    %c0_180 = arith.constant 0 : index
    %c2_181 = arith.constant 2 : index
    %c0_182 = arith.constant 0 : index
    %148 = vector.load %arg13[%c1_178, %c0_179, %c0_180, %c2_181, %c0_182] : memref<2x2x6x16x10xf32, #tpu.memory_space<vmem>>, vector<1x1x4x8x10xf32>
    %149 = vector.shape_cast %148 : vector<1x1x4x8x10xf32> to vector<4x8x10xf32>
    %c0_183 = arith.constant 0 : index
    %c0_184 = arith.constant 0 : index
    %c0_185 = arith.constant 0 : index
    %c70 = arith.constant 70 : index
    %150 = vector.load %arg14[%c0_183, %c0_184, %c0_185, %c70] : memref<4x4x8x250xf32, #tpu.memory_space<vmem>>, vector<1x4x8x10xf32>
    %151 = vector.shape_cast %150 : vector<1x4x8x10xf32> to vector<4x8x10xf32>
    %152 = vector.shape_cast %149 : vector<4x8x10xf32> to vector<1x4x8x10xf32>
    tpu.vector_store %arg14[%c0_183, %c0_184, %c0_185, %c70], %152 {strides = array<i32>} : memref<4x4x8x250xf32, #tpu.memory_space<vmem>>, vector<1x4x8x10xf32>,
    %c1_186 = arith.constant 1 : index
    %c1_187 = arith.constant 1 : index
    %c0_188 = arith.constant 0 : index
    %c2_189 = arith.constant 2 : index
    %c0_190 = arith.constant 0 : index
    %153 = vector.load %arg13[%c1_186, %c1_187, %c0_188, %c2_189, %c0_190] : memref<2x2x6x16x10xf32, #tpu.memory_space<vmem>>, vector<1x1x4x8x10xf32>
    %154 = vector.shape_cast %153 : vector<1x1x4x8x10xf32> to vector<4x8x10xf32>
    %c0_191 = arith.constant 0 : index
    %c0_192 = arith.constant 0 : index
    %c0_193 = arith.constant 0 : index
    %c80 = arith.constant 80 : index
    %155 = vector.load %arg14[%c0_191, %c0_192, %c0_193, %c80] : memref<4x4x8x250xf32, #tpu.memory_space<vmem>>, vector<1x4x8x10xf32>
    %156 = vector.shape_cast %155 : vector<1x4x8x10xf32> to vector<4x8x10xf32>
    %157 = vector.shape_cast %154 : vector<4x8x10xf32> to vector<1x4x8x10xf32>
    tpu.vector_store %arg14[%c0_191, %c0_192, %c0_193, %c80], %157 {strides = array<i32>} : memref<4x4x8x250xf32, #tpu.memory_space<vmem>>, vector<1x4x8x10xf32>,
    %c1_194 = arith.constant 1 : index
    %c0_195 = arith.constant 0 : index
    %c0_196 = arith.constant 0 : index
    %c4_197 = arith.constant 4 : index
    %c0_198 = arith.constant 0 : index
    %158 = vector.load %arg13[%c1_194, %c0_195, %c0_196, %c4_197, %c0_198] : memref<2x2x6x16x10xf32, #tpu.memory_space<vmem>>, vector<1x1x4x8x10xf32>
    %159 = vector.shape_cast %158 : vector<1x1x4x8x10xf32> to vector<4x8x10xf32>
    %c0_199 = arith.constant 0 : index
    %c0_200 = arith.constant 0 : index
    %c0_201 = arith.constant 0 : index
    %c90 = arith.constant 90 : index
    %160 = vector.load %arg14[%c0_199, %c0_200, %c0_201, %c90] : memref<4x4x8x250xf32, #tpu.memory_space<vmem>>, vector<1x4x8x10xf32>
    %161 = vector.shape_cast %160 : vector<1x4x8x10xf32> to vector<4x8x10xf32>
    %162 = vector.shape_cast %159 : vector<4x8x10xf32> to vector<1x4x8x10xf32>
    tpu.vector_store %arg14[%c0_199, %c0_200, %c0_201, %c90], %162 {strides = array<i32>} : memref<4x4x8x250xf32, #tpu.memory_space<vmem>>, vector<1x4x8x10xf32>,
    %c0_202 = arith.constant 0 : index
    %c0_203 = arith.constant 0 : index
    %c1_204 = arith.constant 1 : index
    %c0_205 = arith.constant 0 : index
    %c0_206 = arith.constant 0 : index
    %163 = vector.load %arg13[%c0_202, %c0_203, %c1_204, %c0_205, %c0_206] : memref<2x2x6x16x10xf32, #tpu.memory_space<vmem>>, vector<1x1x4x8x10xf32>
    %164 = vector.shape_cast %163 : vector<1x1x4x8x10xf32> to vector<4x8x10xf32>
    %c0_207 = arith.constant 0 : index
    %c0_208 = arith.constant 0 : index
    %c0_209 = arith.constant 0 : index
    %c100 = arith.constant 100 : index
    %165 = vector.load %arg14[%c0_207, %c0_208, %c0_209, %c100] : memref<4x4x8x250xf32, #tpu.memory_space<vmem>>, vector<1x4x8x10xf32>
    %166 = vector.shape_cast %165 : vector<1x4x8x10xf32> to vector<4x8x10xf32>
    %167 = vector.shape_cast %164 : vector<4x8x10xf32> to vector<1x4x8x10xf32>
    tpu.vector_store %arg14[%c0_207, %c0_208, %c0_209, %c100], %167 {strides = array<i32>} : memref<4x4x8x250xf32, #tpu.memory_space<vmem>>, vector<1x4x8x10xf32>,
    %c0_210 = arith.constant 0 : index
    %c1_211 = arith.constant 1 : index
    %c1_212 = arith.constant 1 : index
    %c0_213 = arith.constant 0 : index
    %c0_214 = arith.constant 0 : index
    %168 = vector.load %arg13[%c0_210, %c1_211, %c1_212, %c0_213, %c0_214] : memref<2x2x6x16x10xf32, #tpu.memory_space<vmem>>, vector<1x1x4x8x10xf32>
    %169 = vector.shape_cast %168 : vector<1x1x4x8x10xf32> to vector<4x8x10xf32>
    %c0_215 = arith.constant 0 : index
    %c0_216 = arith.constant 0 : index
    %c0_217 = arith.constant 0 : index
    %c110 = arith.constant 110 : index
    %170 = vector.load %arg14[%c0_215, %c0_216, %c0_217, %c110] : memref<4x4x8x250xf32, #tpu.memory_space<vmem>>, vector<1x4x8x10xf32>
    %171 = vector.shape_cast %170 : vector<1x4x8x10xf32> to vector<4x8x10xf32>
    %172 = vector.shape_cast %169 : vector<4x8x10xf32> to vector<1x4x8x10xf32>
    tpu.vector_store %arg14[%c0_215, %c0_216, %c0_217, %c110], %172 {strides = array<i32>} : memref<4x4x8x250xf32, #tpu.memory_space<vmem>>, vector<1x4x8x10xf32>,
    %c0_218 = arith.constant 0 : index
    %c0_219 = arith.constant 0 : index
    %c1_220 = arith.constant 1 : index
    %c2_221 = arith.constant 2 : index
    %c0_222 = arith.constant 0 : index
    %173 = vector.load %arg13[%c0_218, %c0_219, %c1_220, %c2_221, %c0_222] : memref<2x2x6x16x10xf32, #tpu.memory_space<vmem>>, vector<1x1x4x8x10xf32>
    %174 = vector.shape_cast %173 : vector<1x1x4x8x10xf32> to vector<4x8x10xf32>
    %c0_223 = arith.constant 0 : index
    %c0_224 = arith.constant 0 : index
    %c0_225 = arith.constant 0 : index
    %c120 = arith.constant 120 : index
    %175 = vector.load %arg14[%c0_223, %c0_224, %c0_225, %c120] : memref<4x4x8x250xf32, #tpu.memory_space<vmem>>, vector<1x4x8x10xf32>
    %176 = vector.shape_cast %175 : vector<1x4x8x10xf32> to vector<4x8x10xf32>
    %177 = vector.shape_cast %174 : vector<4x8x10xf32> to vector<1x4x8x10xf32>
    tpu.vector_store %arg14[%c0_223, %c0_224, %c0_225, %c120], %177 {strides = array<i32>} : memref<4x4x8x250xf32, #tpu.memory_space<vmem>>, vector<1x4x8x10xf32>,
    %c0_226 = arith.constant 0 : index
    %c1_227 = arith.constant 1 : index
    %c1_228 = arith.constant 1 : index
    %c2_229 = arith.constant 2 : index
    %c0_230 = arith.constant 0 : index
    %178 = vector.load %arg13[%c0_226, %c1_227, %c1_228, %c2_229, %c0_230] : memref<2x2x6x16x10xf32, #tpu.memory_space<vmem>>, vector<1x1x4x8x10xf32>
    %179 = vector.shape_cast %178 : vector<1x1x4x8x10xf32> to vector<4x8x10xf32>
    %c0_231 = arith.constant 0 : index
    %c0_232 = arith.constant 0 : index
    %c0_233 = arith.constant 0 : index
    %c130 = arith.constant 130 : index
    %180 = vector.load %arg14[%c0_231, %c0_232, %c0_233, %c130] : memref<4x4x8x250xf32, #tpu.memory_space<vmem>>, vector<1x4x8x10xf32>
    %181 = vector.shape_cast %180 : vector<1x4x8x10xf32> to vector<4x8x10xf32>
    %182 = vector.shape_cast %179 : vector<4x8x10xf32> to vector<1x4x8x10xf32>
    tpu.vector_store %arg14[%c0_231, %c0_232, %c0_233, %c130], %182 {strides = array<i32>} : memref<4x4x8x250xf32, #tpu.memory_space<vmem>>, vector<1x4x8x10xf32>,
    %c0_234 = arith.constant 0 : index
    %c0_235 = arith.constant 0 : index
    %c1_236 = arith.constant 1 : index
    %c4_237 = arith.constant 4 : index
    %c0_238 = arith.constant 0 : index
    %183 = vector.load %arg13[%c0_234, %c0_235, %c1_236, %c4_237, %c0_238] : memref<2x2x6x16x10xf32, #tpu.memory_space<vmem>>, vector<1x1x4x8x10xf32>
    %184 = vector.shape_cast %183 : vector<1x1x4x8x10xf32> to vector<4x8x10xf32>
    %c0_239 = arith.constant 0 : index
    %c0_240 = arith.constant 0 : index
    %c0_241 = arith.constant 0 : index
    %c140 = arith.constant 140 : index
    %185 = vector.load %arg14[%c0_239, %c0_240, %c0_241, %c140] : memref<4x4x8x250xf32, #tpu.memory_space<vmem>>, vector<1x4x8x10xf32>
    %186 = vector.shape_cast %185 : vector<1x4x8x10xf32> to vector<4x8x10xf32>
    %187 = vector.shape_cast %184 : vector<4x8x10xf32> to vector<1x4x8x10xf32>
    tpu.vector_store %arg14[%c0_239, %c0_240, %c0_241, %c140], %187 {strides = array<i32>} : memref<4x4x8x250xf32, #tpu.memory_space<vmem>>, vector<1x4x8x10xf32>,
    %c1_242 = arith.constant 1 : index
    %c0_243 = arith.constant 0 : index
    %c1_244 = arith.constant 1 : index
    %c0_245 = arith.constant 0 : index
    %c0_246 = arith.constant 0 : index
    %188 = vector.load %arg13[%c1_242, %c0_243, %c1_244, %c0_245, %c0_246] : memref<2x2x6x16x10xf32, #tpu.memory_space<vmem>>, vector<1x1x4x8x10xf32>
    %189 = vector.shape_cast %188 : vector<1x1x4x8x10xf32> to vector<4x8x10xf32>
    %c0_247 = arith.constant 0 : index
    %c0_248 = arith.constant 0 : index
    %c0_249 = arith.constant 0 : index
    %c150 = arith.constant 150 : index
    %190 = vector.load %arg14[%c0_247, %c0_248, %c0_249, %c150] : memref<4x4x8x250xf32, #tpu.memory_space<vmem>>, vector<1x4x8x10xf32>
    %191 = vector.shape_cast %190 : vector<1x4x8x10xf32> to vector<4x8x10xf32>
    %192 = vector.shape_cast %189 : vector<4x8x10xf32> to vector<1x4x8x10xf32>
    tpu.vector_store %arg14[%c0_247, %c0_248, %c0_249, %c150], %192 {strides = array<i32>} : memref<4x4x8x250xf32, #tpu.memory_space<vmem>>, vector<1x4x8x10xf32>,
    %c1_250 = arith.constant 1 : index
    %c1_251 = arith.constant 1 : index
    %c1_252 = arith.constant 1 : index
    %c0_253 = arith.constant 0 : index
    %c0_254 = arith.constant 0 : index
    %193 = vector.load %arg13[%c1_250, %c1_251, %c1_252, %c0_253, %c0_254] : memref<2x2x6x16x10xf32, #tpu.memory_space<vmem>>, vector<1x1x4x8x10xf32>
    %194 = vector.shape_cast %193 : vector<1x1x4x8x10xf32> to vector<4x8x10xf32>
    %c0_255 = arith.constant 0 : index
    %c0_256 = arith.constant 0 : index
    %c0_257 = arith.constant 0 : index
    %c160 = arith.constant 160 : index
    %195 = vector.load %arg14[%c0_255, %c0_256, %c0_257, %c160] : memref<4x4x8x250xf32, #tpu.memory_space<vmem>>, vector<1x4x8x10xf32>
    %196 = vector.shape_cast %195 : vector<1x4x8x10xf32> to vector<4x8x10xf32>
    %197 = vector.shape_cast %194 : vector<4x8x10xf32> to vector<1x4x8x10xf32>
    tpu.vector_store %arg14[%c0_255, %c0_256, %c0_257, %c160], %197 {strides = array<i32>} : memref<4x4x8x250xf32, #tpu.memory_space<vmem>>, vector<1x4x8x10xf32>,
    %c1_258 = arith.constant 1 : index
    %c0_259 = arith.constant 0 : index
    %c1_260 = arith.constant 1 : index
    %c2_261 = arith.constant 2 : index
    %c0_262 = arith.constant 0 : index
    %198 = vector.load %arg13[%c1_258, %c0_259, %c1_260, %c2_261, %c0_262] : memref<2x2x6x16x10xf32, #tpu.memory_space<vmem>>, vector<1x1x4x8x10xf32>
    %199 = vector.shape_cast %198 : vector<1x1x4x8x10xf32> to vector<4x8x10xf32>
    %c0_263 = arith.constant 0 : index
    %c0_264 = arith.constant 0 : index
    %c0_265 = arith.constant 0 : index
    %c170 = arith.constant 170 : index
    %200 = vector.load %arg14[%c0_263, %c0_264, %c0_265, %c170] : memref<4x4x8x250xf32, #tpu.memory_space<vmem>>, vector<1x4x8x10xf32>
    %201 = vector.shape_cast %200 : vector<1x4x8x10xf32> to vector<4x8x10xf32>
    %202 = vector.shape_cast %199 : vector<4x8x10xf32> to vector<1x4x8x10xf32>
    tpu.vector_store %arg14[%c0_263, %c0_264, %c0_265, %c170], %202 {strides = array<i32>} : memref<4x4x8x250xf32, #tpu.memory_space<vmem>>, vector<1x4x8x10xf32>,
    %c1_266 = arith.constant 1 : index
    %c1_267 = arith.constant 1 : index
    %c1_268 = arith.constant 1 : index
    %c2_269 = arith.constant 2 : index
    %c0_270 = arith.constant 0 : index
    %203 = vector.load %arg13[%c1_266, %c1_267, %c1_268, %c2_269, %c0_270] : memref<2x2x6x16x10xf32, #tpu.memory_space<vmem>>, vector<1x1x4x8x10xf32>
    %204 = vector.shape_cast %203 : vector<1x1x4x8x10xf32> to vector<4x8x10xf32>
    %c0_271 = arith.constant 0 : index
    %c0_272 = arith.constant 0 : index
    %c0_273 = arith.constant 0 : index
    %c180 = arith.constant 180 : index
    %205 = vector.load %arg14[%c0_271, %c0_272, %c0_273, %c180] : memref<4x4x8x250xf32, #tpu.memory_space<vmem>>, vector<1x4x8x10xf32>
    %206 = vector.shape_cast %205 : vector<1x4x8x10xf32> to vector<4x8x10xf32>
    %207 = vector.shape_cast %204 : vector<4x8x10xf32> to vector<1x4x8x10xf32>
    tpu.vector_store %arg14[%c0_271, %c0_272, %c0_273, %c180], %207 {strides = array<i32>} : memref<4x4x8x250xf32, #tpu.memory_space<vmem>>, vector<1x4x8x10xf32>,
    %c1_274 = arith.constant 1 : index
    %c0_275 = arith.constant 0 : index
    %c1_276 = arith.constant 1 : index
    %c4_277 = arith.constant 4 : index
    %c0_278 = arith.constant 0 : index
    %208 = vector.load %arg13[%c1_274, %c0_275, %c1_276, %c4_277, %c0_278] : memref<2x2x6x16x10xf32, #tpu.memory_space<vmem>>, vector<1x1x4x8x10xf32>
    %209 = vector.shape_cast %208 : vector<1x1x4x8x10xf32> to vector<4x8x10xf32>
    %c0_279 = arith.constant 0 : index
    %c0_280 = arith.constant 0 : index
    %c0_281 = arith.constant 0 : index
    %c190 = arith.constant 190 : index
    %210 = vector.load %arg14[%c0_279, %c0_280, %c0_281, %c190] : memref<4x4x8x250xf32, #tpu.memory_space<vmem>>, vector<1x4x8x10xf32>
    %211 = vector.shape_cast %210 : vector<1x4x8x10xf32> to vector<4x8x10xf32>
    %212 = vector.shape_cast %209 : vector<4x8x10xf32> to vector<1x4x8x10xf32>
    tpu.vector_store %arg14[%c0_279, %c0_280, %c0_281, %c190], %212 {strides = array<i32>} : memref<4x4x8x250xf32, #tpu.memory_space<vmem>>, vector<1x4x8x10xf32>,
    %c0_282 = arith.constant 0 : index
    %c0_283 = arith.constant 0 : index
    %c2_284 = arith.constant 2 : index
    %c0_285 = arith.constant 0 : index
    %c0_286 = arith.constant 0 : index
    %213 = vector.load %arg13[%c0_282, %c0_283, %c2_284, %c0_285, %c0_286] : memref<2x2x6x16x10xf32, #tpu.memory_space<vmem>>, vector<1x1x4x8x10xf32>
    %214 = vector.shape_cast %213 : vector<1x1x4x8x10xf32> to vector<4x8x10xf32>
    %c0_287 = arith.constant 0 : index
    %c0_288 = arith.constant 0 : index
    %c0_289 = arith.constant 0 : index
    %c200 = arith.constant 200 : index
    %215 = vector.load %arg14[%c0_287, %c0_288, %c0_289, %c200] : memref<4x4x8x250xf32, #tpu.memory_space<vmem>>, vector<1x4x8x10xf32>
    %216 = vector.shape_cast %215 : vector<1x4x8x10xf32> to vector<4x8x10xf32>
    %217 = vector.shape_cast %214 : vector<4x8x10xf32> to vector<1x4x8x10xf32>
    tpu.vector_store %arg14[%c0_287, %c0_288, %c0_289, %c200], %217 {strides = array<i32>} : memref<4x4x8x250xf32, #tpu.memory_space<vmem>>, vector<1x4x8x10xf32>,
    %c0_290 = arith.constant 0 : index
    %c1_291 = arith.constant 1 : index
    %c2_292 = arith.constant 2 : index
    %c0_293 = arith.constant 0 : index
    %c0_294 = arith.constant 0 : index
    %218 = vector.load %arg13[%c0_290, %c1_291, %c2_292, %c0_293, %c0_294] : memref<2x2x6x16x10xf32, #tpu.memory_space<vmem>>, vector<1x1x4x8x10xf32>
    %219 = vector.shape_cast %218 : vector<1x1x4x8x10xf32> to vector<4x8x10xf32>
    %c0_295 = arith.constant 0 : index
    %c0_296 = arith.constant 0 : index
    %c0_297 = arith.constant 0 : index
    %c210 = arith.constant 210 : index
    %220 = vector.load %arg14[%c0_295, %c0_296, %c0_297, %c210] : memref<4x4x8x250xf32, #tpu.memory_space<vmem>>, vector<1x4x8x10xf32>
    %221 = vector.shape_cast %220 : vector<1x4x8x10xf32> to vector<4x8x10xf32>
    %222 = vector.shape_cast %219 : vector<4x8x10xf32> to vector<1x4x8x10xf32>
    tpu.vector_store %arg14[%c0_295, %c0_296, %c0_297, %c210], %222 {strides = array<i32>} : memref<4x4x8x250xf32, #tpu.memory_space<vmem>>, vector<1x4x8x10xf32>,
    %c0_298 = arith.constant 0 : index
    %c0_299 = arith.constant 0 : index
    %c2_300 = arith.constant 2 : index
    %c2_301 = arith.constant 2 : index
    %c0_302 = arith.constant 0 : index
    %223 = vector.load %arg13[%c0_298, %c0_299, %c2_300, %c2_301, %c0_302] : memref<2x2x6x16x10xf32, #tpu.memory_space<vmem>>, vector<1x1x4x8x10xf32>
    %224 = vector.shape_cast %223 : vector<1x1x4x8x10xf32> to vector<4x8x10xf32>
    %c0_303 = arith.constant 0 : index
    %c0_304 = arith.constant 0 : index
    %c0_305 = arith.constant 0 : index
    %c220 = arith.constant 220 : index
    %225 = vector.load %arg14[%c0_303, %c0_304, %c0_305, %c220] : memref<4x4x8x250xf32, #tpu.memory_space<vmem>>, vector<1x4x8x10xf32>
    %226 = vector.shape_cast %225 : vector<1x4x8x10xf32> to vector<4x8x10xf32>
    %227 = vector.shape_cast %224 : vector<4x8x10xf32> to vector<1x4x8x10xf32>
    tpu.vector_store %arg14[%c0_303, %c0_304, %c0_305, %c220], %227 {strides = array<i32>} : memref<4x4x8x250xf32, #tpu.memory_space<vmem>>, vector<1x4x8x10xf32>,
    %c0_306 = arith.constant 0 : index
    %c1_307 = arith.constant 1 : index
    %c2_308 = arith.constant 2 : index
    %c2_309 = arith.constant 2 : index
    %c0_310 = arith.constant 0 : index
    %228 = vector.load %arg13[%c0_306, %c1_307, %c2_308, %c2_309, %c0_310] : memref<2x2x6x16x10xf32, #tpu.memory_space<vmem>>, vector<1x1x4x8x10xf32>
    %229 = vector.shape_cast %228 : vector<1x1x4x8x10xf32> to vector<4x8x10xf32>
    %c0_311 = arith.constant 0 : index
    %c0_312 = arith.constant 0 : index
    %c0_313 = arith.constant 0 : index
    %c230 = arith.constant 230 : index
    %230 = vector.load %arg14[%c0_311, %c0_312, %c0_313, %c230] : memref<4x4x8x250xf32, #tpu.memory_space<vmem>>, vector<1x4x8x10xf32>
    %231 = vector.shape_cast %230 : vector<1x4x8x10xf32> to vector<4x8x10xf32>
    %232 = vector.shape_cast %229 : vector<4x8x10xf32> to vector<1x4x8x10xf32>
    tpu.vector_store %arg14[%c0_311, %c0_312, %c0_313, %c230], %232 {strides = array<i32>} : memref<4x4x8x250xf32, #tpu.memory_space<vmem>>, vector<1x4x8x10xf32>,
    %c0_314 = arith.constant 0 : index
    %c0_315 = arith.constant 0 : index
    %c2_316 = arith.constant 2 : index
    %c4_317 = arith.constant 4 : index
    %c0_318 = arith.constant 0 : index
    %233 = vector.load %arg13[%c0_314, %c0_315, %c2_316, %c4_317, %c0_318] : memref<2x2x6x16x10xf32, #tpu.memory_space<vmem>>, vector<1x1x4x8x10xf32>
    %234 = vector.shape_cast %233 : vector<1x1x4x8x10xf32> to vector<4x8x10xf32>
    %c0_319 = arith.constant 0 : index
    %c0_320 = arith.constant 0 : index
    %c0_321 = arith.constant 0 : index
    %c240 = arith.constant 240 : index
    %235 = vector.load %arg14[%c0_319, %c0_320, %c0_321, %c240] : memref<4x4x8x250xf32, #tpu.memory_space<vmem>>, vector<1x4x8x10xf32>
    %236 = vector.shape_cast %235 : vector<1x4x8x10xf32> to vector<4x8x10xf32>
    %237 = vector.shape_cast %234 : vector<4x8x10xf32> to vector<1x4x8x10xf32>
    tpu.vector_store %arg14[%c0_319, %c0_320, %c0_321, %c240], %237 {strides = array<i32>} : memref<4x4x8x250xf32, #tpu.memory_space<vmem>>, vector<1x4x8x10xf32>,
    %c0_322 = arith.constant 0 : index
    %c1_323 = arith.constant 1 : index
    %c0_324 = arith.constant 0 : index
    %c0_325 = arith.constant 0 : index
    %c0_326 = arith.constant 0 : index
    %238 = vector.load %arg13[%c0_322, %c1_323, %c0_324, %c0_325, %c0_326] : memref<2x2x6x16x10xf32, #tpu.memory_space<vmem>>, vector<1x1x4x8x10xf32>
    %239 = vector.shape_cast %238 : vector<1x1x4x8x10xf32> to vector<4x8x10xf32>
    %c1_327 = arith.constant 1 : index
    %c0_328 = arith.constant 0 : index
    %c0_329 = arith.constant 0 : index
    %c0_330 = arith.constant 0 : index
    %240 = vector.load %arg14[%c1_327, %c0_328, %c0_329, %c0_330] : memref<4x4x8x250xf32, #tpu.memory_space<vmem>>, vector<1x4x8x10xf32>
    %241 = vector.shape_cast %240 : vector<1x4x8x10xf32> to vector<4x8x10xf32>
    %242 = vector.shape_cast %239 : vector<4x8x10xf32> to vector<1x4x8x10xf32>
    tpu.vector_store %arg14[%c1_327, %c0_328, %c0_329, %c0_330], %242 {strides = array<i32>} : memref<4x4x8x250xf32, #tpu.memory_space<vmem>>, vector<1x4x8x10xf32>,
    %c0_331 = arith.constant 0 : index
    %c0_332 = arith.constant 0 : index
    %c0_333 = arith.constant 0 : index
    %c2_334 = arith.constant 2 : index
    %c0_335 = arith.constant 0 : index
    %243 = vector.load %arg13[%c0_331, %c0_332, %c0_333, %c2_334, %c0_335] : memref<2x2x6x16x10xf32, #tpu.memory_space<vmem>>, vector<1x1x4x8x10xf32>
    %244 = vector.shape_cast %243 : vector<1x1x4x8x10xf32> to vector<4x8x10xf32>
    %c1_336 = arith.constant 1 : index
    %c0_337 = arith.constant 0 : index
    %c0_338 = arith.constant 0 : index
    %c10_339 = arith.constant 10 : index
    %245 = vector.load %arg14[%c1_336, %c0_337, %c0_338, %c10_339] : memref<4x4x8x250xf32, #tpu.memory_space<vmem>>, vector<1x4x8x10xf32>
    %246 = vector.shape_cast %245 : vector<1x4x8x10xf32> to vector<4x8x10xf32>
    %247 = vector.shape_cast %244 : vector<4x8x10xf32> to vector<1x4x8x10xf32>
    tpu.vector_store %arg14[%c1_336, %c0_337, %c0_338, %c10_339], %247 {strides = array<i32>} : memref<4x4x8x250xf32, #tpu.memory_space<vmem>>, vector<1x4x8x10xf32>,
    %c0_340 = arith.constant 0 : index
    %c1_341 = arith.constant 1 : index
    %c0_342 = arith.constant 0 : index
    %c2_343 = arith.constant 2 : index
    %c0_344 = arith.constant 0 : index
    %248 = vector.load %arg13[%c0_340, %c1_341, %c0_342, %c2_343, %c0_344] : memref<2x2x6x16x10xf32, #tpu.memory_space<vmem>>, vector<1x1x4x8x10xf32>
    %249 = vector.shape_cast %248 : vector<1x1x4x8x10xf32> to vector<4x8x10xf32>
    %c1_345 = arith.constant 1 : index
    %c0_346 = arith.constant 0 : index
    %c0_347 = arith.constant 0 : index
    %c20_348 = arith.constant 20 : index
    %250 = vector.load %arg14[%c1_345, %c0_346, %c0_347, %c20_348] : memref<4x4x8x250xf32, #tpu.memory_space<vmem>>, vector<1x4x8x10xf32>
    %251 = vector.shape_cast %250 : vector<1x4x8x10xf32> to vector<4x8x10xf32>
    %252 = vector.shape_cast %249 : vector<4x8x10xf32> to vector<1x4x8x10xf32>
    tpu.vector_store %arg14[%c1_345, %c0_346, %c0_347, %c20_348], %252 {strides = array<i32>} : memref<4x4x8x250xf32, #tpu.memory_space<vmem>>, vector<1x4x8x10xf32>,
    %c0_349 = arith.constant 0 : index
    %c0_350 = arith.constant 0 : index
    %c0_351 = arith.constant 0 : index
    %c4_352 = arith.constant 4 : index
    %c0_353 = arith.constant 0 : index
    %253 = vector.load %arg13[%c0_349, %c0_350, %c0_351, %c4_352, %c0_353] : memref<2x2x6x16x10xf32, #tpu.memory_space<vmem>>, vector<1x1x4x8x10xf32>
    %254 = vector.shape_cast %253 : vector<1x1x4x8x10xf32> to vector<4x8x10xf32>
    %c1_354 = arith.constant 1 : index
    %c0_355 = arith.constant 0 : index
    %c0_356 = arith.constant 0 : index
    %c30_357 = arith.constant 30 : index
    %255 = vector.load %arg14[%c1_354, %c0_355, %c0_356, %c30_357] : memref<4x4x8x250xf32, #tpu.memory_space<vmem>>, vector<1x4x8x10xf32>
    %256 = vector.shape_cast %255 : vector<1x4x8x10xf32> to vector<4x8x10xf32>
    %257 = vector.shape_cast %254 : vector<4x8x10xf32> to vector<1x4x8x10xf32>
    tpu.vector_store %arg14[%c1_354, %c0_355, %c0_356, %c30_357], %257 {strides = array<i32>} : memref<4x4x8x250xf32, #tpu.memory_space<vmem>>, vector<1x4x8x10xf32>,
    %c0_358 = arith.constant 0 : index
    %c1_359 = arith.constant 1 : index
    %c0_360 = arith.constant 0 : index
    %c4_361 = arith.constant 4 : index
    %c0_362 = arith.constant 0 : index
    %258 = vector.load %arg13[%c0_358, %c1_359, %c0_360, %c4_361, %c0_362] : memref<2x2x6x16x10xf32, #tpu.memory_space<vmem>>, vector<1x1x4x8x10xf32>
    %259 = vector.shape_cast %258 : vector<1x1x4x8x10xf32> to vector<4x8x10xf32>
    %c1_363 = arith.constant 1 : index
    %c0_364 = arith.constant 0 : index
    %c0_365 = arith.constant 0 : index
    %c40_366 = arith.constant 40 : index
    %260 = vector.load %arg14[%c1_363, %c0_364, %c0_365, %c40_366] : memref<4x4x8x250xf32, #tpu.memory_space<vmem>>, vector<1x4x8x10xf32>
    %261 = vector.shape_cast %260 : vector<1x4x8x10xf32> to vector<4x8x10xf32>
    %262 = vector.shape_cast %259 : vector<4x8x10xf32> to vector<1x4x8x10xf32>
    tpu.vector_store %arg14[%c1_363, %c0_364, %c0_365, %c40_366], %262 {strides = array<i32>} : memref<4x4x8x250xf32, #tpu.memory_space<vmem>>, vector<1x4x8x10xf32>,
    %c1_367 = arith.constant 1 : index
    %c1_368 = arith.constant 1 : index
    %c0_369 = arith.constant 0 : index
    %c0_370 = arith.constant 0 : index
    %c0_371 = arith.constant 0 : index
    %263 = vector.load %arg13[%c1_367, %c1_368, %c0_369, %c0_370, %c0_371] : memref<2x2x6x16x10xf32, #tpu.memory_space<vmem>>, vector<1x1x4x8x10xf32>
    %264 = vector.shape_cast %263 : vector<1x1x4x8x10xf32> to vector<4x8x10xf32>
    %c1_372 = arith.constant 1 : index
    %c0_373 = arith.constant 0 : index
    %c0_374 = arith.constant 0 : index
    %c50_375 = arith.constant 50 : index
    %265 = vector.load %arg14[%c1_372, %c0_373, %c0_374, %c50_375] : memref<4x4x8x250xf32, #tpu.memory_space<vmem>>, vector<1x4x8x10xf32>
    %266 = vector.shape_cast %265 : vector<1x4x8x10xf32> to vector<4x8x10xf32>
    %267 = vector.shape_cast %264 : vector<4x8x10xf32> to vector<1x4x8x10xf32>
    tpu.vector_store %arg14[%c1_372, %c0_373, %c0_374, %c50_375], %267 {strides = array<i32>} : memref<4x4x8x250xf32, #tpu.memory_space<vmem>>, vector<1x4x8x10xf32>,
    %c1_376 = arith.constant 1 : index
    %c0_377 = arith.constant 0 : index
    %c0_378 = arith.constant 0 : index
    %c2_379 = arith.constant 2 : index
    %c0_380 = arith.constant 0 : index
    %268 = vector.load %arg13[%c1_376, %c0_377, %c0_378, %c2_379, %c0_380] : memref<2x2x6x16x10xf32, #tpu.memory_space<vmem>>, vector<1x1x4x8x10xf32>
    %269 = vector.shape_cast %268 : vector<1x1x4x8x10xf32> to vector<4x8x10xf32>
    %c1_381 = arith.constant 1 : index
    %c0_382 = arith.constant 0 : index
    %c0_383 = arith.constant 0 : index
    %c60_384 = arith.constant 60 : index
    %270 = vector.load %arg14[%c1_381, %c0_382, %c0_383, %c60_384] : memref<4x4x8x250xf32, #tpu.memory_space<vmem>>, vector<1x4x8x10xf32>
    %271 = vector.shape_cast %270 : vector<1x4x8x10xf32> to vector<4x8x10xf32>
    %272 = vector.shape_cast %269 : vector<4x8x10xf32> to vector<1x4x8x10xf32>
    tpu.vector_store %arg14[%c1_381, %c0_382, %c0_383, %c60_384], %272 {strides = array<i32>} : memref<4x4x8x250xf32, #tpu.memory_space<vmem>>, vector<1x4x8x10xf32>,
    %c1_385 = arith.constant 1 : index
    %c1_386 = arith.constant 1 : index
    %c0_387 = arith.constant 0 : index
    %c2_388 = arith.constant 2 : index
    %c0_389 = arith.constant 0 : index
    %273 = vector.load %arg13[%c1_385, %c1_386, %c0_387, %c2_388, %c0_389] : memref<2x2x6x16x10xf32, #tpu.memory_space<vmem>>, vector<1x1x4x8x10xf32>
    %274 = vector.shape_cast %273 : vector<1x1x4x8x10xf32> to vector<4x8x10xf32>
    %c1_390 = arith.constant 1 : index
    %c0_391 = arith.constant 0 : index
    %c0_392 = arith.constant 0 : index
    %c70_393 = arith.constant 70 : index
    %275 = vector.load %arg14[%c1_390, %c0_391, %c0_392, %c70_393] : memref<4x4x8x250xf32, #tpu.memory_space<vmem>>, vector<1x4x8x10xf32>
    %276 = vector.shape_cast %275 : vector<1x4x8x10xf32> to vector<4x8x10xf32>
    %277 = vector.shape_cast %274 : vector<4x8x10xf32> to vector<1x4x8x10xf32>
    tpu.vector_store %arg14[%c1_390, %c0_391, %c0_392, %c70_393], %277 {strides = array<i32>} : memref<4x4x8x250xf32, #tpu.memory_space<vmem>>, vector<1x4x8x10xf32>,
    %c1_394 = arith.constant 1 : index
    %c0_395 = arith.constant 0 : index
    %c0_396 = arith.constant 0 : index
    %c4_397 = arith.constant 4 : index
    %c0_398 = arith.constant 0 : index
    %278 = vector.load %arg13[%c1_394, %c0_395, %c0_396, %c4_397, %c0_398] : memref<2x2x6x16x10xf32, #tpu.memory_space<vmem>>, vector<1x1x4x8x10xf32>
    %279 = vector.shape_cast %278 : vector<1x1x4x8x10xf32> to vector<4x8x10xf32>
    %c1_399 = arith.constant 1 : index
    %c0_400 = arith.constant 0 : index
    %c0_401 = arith.constant 0 : index
    %c80_402 = arith.constant 80 : index
    %280 = vector.load %arg14[%c1_399, %c0_400, %c0_401, %c80_402] : memref<4x4x8x250xf32, #tpu.memory_space<vmem>>, vector<1x4x8x10xf32>
    %281 = vector.shape_cast %280 : vector<1x4x8x10xf32> to vector<4x8x10xf32>
    %282 = vector.shape_cast %279 : vector<4x8x10xf32> to vector<1x4x8x10xf32>
    tpu.vector_store %arg14[%c1_399, %c0_400, %c0_401, %c80_402], %282 {strides = array<i32>} : memref<4x4x8x250xf32, #tpu.memory_space<vmem>>, vector<1x4x8x10xf32>,
    %c1_403 = arith.constant 1 : index
    %c1_404 = arith.constant 1 : index
    %c0_405 = arith.constant 0 : index
    %c4_406 = arith.constant 4 : index
    %c0_407 = arith.constant 0 : index
    %283 = vector.load %arg13[%c1_403, %c1_404, %c0_405, %c4_406, %c0_407] : memref<2x2x6x16x10xf32, #tpu.memory_space<vmem>>, vector<1x1x4x8x10xf32>
    %284 = vector.shape_cast %283 : vector<1x1x4x8x10xf32> to vector<4x8x10xf32>
    %c1_408 = arith.constant 1 : index
    %c0_409 = arith.constant 0 : index
    %c0_410 = arith.constant 0 : index
    %c90_411 = arith.constant 90 : index
    %285 = vector.load %arg14[%c1_408, %c0_409, %c0_410, %c90_411] : memref<4x4x8x250xf32, #tpu.memory_space<vmem>>, vector<1x4x8x10xf32>
    %286 = vector.shape_cast %285 : vector<1x4x8x10xf32> to vector<4x8x10xf32>
    %287 = vector.shape_cast %284 : vector<4x8x10xf32> to vector<1x4x8x10xf32>
    tpu.vector_store %arg14[%c1_408, %c0_409, %c0_410, %c90_411], %287 {strides = array<i32>} : memref<4x4x8x250xf32, #tpu.memory_space<vmem>>, vector<1x4x8x10xf32>,
    %c0_412 = arith.constant 0 : index
    %c1_413 = arith.constant 1 : index
    %c1_414 = arith.constant 1 : index
    %c0_415 = arith.constant 0 : index
    %c0_416 = arith.constant 0 : index
    %288 = vector.load %arg13[%c0_412, %c1_413, %c1_414, %c0_415, %c0_416] : memref<2x2x6x16x10xf32, #tpu.memory_space<vmem>>, vector<1x1x4x8x10xf32>
    %289 = vector.shape_cast %288 : vector<1x1x4x8x10xf32> to vector<4x8x10xf32>
    %c1_417 = arith.constant 1 : index
    %c0_418 = arith.constant 0 : index
    %c0_419 = arith.constant 0 : index
    %c100_420 = arith.constant 100 : index
    %290 = vector.load %arg14[%c1_417, %c0_418, %c0_419, %c100_420] : memref<4x4x8x250xf32, #tpu.memory_space<vmem>>, vector<1x4x8x10xf32>
    %291 = vector.shape_cast %290 : vector<1x4x8x10xf32> to vector<4x8x10xf32>
    %292 = vector.shape_cast %289 : vector<4x8x10xf32> to vector<1x4x8x10xf32>
    tpu.vector_store %arg14[%c1_417, %c0_418, %c0_419, %c100_420], %292 {strides = array<i32>} : memref<4x4x8x250xf32, #tpu.memory_space<vmem>>, vector<1x4x8x10xf32>,
    %c0_421 = arith.constant 0 : index
    %c0_422 = arith.constant 0 : index
    %c1_423 = arith.constant 1 : index
    %c2_424 = arith.constant 2 : index
    %c0_425 = arith.constant 0 : index
    %293 = vector.load %arg13[%c0_421, %c0_422, %c1_423, %c2_424, %c0_425] : memref<2x2x6x16x10xf32, #tpu.memory_space<vmem>>, vector<1x1x4x8x10xf32>
    %294 = vector.shape_cast %293 : vector<1x1x4x8x10xf32> to vector<4x8x10xf32>
    %c1_426 = arith.constant 1 : index
    %c0_427 = arith.constant 0 : index
    %c0_428 = arith.constant 0 : index
    %c110_429 = arith.constant 110 : index
    %295 = vector.load %arg14[%c1_426, %c0_427, %c0_428, %c110_429] : memref<4x4x8x250xf32, #tpu.memory_space<vmem>>, vector<1x4x8x10xf32>
    %296 = vector.shape_cast %295 : vector<1x4x8x10xf32> to vector<4x8x10xf32>
    %297 = vector.shape_cast %294 : vector<4x8x10xf32> to vector<1x4x8x10xf32>
    tpu.vector_store %arg14[%c1_426, %c0_427, %c0_428, %c110_429], %297 {strides = array<i32>} : memref<4x4x8x250xf32, #tpu.memory_space<vmem>>, vector<1x4x8x10xf32>,
    %c0_430 = arith.constant 0 : index
    %c1_431 = arith.constant 1 : index
    %c1_432 = arith.constant 1 : index
    %c2_433 = arith.constant 2 : index
    %c0_434 = arith.constant 0 : index
    %298 = vector.load %arg13[%c0_430, %c1_431, %c1_432, %c2_433, %c0_434] : memref<2x2x6x16x10xf32, #tpu.memory_space<vmem>>, vector<1x1x4x8x10xf32>
    %299 = vector.shape_cast %298 : vector<1x1x4x8x10xf32> to vector<4x8x10xf32>
    %c1_435 = arith.constant 1 : index
    %c0_436 = arith.constant 0 : index
    %c0_437 = arith.constant 0 : index
    %c120_438 = arith.constant 120 : index
    %300 = vector.load %arg14[%c1_435, %c0_436, %c0_437, %c120_438] : memref<4x4x8x250xf32, #tpu.memory_space<vmem>>, vector<1x4x8x10xf32>
    %301 = vector.shape_cast %300 : vector<1x4x8x10xf32> to vector<4x8x10xf32>
    %302 = vector.shape_cast %299 : vector<4x8x10xf32> to vector<1x4x8x10xf32>
    tpu.vector_store %arg14[%c1_435, %c0_436, %c0_437, %c120_438], %302 {strides = array<i32>} : memref<4x4x8x250xf32, #tpu.memory_space<vmem>>, vector<1x4x8x10xf32>,
    %c0_439 = arith.constant 0 : index
    %c0_440 = arith.constant 0 : index
    %c1_441 = arith.constant 1 : index
    %c4_442 = arith.constant 4 : index
    %c0_443 = arith.constant 0 : index
    %303 = vector.load %arg13[%c0_439, %c0_440, %c1_441, %c4_442, %c0_443] : memref<2x2x6x16x10xf32, #tpu.memory_space<vmem>>, vector<1x1x4x8x10xf32>
    %304 = vector.shape_cast %303 : vector<1x1x4x8x10xf32> to vector<4x8x10xf32>
    %c1_444 = arith.constant 1 : index
    %c0_445 = arith.constant 0 : index
    %c0_446 = arith.constant 0 : index
    %c130_447 = arith.constant 130 : index
    %305 = vector.load %arg14[%c1_444, %c0_445, %c0_446, %c130_447] : memref<4x4x8x250xf32, #tpu.memory_space<vmem>>, vector<1x4x8x10xf32>
    %306 = vector.shape_cast %305 : vector<1x4x8x10xf32> to vector<4x8x10xf32>
    %307 = vector.shape_cast %304 : vector<4x8x10xf32> to vector<1x4x8x10xf32>
    tpu.vector_store %arg14[%c1_444, %c0_445, %c0_446, %c130_447], %307 {strides = array<i32>} : memref<4x4x8x250xf32, #tpu.memory_space<vmem>>, vector<1x4x8x10xf32>,
    %c0_448 = arith.constant 0 : index
    %c1_449 = arith.constant 1 : index
    %c1_450 = arith.constant 1 : index
    %c4_451 = arith.constant 4 : index
    %c0_452 = arith.constant 0 : index
    %308 = vector.load %arg13[%c0_448, %c1_449, %c1_450, %c4_451, %c0_452] : memref<2x2x6x16x10xf32, #tpu.memory_space<vmem>>, vector<1x1x4x8x10xf32>
    %309 = vector.shape_cast %308 : vector<1x1x4x8x10xf32> to vector<4x8x10xf32>
    %c1_453 = arith.constant 1 : index
    %c0_454 = arith.constant 0 : index
    %c0_455 = arith.constant 0 : index
    %c140_456 = arith.constant 140 : index
    %310 = vector.load %arg14[%c1_453, %c0_454, %c0_455, %c140_456] : memref<4x4x8x250xf32, #tpu.memory_space<vmem>>, vector<1x4x8x10xf32>
    %311 = vector.shape_cast %310 : vector<1x4x8x10xf32> to vector<4x8x10xf32>
    %312 = vector.shape_cast %309 : vector<4x8x10xf32> to vector<1x4x8x10xf32>
    tpu.vector_store %arg14[%c1_453, %c0_454, %c0_455, %c140_456], %312 {strides = array<i32>} : memref<4x4x8x250xf32, #tpu.memory_space<vmem>>, vector<1x4x8x10xf32>,
    %c1_457 = arith.constant 1 : index
    %c1_458 = arith.constant 1 : index
    %c1_459 = arith.constant 1 : index
    %c0_460 = arith.constant 0 : index
    %c0_461 = arith.constant 0 : index
    %313 = vector.load %arg13[%c1_457, %c1_458, %c1_459, %c0_460, %c0_461] : memref<2x2x6x16x10xf32, #tpu.memory_space<vmem>>, vector<1x1x4x8x10xf32>
    %314 = vector.shape_cast %313 : vector<1x1x4x8x10xf32> to vector<4x8x10xf32>
    %c1_462 = arith.constant 1 : index
    %c0_463 = arith.constant 0 : index
    %c0_464 = arith.constant 0 : index
    %c150_465 = arith.constant 150 : index
    %315 = vector.load %arg14[%c1_462, %c0_463, %c0_464, %c150_465] : memref<4x4x8x250xf32, #tpu.memory_space<vmem>>, vector<1x4x8x10xf32>
    %316 = vector.shape_cast %315 : vector<1x4x8x10xf32> to vector<4x8x10xf32>
    %317 = vector.shape_cast %314 : vector<4x8x10xf32> to vector<1x4x8x10xf32>
    tpu.vector_store %arg14[%c1_462, %c0_463, %c0_464, %c150_465], %317 {strides = array<i32>} : memref<4x4x8x250xf32, #tpu.memory_space<vmem>>, vector<1x4x8x10xf32>,
    %c1_466 = arith.constant 1 : index
    %c0_467 = arith.constant 0 : index
    %c1_468 = arith.constant 1 : index
    %c2_469 = arith.constant 2 : index
    %c0_470 = arith.constant 0 : index
    %318 = vector.load %arg13[%c1_466, %c0_467, %c1_468, %c2_469, %c0_470] : memref<2x2x6x16x10xf32, #tpu.memory_space<vmem>>, vector<1x1x4x8x10xf32>
    %319 = vector.shape_cast %318 : vector<1x1x4x8x10xf32> to vector<4x8x10xf32>
    %c1_471 = arith.constant 1 : index
    %c0_472 = arith.constant 0 : index
    %c0_473 = arith.constant 0 : index
    %c160_474 = arith.constant 160 : index
    %320 = vector.load %arg14[%c1_471, %c0_472, %c0_473, %c160_474] : memref<4x4x8x250xf32, #tpu.memory_space<vmem>>, vector<1x4x8x10xf32>
    %321 = vector.shape_cast %320 : vector<1x4x8x10xf32> to vector<4x8x10xf32>
    %322 = vector.shape_cast %319 : vector<4x8x10xf32> to vector<1x4x8x10xf32>
    tpu.vector_store %arg14[%c1_471, %c0_472, %c0_473, %c160_474], %322 {strides = array<i32>} : memref<4x4x8x250xf32, #tpu.memory_space<vmem>>, vector<1x4x8x10xf32>,
    %c1_475 = arith.constant 1 : index
    %c1_476 = arith.constant 1 : index
    %c1_477 = arith.constant 1 : index
    %c2_478 = arith.constant 2 : index
    %c0_479 = arith.constant 0 : index
    %323 = vector.load %arg13[%c1_475, %c1_476, %c1_477, %c2_478, %c0_479] : memref<2x2x6x16x10xf32, #tpu.memory_space<vmem>>, vector<1x1x4x8x10xf32>
    %324 = vector.shape_cast %323 : vector<1x1x4x8x10xf32> to vector<4x8x10xf32>
    %c1_480 = arith.constant 1 : index
    %c0_481 = arith.constant 0 : index
    %c0_482 = arith.constant 0 : index
    %c170_483 = arith.constant 170 : index
    %325 = vector.load %arg14[%c1_480, %c0_481, %c0_482, %c170_483] : memref<4x4x8x250xf32, #tpu.memory_space<vmem>>, vector<1x4x8x10xf32>
    %326 = vector.shape_cast %325 : vector<1x4x8x10xf32> to vector<4x8x10xf32>
    %327 = vector.shape_cast %324 : vector<4x8x10xf32> to vector<1x4x8x10xf32>
    tpu.vector_store %arg14[%c1_480, %c0_481, %c0_482, %c170_483], %327 {strides = array<i32>} : memref<4x4x8x250xf32, #tpu.memory_space<vmem>>, vector<1x4x8x10xf32>,
    %c1_484 = arith.constant 1 : index
    %c0_485 = arith.constant 0 : index
    %c1_486 = arith.constant 1 : index
    %c4_487 = arith.constant 4 : index
    %c0_488 = arith.constant 0 : index
    %328 = vector.load %arg13[%c1_484, %c0_485, %c1_486, %c4_487, %c0_488] : memref<2x2x6x16x10xf32, #tpu.memory_space<vmem>>, vector<1x1x4x8x10xf32>
    %329 = vector.shape_cast %328 : vector<1x1x4x8x10xf32> to vector<4x8x10xf32>
    %c1_489 = arith.constant 1 : index
    %c0_490 = arith.constant 0 : index
    %c0_491 = arith.constant 0 : index
    %c180_492 = arith.constant 180 : index
    %330 = vector.load %arg14[%c1_489, %c0_490, %c0_491, %c180_492] : memref<4x4x8x250xf32, #tpu.memory_space<vmem>>, vector<1x4x8x10xf32>
    %331 = vector.shape_cast %330 : vector<1x4x8x10xf32> to vector<4x8x10xf32>
    %332 = vector.shape_cast %329 : vector<4x8x10xf32> to vector<1x4x8x10xf32>
    tpu.vector_store %arg14[%c1_489, %c0_490, %c0_491, %c180_492], %332 {strides = array<i32>} : memref<4x4x8x250xf32, #tpu.memory_space<vmem>>, vector<1x4x8x10xf32>,
    %c1_493 = arith.constant 1 : index
    %c1_494 = arith.constant 1 : index
    %c1_495 = arith.constant 1 : index
    %c4_496 = arith.constant 4 : index
    %c0_497 = arith.constant 0 : index
    %333 = vector.load %arg13[%c1_493, %c1_494, %c1_495, %c4_496, %c0_497] : memref<2x2x6x16x10xf32, #tpu.memory_space<vmem>>, vector<1x1x4x8x10xf32>
    %334 = vector.shape_cast %333 : vector<1x1x4x8x10xf32> to vector<4x8x10xf32>
    %c1_498 = arith.constant 1 : index
    %c0_499 = arith.constant 0 : index
    %c0_500 = arith.constant 0 : index
    %c190_501 = arith.constant 190 : index
    %335 = vector.load %arg14[%c1_498, %c0_499, %c0_500, %c190_501] : memref<4x4x8x250xf32, #tpu.memory_space<vmem>>, vector<1x4x8x10xf32>
    %336 = vector.shape_cast %335 : vector<1x4x8x10xf32> to vector<4x8x10xf32>
    %337 = vector.shape_cast %334 : vector<4x8x10xf32> to vector<1x4x8x10xf32>
    tpu.vector_store %arg14[%c1_498, %c0_499, %c0_500, %c190_501], %337 {strides = array<i32>} : memref<4x4x8x250xf32, #tpu.memory_space<vmem>>, vector<1x4x8x10xf32>,
    %c0_502 = arith.constant 0 : index
    %c1_503 = arith.constant 1 : index
    %c2_504 = arith.constant 2 : index
    %c0_505 = arith.constant 0 : index
    %c0_506 = arith.constant 0 : index
    %338 = vector.load %arg13[%c0_502, %c1_503, %c2_504, %c0_505, %c0_506] : memref<2x2x6x16x10xf32, #tpu.memory_space<vmem>>, vector<1x1x4x8x10xf32>
    %339 = vector.shape_cast %338 : vector<1x1x4x8x10xf32> to vector<4x8x10xf32>
    %c1_507 = arith.constant 1 : index
    %c0_508 = arith.constant 0 : index
    %c0_509 = arith.constant 0 : index
    %c200_510 = arith.constant 200 : index
    %340 = vector.load %arg14[%c1_507, %c0_508, %c0_509, %c200_510] : memref<4x4x8x250xf32, #tpu.memory_space<vmem>>, vector<1x4x8x10xf32>
    %341 = vector.shape_cast %340 : vector<1x4x8x10xf32> to vector<4x8x10xf32>
    %342 = vector.shape_cast %339 : vector<4x8x10xf32> to vector<1x4x8x10xf32>
    tpu.vector_store %arg14[%c1_507, %c0_508, %c0_509, %c200_510], %342 {strides = array<i32>} : memref<4x4x8x250xf32, #tpu.memory_space<vmem>>, vector<1x4x8x10xf32>,
    %c0_511 = arith.constant 0 : index
    %c0_512 = arith.constant 0 : index
    %c2_513 = arith.constant 2 : index
    %c2_514 = arith.constant 2 : index
    %c0_515 = arith.constant 0 : index
    %343 = vector.load %arg13[%c0_511, %c0_512, %c2_513, %c2_514, %c0_515] : memref<2x2x6x16x10xf32, #tpu.memory_space<vmem>>, vector<1x1x4x8x10xf32>
    %344 = vector.shape_cast %343 : vector<1x1x4x8x10xf32> to vector<4x8x10xf32>
    %c1_516 = arith.constant 1 : index
    %c0_517 = arith.constant 0 : index
    %c0_518 = arith.constant 0 : index
    %c210_519 = arith.constant 210 : index
    %345 = vector.load %arg14[%c1_516, %c0_517, %c0_518, %c210_519] : memref<4x4x8x250xf32, #tpu.memory_space<vmem>>, vector<1x4x8x10xf32>
    %346 = vector.shape_cast %345 : vector<1x4x8x10xf32> to vector<4x8x10xf32>
    %347 = vector.shape_cast %344 : vector<4x8x10xf32> to vector<1x4x8x10xf32>
    tpu.vector_store %arg14[%c1_516, %c0_517, %c0_518, %c210_519], %347 {strides = array<i32>} : memref<4x4x8x250xf32, #tpu.memory_space<vmem>>, vector<1x4x8x10xf32>,
    %c0_520 = arith.constant 0 : index
    %c1_521 = arith.constant 1 : index
    %c2_522 = arith.constant 2 : index
    %c2_523 = arith.constant 2 : index
    %c0_524 = arith.constant 0 : index
    %348 = vector.load %arg13[%c0_520, %c1_521, %c2_522, %c2_523, %c0_524] : memref<2x2x6x16x10xf32, #tpu.memory_space<vmem>>, vector<1x1x4x8x10xf32>
    %349 = vector.shape_cast %348 : vector<1x1x4x8x10xf32> to vector<4x8x10xf32>
    %c1_525 = arith.constant 1 : index
    %c0_526 = arith.constant 0 : index
    %c0_527 = arith.constant 0 : index
    %c220_528 = arith.constant 220 : index
    %350 = vector.load %arg14[%c1_525, %c0_526, %c0_527, %c220_528] : memref<4x4x8x250xf32, #tpu.memory_space<vmem>>, vector<1x4x8x10xf32>
    %351 = vector.shape_cast %350 : vector<1x4x8x10xf32> to vector<4x8x10xf32>
    %352 = vector.shape_cast %349 : vector<4x8x10xf32> to vector<1x4x8x10xf32>
    tpu.vector_store %arg14[%c1_525, %c0_526, %c0_527, %c220_528], %352 {strides = array<i32>} : memref<4x4x8x250xf32, #tpu.memory_space<vmem>>, vector<1x4x8x10xf32>,
    %c0_529 = arith.constant 0 : index
    %c0_530 = arith.constant 0 : index
    %c2_531 = arith.constant 2 : index
    %c4_532 = arith.constant 4 : index
    %c0_533 = arith.constant 0 : index
    %353 = vector.load %arg13[%c0_529, %c0_530, %c2_531, %c4_532, %c0_533] : memref<2x2x6x16x10xf32, #tpu.memory_space<vmem>>, vector<1x1x4x8x10xf32>
    %354 = vector.shape_cast %353 : vector<1x1x4x8x10xf32> to vector<4x8x10xf32>
    %c1_534 = arith.constant 1 : index
    %c0_535 = arith.constant 0 : index
    %c0_536 = arith.constant 0 : index
    %c230_537 = arith.constant 230 : index
    %355 = vector.load %arg14[%c1_534, %c0_535, %c0_536, %c230_537] : memref<4x4x8x250xf32, #tpu.memory_space<vmem>>, vector<1x4x8x10xf32>
    %356 = vector.shape_cast %355 : vector<1x4x8x10xf32> to vector<4x8x10xf32>
    %357 = vector.shape_cast %354 : vector<4x8x10xf32> to vector<1x4x8x10xf32>
    tpu.vector_store %arg14[%c1_534, %c0_535, %c0_536, %c230_537], %357 {strides = array<i32>} : memref<4x4x8x250xf32, #tpu.memory_space<vmem>>, vector<1x4x8x10xf32>,
    %c0_538 = arith.constant 0 : index
    %c1_539 = arith.constant 1 : index
    %c2_540 = arith.constant 2 : index
    %c4_541 = arith.constant 4 : index
    %c0_542 = arith.constant 0 : index
    %358 = vector.load %arg13[%c0_538, %c1_539, %c2_540, %c4_541, %c0_542] : memref<2x2x6x16x10xf32, #tpu.memory_space<vmem>>, vector<1x1x4x8x10xf32>
    %359 = vector.shape_cast %358 : vector<1x1x4x8x10xf32> to vector<4x8x10xf32>
    %c1_543 = arith.constant 1 : index
    %c0_544 = arith.constant 0 : index
    %c0_545 = arith.constant 0 : index
    %c240_546 = arith.constant 240 : index
    %360 = vector.load %arg14[%c1_543, %c0_544, %c0_545, %c240_546] : memref<4x4x8x250xf32, #tpu.memory_space<vmem>>, vector<1x4x8x10xf32>
    %361 = vector.shape_cast %360 : vector<1x4x8x10xf32> to vector<4x8x10xf32>
    %362 = vector.shape_cast %359 : vector<4x8x10xf32> to vector<1x4x8x10xf32>
    tpu.vector_store %arg14[%c1_543, %c0_544, %c0_545, %c240_546], %362 {strides = array<i32>} : memref<4x4x8x250xf32, #tpu.memory_space<vmem>>, vector<1x4x8x10xf32>,
    %c1_547 = arith.constant 1 : index
    %c0_548 = arith.constant 0 : index
    %c0_549 = arith.constant 0 : index
    %c0_550 = arith.constant 0 : index
    %c0_551 = arith.constant 0 : index
    %363 = vector.load %arg13[%c1_547, %c0_548, %c0_549, %c0_550, %c0_551] : memref<2x2x6x16x10xf32, #tpu.memory_space<vmem>>, vector<1x1x4x8x10xf32>
    %364 = vector.shape_cast %363 : vector<1x1x4x8x10xf32> to vector<4x8x10xf32>
    %c2_552 = arith.constant 2 : index
    %c0_553 = arith.constant 0 : index
    %c0_554 = arith.constant 0 : index
    %c0_555 = arith.constant 0 : index
    %365 = vector.load %arg14[%c2_552, %c0_553, %c0_554, %c0_555] : memref<4x4x8x250xf32, #tpu.memory_space<vmem>>, vector<1x4x8x10xf32>
    %366 = vector.shape_cast %365 : vector<1x4x8x10xf32> to vector<4x8x10xf32>
    %367 = vector.shape_cast %364 : vector<4x8x10xf32> to vector<1x4x8x10xf32>
    tpu.vector_store %arg14[%c2_552, %c0_553, %c0_554, %c0_555], %367 {strides = array<i32>} : memref<4x4x8x250xf32, #tpu.memory_space<vmem>>, vector<1x4x8x10xf32>,
    %c1_556 = arith.constant 1 : index
    %c1_557 = arith.constant 1 : index
    %c0_558 = arith.constant 0 : index
    %c0_559 = arith.constant 0 : index
    %c0_560 = arith.constant 0 : index
    %368 = vector.load %arg13[%c1_556, %c1_557, %c0_558, %c0_559, %c0_560] : memref<2x2x6x16x10xf32, #tpu.memory_space<vmem>>, vector<1x1x4x8x10xf32>
    %369 = vector.shape_cast %368 : vector<1x1x4x8x10xf32> to vector<4x8x10xf32>
    %c2_561 = arith.constant 2 : index
    %c0_562 = arith.constant 0 : index
    %c0_563 = arith.constant 0 : index
    %c10_564 = arith.constant 10 : index
    %370 = vector.load %arg14[%c2_561, %c0_562, %c0_563, %c10_564] : memref<4x4x8x250xf32, #tpu.memory_space<vmem>>, vector<1x4x8x10xf32>
    %371 = vector.shape_cast %370 : vector<1x4x8x10xf32> to vector<4x8x10xf32>
    %372 = vector.shape_cast %369 : vector<4x8x10xf32> to vector<1x4x8x10xf32>
    tpu.vector_store %arg14[%c2_561, %c0_562, %c0_563, %c10_564], %372 {strides = array<i32>} : memref<4x4x8x250xf32, #tpu.memory_space<vmem>>, vector<1x4x8x10xf32>,
    %c1_565 = arith.constant 1 : index
    %c0_566 = arith.constant 0 : index
    %c0_567 = arith.constant 0 : index
    %c2_568 = arith.constant 2 : index
    %c0_569 = arith.constant 0 : index
    %373 = vector.load %arg13[%c1_565, %c0_566, %c0_567, %c2_568, %c0_569] : memref<2x2x6x16x10xf32, #tpu.memory_space<vmem>>, vector<1x1x4x8x10xf32>
    %374 = vector.shape_cast %373 : vector<1x1x4x8x10xf32> to vector<4x8x10xf32>
    %c2_570 = arith.constant 2 : index
    %c0_571 = arith.constant 0 : index
    %c0_572 = arith.constant 0 : index
    %c20_573 = arith.constant 20 : index
    %375 = vector.load %arg14[%c2_570, %c0_571, %c0_572, %c20_573] : memref<4x4x8x250xf32, #tpu.memory_space<vmem>>, vector<1x4x8x10xf32>
    %376 = vector.shape_cast %375 : vector<1x4x8x10xf32> to vector<4x8x10xf32>
    %377 = vector.shape_cast %374 : vector<4x8x10xf32> to vector<1x4x8x10xf32>
    tpu.vector_store %arg14[%c2_570, %c0_571, %c0_572, %c20_573], %377 {strides = array<i32>} : memref<4x4x8x250xf32, #tpu.memory_space<vmem>>, vector<1x4x8x10xf32>,
    %c1_574 = arith.constant 1 : index
    %c1_575 = arith.constant 1 : index
    %c0_576 = arith.constant 0 : index
    %c2_577 = arith.constant 2 : index
    %c0_578 = arith.constant 0 : index
    %378 = vector.load %arg13[%c1_574, %c1_575, %c0_576, %c2_577, %c0_578] : memref<2x2x6x16x10xf32, #tpu.memory_space<vmem>>, vector<1x1x4x8x10xf32>
    %379 = vector.shape_cast %378 : vector<1x1x4x8x10xf32> to vector<4x8x10xf32>
    %c2_579 = arith.constant 2 : index
    %c0_580 = arith.constant 0 : index
    %c0_581 = arith.constant 0 : index
    %c30_582 = arith.constant 30 : index
    %380 = vector.load %arg14[%c2_579, %c0_580, %c0_581, %c30_582] : memref<4x4x8x250xf32, #tpu.memory_space<vmem>>, vector<1x4x8x10xf32>
    %381 = vector.shape_cast %380 : vector<1x4x8x10xf32> to vector<4x8x10xf32>
    %382 = vector.shape_cast %379 : vector<4x8x10xf32> to vector<1x4x8x10xf32>
    tpu.vector_store %arg14[%c2_579, %c0_580, %c0_581, %c30_582], %382 {strides = array<i32>} : memref<4x4x8x250xf32, #tpu.memory_space<vmem>>, vector<1x4x8x10xf32>,
    %c1_583 = arith.constant 1 : index
    %c0_584 = arith.constant 0 : index
    %c0_585 = arith.constant 0 : index
    %c4_586 = arith.constant 4 : index
    %c0_587 = arith.constant 0 : index
    %383 = vector.load %arg13[%c1_583, %c0_584, %c0_585, %c4_586, %c0_587] : memref<2x2x6x16x10xf32, #tpu.memory_space<vmem>>, vector<1x1x4x8x10xf32>
    %384 = vector.shape_cast %383 : vector<1x1x4x8x10xf32> to vector<4x8x10xf32>
    %c2_588 = arith.constant 2 : index
    %c0_589 = arith.constant 0 : index
    %c0_590 = arith.constant 0 : index
    %c40_591 = arith.constant 40 : index
    %385 = vector.load %arg14[%c2_588, %c0_589, %c0_590, %c40_591] : memref<4x4x8x250xf32, #tpu.memory_space<vmem>>, vector<1x4x8x10xf32>
    %386 = vector.shape_cast %385 : vector<1x4x8x10xf32> to vector<4x8x10xf32>
    %387 = vector.shape_cast %384 : vector<4x8x10xf32> to vector<1x4x8x10xf32>
    tpu.vector_store %arg14[%c2_588, %c0_589, %c0_590, %c40_591], %387 {strides = array<i32>} : memref<4x4x8x250xf32, #tpu.memory_space<vmem>>, vector<1x4x8x10xf32>,
    %c0_592 = arith.constant 0 : index
    %c0_593 = arith.constant 0 : index
    %c1_594 = arith.constant 1 : index
    %c0_595 = arith.constant 0 : index
    %c0_596 = arith.constant 0 : index
    %388 = vector.load %arg13[%c0_592, %c0_593, %c1_594, %c0_595, %c0_596] : memref<2x2x6x16x10xf32, #tpu.memory_space<vmem>>, vector<1x1x4x8x10xf32>
    %389 = vector.shape_cast %388 : vector<1x1x4x8x10xf32> to vector<4x8x10xf32>
    %c2_597 = arith.constant 2 : index
    %c0_598 = arith.constant 0 : index
    %c0_599 = arith.constant 0 : index
    %c50_600 = arith.constant 50 : index
    %390 = vector.load %arg14[%c2_597, %c0_598, %c0_599, %c50_600] : memref<4x4x8x250xf32, #tpu.memory_space<vmem>>, vector<1x4x8x10xf32>
    %391 = vector.shape_cast %390 : vector<1x4x8x10xf32> to vector<4x8x10xf32>
    %392 = vector.shape_cast %389 : vector<4x8x10xf32> to vector<1x4x8x10xf32>
    tpu.vector_store %arg14[%c2_597, %c0_598, %c0_599, %c50_600], %392 {strides = array<i32>} : memref<4x4x8x250xf32, #tpu.memory_space<vmem>>, vector<1x4x8x10xf32>,
    %c0_601 = arith.constant 0 : index
    %c1_602 = arith.constant 1 : index
    %c1_603 = arith.constant 1 : index
    %c0_604 = arith.constant 0 : index
    %c0_605 = arith.constant 0 : index
    %393 = vector.load %arg13[%c0_601, %c1_602, %c1_603, %c0_604, %c0_605] : memref<2x2x6x16x10xf32, #tpu.memory_space<vmem>>, vector<1x1x4x8x10xf32>
    %394 = vector.shape_cast %393 : vector<1x1x4x8x10xf32> to vector<4x8x10xf32>
    %c2_606 = arith.constant 2 : index
    %c0_607 = arith.constant 0 : index
    %c0_608 = arith.constant 0 : index
    %c60_609 = arith.constant 60 : index
    %395 = vector.load %arg14[%c2_606, %c0_607, %c0_608, %c60_609] : memref<4x4x8x250xf32, #tpu.memory_space<vmem>>, vector<1x4x8x10xf32>
    %396 = vector.shape_cast %395 : vector<1x4x8x10xf32> to vector<4x8x10xf32>
    %397 = vector.shape_cast %394 : vector<4x8x10xf32> to vector<1x4x8x10xf32>
    tpu.vector_store %arg14[%c2_606, %c0_607, %c0_608, %c60_609], %397 {strides = array<i32>} : memref<4x4x8x250xf32, #tpu.memory_space<vmem>>, vector<1x4x8x10xf32>,
    %c0_610 = arith.constant 0 : index
    %c0_611 = arith.constant 0 : index
    %c1_612 = arith.constant 1 : index
    %c2_613 = arith.constant 2 : index
    %c0_614 = arith.constant 0 : index
    %398 = vector.load %arg13[%c0_610, %c0_611, %c1_612, %c2_613, %c0_614] : memref<2x2x6x16x10xf32, #tpu.memory_space<vmem>>, vector<1x1x4x8x10xf32>
    %399 = vector.shape_cast %398 : vector<1x1x4x8x10xf32> to vector<4x8x10xf32>
    %c2_615 = arith.constant 2 : index
    %c0_616 = arith.constant 0 : index
    %c0_617 = arith.constant 0 : index
    %c70_618 = arith.constant 70 : index
    %400 = vector.load %arg14[%c2_615, %c0_616, %c0_617, %c70_618] : memref<4x4x8x250xf32, #tpu.memory_space<vmem>>, vector<1x4x8x10xf32>
    %401 = vector.shape_cast %400 : vector<1x4x8x10xf32> to vector<4x8x10xf32>
    %402 = vector.shape_cast %399 : vector<4x8x10xf32> to vector<1x4x8x10xf32>
    tpu.vector_store %arg14[%c2_615, %c0_616, %c0_617, %c70_618], %402 {strides = array<i32>} : memref<4x4x8x250xf32, #tpu.memory_space<vmem>>, vector<1x4x8x10xf32>,
    %c0_619 = arith.constant 0 : index
    %c1_620 = arith.constant 1 : index
    %c1_621 = arith.constant 1 : index
    %c2_622 = arith.constant 2 : index
    %c0_623 = arith.constant 0 : index
    %403 = vector.load %arg13[%c0_619, %c1_620, %c1_621, %c2_622, %c0_623] : memref<2x2x6x16x10xf32, #tpu.memory_space<vmem>>, vector<1x1x4x8x10xf32>
    %404 = vector.shape_cast %403 : vector<1x1x4x8x10xf32> to vector<4x8x10xf32>
    %c2_624 = arith.constant 2 : index
    %c0_625 = arith.constant 0 : index
    %c0_626 = arith.constant 0 : index
    %c80_627 = arith.constant 80 : index
    %405 = vector.load %arg14[%c2_624, %c0_625, %c0_626, %c80_627] : memref<4x4x8x250xf32, #tpu.memory_space<vmem>>, vector<1x4x8x10xf32>
    %406 = vector.shape_cast %405 : vector<1x4x8x10xf32> to vector<4x8x10xf32>
    %407 = vector.shape_cast %404 : vector<4x8x10xf32> to vector<1x4x8x10xf32>
    tpu.vector_store %arg14[%c2_624, %c0_625, %c0_626, %c80_627], %407 {strides = array<i32>} : memref<4x4x8x250xf32, #tpu.memory_space<vmem>>, vector<1x4x8x10xf32>,
    %c0_628 = arith.constant 0 : index
    %c0_629 = arith.constant 0 : index
    %c1_630 = arith.constant 1 : index
    %c4_631 = arith.constant 4 : index
    %c0_632 = arith.constant 0 : index
    %408 = vector.load %arg13[%c0_628, %c0_629, %c1_630, %c4_631, %c0_632] : memref<2x2x6x16x10xf32, #tpu.memory_space<vmem>>, vector<1x1x4x8x10xf32>
    %409 = vector.shape_cast %408 : vector<1x1x4x8x10xf32> to vector<4x8x10xf32>
    %c2_633 = arith.constant 2 : index
    %c0_634 = arith.constant 0 : index
    %c0_635 = arith.constant 0 : index
    %c90_636 = arith.constant 90 : index
    %410 = vector.load %arg14[%c2_633, %c0_634, %c0_635, %c90_636] : memref<4x4x8x250xf32, #tpu.memory_space<vmem>>, vector<1x4x8x10xf32>
    %411 = vector.shape_cast %410 : vector<1x4x8x10xf32> to vector<4x8x10xf32>
    %412 = vector.shape_cast %409 : vector<4x8x10xf32> to vector<1x4x8x10xf32>
    tpu.vector_store %arg14[%c2_633, %c0_634, %c0_635, %c90_636], %412 {strides = array<i32>} : memref<4x4x8x250xf32, #tpu.memory_space<vmem>>, vector<1x4x8x10xf32>,
    %c1_637 = arith.constant 1 : index
    %c0_638 = arith.constant 0 : index
    %c1_639 = arith.constant 1 : index
    %c0_640 = arith.constant 0 : index
    %c0_641 = arith.constant 0 : index
    %413 = vector.load %arg13[%c1_637, %c0_638, %c1_639, %c0_640, %c0_641] : memref<2x2x6x16x10xf32, #tpu.memory_space<vmem>>, vector<1x1x4x8x10xf32>
    %414 = vector.shape_cast %413 : vector<1x1x4x8x10xf32> to vector<4x8x10xf32>
    %c2_642 = arith.constant 2 : index
    %c0_643 = arith.constant 0 : index
    %c0_644 = arith.constant 0 : index
    %c100_645 = arith.constant 100 : index
    %415 = vector.load %arg14[%c2_642, %c0_643, %c0_644, %c100_645] : memref<4x4x8x250xf32, #tpu.memory_space<vmem>>, vector<1x4x8x10xf32>
    %416 = vector.shape_cast %415 : vector<1x4x8x10xf32> to vector<4x8x10xf32>
    %417 = vector.shape_cast %414 : vector<4x8x10xf32> to vector<1x4x8x10xf32>
    tpu.vector_store %arg14[%c2_642, %c0_643, %c0_644, %c100_645], %417 {strides = array<i32>} : memref<4x4x8x250xf32, #tpu.memory_space<vmem>>, vector<1x4x8x10xf32>,
    %c1_646 = arith.constant 1 : index
    %c1_647 = arith.constant 1 : index
    %c1_648 = arith.constant 1 : index
    %c0_649 = arith.constant 0 : index
    %c0_650 = arith.constant 0 : index
    %418 = vector.load %arg13[%c1_646, %c1_647, %c1_648, %c0_649, %c0_650] : memref<2x2x6x16x10xf32, #tpu.memory_space<vmem>>, vector<1x1x4x8x10xf32>
    %419 = vector.shape_cast %418 : vector<1x1x4x8x10xf32> to vector<4x8x10xf32>
    %c2_651 = arith.constant 2 : index
    %c0_652 = arith.constant 0 : index
    %c0_653 = arith.constant 0 : index
    %c110_654 = arith.constant 110 : index
    %420 = vector.load %arg14[%c2_651, %c0_652, %c0_653, %c110_654] : memref<4x4x8x250xf32, #tpu.memory_space<vmem>>, vector<1x4x8x10xf32>
    %421 = vector.shape_cast %420 : vector<1x4x8x10xf32> to vector<4x8x10xf32>
    %422 = vector.shape_cast %419 : vector<4x8x10xf32> to vector<1x4x8x10xf32>
    tpu.vector_store %arg14[%c2_651, %c0_652, %c0_653, %c110_654], %422 {strides = array<i32>} : memref<4x4x8x250xf32, #tpu.memory_space<vmem>>, vector<1x4x8x10xf32>,
    %c1_655 = arith.constant 1 : index
    %c0_656 = arith.constant 0 : index
    %c1_657 = arith.constant 1 : index
    %c2_658 = arith.constant 2 : index
    %c0_659 = arith.constant 0 : index
    %423 = vector.load %arg13[%c1_655, %c0_656, %c1_657, %c2_658, %c0_659] : memref<2x2x6x16x10xf32, #tpu.memory_space<vmem>>, vector<1x1x4x8x10xf32>
    %424 = vector.shape_cast %423 : vector<1x1x4x8x10xf32> to vector<4x8x10xf32>
    %c2_660 = arith.constant 2 : index
    %c0_661 = arith.constant 0 : index
    %c0_662 = arith.constant 0 : index
    %c120_663 = arith.constant 120 : index
    %425 = vector.load %arg14[%c2_660, %c0_661, %c0_662, %c120_663] : memref<4x4x8x250xf32, #tpu.memory_space<vmem>>, vector<1x4x8x10xf32>
    %426 = vector.shape_cast %425 : vector<1x4x8x10xf32> to vector<4x8x10xf32>
    %427 = vector.shape_cast %424 : vector<4x8x10xf32> to vector<1x4x8x10xf32>
    tpu.vector_store %arg14[%c2_660, %c0_661, %c0_662, %c120_663], %427 {strides = array<i32>} : memref<4x4x8x250xf32, #tpu.memory_space<vmem>>, vector<1x4x8x10xf32>,
    %c1_664 = arith.constant 1 : index
    %c1_665 = arith.constant 1 : index
    %c1_666 = arith.constant 1 : index
    %c2_667 = arith.constant 2 : index
    %c0_668 = arith.constant 0 : index
    %428 = vector.load %arg13[%c1_664, %c1_665, %c1_666, %c2_667, %c0_668] : memref<2x2x6x16x10xf32, #tpu.memory_space<vmem>>, vector<1x1x4x8x10xf32>
    %429 = vector.shape_cast %428 : vector<1x1x4x8x10xf32> to vector<4x8x10xf32>
    %c2_669 = arith.constant 2 : index
    %c0_670 = arith.constant 0 : index
    %c0_671 = arith.constant 0 : index
    %c130_672 = arith.constant 130 : index
    %430 = vector.load %arg14[%c2_669, %c0_670, %c0_671, %c130_672] : memref<4x4x8x250xf32, #tpu.memory_space<vmem>>, vector<1x4x8x10xf32>
    %431 = vector.shape_cast %430 : vector<1x4x8x10xf32> to vector<4x8x10xf32>
    %432 = vector.shape_cast %429 : vector<4x8x10xf32> to vector<1x4x8x10xf32>
    tpu.vector_store %arg14[%c2_669, %c0_670, %c0_671, %c130_672], %432 {strides = array<i32>} : memref<4x4x8x250xf32, #tpu.memory_space<vmem>>, vector<1x4x8x10xf32>,
    %c1_673 = arith.constant 1 : index
    %c0_674 = arith.constant 0 : index
    %c1_675 = arith.constant 1 : index
    %c4_676 = arith.constant 4 : index
    %c0_677 = arith.constant 0 : index
    %433 = vector.load %arg13[%c1_673, %c0_674, %c1_675, %c4_676, %c0_677] : memref<2x2x6x16x10xf32, #tpu.memory_space<vmem>>, vector<1x1x4x8x10xf32>
    %434 = vector.shape_cast %433 : vector<1x1x4x8x10xf32> to vector<4x8x10xf32>
    %c2_678 = arith.constant 2 : index
    %c0_679 = arith.constant 0 : index
    %c0_680 = arith.constant 0 : index
    %c140_681 = arith.constant 140 : index
    %435 = vector.load %arg14[%c2_678, %c0_679, %c0_680, %c140_681] : memref<4x4x8x250xf32, #tpu.memory_space<vmem>>, vector<1x4x8x10xf32>
    %436 = vector.shape_cast %435 : vector<1x4x8x10xf32> to vector<4x8x10xf32>
    %437 = vector.shape_cast %434 : vector<4x8x10xf32> to vector<1x4x8x10xf32>
    tpu.vector_store %arg14[%c2_678, %c0_679, %c0_680, %c140_681], %437 {strides = array<i32>} : memref<4x4x8x250xf32, #tpu.memory_space<vmem>>, vector<1x4x8x10xf32>,
    %c0_682 = arith.constant 0 : index
    %c0_683 = arith.constant 0 : index
    %c2_684 = arith.constant 2 : index
    %c0_685 = arith.constant 0 : index
    %c0_686 = arith.constant 0 : index
    %438 = vector.load %arg13[%c0_682, %c0_683, %c2_684, %c0_685, %c0_686] : memref<2x2x6x16x10xf32, #tpu.memory_space<vmem>>, vector<1x1x4x8x10xf32>
    %439 = vector.shape_cast %438 : vector<1x1x4x8x10xf32> to vector<4x8x10xf32>
    %c2_687 = arith.constant 2 : index
    %c0_688 = arith.constant 0 : index
    %c0_689 = arith.constant 0 : index
    %c150_690 = arith.constant 150 : index
    %440 = vector.load %arg14[%c2_687, %c0_688, %c0_689, %c150_690] : memref<4x4x8x250xf32, #tpu.memory_space<vmem>>, vector<1x4x8x10xf32>
    %441 = vector.shape_cast %440 : vector<1x4x8x10xf32> to vector<4x8x10xf32>
    %442 = vector.shape_cast %439 : vector<4x8x10xf32> to vector<1x4x8x10xf32>
    tpu.vector_store %arg14[%c2_687, %c0_688, %c0_689, %c150_690], %442 {strides = array<i32>} : memref<4x4x8x250xf32, #tpu.memory_space<vmem>>, vector<1x4x8x10xf32>,
    %c0_691 = arith.constant 0 : index
    %c1_692 = arith.constant 1 : index
    %c2_693 = arith.constant 2 : index
    %c0_694 = arith.constant 0 : index
    %c0_695 = arith.constant 0 : index
    %443 = vector.load %arg13[%c0_691, %c1_692, %c2_693, %c0_694, %c0_695] : memref<2x2x6x16x10xf32, #tpu.memory_space<vmem>>, vector<1x1x4x8x10xf32>
    %444 = vector.shape_cast %443 : vector<1x1x4x8x10xf32> to vector<4x8x10xf32>
    %c2_696 = arith.constant 2 : index
    %c0_697 = arith.constant 0 : index
    %c0_698 = arith.constant 0 : index
    %c160_699 = arith.constant 160 : index
    %445 = vector.load %arg14[%c2_696, %c0_697, %c0_698, %c160_699] : memref<4x4x8x250xf32, #tpu.memory_space<vmem>>, vector<1x4x8x10xf32>
    %446 = vector.shape_cast %445 : vector<1x4x8x10xf32> to vector<4x8x10xf32>
    %447 = vector.shape_cast %444 : vector<4x8x10xf32> to vector<1x4x8x10xf32>
    tpu.vector_store %arg14[%c2_696, %c0_697, %c0_698, %c160_699], %447 {strides = array<i32>} : memref<4x4x8x250xf32, #tpu.memory_space<vmem>>, vector<1x4x8x10xf32>,
    %c0_700 = arith.constant 0 : index
    %c0_701 = arith.constant 0 : index
    %c2_702 = arith.constant 2 : index
    %c2_703 = arith.constant 2 : index
    %c0_704 = arith.constant 0 : index
    %448 = vector.load %arg13[%c0_700, %c0_701, %c2_702, %c2_703, %c0_704] : memref<2x2x6x16x10xf32, #tpu.memory_space<vmem>>, vector<1x1x4x8x10xf32>
    %449 = vector.shape_cast %448 : vector<1x1x4x8x10xf32> to vector<4x8x10xf32>
    %c2_705 = arith.constant 2 : index
    %c0_706 = arith.constant 0 : index
    %c0_707 = arith.constant 0 : index
    %c170_708 = arith.constant 170 : index
    %450 = vector.load %arg14[%c2_705, %c0_706, %c0_707, %c170_708] : memref<4x4x8x250xf32, #tpu.memory_space<vmem>>, vector<1x4x8x10xf32>
    %451 = vector.shape_cast %450 : vector<1x4x8x10xf32> to vector<4x8x10xf32>
    %452 = vector.shape_cast %449 : vector<4x8x10xf32> to vector<1x4x8x10xf32>
    tpu.vector_store %arg14[%c2_705, %c0_706, %c0_707, %c170_708], %452 {strides = array<i32>} : memref<4x4x8x250xf32, #tpu.memory_space<vmem>>, vector<1x4x8x10xf32>,
    %c0_709 = arith.constant 0 : index
    %c1_710 = arith.constant 1 : index
    %c2_711 = arith.constant 2 : index
    %c2_712 = arith.constant 2 : index
    %c0_713 = arith.constant 0 : index
    %453 = vector.load %arg13[%c0_709, %c1_710, %c2_711, %c2_712, %c0_713] : memref<2x2x6x16x10xf32, #tpu.memory_space<vmem>>, vector<1x1x4x8x10xf32>
    %454 = vector.shape_cast %453 : vector<1x1x4x8x10xf32> to vector<4x8x10xf32>
    %c2_714 = arith.constant 2 : index
    %c0_715 = arith.constant 0 : index
    %c0_716 = arith.constant 0 : index
    %c180_717 = arith.constant 180 : index
    %455 = vector.load %arg14[%c2_714, %c0_715, %c0_716, %c180_717] : memref<4x4x8x250xf32, #tpu.memory_space<vmem>>, vector<1x4x8x10xf32>
    %456 = vector.shape_cast %455 : vector<1x4x8x10xf32> to vector<4x8x10xf32>
    %457 = vector.shape_cast %454 : vector<4x8x10xf32> to vector<1x4x8x10xf32>
    tpu.vector_store %arg14[%c2_714, %c0_715, %c0_716, %c180_717], %457 {strides = array<i32>} : memref<4x4x8x250xf32, #tpu.memory_space<vmem>>, vector<1x4x8x10xf32>,
    %c0_718 = arith.constant 0 : index
    %c0_719 = arith.constant 0 : index
    %c2_720 = arith.constant 2 : index
    %c4_721 = arith.constant 4 : index
    %c0_722 = arith.constant 0 : index
    %458 = vector.load %arg13[%c0_718, %c0_719, %c2_720, %c4_721, %c0_722] : memref<2x2x6x16x10xf32, #tpu.memory_space<vmem>>, vector<1x1x4x8x10xf32>
    %459 = vector.shape_cast %458 : vector<1x1x4x8x10xf32> to vector<4x8x10xf32>
    %c2_723 = arith.constant 2 : index
    %c0_724 = arith.constant 0 : index
    %c0_725 = arith.constant 0 : index
    %c190_726 = arith.constant 190 : index
    %460 = vector.load %arg14[%c2_723, %c0_724, %c0_725, %c190_726] : memref<4x4x8x250xf32, #tpu.memory_space<vmem>>, vector<1x4x8x10xf32>
    %461 = vector.shape_cast %460 : vector<1x4x8x10xf32> to vector<4x8x10xf32>
    %462 = vector.shape_cast %459 : vector<4x8x10xf32> to vector<1x4x8x10xf32>
    tpu.vector_store %arg14[%c2_723, %c0_724, %c0_725, %c190_726], %462 {strides = array<i32>} : memref<4x4x8x250xf32, #tpu.memory_space<vmem>>, vector<1x4x8x10xf32>,
    %c1_727 = arith.constant 1 : index
    %c0_728 = arith.constant 0 : index
    %c2_729 = arith.constant 2 : index
    %c0_730 = arith.constant 0 : index
    %c0_731 = arith.constant 0 : index
    %463 = vector.load %arg13[%c1_727, %c0_728, %c2_729, %c0_730, %c0_731] : memref<2x2x6x16x10xf32, #tpu.memory_space<vmem>>, vector<1x1x4x8x10xf32>
    %464 = vector.shape_cast %463 : vector<1x1x4x8x10xf32> to vector<4x8x10xf32>
    %c2_732 = arith.constant 2 : index
    %c0_733 = arith.constant 0 : index
    %c0_734 = arith.constant 0 : index
    %c200_735 = arith.constant 200 : index
    %465 = vector.load %arg14[%c2_732, %c0_733, %c0_734, %c200_735] : memref<4x4x8x250xf32, #tpu.memory_space<vmem>>, vector<1x4x8x10xf32>
    %466 = vector.shape_cast %465 : vector<1x4x8x10xf32> to vector<4x8x10xf32>
    %467 = vector.shape_cast %464 : vector<4x8x10xf32> to vector<1x4x8x10xf32>
    tpu.vector_store %arg14[%c2_732, %c0_733, %c0_734, %c200_735], %467 {strides = array<i32>} : memref<4x4x8x250xf32, #tpu.memory_space<vmem>>, vector<1x4x8x10xf32>,
    %c1_736 = arith.constant 1 : index
    %c1_737 = arith.constant 1 : index
    %c2_738 = arith.constant 2 : index
    %c0_739 = arith.constant 0 : index
    %c0_740 = arith.constant 0 : index
    %468 = vector.load %arg13[%c1_736, %c1_737, %c2_738, %c0_739, %c0_740] : memref<2x2x6x16x10xf32, #tpu.memory_space<vmem>>, vector<1x1x4x8x10xf32>
    %469 = vector.shape_cast %468 : vector<1x1x4x8x10xf32> to vector<4x8x10xf32>
    %c2_741 = arith.constant 2 : index
    %c0_742 = arith.constant 0 : index
    %c0_743 = arith.constant 0 : index
    %c210_744 = arith.constant 210 : index
    %470 = vector.load %arg14[%c2_741, %c0_742, %c0_743, %c210_744] : memref<4x4x8x250xf32, #tpu.memory_space<vmem>>, vector<1x4x8x10xf32>
    %471 = vector.shape_cast %470 : vector<1x4x8x10xf32> to vector<4x8x10xf32>
    %472 = vector.shape_cast %469 : vector<4x8x10xf32> to vector<1x4x8x10xf32>
    tpu.vector_store %arg14[%c2_741, %c0_742, %c0_743, %c210_744], %472 {strides = array<i32>} : memref<4x4x8x250xf32, #tpu.memory_space<vmem>>, vector<1x4x8x10xf32>,
    %c1_745 = arith.constant 1 : index
    %c0_746 = arith.constant 0 : index
    %c2_747 = arith.constant 2 : index
    %c2_748 = arith.constant 2 : index
    %c0_749 = arith.constant 0 : index
    %473 = vector.load %arg13[%c1_745, %c0_746, %c2_747, %c2_748, %c0_749] : memref<2x2x6x16x10xf32, #tpu.memory_space<vmem>>, vector<1x1x4x8x10xf32>
    %474 = vector.shape_cast %473 : vector<1x1x4x8x10xf32> to vector<4x8x10xf32>
    %c2_750 = arith.constant 2 : index
    %c0_751 = arith.constant 0 : index
    %c0_752 = arith.constant 0 : index
    %c220_753 = arith.constant 220 : index
    %475 = vector.load %arg14[%c2_750, %c0_751, %c0_752, %c220_753] : memref<4x4x8x250xf32, #tpu.memory_space<vmem>>, vector<1x4x8x10xf32>
    %476 = vector.shape_cast %475 : vector<1x4x8x10xf32> to vector<4x8x10xf32>
    %477 = vector.shape_cast %474 : vector<4x8x10xf32> to vector<1x4x8x10xf32>
    tpu.vector_store %arg14[%c2_750, %c0_751, %c0_752, %c220_753], %477 {strides = array<i32>} : memref<4x4x8x250xf32, #tpu.memory_space<vmem>>, vector<1x4x8x10xf32>,
    %c1_754 = arith.constant 1 : index
    %c1_755 = arith.constant 1 : index
    %c2_756 = arith.constant 2 : index
    %c2_757 = arith.constant 2 : index
    %c0_758 = arith.constant 0 : index
    %478 = vector.load %arg13[%c1_754, %c1_755, %c2_756, %c2_757, %c0_758] : memref<2x2x6x16x10xf32, #tpu.memory_space<vmem>>, vector<1x1x4x8x10xf32>
    %479 = vector.shape_cast %478 : vector<1x1x4x8x10xf32> to vector<4x8x10xf32>
    %c2_759 = arith.constant 2 : index
    %c0_760 = arith.constant 0 : index
    %c0_761 = arith.constant 0 : index
    %c230_762 = arith.constant 230 : index
    %480 = vector.load %arg14[%c2_759, %c0_760, %c0_761, %c230_762] : memref<4x4x8x250xf32, #tpu.memory_space<vmem>>, vector<1x4x8x10xf32>
    %481 = vector.shape_cast %480 : vector<1x4x8x10xf32> to vector<4x8x10xf32>
    %482 = vector.shape_cast %479 : vector<4x8x10xf32> to vector<1x4x8x10xf32>
    tpu.vector_store %arg14[%c2_759, %c0_760, %c0_761, %c230_762], %482 {strides = array<i32>} : memref<4x4x8x250xf32, #tpu.memory_space<vmem>>, vector<1x4x8x10xf32>,
    %c1_763 = arith.constant 1 : index
    %c0_764 = arith.constant 0 : index
    %c2_765 = arith.constant 2 : index
    %c4_766 = arith.constant 4 : index
    %c0_767 = arith.constant 0 : index
    %483 = vector.load %arg13[%c1_763, %c0_764, %c2_765, %c4_766, %c0_767] : memref<2x2x6x16x10xf32, #tpu.memory_space<vmem>>, vector<1x1x4x8x10xf32>
    %484 = vector.shape_cast %483 : vector<1x1x4x8x10xf32> to vector<4x8x10xf32>
    %c2_768 = arith.constant 2 : index
    %c0_769 = arith.constant 0 : index
    %c0_770 = arith.constant 0 : index
    %c240_771 = arith.constant 240 : index
    %485 = vector.load %arg14[%c2_768, %c0_769, %c0_770, %c240_771] : memref<4x4x8x250xf32, #tpu.memory_space<vmem>>, vector<1x4x8x10xf32>
    %486 = vector.shape_cast %485 : vector<1x4x8x10xf32> to vector<4x8x10xf32>
    %487 = vector.shape_cast %484 : vector<4x8x10xf32> to vector<1x4x8x10xf32>
    tpu.vector_store %arg14[%c2_768, %c0_769, %c0_770, %c240_771], %487 {strides = array<i32>} : memref<4x4x8x250xf32, #tpu.memory_space<vmem>>, vector<1x4x8x10xf32>,
    %c1_772 = arith.constant 1 : index
    %c1_773 = arith.constant 1 : index
    %c0_774 = arith.constant 0 : index
    %c0_775 = arith.constant 0 : index
    %c0_776 = arith.constant 0 : index
    %488 = vector.load %arg13[%c1_772, %c1_773, %c0_774, %c0_775, %c0_776] : memref<2x2x6x16x10xf32, #tpu.memory_space<vmem>>, vector<1x1x4x8x10xf32>
    %489 = vector.shape_cast %488 : vector<1x1x4x8x10xf32> to vector<4x8x10xf32>
    %c3_777 = arith.constant 3 : index
    %c0_778 = arith.constant 0 : index
    %c0_779 = arith.constant 0 : index
    %c0_780 = arith.constant 0 : index
    %490 = vector.load %arg14[%c3_777, %c0_778, %c0_779, %c0_780] : memref<4x4x8x250xf32, #tpu.memory_space<vmem>>, vector<1x4x8x10xf32>
    %491 = vector.shape_cast %490 : vector<1x4x8x10xf32> to vector<4x8x10xf32>
    %492 = vector.shape_cast %489 : vector<4x8x10xf32> to vector<1x4x8x10xf32>
    tpu.vector_store %arg14[%c3_777, %c0_778, %c0_779, %c0_780], %492 {strides = array<i32>} : memref<4x4x8x250xf32, #tpu.memory_space<vmem>>, vector<1x4x8x10xf32>,
    %c1_781 = arith.constant 1 : index
    %c0_782 = arith.constant 0 : index
    %c0_783 = arith.constant 0 : index
    %c2_784 = arith.constant 2 : index
    %c0_785 = arith.constant 0 : index
    %493 = vector.load %arg13[%c1_781, %c0_782, %c0_783, %c2_784, %c0_785] : memref<2x2x6x16x10xf32, #tpu.memory_space<vmem>>, vector<1x1x4x8x10xf32>
    %494 = vector.shape_cast %493 : vector<1x1x4x8x10xf32> to vector<4x8x10xf32>
    %c3_786 = arith.constant 3 : index
    %c0_787 = arith.constant 0 : index
    %c0_788 = arith.constant 0 : index
    %c10_789 = arith.constant 10 : index
    %495 = vector.load %arg14[%c3_786, %c0_787, %c0_788, %c10_789] : memref<4x4x8x250xf32, #tpu.memory_space<vmem>>, vector<1x4x8x10xf32>
    %496 = vector.shape_cast %495 : vector<1x4x8x10xf32> to vector<4x8x10xf32>
    %497 = vector.shape_cast %494 : vector<4x8x10xf32> to vector<1x4x8x10xf32>
    tpu.vector_store %arg14[%c3_786, %c0_787, %c0_788, %c10_789], %497 {strides = array<i32>} : memref<4x4x8x250xf32, #tpu.memory_space<vmem>>, vector<1x4x8x10xf32>,
    %c1_790 = arith.constant 1 : index
    %c1_791 = arith.constant 1 : index
    %c0_792 = arith.constant 0 : index
    %c2_793 = arith.constant 2 : index
    %c0_794 = arith.constant 0 : index
    %498 = vector.load %arg13[%c1_790, %c1_791, %c0_792, %c2_793, %c0_794] : memref<2x2x6x16x10xf32, #tpu.memory_space<vmem>>, vector<1x1x4x8x10xf32>
    %499 = vector.shape_cast %498 : vector<1x1x4x8x10xf32> to vector<4x8x10xf32>
    %c3_795 = arith.constant 3 : index
    %c0_796 = arith.constant 0 : index
    %c0_797 = arith.constant 0 : index
    %c20_798 = arith.constant 20 : index
    %500 = vector.load %arg14[%c3_795, %c0_796, %c0_797, %c20_798] : memref<4x4x8x250xf32, #tpu.memory_space<vmem>>, vector<1x4x8x10xf32>
    %501 = vector.shape_cast %500 : vector<1x4x8x10xf32> to vector<4x8x10xf32>
    %502 = vector.shape_cast %499 : vector<4x8x10xf32> to vector<1x4x8x10xf32>
    tpu.vector_store %arg14[%c3_795, %c0_796, %c0_797, %c20_798], %502 {strides = array<i32>} : memref<4x4x8x250xf32, #tpu.memory_space<vmem>>, vector<1x4x8x10xf32>,
    %c1_799 = arith.constant 1 : index
    %c0_800 = arith.constant 0 : index
    %c0_801 = arith.constant 0 : index
    %c4_802 = arith.constant 4 : index
    %c0_803 = arith.constant 0 : index
    %503 = vector.load %arg13[%c1_799, %c0_800, %c0_801, %c4_802, %c0_803] : memref<2x2x6x16x10xf32, #tpu.memory_space<vmem>>, vector<1x1x4x8x10xf32>
    %504 = vector.shape_cast %503 : vector<1x1x4x8x10xf32> to vector<4x8x10xf32>
    %c3_804 = arith.constant 3 : index
    %c0_805 = arith.constant 0 : index
    %c0_806 = arith.constant 0 : index
    %c30_807 = arith.constant 30 : index
    %505 = vector.load %arg14[%c3_804, %c0_805, %c0_806, %c30_807] : memref<4x4x8x250xf32, #tpu.memory_space<vmem>>, vector<1x4x8x10xf32>
    %506 = vector.shape_cast %505 : vector<1x4x8x10xf32> to vector<4x8x10xf32>
    %507 = vector.shape_cast %504 : vector<4x8x10xf32> to vector<1x4x8x10xf32>
    tpu.vector_store %arg14[%c3_804, %c0_805, %c0_806, %c30_807], %507 {strides = array<i32>} : memref<4x4x8x250xf32, #tpu.memory_space<vmem>>, vector<1x4x8x10xf32>,
    %c1_808 = arith.constant 1 : index
    %c1_809 = arith.constant 1 : index
    %c0_810 = arith.constant 0 : index
    %c4_811 = arith.constant 4 : index
    %c0_812 = arith.constant 0 : index
    %508 = vector.load %arg13[%c1_808, %c1_809, %c0_810, %c4_811, %c0_812] : memref<2x2x6x16x10xf32, #tpu.memory_space<vmem>>, vector<1x1x4x8x10xf32>
    %509 = vector.shape_cast %508 : vector<1x1x4x8x10xf32> to vector<4x8x10xf32>
    %c3_813 = arith.constant 3 : index
    %c0_814 = arith.constant 0 : index
    %c0_815 = arith.constant 0 : index
    %c40_816 = arith.constant 40 : index
    %510 = vector.load %arg14[%c3_813, %c0_814, %c0_815, %c40_816] : memref<4x4x8x250xf32, #tpu.memory_space<vmem>>, vector<1x4x8x10xf32>
    %511 = vector.shape_cast %510 : vector<1x4x8x10xf32> to vector<4x8x10xf32>
    %512 = vector.shape_cast %509 : vector<4x8x10xf32> to vector<1x4x8x10xf32>
    tpu.vector_store %arg14[%c3_813, %c0_814, %c0_815, %c40_816], %512 {strides = array<i32>} : memref<4x4x8x250xf32, #tpu.memory_space<vmem>>, vector<1x4x8x10xf32>,
    %c0_817 = arith.constant 0 : index
    %c1_818 = arith.constant 1 : index
    %c1_819 = arith.constant 1 : index
    %c0_820 = arith.constant 0 : index
    %c0_821 = arith.constant 0 : index
    %513 = vector.load %arg13[%c0_817, %c1_818, %c1_819, %c0_820, %c0_821] : memref<2x2x6x16x10xf32, #tpu.memory_space<vmem>>, vector<1x1x4x8x10xf32>
    %514 = vector.shape_cast %513 : vector<1x1x4x8x10xf32> to vector<4x8x10xf32>
    %c3_822 = arith.constant 3 : index
    %c0_823 = arith.constant 0 : index
    %c0_824 = arith.constant 0 : index
    %c50_825 = arith.constant 50 : index
    %515 = vector.load %arg14[%c3_822, %c0_823, %c0_824, %c50_825] : memref<4x4x8x250xf32, #tpu.memory_space<vmem>>, vector<1x4x8x10xf32>
    %516 = vector.shape_cast %515 : vector<1x4x8x10xf32> to vector<4x8x10xf32>
    %517 = vector.shape_cast %514 : vector<4x8x10xf32> to vector<1x4x8x10xf32>
    tpu.vector_store %arg14[%c3_822, %c0_823, %c0_824, %c50_825], %517 {strides = array<i32>} : memref<4x4x8x250xf32, #tpu.memory_space<vmem>>, vector<1x4x8x10xf32>,
    %c0_826 = arith.constant 0 : index
    %c0_827 = arith.constant 0 : index
    %c1_828 = arith.constant 1 : index
    %c2_829 = arith.constant 2 : index
    %c0_830 = arith.constant 0 : index
    %518 = vector.load %arg13[%c0_826, %c0_827, %c1_828, %c2_829, %c0_830] : memref<2x2x6x16x10xf32, #tpu.memory_space<vmem>>, vector<1x1x4x8x10xf32>
    %519 = vector.shape_cast %518 : vector<1x1x4x8x10xf32> to vector<4x8x10xf32>
    %c3_831 = arith.constant 3 : index
    %c0_832 = arith.constant 0 : index
    %c0_833 = arith.constant 0 : index
    %c60_834 = arith.constant 60 : index
    %520 = vector.load %arg14[%c3_831, %c0_832, %c0_833, %c60_834] : memref<4x4x8x250xf32, #tpu.memory_space<vmem>>, vector<1x4x8x10xf32>
    %521 = vector.shape_cast %520 : vector<1x4x8x10xf32> to vector<4x8x10xf32>
    %522 = vector.shape_cast %519 : vector<4x8x10xf32> to vector<1x4x8x10xf32>
    tpu.vector_store %arg14[%c3_831, %c0_832, %c0_833, %c60_834], %522 {strides = array<i32>} : memref<4x4x8x250xf32, #tpu.memory_space<vmem>>, vector<1x4x8x10xf32>,
    %c0_835 = arith.constant 0 : index
    %c1_836 = arith.constant 1 : index
    %c1_837 = arith.constant 1 : index
    %c2_838 = arith.constant 2 : index
    %c0_839 = arith.constant 0 : index
    %523 = vector.load %arg13[%c0_835, %c1_836, %c1_837, %c2_838, %c0_839] : memref<2x2x6x16x10xf32, #tpu.memory_space<vmem>>, vector<1x1x4x8x10xf32>
    %524 = vector.shape_cast %523 : vector<1x1x4x8x10xf32> to vector<4x8x10xf32>
    %c3_840 = arith.constant 3 : index
    %c0_841 = arith.constant 0 : index
    %c0_842 = arith.constant 0 : index
    %c70_843 = arith.constant 70 : index
    %525 = vector.load %arg14[%c3_840, %c0_841, %c0_842, %c70_843] : memref<4x4x8x250xf32, #tpu.memory_space<vmem>>, vector<1x4x8x10xf32>
    %526 = vector.shape_cast %525 : vector<1x4x8x10xf32> to vector<4x8x10xf32>
    %527 = vector.shape_cast %524 : vector<4x8x10xf32> to vector<1x4x8x10xf32>
    tpu.vector_store %arg14[%c3_840, %c0_841, %c0_842, %c70_843], %527 {strides = array<i32>} : memref<4x4x8x250xf32, #tpu.memory_space<vmem>>, vector<1x4x8x10xf32>,
    %c0_844 = arith.constant 0 : index
    %c0_845 = arith.constant 0 : index
    %c1_846 = arith.constant 1 : index
    %c4_847 = arith.constant 4 : index
    %c0_848 = arith.constant 0 : index
    %528 = vector.load %arg13[%c0_844, %c0_845, %c1_846, %c4_847, %c0_848] : memref<2x2x6x16x10xf32, #tpu.memory_space<vmem>>, vector<1x1x4x8x10xf32>
    %529 = vector.shape_cast %528 : vector<1x1x4x8x10xf32> to vector<4x8x10xf32>
    %c3_849 = arith.constant 3 : index
    %c0_850 = arith.constant 0 : index
    %c0_851 = arith.constant 0 : index
    %c80_852 = arith.constant 80 : index
    %530 = vector.load %arg14[%c3_849, %c0_850, %c0_851, %c80_852] : memref<4x4x8x250xf32, #tpu.memory_space<vmem>>, vector<1x4x8x10xf32>
    %531 = vector.shape_cast %530 : vector<1x4x8x10xf32> to vector<4x8x10xf32>
    %532 = vector.shape_cast %529 : vector<4x8x10xf32> to vector<1x4x8x10xf32>
    tpu.vector_store %arg14[%c3_849, %c0_850, %c0_851, %c80_852], %532 {strides = array<i32>} : memref<4x4x8x250xf32, #tpu.memory_space<vmem>>, vector<1x4x8x10xf32>,
    %c0_853 = arith.constant 0 : index
    %c1_854 = arith.constant 1 : index
    %c1_855 = arith.constant 1 : index
    %c4_856 = arith.constant 4 : index
    %c0_857 = arith.constant 0 : index
    %533 = vector.load %arg13[%c0_853, %c1_854, %c1_855, %c4_856, %c0_857] : memref<2x2x6x16x10xf32, #tpu.memory_space<vmem>>, vector<1x1x4x8x10xf32>
    %534 = vector.shape_cast %533 : vector<1x1x4x8x10xf32> to vector<4x8x10xf32>
    %c3_858 = arith.constant 3 : index
    %c0_859 = arith.constant 0 : index
    %c0_860 = arith.constant 0 : index
    %c90_861 = arith.constant 90 : index
    %535 = vector.load %arg14[%c3_858, %c0_859, %c0_860, %c90_861] : memref<4x4x8x250xf32, #tpu.memory_space<vmem>>, vector<1x4x8x10xf32>
    %536 = vector.shape_cast %535 : vector<1x4x8x10xf32> to vector<4x8x10xf32>
    %537 = vector.shape_cast %534 : vector<4x8x10xf32> to vector<1x4x8x10xf32>
    tpu.vector_store %arg14[%c3_858, %c0_859, %c0_860, %c90_861], %537 {strides = array<i32>} : memref<4x4x8x250xf32, #tpu.memory_space<vmem>>, vector<1x4x8x10xf32>,
    %c1_862 = arith.constant 1 : index
    %c1_863 = arith.constant 1 : index
    %c1_864 = arith.constant 1 : index
    %c0_865 = arith.constant 0 : index
    %c0_866 = arith.constant 0 : index
    %538 = vector.load %arg13[%c1_862, %c1_863, %c1_864, %c0_865, %c0_866] : memref<2x2x6x16x10xf32, #tpu.memory_space<vmem>>, vector<1x1x4x8x10xf32>
    %539 = vector.shape_cast %538 : vector<1x1x4x8x10xf32> to vector<4x8x10xf32>
    %c3_867 = arith.constant 3 : index
    %c0_868 = arith.constant 0 : index
    %c0_869 = arith.constant 0 : index
    %c100_870 = arith.constant 100 : index
    %540 = vector.load %arg14[%c3_867, %c0_868, %c0_869, %c100_870] : memref<4x4x8x250xf32, #tpu.memory_space<vmem>>, vector<1x4x8x10xf32>
    %541 = vector.shape_cast %540 : vector<1x4x8x10xf32> to vector<4x8x10xf32>
    %542 = vector.shape_cast %539 : vector<4x8x10xf32> to vector<1x4x8x10xf32>
    tpu.vector_store %arg14[%c3_867, %c0_868, %c0_869, %c100_870], %542 {strides = array<i32>} : memref<4x4x8x250xf32, #tpu.memory_space<vmem>>, vector<1x4x8x10xf32>,
    %c1_871 = arith.constant 1 : index
    %c0_872 = arith.constant 0 : index
    %c1_873 = arith.constant 1 : index
    %c2_874 = arith.constant 2 : index
    %c0_875 = arith.constant 0 : index
    %543 = vector.load %arg13[%c1_871, %c0_872, %c1_873, %c2_874, %c0_875] : memref<2x2x6x16x10xf32, #tpu.memory_space<vmem>>, vector<1x1x4x8x10xf32>
    %544 = vector.shape_cast %543 : vector<1x1x4x8x10xf32> to vector<4x8x10xf32>
    %c3_876 = arith.constant 3 : index
    %c0_877 = arith.constant 0 : index
    %c0_878 = arith.constant 0 : index
    %c110_879 = arith.constant 110 : index
    %545 = vector.load %arg14[%c3_876, %c0_877, %c0_878, %c110_879] : memref<4x4x8x250xf32, #tpu.memory_space<vmem>>, vector<1x4x8x10xf32>
    %546 = vector.shape_cast %545 : vector<1x4x8x10xf32> to vector<4x8x10xf32>
    %547 = vector.shape_cast %544 : vector<4x8x10xf32> to vector<1x4x8x10xf32>
    tpu.vector_store %arg14[%c3_876, %c0_877, %c0_878, %c110_879], %547 {strides = array<i32>} : memref<4x4x8x250xf32, #tpu.memory_space<vmem>>, vector<1x4x8x10xf32>,
    %c1_880 = arith.constant 1 : index
    %c1_881 = arith.constant 1 : index
    %c1_882 = arith.constant 1 : index
    %c2_883 = arith.constant 2 : index
    %c0_884 = arith.constant 0 : index
    %548 = vector.load %arg13[%c1_880, %c1_881, %c1_882, %c2_883, %c0_884] : memref<2x2x6x16x10xf32, #tpu.memory_space<vmem>>, vector<1x1x4x8x10xf32>
    %549 = vector.shape_cast %548 : vector<1x1x4x8x10xf32> to vector<4x8x10xf32>
    %c3_885 = arith.constant 3 : index
    %c0_886 = arith.constant 0 : index
    %c0_887 = arith.constant 0 : index
    %c120_888 = arith.constant 120 : index
    %550 = vector.load %arg14[%c3_885, %c0_886, %c0_887, %c120_888] : memref<4x4x8x250xf32, #tpu.memory_space<vmem>>, vector<1x4x8x10xf32>
    %551 = vector.shape_cast %550 : vector<1x4x8x10xf32> to vector<4x8x10xf32>
    %552 = vector.shape_cast %549 : vector<4x8x10xf32> to vector<1x4x8x10xf32>
    tpu.vector_store %arg14[%c3_885, %c0_886, %c0_887, %c120_888], %552 {strides = array<i32>} : memref<4x4x8x250xf32, #tpu.memory_space<vmem>>, vector<1x4x8x10xf32>,
    %c1_889 = arith.constant 1 : index
    %c0_890 = arith.constant 0 : index
    %c1_891 = arith.constant 1 : index
    %c4_892 = arith.constant 4 : index
    %c0_893 = arith.constant 0 : index
    %553 = vector.load %arg13[%c1_889, %c0_890, %c1_891, %c4_892, %c0_893] : memref<2x2x6x16x10xf32, #tpu.memory_space<vmem>>, vector<1x1x4x8x10xf32>
    %554 = vector.shape_cast %553 : vector<1x1x4x8x10xf32> to vector<4x8x10xf32>
    %c3_894 = arith.constant 3 : index
    %c0_895 = arith.constant 0 : index
    %c0_896 = arith.constant 0 : index
    %c130_897 = arith.constant 130 : index
    %555 = vector.load %arg14[%c3_894, %c0_895, %c0_896, %c130_897] : memref<4x4x8x250xf32, #tpu.memory_space<vmem>>, vector<1x4x8x10xf32>
    %556 = vector.shape_cast %555 : vector<1x4x8x10xf32> to vector<4x8x10xf32>
    %557 = vector.shape_cast %554 : vector<4x8x10xf32> to vector<1x4x8x10xf32>
    tpu.vector_store %arg14[%c3_894, %c0_895, %c0_896, %c130_897], %557 {strides = array<i32>} : memref<4x4x8x250xf32, #tpu.memory_space<vmem>>, vector<1x4x8x10xf32>,
    %c1_898 = arith.constant 1 : index
    %c1_899 = arith.constant 1 : index
    %c1_900 = arith.constant 1 : index
    %c4_901 = arith.constant 4 : index
    %c0_902 = arith.constant 0 : index
    %558 = vector.load %arg13[%c1_898, %c1_899, %c1_900, %c4_901, %c0_902] : memref<2x2x6x16x10xf32, #tpu.memory_space<vmem>>, vector<1x1x4x8x10xf32>
    %559 = vector.shape_cast %558 : vector<1x1x4x8x10xf32> to vector<4x8x10xf32>
    %c3_903 = arith.constant 3 : index
    %c0_904 = arith.constant 0 : index
    %c0_905 = arith.constant 0 : index
    %c140_906 = arith.constant 140 : index
    %560 = vector.load %arg14[%c3_903, %c0_904, %c0_905, %c140_906] : memref<4x4x8x250xf32, #tpu.memory_space<vmem>>, vector<1x4x8x10xf32>
    %561 = vector.shape_cast %560 : vector<1x4x8x10xf32> to vector<4x8x10xf32>
    %562 = vector.shape_cast %559 : vector<4x8x10xf32> to vector<1x4x8x10xf32>
    tpu.vector_store %arg14[%c3_903, %c0_904, %c0_905, %c140_906], %562 {strides = array<i32>} : memref<4x4x8x250xf32, #tpu.memory_space<vmem>>, vector<1x4x8x10xf32>,
    %c0_907 = arith.constant 0 : index
    %c1_908 = arith.constant 1 : index
    %c2_909 = arith.constant 2 : index
    %c0_910 = arith.constant 0 : index
    %c0_911 = arith.constant 0 : index
    %563 = vector.load %arg13[%c0_907, %c1_908, %c2_909, %c0_910, %c0_911] : memref<2x2x6x16x10xf32, #tpu.memory_space<vmem>>, vector<1x1x4x8x10xf32>
    %564 = vector.shape_cast %563 : vector<1x1x4x8x10xf32> to vector<4x8x10xf32>
    %c3_912 = arith.constant 3 : index
    %c0_913 = arith.constant 0 : index
    %c0_914 = arith.constant 0 : index
    %c150_915 = arith.constant 150 : index
    %565 = vector.load %arg14[%c3_912, %c0_913, %c0_914, %c150_915] : memref<4x4x8x250xf32, #tpu.memory_space<vmem>>, vector<1x4x8x10xf32>
    %566 = vector.shape_cast %565 : vector<1x4x8x10xf32> to vector<4x8x10xf32>
    %567 = vector.shape_cast %564 : vector<4x8x10xf32> to vector<1x4x8x10xf32>
    tpu.vector_store %arg14[%c3_912, %c0_913, %c0_914, %c150_915], %567 {strides = array<i32>} : memref<4x4x8x250xf32, #tpu.memory_space<vmem>>, vector<1x4x8x10xf32>,
    %c0_916 = arith.constant 0 : index
    %c0_917 = arith.constant 0 : index
    %c2_918 = arith.constant 2 : index
    %c2_919 = arith.constant 2 : index
    %c0_920 = arith.constant 0 : index
    %568 = vector.load %arg13[%c0_916, %c0_917, %c2_918, %c2_919, %c0_920] : memref<2x2x6x16x10xf32, #tpu.memory_space<vmem>>, vector<1x1x4x8x10xf32>
    %569 = vector.shape_cast %568 : vector<1x1x4x8x10xf32> to vector<4x8x10xf32>
    %c3_921 = arith.constant 3 : index
    %c0_922 = arith.constant 0 : index
    %c0_923 = arith.constant 0 : index
    %c160_924 = arith.constant 160 : index
    %570 = vector.load %arg14[%c3_921, %c0_922, %c0_923, %c160_924] : memref<4x4x8x250xf32, #tpu.memory_space<vmem>>, vector<1x4x8x10xf32>
    %571 = vector.shape_cast %570 : vector<1x4x8x10xf32> to vector<4x8x10xf32>
    %572 = vector.shape_cast %569 : vector<4x8x10xf32> to vector<1x4x8x10xf32>
    tpu.vector_store %arg14[%c3_921, %c0_922, %c0_923, %c160_924], %572 {strides = array<i32>} : memref<4x4x8x250xf32, #tpu.memory_space<vmem>>, vector<1x4x8x10xf32>,
    %c0_925 = arith.constant 0 : index
    %c1_926 = arith.constant 1 : index
    %c2_927 = arith.constant 2 : index
    %c2_928 = arith.constant 2 : index
    %c0_929 = arith.constant 0 : index
    %573 = vector.load %arg13[%c0_925, %c1_926, %c2_927, %c2_928, %c0_929] : memref<2x2x6x16x10xf32, #tpu.memory_space<vmem>>, vector<1x1x4x8x10xf32>
    %574 = vector.shape_cast %573 : vector<1x1x4x8x10xf32> to vector<4x8x10xf32>
    %c3_930 = arith.constant 3 : index
    %c0_931 = arith.constant 0 : index
    %c0_932 = arith.constant 0 : index
    %c170_933 = arith.constant 170 : index
    %575 = vector.load %arg14[%c3_930, %c0_931, %c0_932, %c170_933] : memref<4x4x8x250xf32, #tpu.memory_space<vmem>>, vector<1x4x8x10xf32>
    %576 = vector.shape_cast %575 : vector<1x4x8x10xf32> to vector<4x8x10xf32>
    %577 = vector.shape_cast %574 : vector<4x8x10xf32> to vector<1x4x8x10xf32>
    tpu.vector_store %arg14[%c3_930, %c0_931, %c0_932, %c170_933], %577 {strides = array<i32>} : memref<4x4x8x250xf32, #tpu.memory_space<vmem>>, vector<1x4x8x10xf32>,
    %c0_934 = arith.constant 0 : index
    %c0_935 = arith.constant 0 : index
    %c2_936 = arith.constant 2 : index
    %c4_937 = arith.constant 4 : index
    %c0_938 = arith.constant 0 : index
    %578 = vector.load %arg13[%c0_934, %c0_935, %c2_936, %c4_937, %c0_938] : memref<2x2x6x16x10xf32, #tpu.memory_space<vmem>>, vector<1x1x4x8x10xf32>
    %579 = vector.shape_cast %578 : vector<1x1x4x8x10xf32> to vector<4x8x10xf32>
    %c3_939 = arith.constant 3 : index
    %c0_940 = arith.constant 0 : index
    %c0_941 = arith.constant 0 : index
    %c180_942 = arith.constant 180 : index
    %580 = vector.load %arg14[%c3_939, %c0_940, %c0_941, %c180_942] : memref<4x4x8x250xf32, #tpu.memory_space<vmem>>, vector<1x4x8x10xf32>
    %581 = vector.shape_cast %580 : vector<1x4x8x10xf32> to vector<4x8x10xf32>
    %582 = vector.shape_cast %579 : vector<4x8x10xf32> to vector<1x4x8x10xf32>
    tpu.vector_store %arg14[%c3_939, %c0_940, %c0_941, %c180_942], %582 {strides = array<i32>} : memref<4x4x8x250xf32, #tpu.memory_space<vmem>>, vector<1x4x8x10xf32>,
    %c0_943 = arith.constant 0 : index
    %c1_944 = arith.constant 1 : index
    %c2_945 = arith.constant 2 : index
    %c4_946 = arith.constant 4 : index
    %c0_947 = arith.constant 0 : index
    %583 = vector.load %arg13[%c0_943, %c1_944, %c2_945, %c4_946, %c0_947] : memref<2x2x6x16x10xf32, #tpu.memory_space<vmem>>, vector<1x1x4x8x10xf32>
    %584 = vector.shape_cast %583 : vector<1x1x4x8x10xf32> to vector<4x8x10xf32>
    %c3_948 = arith.constant 3 : index
    %c0_949 = arith.constant 0 : index
    %c0_950 = arith.constant 0 : index
    %c190_951 = arith.constant 190 : index
    %585 = vector.load %arg14[%c3_948, %c0_949, %c0_950, %c190_951] : memref<4x4x8x250xf32, #tpu.memory_space<vmem>>, vector<1x4x8x10xf32>
    %586 = vector.shape_cast %585 : vector<1x4x8x10xf32> to vector<4x8x10xf32>
    %587 = vector.shape_cast %584 : vector<4x8x10xf32> to vector<1x4x8x10xf32>
    tpu.vector_store %arg14[%c3_948, %c0_949, %c0_950, %c190_951], %587 {strides = array<i32>} : memref<4x4x8x250xf32, #tpu.memory_space<vmem>>, vector<1x4x8x10xf32>,
    %c1_952 = arith.constant 1 : index
    %c1_953 = arith.constant 1 : index
    %c2_954 = arith.constant 2 : index
    %c0_955 = arith.constant 0 : index
    %c0_956 = arith.constant 0 : index
    %588 = vector.load %arg13[%c1_952, %c1_953, %c2_954, %c0_955, %c0_956] : memref<2x2x6x16x10xf32, #tpu.memory_space<vmem>>, vector<1x1x4x8x10xf32>
    %589 = vector.shape_cast %588 : vector<1x1x4x8x10xf32> to vector<4x8x10xf32>
    %c3_957 = arith.constant 3 : index
    %c0_958 = arith.constant 0 : index
    %c0_959 = arith.constant 0 : index
    %c200_960 = arith.constant 200 : index
    %590 = vector.load %arg14[%c3_957, %c0_958, %c0_959, %c200_960] : memref<4x4x8x250xf32, #tpu.memory_space<vmem>>, vector<1x4x8x10xf32>
    %591 = vector.shape_cast %590 : vector<1x4x8x10xf32> to vector<4x8x10xf32>
    %592 = vector.shape_cast %589 : vector<4x8x10xf32> to vector<1x4x8x10xf32>
    tpu.vector_store %arg14[%c3_957, %c0_958, %c0_959, %c200_960], %592 {strides = array<i32>} : memref<4x4x8x250xf32, #tpu.memory_space<vmem>>, vector<1x4x8x10xf32>,
    %c1_961 = arith.constant 1 : index
    %c0_962 = arith.constant 0 : index
    %c2_963 = arith.constant 2 : index
    %c2_964 = arith.constant 2 : index
    %c0_965 = arith.constant 0 : index
    %593 = vector.load %arg13[%c1_961, %c0_962, %c2_963, %c2_964, %c0_965] : memref<2x2x6x16x10xf32, #tpu.memory_space<vmem>>, vector<1x1x4x8x10xf32>
    %594 = vector.shape_cast %593 : vector<1x1x4x8x10xf32> to vector<4x8x10xf32>
    %c3_966 = arith.constant 3 : index
    %c0_967 = arith.constant 0 : index
    %c0_968 = arith.constant 0 : index
    %c210_969 = arith.constant 210 : index
    %595 = vector.load %arg14[%c3_966, %c0_967, %c0_968, %c210_969] : memref<4x4x8x250xf32, #tpu.memory_space<vmem>>, vector<1x4x8x10xf32>
    %596 = vector.shape_cast %595 : vector<1x4x8x10xf32> to vector<4x8x10xf32>
    %597 = vector.shape_cast %594 : vector<4x8x10xf32> to vector<1x4x8x10xf32>
    tpu.vector_store %arg14[%c3_966, %c0_967, %c0_968, %c210_969], %597 {strides = array<i32>} : memref<4x4x8x250xf32, #tpu.memory_space<vmem>>, vector<1x4x8x10xf32>,
    %c1_970 = arith.constant 1 : index
    %c1_971 = arith.constant 1 : index
    %c2_972 = arith.constant 2 : index
    %c2_973 = arith.constant 2 : index
    %c0_974 = arith.constant 0 : index
    %598 = vector.load %arg13[%c1_970, %c1_971, %c2_972, %c2_973, %c0_974] : memref<2x2x6x16x10xf32, #tpu.memory_space<vmem>>, vector<1x1x4x8x10xf32>
    %599 = vector.shape_cast %598 : vector<1x1x4x8x10xf32> to vector<4x8x10xf32>
    %c3_975 = arith.constant 3 : index
    %c0_976 = arith.constant 0 : index
    %c0_977 = arith.constant 0 : index
    %c220_978 = arith.constant 220 : index
    %600 = vector.load %arg14[%c3_975, %c0_976, %c0_977, %c220_978] : memref<4x4x8x250xf32, #tpu.memory_space<vmem>>, vector<1x4x8x10xf32>
    %601 = vector.shape_cast %600 : vector<1x4x8x10xf32> to vector<4x8x10xf32>
    %602 = vector.shape_cast %599 : vector<4x8x10xf32> to vector<1x4x8x10xf32>
    tpu.vector_store %arg14[%c3_975, %c0_976, %c0_977, %c220_978], %602 {strides = array<i32>} : memref<4x4x8x250xf32, #tpu.memory_space<vmem>>, vector<1x4x8x10xf32>,
    %c1_979 = arith.constant 1 : index
    %c0_980 = arith.constant 0 : index
    %c2_981 = arith.constant 2 : index
    %c4_982 = arith.constant 4 : index
    %c0_983 = arith.constant 0 : index
    %603 = vector.load %arg13[%c1_979, %c0_980, %c2_981, %c4_982, %c0_983] : memref<2x2x6x16x10xf32, #tpu.memory_space<vmem>>, vector<1x1x4x8x10xf32>
    %604 = vector.shape_cast %603 : vector<1x1x4x8x10xf32> to vector<4x8x10xf32>
    %c3_984 = arith.constant 3 : index
    %c0_985 = arith.constant 0 : index
    %c0_986 = arith.constant 0 : index
    %c230_987 = arith.constant 230 : index
    %605 = vector.load %arg14[%c3_984, %c0_985, %c0_986, %c230_987] : memref<4x4x8x250xf32, #tpu.memory_space<vmem>>, vector<1x4x8x10xf32>
    %606 = vector.shape_cast %605 : vector<1x4x8x10xf32> to vector<4x8x10xf32>
    %607 = vector.shape_cast %604 : vector<4x8x10xf32> to vector<1x4x8x10xf32>
    tpu.vector_store %arg14[%c3_984, %c0_985, %c0_986, %c230_987], %607 {strides = array<i32>} : memref<4x4x8x250xf32, #tpu.memory_space<vmem>>, vector<1x4x8x10xf32>,
    %c1_988 = arith.constant 1 : index
    %c1_989 = arith.constant 1 : index
    %c2_990 = arith.constant 2 : index
    %c4_991 = arith.constant 4 : index
    %c0_992 = arith.constant 0 : index
    %608 = vector.load %arg13[%c1_988, %c1_989, %c2_990, %c4_991, %c0_992] : memref<2x2x6x16x10xf32, #tpu.memory_space<vmem>>, vector<1x1x4x8x10xf32>
    %609 = vector.shape_cast %608 : vector<1x1x4x8x10xf32> to vector<4x8x10xf32>
    %c3_993 = arith.constant 3 : index
    %c0_994 = arith.constant 0 : index
    %c0_995 = arith.constant 0 : index
    %c240_996 = arith.constant 240 : index
    %610 = vector.load %arg14[%c3_993, %c0_994, %c0_995, %c240_996] : memref<4x4x8x250xf32, #tpu.memory_space<vmem>>, vector<1x4x8x10xf32>
    %611 = vector.shape_cast %610 : vector<1x4x8x10xf32> to vector<4x8x10xf32>
    %612 = vector.shape_cast %609 : vector<4x8x10xf32> to vector<1x4x8x10xf32>
    tpu.vector_store %arg14[%c3_993, %c0_994, %c0_995, %c240_996], %612 {strides = array<i32>} : memref<4x4x8x250xf32, #tpu.memory_space<vmem>>, vector<1x4x8x10xf32>,
    %c0_997 = arith.constant 0 : index
    %c0_998 = arith.constant 0 : index
    %c0_999 = arith.constant 0 : index
    %c0_1000 = arith.constant 0 : index
    %613 = vector.load %arg14[%c0_997, %c0_998, %c0_999, %c0_1000] : memref<4x4x8x250xf32, #tpu.memory_space<vmem>>, vector<4x4x8x250xf32>
    %614 = vector.shape_cast %613 : vector<4x4x8x250xf32> to vector<128x250xf32>
    %c0_1001 = arith.constant 0 : index
    %c0_1002 = arith.constant 0 : index
    %615 = vector.load %arg4[%c0_1001, %c0_1002] : memref<250x20xf32, #tpu.memory_space<vmem>>, vector<250x20xf32>
    %cst_1003 = arith.constant dense<0.000000e+00> : vector<128x20xf32>
    %616 = tpu.matmul %614, %615, %cst_1003 {dimension_numbers = #tpu.dot_dimension_numbers<[1], [0], [0], [1], [0, 0, 1, 1], [], []>} : vector<128x250xf32>, vector<250x20xf32>, vector<128x20xf32> -> vector<128x20xf32>
    %617 = vector.extract_strided_slice %616 {offsets = [0, 0], sizes = [32, 20], strides = [1, 1]} : vector<128x20xf32> to vector<32x20xf32>
    %618 = vector.extract_strided_slice %616 {offsets = [32, 0], sizes = [32, 20], strides = [1, 1]} : vector<128x20xf32> to vector<32x20xf32>
    %619 = arith.maximumf %617, %618 : vector<32x20xf32>
    %620 = vector.extract_strided_slice %616 {offsets = [64, 0], sizes = [32, 20], strides = [1, 1]} : vector<128x20xf32> to vector<32x20xf32>
    %621 = arith.maximumf %619, %620 : vector<32x20xf32>
    %622 = vector.extract_strided_slice %616 {offsets = [96, 0], sizes = [32, 20], strides = [1, 1]} : vector<128x20xf32> to vector<32x20xf32>
    %623 = arith.maximumf %621, %622 : vector<32x20xf32>
    %c0_1004 = arith.constant 0 : index
    %c0_1005 = arith.constant 0 : index
    %624 = vector.load %arg5[%c0_1004, %c0_1005] : memref<1x20xf32, #tpu.memory_space<vmem>>, vector<1x20xf32>
    %625 = vector.broadcast %624 : vector<1x20xf32> to vector<32x20xf32>
    %626 = arith.addf %623, %625 : vector<32x20xf32>
    %cst_1006 = arith.constant 0.000000e+00 : f32
    %627 = vector.broadcast %cst_1006 : f32 to vector<32x20xf32>
    %628 = arith.maximumf %626, %627 : vector<32x20xf32>
    %629 = arith.truncf %628 : vector<32x20xf32> to vector<32x20xbf16>
    %630 = vector.extract_strided_slice %629 {offsets = [0, 0], sizes = [2, 20], strides = [1, 1]} : vector<32x20xbf16> to vector<2x20xbf16>
    %c0_1007 = arith.constant 0 : index
    %c0_1008 = arith.constant 0 : index
    %631 = vector.load %arg15[%c0_1007, %c0_1008] : memref<2x320xbf16, #tpu.memory_space<vmem>>, vector<2x20xbf16>
    tpu.vector_store %arg15[%c0_1007, %c0_1008], %630 {strides = array<i32>} : memref<2x320xbf16, #tpu.memory_space<vmem>>, vector<2x20xbf16>,
    %632 = vector.extract_strided_slice %629 {offsets = [2, 0], sizes = [2, 20], strides = [1, 1]} : vector<32x20xbf16> to vector<2x20xbf16>
    %c0_1009 = arith.constant 0 : index
    %c20_1010 = arith.constant 20 : index
    %633 = vector.load %arg15[%c0_1009, %c20_1010] : memref<2x320xbf16, #tpu.memory_space<vmem>>, vector<2x20xbf16>
    tpu.vector_store %arg15[%c0_1009, %c20_1010], %632 {strides = array<i32>} : memref<2x320xbf16, #tpu.memory_space<vmem>>, vector<2x20xbf16>,
    %634 = vector.extract_strided_slice %629 {offsets = [4, 0], sizes = [2, 20], strides = [1, 1]} : vector<32x20xbf16> to vector<2x20xbf16>
    %c0_1011 = arith.constant 0 : index
    %c40_1012 = arith.constant 40 : index
    %635 = vector.load %arg15[%c0_1011, %c40_1012] : memref<2x320xbf16, #tpu.memory_space<vmem>>, vector<2x20xbf16>
    tpu.vector_store %arg15[%c0_1011, %c40_1012], %634 {strides = array<i32>} : memref<2x320xbf16, #tpu.memory_space<vmem>>, vector<2x20xbf16>,
    %636 = vector.extract_strided_slice %629 {offsets = [6, 0], sizes = [2, 20], strides = [1, 1]} : vector<32x20xbf16> to vector<2x20xbf16>
    %c0_1013 = arith.constant 0 : index
    %c60_1014 = arith.constant 60 : index
    %637 = vector.load %arg15[%c0_1013, %c60_1014] : memref<2x320xbf16, #tpu.memory_space<vmem>>, vector<2x20xbf16>
    tpu.vector_store %arg15[%c0_1013, %c60_1014], %636 {strides = array<i32>} : memref<2x320xbf16, #tpu.memory_space<vmem>>, vector<2x20xbf16>,
    %638 = vector.extract_strided_slice %629 {offsets = [8, 0], sizes = [2, 20], strides = [1, 1]} : vector<32x20xbf16> to vector<2x20xbf16>
    %c0_1015 = arith.constant 0 : index
    %c80_1016 = arith.constant 80 : index
    %639 = vector.load %arg15[%c0_1015, %c80_1016] : memref<2x320xbf16, #tpu.memory_space<vmem>>, vector<2x20xbf16>
    tpu.vector_store %arg15[%c0_1015, %c80_1016], %638 {strides = array<i32>} : memref<2x320xbf16, #tpu.memory_space<vmem>>, vector<2x20xbf16>,
    %640 = vector.extract_strided_slice %629 {offsets = [10, 0], sizes = [2, 20], strides = [1, 1]} : vector<32x20xbf16> to vector<2x20xbf16>
    %c0_1017 = arith.constant 0 : index
    %c100_1018 = arith.constant 100 : index
    %641 = vector.load %arg15[%c0_1017, %c100_1018] : memref<2x320xbf16, #tpu.memory_space<vmem>>, vector<2x20xbf16>
    tpu.vector_store %arg15[%c0_1017, %c100_1018], %640 {strides = array<i32>} : memref<2x320xbf16, #tpu.memory_space<vmem>>, vector<2x20xbf16>,
    %642 = vector.extract_strided_slice %629 {offsets = [12, 0], sizes = [2, 20], strides = [1, 1]} : vector<32x20xbf16> to vector<2x20xbf16>
    %c0_1019 = arith.constant 0 : index
    %c120_1020 = arith.constant 120 : index
    %643 = vector.load %arg15[%c0_1019, %c120_1020] : memref<2x320xbf16, #tpu.memory_space<vmem>>, vector<2x20xbf16>
    tpu.vector_store %arg15[%c0_1019, %c120_1020], %642 {strides = array<i32>} : memref<2x320xbf16, #tpu.memory_space<vmem>>, vector<2x20xbf16>,
    %644 = vector.extract_strided_slice %629 {offsets = [14, 0], sizes = [2, 20], strides = [1, 1]} : vector<32x20xbf16> to vector<2x20xbf16>
    %c0_1021 = arith.constant 0 : index
    %c140_1022 = arith.constant 140 : index
    %645 = vector.load %arg15[%c0_1021, %c140_1022] : memref<2x320xbf16, #tpu.memory_space<vmem>>, vector<2x20xbf16>
    tpu.vector_store %arg15[%c0_1021, %c140_1022], %644 {strides = array<i32>} : memref<2x320xbf16, #tpu.memory_space<vmem>>, vector<2x20xbf16>,
    %646 = vector.extract_strided_slice %629 {offsets = [16, 0], sizes = [2, 20], strides = [1, 1]} : vector<32x20xbf16> to vector<2x20xbf16>
    %c0_1023 = arith.constant 0 : index
    %c160_1024 = arith.constant 160 : index
    %647 = vector.load %arg15[%c0_1023, %c160_1024] : memref<2x320xbf16, #tpu.memory_space<vmem>>, vector<2x20xbf16>
    tpu.vector_store %arg15[%c0_1023, %c160_1024], %646 {strides = array<i32>} : memref<2x320xbf16, #tpu.memory_space<vmem>>, vector<2x20xbf16>,
    %648 = vector.extract_strided_slice %629 {offsets = [18, 0], sizes = [2, 20], strides = [1, 1]} : vector<32x20xbf16> to vector<2x20xbf16>
    %c0_1025 = arith.constant 0 : index
    %c180_1026 = arith.constant 180 : index
    %649 = vector.load %arg15[%c0_1025, %c180_1026] : memref<2x320xbf16, #tpu.memory_space<vmem>>, vector<2x20xbf16>
    tpu.vector_store %arg15[%c0_1025, %c180_1026], %648 {strides = array<i32>} : memref<2x320xbf16, #tpu.memory_space<vmem>>, vector<2x20xbf16>,
    %650 = vector.extract_strided_slice %629 {offsets = [20, 0], sizes = [2, 20], strides = [1, 1]} : vector<32x20xbf16> to vector<2x20xbf16>
    %c0_1027 = arith.constant 0 : index
    %c200_1028 = arith.constant 200 : index
    %651 = vector.load %arg15[%c0_1027, %c200_1028] : memref<2x320xbf16, #tpu.memory_space<vmem>>, vector<2x20xbf16>
    tpu.vector_store %arg15[%c0_1027, %c200_1028], %650 {strides = array<i32>} : memref<2x320xbf16, #tpu.memory_space<vmem>>, vector<2x20xbf16>,
    %652 = vector.extract_strided_slice %629 {offsets = [22, 0], sizes = [2, 20], strides = [1, 1]} : vector<32x20xbf16> to vector<2x20xbf16>
    %c0_1029 = arith.constant 0 : index
    %c220_1030 = arith.constant 220 : index
    %653 = vector.load %arg15[%c0_1029, %c220_1030] : memref<2x320xbf16, #tpu.memory_space<vmem>>, vector<2x20xbf16>
    tpu.vector_store %arg15[%c0_1029, %c220_1030], %652 {strides = array<i32>} : memref<2x320xbf16, #tpu.memory_space<vmem>>, vector<2x20xbf16>,
    %654 = vector.extract_strided_slice %629 {offsets = [24, 0], sizes = [2, 20], strides = [1, 1]} : vector<32x20xbf16> to vector<2x20xbf16>
    %c0_1031 = arith.constant 0 : index
    %c240_1032 = arith.constant 240 : index
    %655 = vector.load %arg15[%c0_1031, %c240_1032] : memref<2x320xbf16, #tpu.memory_space<vmem>>, vector<2x20xbf16>
    tpu.vector_store %arg15[%c0_1031, %c240_1032], %654 {strides = array<i32>} : memref<2x320xbf16, #tpu.memory_space<vmem>>, vector<2x20xbf16>,
    %656 = vector.extract_strided_slice %629 {offsets = [26, 0], sizes = [2, 20], strides = [1, 1]} : vector<32x20xbf16> to vector<2x20xbf16>
    %c0_1033 = arith.constant 0 : index
    %c260 = arith.constant 260 : index
    %657 = vector.load %arg15[%c0_1033, %c260] : memref<2x320xbf16, #tpu.memory_space<vmem>>, vector<2x20xbf16>
    tpu.vector_store %arg15[%c0_1033, %c260], %656 {strides = array<i32>} : memref<2x320xbf16, #tpu.memory_space<vmem>>, vector<2x20xbf16>,
    %658 = vector.extract_strided_slice %629 {offsets = [28, 0], sizes = [2, 20], strides = [1, 1]} : vector<32x20xbf16> to vector<2x20xbf16>
    %c0_1034 = arith.constant 0 : index
    %c280 = arith.constant 280 : index
    %659 = vector.load %arg15[%c0_1034, %c280] : memref<2x320xbf16, #tpu.memory_space<vmem>>, vector<2x20xbf16>
    tpu.vector_store %arg15[%c0_1034, %c280], %658 {strides = array<i32>} : memref<2x320xbf16, #tpu.memory_space<vmem>>, vector<2x20xbf16>,
    %660 = vector.extract_strided_slice %629 {offsets = [30, 0], sizes = [2, 20], strides = [1, 1]} : vector<32x20xbf16> to vector<2x20xbf16>
    %c0_1035 = arith.constant 0 : index
    %c300 = arith.constant 300 : index
    %661 = vector.load %arg15[%c0_1035, %c300] : memref<2x320xbf16, #tpu.memory_space<vmem>>, vector<2x20xbf16>
    tpu.vector_store %arg15[%c0_1035, %c300], %660 {strides = array<i32>} : memref<2x320xbf16, #tpu.memory_space<vmem>>, vector<2x20xbf16>,
    %c0_1036 = arith.constant 0 : index
    %c0_1037 = arith.constant 0 : index
    %662 = vector.load %arg15[%c0_1036, %c0_1037] : memref<2x320xbf16, #tpu.memory_space<vmem>>, vector<2x320xbf16>
    %c0_1038 = arith.constant 0 : index
    %c0_1039 = arith.constant 0 : index
    %663 = vector.load %arg6[%c0_1038, %c0_1039] : memref<320x50xbf16, #tpu.memory_space<vmem>>, vector<320x50xbf16>
    %cst_1040 = arith.constant dense<0.000000e+00> : vector<2x50xf32>
    %664 = tpu.matmul %662, %663, %cst_1040 {dimension_numbers = #tpu.dot_dimension_numbers<[1], [0], [0], [1], [0, 0, 1, 1], [], []>} : vector<2x320xbf16>, vector<320x50xbf16>, vector<2x50xf32> -> vector<2x50xf32>
    %c0_1041 = arith.constant 0 : index
    %c0_1042 = arith.constant 0 : index
    %665 = vector.load %arg7[%c0_1041, %c0_1042] : memref<1x50xf32, #tpu.memory_space<vmem>>, vector<1x50xf32>
    %666 = vector.broadcast %665 : vector<1x50xf32> to vector<2x50xf32>
    %667 = arith.addf %664, %666 : vector<2x50xf32>
    %cst_1043 = arith.constant 0.000000e+00 : f32
    %668 = vector.broadcast %cst_1043 : f32 to vector<2x50xf32>
    %669 = arith.maximumf %667, %668 : vector<2x50xf32>
    %670 = arith.truncf %669 : vector<2x50xf32> to vector<2x50xbf16>
    %c0_1044 = arith.constant 0 : index
    %c0_1045 = arith.constant 0 : index
    %671 = vector.load %arg8[%c0_1044, %c0_1045] : memref<50x20xbf16, #tpu.memory_space<vmem>>, vector<50x20xbf16>
    %cst_1046 = arith.constant dense<0.000000e+00> : vector<2x20xf32>
    %672 = tpu.matmul %670, %671, %cst_1046 {dimension_numbers = #tpu.dot_dimension_numbers<[1], [0], [0], [1], [0, 0, 1, 1], [], []>} : vector<2x50xbf16>, vector<50x20xbf16>, vector<2x20xf32> -> vector<2x20xf32>
    %c0_1047 = arith.constant 0 : index
    %c0_1048 = arith.constant 0 : index
    %673 = vector.load %arg9[%c0_1047, %c0_1048] : memref<1x20xf32, #tpu.memory_space<vmem>>, vector<1x20xf32>
    %674 = vector.broadcast %673 : vector<1x20xf32> to vector<2x20xf32>
    %675 = arith.addf %672, %674 : vector<2x20xf32>
    %676 = arith.truncf %675 : vector<2x20xf32> to vector<2x20xbf16>
    %c0_1049 = arith.constant 0 : index
    %c0_1050 = arith.constant 0 : index
    %677 = vector.load %arg10[%c0_1049, %c0_1050] : memref<20x2xbf16, #tpu.memory_space<vmem>>, vector<20x2xbf16>
    %cst_1051 = arith.constant dense<0.000000e+00> : vector<2x2xf32>
    %678 = tpu.matmul %676, %677, %cst_1051 {dimension_numbers = #tpu.dot_dimension_numbers<[1], [0], [0], [1], [0, 0, 1, 1], [], []>} : vector<2x20xbf16>, vector<20x2xbf16>, vector<2x2xf32> -> vector<2x2xf32>
    %c0_1052 = arith.constant 0 : index
    %c0_1053 = arith.constant 0 : index
    %679 = vector.load %arg11[%c0_1052, %c0_1053] : memref<1x2xf32, #tpu.memory_space<vmem>>, vector<1x2xf32>
    %680 = vector.broadcast %679 : vector<1x2xf32> to vector<2x2xf32>
    %681 = arith.addf %678, %680 : vector<2x2xf32>
    %cst_1054 = arith.constant dense<0xFF800000> : vector<2xf32>
    %682 = vector.multi_reduction <maximumf>, %681, %cst_1054 [1] : vector<2x2xf32> to vector<2xf32>
    %683 = vector.shape_cast %682 : vector<2xf32> to vector<2x1xf32>
    %684 = vector.broadcast %683 : vector<2x1xf32> to vector<2x2xf32>
    %685 = arith.subf %681, %684 : vector<2x2xf32>
    %686 = math.exp %685 : vector<2x2xf32>
    %cst_1055 = arith.constant dense<0.000000e+00> : vector<2xf32>
    %687 = vector.multi_reduction <add>, %686, %cst_1055 [1] : vector<2x2xf32> to vector<2xf32>
    %688 = vector.shape_cast %687 : vector<2xf32> to vector<2x1xf32>
    %689 = math.log %688 : vector<2x1xf32>
    %690 = arith.addf %683, %689 : vector<2x1xf32>
    %691 = vector.broadcast %690 : vector<2x1xf32> to vector<2x2xf32>
    %692 = arith.subf %681, %691 : vector<2x2xf32>
    %c0_1056 = arith.constant 0 : index
    %c0_1057 = arith.constant 0 : index
    %693 = vector.load %arg12[%c0_1056, %c0_1057] : memref<2x2xf32, #tpu.memory_space<vmem>>, vector<2x2xf32>
    tpu.vector_store %arg12[%c0_1056, %c0_1057], %692 {strides = array<i32>} : memref<2x2xf32, #tpu.memory_space<vmem>>, vector<2x2xf32>,
    return
  }
  func.func @transform_0(%arg0: i32) -> (i32, i32) {
    %c0_i32 = arith.constant 0 : i32
    %c0_i32_0 = arith.constant 0 : i32
    %c0_i32_1 = arith.constant 0 : i32
    return %c0_i32, %c0_i32_0 : i32, i32
  }
  func.func @transform_1(%arg0: i32) -> (i32, i32) {
    %c0_i32 = arith.constant 0 : i32
    %c0_i32_0 = arith.constant 0 : i32
    %c0_i32_1 = arith.constant 0 : i32
    return %c0_i32, %c0_i32_0 : i32, i32
  }
  func.func @transform_2(%arg0: i32) -> (i32, i32) {
    %c0_i32 = arith.constant 0 : i32
    %c0_i32_0 = arith.constant 0 : i32
    %c0_i32_1 = arith.constant 0 : i32
    return %c0_i32, %c0_i32_0 : i32, i32
  }
  func.func @transform_3(%arg0: i32) -> (i32, i32) {
    %c0_i32 = arith.constant 0 : i32
    %c0_i32_0 = arith.constant 0 : i32
    %c0_i32_1 = arith.constant 0 : i32
    return %c0_i32, %c0_i32_0 : i32, i32
  }
  func.func @transform_4(%arg0: i32) -> (i32, i32) {
    %c0_i32 = arith.constant 0 : i32
    %c0_i32_0 = arith.constant 0 : i32
    %c0_i32_1 = arith.constant 0 : i32
    return %c0_i32, %c0_i32_0 : i32, i32
  }
  func.func @transform_5(%arg0: i32) -> (i32, i32) {
    %c0_i32 = arith.constant 0 : i32
    %c0_i32_0 = arith.constant 0 : i32
    %c0_i32_1 = arith.constant 0 : i32
    return %c0_i32, %c0_i32_0 : i32, i32
  }
  func.func @transform_6(%arg0: i32) -> (i32, i32) {
    %c0_i32 = arith.constant 0 : i32
    %c0_i32_0 = arith.constant 0 : i32
    %c0_i32_1 = arith.constant 0 : i32
    return %c0_i32, %c0_i32_0 : i32, i32
  }
  func.func @transform_7(%arg0: i32) -> (i32, i32) {
    %c0_i32 = arith.constant 0 : i32
    %c0_i32_0 = arith.constant 0 : i32
    %c0_i32_1 = arith.constant 0 : i32
    return %c0_i32, %c0_i32_0 : i32, i32
  }
  func.func @transform_8(%arg0: i32) -> (i32, i32) {
    %c0_i32 = arith.constant 0 : i32
    %c0_i32_0 = arith.constant 0 : i32
    %c0_i32_1 = arith.constant 0 : i32
    return %c0_i32, %c0_i32_0 : i32, i32
  }
  func.func @transform_9(%arg0: i32) -> (i32, i32) {
    %c0_i32 = arith.constant 0 : i32
    %c0_i32_0 = arith.constant 0 : i32
    %c0_i32_1 = arith.constant 0 : i32
    return %c0_i32, %c0_i32_0 : i32, i32
  }
  func.func @transform_10(%arg0: i32) -> (i32, i32) {
    %c0_i32 = arith.constant 0 : i32
    %c0_i32_0 = arith.constant 0 : i32
    %c0_i32_1 = arith.constant 0 : i32
    return %c0_i32, %c0_i32_0 : i32, i32
  }
  func.func @transform_11(%arg0: i32) -> (i32, i32) {
    %c0_i32 = arith.constant 0 : i32
    %c0_i32_0 = arith.constant 0 : i32
    %c0_i32_1 = arith.constant 0 : i32
    return %c0_i32, %c0_i32_0 : i32, i32
  }
}

</mosaic_0001>

<bundles_post_ra>
// kernel: net2net_forward.1
= control target key start
LH: loop header
LB: loop body
LE: loop exit
PB: predicated region body
PF: predicated region fallthrough
CT: control target
= control target key end

     0   :  { %s8846_s0 = inlined_call_operand.vmem [shape: bf16[1536,25], index: 0, kind: input, shape index: {}]   ;;  %s8847_s1 = inlined_call_operand.vmem [shape: bf16[25,10], index: 1, kind: input, shape index: {}]   ;;  %s8848_s2 = inlined_call_operand.vmem [shape: f32[1,10], index: 2, kind: input, shape index: {}]   ;;  %s8849_s3 = inlined_call_operand.vmem [shape: f32[250,20], index: 3, kind: input, shape index: {}]   ;;  %s8850_s4 = inlined_call_operand.vmem [shape: f32[1,20], index: 4, kind: input, shape index: {}]   ;;  %s8851_s5 = inlined_call_operand.vmem [shape: bf16[320,50], index: 5, kind: input, shape index: {}]   ;;  %s8852_s6 = inlined_call_operand.vmem [shape: f32[1,50], index: 6, kind: input, shape index: {}]   ;;  %s8853_s7 = inlined_call_operand.vmem [shape: bf16[50,20], index: 7, kind: input, shape index: {}]   ;;  %s8854_s8 = inlined_call_operand.vmem [shape: f32[1,20], index: 8, kind: input, shape index: {}]   ;;  %s8855_s9 = inlined_call_operand.vmem [shape: bf16[20,2], index: 9, kind: input, shape index: {}]   ;;  %s8856_s10 = inlined_call_operand.vmem [shape: f32[1,2], index: 10, kind: input, shape index: {}]   ;;  %s8857_s11 = inlined_call_operand.hbm [shape: f32[2,2], index: 11, kind: output, shape index: {}]  }
   0x1   :  { %8937 = sst [smem:[#allocation115_spill]] %s8852_s6 }
   0x2   :  { %8938 = sst [smem:[#allocation116_spill]] %s8854_s8 }
   0x3   :  { %8939 = sst [smem:[#allocation117_spill]] %s8856_s10 }
   0x4   :  { %8940 = sst [smem:[#allocation118_spill]] %s8857_s11 }
   0x5   :  { %v5460_v0 = vld [vmem:[%s8847_s1 + $0x8] sm:$0xf]  ;;  %v5771_v1 = vld [vmem:[%s8847_s1 + $0x8] sm:$0x10]  ;;  %vm1016_vm0 = vcmask 1043456   ;;  %vm1017_vm1 = vcmask 1044480  }
   0x6   :  { %v5461_v2 = vor.u32 %v5771_v1, %v5460_v0  ;;  %v5867_v3 = vmov 65535  }
   0x7   :  { %v1018_v4 = vsel %vm1016_vm0, 4294967295, %v5867_v3 }
   0x8   :  { %v1019_v5 = vsel %vm1017_vm1, %v1018_v4, 0 }
   0x9   :  { %v1021_v6 = vand.u32 %v5461_v2, %v1019_v5 }
   0xa   :  { %16 = vsyncpa [#allocation6], 0  ;;  %v5770_v7 = vld [vmem:[%s8847_s1] sm:$0xff]  ;;  %vm727_vm2 = vcmask 203776   ;;  %v5675_v10 = vld [vmem:[%s8846_s0 + $0x8] sm:$0xff]  ;;  %vm1852_vm3 = vcmask 80896  }
   0xb   :  { %1029 = vmatpush.bf16.msra.mxu0 %v1021_v6  ;;  %5798 = vmatpush.bf16.msra.mxu3 %v1021_v6  ;;  %v5674_v8 = vld [vmem:[%s8846_s0] sm:$0xff]  ;;  %v5747_v11 = vld [vmem:[%s8846_s0 + $0x248] sm:$0xff]  ;;  %v5676_v12 = vld [vmem:[%s8846_s0 + $0x10] sm:$0xff]  ;;  %s8875_s28 = smov 100   ;;  %s8873_s29 = smov 110   ;;  %vm8896_vm4 = vcmask 15360  }
   0xc   :  { %5797 = vmatpush.bf16.msra.mxu2 %v1021_v6  ;;  %5796 = vmatpush.bf16.msra.mxu1 %v1021_v6  ;;  %v5746_v9 = vld [vmem:[%s8846_s0 + $0x240] sm:$0xff]  ;;  %v5748_v13 = vld [vmem:[%s8846_s0 + $0x250] sm:$0xff]  ;;  %v5727_v14 = vld [vmem:[%s8846_s0 + $0x1a8] sm:$0xff]  ;;  %s8858_s30 = smov 10   ;;  %s8903_s14 = smov 120   ;;  %vm8923_vm5 = vcmask 162896  }
   0xd   :  { %v5677_v15 = vld [vmem:[%s8846_s0 + $0x18] sm:$0xff]  ;;  %v5728_v17 = vld [vmem:[%s8846_s0 + $0x1b0] sm:$0xff]  ;;  %v5678_v18 = vld [vmem:[%s8846_s0 + $0x20] sm:$0xff]  ;;  %s8932_s15 = smov 20   ;;  %s8860_s16 = smov 60   ;;  %vm8907_vm6 = vcmask 244896  }
   0xe   :  { %v5749_v16 = vld [vmem:[%s8846_s0 + $0x258] sm:$0xff]  ;;  %v5750_v19 = vld [vmem:[%s8846_s0 + $0x260] sm:$0xff]  ;;  %v5679_v22 = vld [vmem:[%s8846_s0 + $0x28] sm:$0xff]  ;;  %s8919_s21 = smov 80   ;;  %s8877_s22 = smov 30   ;;  %vm8910_vm7 = vcmask 326896  }
   0xf   :  { %1030 = vmatpush.bf16.msra.mxu0 %v5770_v7  ;;  %5801 = vmatpush.bf16.msra.mxu3 %v5770_v7  ;;  %v5729_v20 = vld [vmem:[%s8846_s0 + $0x1b8] sm:$0xff]  ;;  %v5751_v23 = vld [vmem:[%s8846_s0 + $0x268] sm:$0xff]  ;;  %v5730_v24 = vld [vmem:[%s8846_s0 + $0x1c0] sm:$0xff]  ;;  %s8866_s1 = smov 2   ;;  %s8868_s13 = smov 82   ;;  %vm8909_vm8 = vcmask 408896  }
  0x10   :  { %5800 = vmatpush.bf16.msra.mxu2 %v5770_v7  ;;  %5799 = vmatpush.bf16.msra.mxu1 %v5770_v7  ;;  %v5705_v21 = vld [vmem:[%s8846_s0 + $0xf8] sm:$0xff]  ;;  %v5706_v25 = vld [vmem:[%s8846_s0 + $0x100] sm:$0xff]  ;;  %v5680_v26 = vld [vmem:[%s8846_s0 + $0x30] sm:$0xff]  ;;  %s8879_s17 = smov 12   ;;  %s8928_s20 = smov 72   ;;  %vm2257_vm9 = vcmask 97296  }
  0x11   :  { %v5752_v27 = vld [vmem:[%s8846_s0 + $0x270] sm:$0xff]  ;;  %v5681_v28 = vld [vmem:[%s8846_s0 + $0x38] sm:$0xff]  ;;  %v5707_v30 = vld [vmem:[%s8846_s0 + $0x108] sm:$0xff]  ;;  %s8871_s23 = smov 102   ;;  %s8926_s24 = smov 40   ;;  %vm2282_vm10 = vcmask 179296  }
  0x12   :  { %5462 = vmatmul.msk.bf16.vlgmr.msra.gmra.mxu0 %vm727_vm2, %v5674_v8  ;;  %5534 = vmatmul.msk.bf16.vlgmr.msra.gmra.mxu3 %vm727_vm2, %v5746_v9  ;;  %v5753_v29 = vld [vmem:[%s8846_s0 + $0x278] sm:$0xff]  ;;  %v5682_v31 = vld [vmem:[%s8846_s0 + $0x40] sm:$0xff]  ;;  %v5708_v34 = vld [vmem:[%s8846_s0 + $0x110] sm:$0xff]  ;;  %s8890_s25 = smov 32   ;;  %s8886_s19 = smov 92   ;;  %vm2052_vm11 = vcmask 490896  }
  0x13   :  { %5515 = vmatmul.msk.bf16.vlgmr.msra.gmra.mxu2 %vm727_vm2, %v5727_v14  ;;  %5493 = vmatmul.msk.bf16.vlgmr.msra.gmra.mxu1 %vm727_vm2, %v5705_v21  ;;  %v5754_v32 = vld [vmem:[%s8846_s0 + $0x280] sm:$0xff]  ;;  %v5683_v38 = vld [vmem:[%s8846_s0 + $0x48] sm:$0xff]  ;;  %v5709_v42 = vld [vmem:[%s8846_s0 + $0x118] sm:$0xff]  ;;  %s8917_s26 = smov 52   ;;  %s8924_s18 = smov 112   ;;  %vm2077_vm12 = vcmask 572896  }
  0x14   :  { %v5731_v39 = vld [vmem:[%s8846_s0 + $0x1c8] sm:$0xff]  ;;  %v5684_v46 = vld [vmem:[%s8846_s0 + $0x50] sm:$0xff]  ;;  %v5710_v48 = vld [vmem:[%s8846_s0 + $0x120] sm:$0xff]  ;;  %s8900_s27 = smov 22   ;;  %s9031_s12 = smov 10   ;;  %vm8911_vm13 = vcmask 654896  }
  0x15   :  { %v5755_v41 = vld [vmem:[%s8846_s0 + $0x288] sm:$0xff]  ;;  %v5685_v52 = vld [vmem:[%s8846_s0 + $0x58] sm:$0xff]  ;;  %v5732_v56 = vld [vmem:[%s8846_s0 + $0x1d0] sm:$0xff]  ;;  %vm8922_vm14 = vcmask 736896   ;;  %vm8897_vm15 = vcmask 818896   ;;  %vm2307_vm0 = vcmask 261296  }
  0x16   :  { %v5711_v54 = vld [vmem:[%s8846_s0 + $0x128] sm:$0xff]  ;;  %v5756_v58 = vld [vmem:[%s8846_s0 + $0x290] sm:$0xff]  ;;  %v5686_v60 = vld [vmem:[%s8846_s0 + $0x60] sm:$0xff]  ;;  %vm2332_vm1 = vcmask 343296   ;;  %s9256_s10 = smov 112  }
  0x17   :  { %v5712_v62 = vld [vmem:[%s8846_s0 + $0x130] sm:$0xff]  ;;  %v5733_v1 = vld [vmem:[%s8846_s0 + $0x1d8] sm:$0xff]  ;;  %v5687_v6 = vld [vmem:[%s8846_s0 + $0x68] sm:$0xff] }
  0x18   :  { %v5757_v3 = vld [vmem:[%s8846_s0 + $0x298] sm:$0xff]  ;;  %v5758_v14 = vld [vmem:[%s8846_s0 + $0x2a0] sm:$0xff] }
  0x19   :  { %v5713_v9 = vld [vmem:[%s8846_s0 + $0x138] sm:$0xff] }
  0x22   :  { %5463 = vmatmul.msk.bf16.gmra.mxu0 %vm727_vm2, %v5675_v10  ;;  %5535 = vmatmul.msk.bf16.gmra.mxu3 %vm727_vm2, %v5747_v11 }
  0x23   :  { %5516 = vmatmul.msk.bf16.gmra.mxu2 %vm727_vm2, %v5728_v17  ;;  %5494 = vmatmul.msk.bf16.gmra.mxu1 %vm727_vm2, %v5706_v25  ;;  %v5688_v17 = vld [vmem:[%s8846_s0 + $0x70] sm:$0xff] }
  0x32   :  { %5464 = vmatmul.msk.bf16.gmra.mxu0 %vm727_vm2, %v5676_v12  ;;  %5536 = vmatmul.msk.bf16.gmra.mxu3 %vm727_vm2, %v5748_v13  ;;  %v5734_v12 = vld [vmem:[%s8846_s0 + $0x1e0] sm:$0xff] }
  0x33   :  { %5517 = vmatmul.msk.bf16.gmra.mxu2 %vm727_vm2, %v5729_v20  ;;  %5495 = vmatmul.msk.bf16.gmra.mxu1 %vm727_vm2, %v5707_v30  ;;  %v5714_v20 = vld [vmem:[%s8846_s0 + $0x140] sm:$0xff] }
  0x42   :  { %5465 = vmatmul.msk.bf16.gmra.mxu0 %vm727_vm2, %v5677_v15  ;;  %5537 = vmatmul.msk.bf16.gmra.mxu3 %vm727_vm2, %v5749_v16 }
  0x43   :  { %5518 = vmatmul.msk.bf16.gmra.mxu2 %vm727_vm2, %v5730_v24  ;;  %5496 = vmatmul.msk.bf16.gmra.mxu1 %vm727_vm2, %v5708_v34 }
  0x52   :  { %5466 = vmatmul.msk.bf16.gmra.mxu0 %vm727_vm2, %v5678_v18  ;;  %5538 = vmatmul.msk.bf16.gmra.mxu3 %vm727_vm2, %v5750_v19 }
  0x53   :  { %5519 = vmatmul.msk.bf16.gmra.mxu2 %vm727_vm2, %v5731_v39  ;;  %5497 = vmatmul.msk.bf16.gmra.mxu1 %vm727_vm2, %v5709_v42  ;;  %v6235_v39 = vld [vmem:[%s8848_s2] ss:$0 sm:$0xff] }
  0x62   :  { %5467 = vmatmul.msk.bf16.gmra.mxu0 %vm727_vm2, %v5679_v22  ;;  %5539 = vmatmul.msk.bf16.gmra.mxu3 %vm727_vm2, %v5751_v23 }
  0x63   :  { %5498 = vmatmul.msk.bf16.gmra.mxu1 %vm727_vm2, %v5710_v48  ;;  %5520 = vmatmul.msk.bf16.gmra.mxu2 %vm727_vm2, %v5732_v56 }
  0x72   :  { %5468 = vmatmul.msk.bf16.gmra.mxu0 %vm727_vm2, %v5680_v26  ;;  %5540 = vmatmul.msk.bf16.gmra.mxu3 %vm727_vm2, %v5752_v27  ;;  %v5689_v27 = vld [vmem:[%s8846_s0 + $0x78] sm:$0xff] }
  0x73   :  { %5499 = vmatmul.msk.bf16.gmra.mxu1 %vm727_vm2, %v5711_v54  ;;  %5521 = vmatmul.msk.bf16.gmra.mxu2 %vm727_vm2, %v5733_v1 }
  0x82   :  { %5469 = vmatmul.msk.bf16.gmra.mxu0 %vm727_vm2, %v5681_v28  ;;  %5541 = vmatmul.msk.bf16.gmra.mxu3 %vm727_vm2, %v5753_v29  ;;  %v5735_v29 = vld [vmem:[%s8846_s0 + $0x1e8] sm:$0xff] }
  0x83   :  { %5500 = vmatmul.msk.bf16.gmra.mxu1 %vm727_vm2, %v5712_v62  ;;  %5522 = vmatmul.msk.bf16.gmra.mxu2 %vm727_vm2, %v5734_v12 }
  0x8f   :  { %v6063_v33 = vpop.f32.mrf.mxu0 }
  0x90   :  { %v1187_v4 = vpop.f32.mrf.mxu1 }
  0x92   :  { %5470 = vmatmul.msk.bf16.gmra.mxu0 %vm727_vm2, %v5682_v31  ;;  %5542 = vmatmul.msk.bf16.gmra.mxu3 %vm727_vm2, %v5754_v32  ;;  %v5759_v31 = vld [vmem:[%s8846_s0 + $0x2a8] sm:$0xff] }
  0x93   :  { %5501 = vmatmul.msk.bf16.gmra.mxu1 %vm727_vm2, %v5713_v9  ;;  %5523 = vmatmul.msk.bf16.gmra.mxu2 %vm727_vm2, %v5735_v29 }
  0x95   :  { %v6071_v35 = vpop.f32.mrf.mxu3 }
  0x96   :  { %v6153_v0 = vpop.f32.mrf.mxu2 }
  0x97   :  { %v6073_v36 = vpop.f32.mrf.mxu0  ;;  %8941 = vst [vmem:[#allocation8_spill] sm:$0xff] %v6153_v0 }
  0x98   :  { %v1189_v11 = vpop.f32.mrf.mxu1 }
  0x9d   :  { %v6075_v37 = vpop.f32.mrf.mxu3 }
  0x9e   :  { %v6172_v8 = vpop.f32.mrf.mxu2 }
  0x9f   :  { %v6083_v40 = vpop.f32.mrf.mxu0  ;;  %8942 = vst [vmem:[#allocation9_spill] sm:$0xff] %v6172_v8 }
  0xa0   :  { %v1192_v19 = vpop.f32.mrf.mxu1 }
  0xa2   :  { %5471 = vmatmul.msk.bf16.gmra.mxu0 %vm727_vm2, %v5683_v38  ;;  %5543 = vmatmul.msk.bf16.gmra.mxu3 %vm727_vm2, %v5755_v41  ;;  %v5715_v38 = vld [vmem:[%s8846_s0 + $0x148] sm:$0xff] }
  0xa3   :  { %5502 = vmatmul.msk.bf16.gmra.mxu1 %vm727_vm2, %v5714_v20 }
  0xa5   :  { %v6095_v43 = vpop.f32.mrf.mxu3 }
  0xa6   :  { %v6190_v15 = vpop.f32.mrf.mxu2 }
  0xa7   :  { %v6097_v44 = vpop.f32.mrf.mxu0  ;;  %8945 = vst [vmem:[#allocation12_spill] sm:$0xff] %v6190_v15 }
  0xa8   :  { %v6211_v24 = vpop.f32.mrf.mxu1 }
  0xad   :  { %v6099_v45 = vpop.f32.mrf.mxu3 }
  0xae   :  { %v6204_v21 = vpop.f32.mrf.mxu2 }
  0xaf   :  { %v6104_v47 = vpop.f32.mrf.mxu0  ;;  %8948 = vst [vmem:[#allocation15_spill] sm:$0xff] %v6204_v21 }
  0xb0   :  { %v6226_v34 = vpop.f32.mrf.mxu1 }
  0xb2   :  { %5472 = vmatmul.msk.bf16.gmra.mxu0 %vm727_vm2, %v5684_v46  ;;  %5544 = vmatmul.msk.bf16.gmra.mxu3 %vm727_vm2, %v5756_v58 }
  0xb3   :  { %5503 = vmatmul.msk.bf16.gmra.mxu1 %vm727_vm2, %v5715_v38 }
  0xb5   :  { %v6111_v49 = vpop.f32.mrf.mxu3 }
  0xb6   :  { %v1307_v25 = vpop.f32.mrf.mxu2 }
  0xb7   :  { %v6113_v50 = vpop.f32.mrf.mxu0 }
  0xb8   :  { %v6239_v58 = vpop.f32.mrf.mxu1 }
  0xbd   :  { %v6115_v51 = vpop.f32.mrf.mxu3 }
  0xbe   :  { %v1309_v46 = vpop.f32.mrf.mxu2 }
  0xbf   :  { %v6120_v53 = vpop.f32.mrf.mxu0 }
  0xc2   :  { %5473 = vmatmul.msk.bf16.gmra.mxu0 %vm727_vm2, %v5685_v52  ;;  %5545 = vmatmul.msk.bf16.gmra.mxu3 %vm727_vm2, %v5757_v3 }
  0xc5   :  { %v6127_v55 = vpop.f32.mrf.mxu3 }
  0xc7   :  { %v6132_v57 = vpop.f32.mrf.mxu0 }
  0xcd   :  { %v6139_v59 = vpop.f32.mrf.mxu3 }
  0xcf   :  { %v6144_v61 = vpop.f32.mrf.mxu0 }
  0xd2   :  { %5474 = vmatmul.msk.bf16.gmra.mxu0 %vm727_vm2, %v5686_v60  ;;  %5546 = vmatmul.msk.bf16.gmra.mxu3 %vm727_vm2, %v5758_v14 }
  0xd5   :  { %v6151_v63 = vpop.f32.mrf.mxu3 }
  0xd7   :  { %v6158_v2 = vpop.f32.mrf.mxu0 }
  0xdd   :  { %v6165_v5 = vpop.f32.mrf.mxu3 }
  0xdf   :  { %v6170_v7 = vpop.f32.mrf.mxu0 }
  0xe2   :  { %5475 = vmatmul.msk.bf16.gmra.mxu0 %vm727_vm2, %v5687_v6  ;;  %5547 = vmatmul.msk.bf16.gmra.mxu3 %vm727_vm2, %v5759_v31  ;;  %v5690_v6 = vld [vmem:[%s8846_s0 + $0x80] sm:$0xff] }
  0xe5   :  { %v6179_v10 = vpop.f32.mrf.mxu3 }
  0xe6   :  { %8943 = vst [vmem:[#allocation10_spill] sm:$0xff] %v6179_v10 }
  0xe7   :  { %v6184_v13 = vpop.f32.mrf.mxu0 }
  0xe8   :  { %8944 = vst [vmem:[#allocation11_spill] sm:$0xff] %v6184_v13 }
  0xed   :  { %v6193_v16 = vpop.f32.mrf.mxu3 }
  0xee   :  { %8946 = vst [vmem:[#allocation13_spill] sm:$0xff] %v6193_v16 }
  0xef   :  { %v6198_v18 = vpop.f32.mrf.mxu0 }
  0xf0   :  { %8947 = vst [vmem:[#allocation14_spill] sm:$0xff] %v6198_v18 }
  0xf2   :  { %5476 = vmatmul.msk.bf16.gmra.mxu0 %vm727_vm2, %v5688_v17 }
  0xf5   :  { %v6207_v22 = vpop.f32.mrf.mxu3 }
  0xf6   :  { %8949 = vst [vmem:[#allocation16_spill] sm:$0xff] %v6207_v22 }
  0xf7   :  { %v6209_v23 = vpop.f32.mrf.mxu0 }
  0xf8   :  { %8950 = vst [vmem:[#allocation17_spill] sm:$0xff] %v6209_v23 }
  0xfd   :  { %v6213_v26 = vpop.f32.mrf.mxu3 }
  0xfe   :  { %8951 = vst [vmem:[#allocation18_spill] sm:$0xff] %v6213_v26 }
  0xff   :  { %v1067_v28 = vpop.f32.mrf.mxu0 }
 0x100   :  { %v1526_v30 = vmax.f32 %v1067_v28, %v1187_v4 }
 0x102   :  { %5477 = vmatmul.msk.bf16.gmra.mxu0 %vm727_vm2, %v5689_v27  ;;  %v1574_v32 = vmax.f32 %v1526_v30, %v1307_v25  ;;  %v6247_v25 = vpop.f32.mrf.mxu1  ;;  %v5716_v27 = vld [vmem:[%s8846_s0 + $0x150] sm:$0xff] }
 0x103   :  { %5504 = vmatmul.msk.bf16.gmra.mxu1 %vm727_vm2, %v5716_v27 }
 0x105   :  { %v1427_v41 = vpop.f32.mrf.mxu3 }
 0x106   :  { %v1622_v42 = vmax.f32 %v1574_v32, %v1427_v41 }
 0x107   :  { %v1069_v48 = vpop.f32.mrf.mxu0 }
 0x108   :  { %v1674_v52 = vadd.f32 %v6235_v39, %v1622_v42  ;;  %v1527_v54 = vmax.f32 %v1069_v48, %v1189_v11  ;;  %v1312_v11 = vpop.f32.mrf.mxu2 }
 0x10a   :  { %v1722_v56 = vmax.f32 %v1674_v52, 0.0  ;;  %v1575_v62 = vmax.f32 %v1527_v54, %v1309_v46  ;;  %v6260_v48 = vpop.f32.mrf.mxu1 }
 0x10c   :  { %v1770_v60 = vpack.c.bf16 %v1722_v56, %v1722_v56 }
 0x10d   :  { %v1429_v1 = vpop.f32.mrf.mxu3 }
 0x10e   :  { %v1818_v3 = vunpack.c.l.bf16 %v1770_v60  ;;  %v1623_v4 = vmax.f32 %v1575_v62, %v1429_v1  ;;  %v5691_v1 = vld [vmem:[%s8846_s0 + $0x88] sm:$0xff] }
 0x10f   :  { %v1072_v9 = vpop.f32.mrf.mxu0 }
 0x110   :  { %1874 = vst.msk [vmem:[#allocation2 + $0x70] sm:$0xff] %vm1852_vm3, %v1818_v3  ;;  %v1675_v12 = vadd.f32 %v6235_v39, %v1623_v4  ;;  %v1528_v14 = vmax.f32 %v1072_v9, %v1192_v19  ;;  %v1314_v52 = vpop.f32.mrf.mxu2 }
 0x112   :  { %v1723_v17 = vmax.f32 %v1675_v12, 0.0  ;;  %5478 = vmatmul.msk.bf16.gmra.mxu0 %vm727_vm2, %v5690_v6  ;;  %v1576_v20 = vmax.f32 %v1528_v14, %v1312_v11  ;;  %v6272_v14 = vpop.f32.mrf.mxu1  ;;  %v5717_v11 = vld [vmem:[%s8846_s0 + $0x158] sm:$0xff] }
 0x113   :  { %5505 = vmatmul.msk.bf16.gmra.mxu1 %vm727_vm2, %v5717_v11 }
 0x114   :  { %v1771_v28 = vpack.c.bf16 %v1723_v17, %v1723_v17 }
 0x115   :  { %v1432_v29 = vpop.f32.mrf.mxu3 }
 0x116   :  { %v1819_v30 = vunpack.c.l.bf16 %v1771_v28  ;;  %v1624_v31 = vmax.f32 %v1576_v20, %v1432_v29 }
 0x117   :  { %v1074_v32 = vpop.f32.mrf.mxu0  ;;  %v2762_v38 = vld [vmem:[#allocation2 + $0x70] sm:$0xff] }
 0x118   :  { %v2538_v19 = vld [vmem:[#allocation2 + $0x70] sm:$0xff]  ;;  %1875 = vst.msk [vmem:[#allocation2 + $0x78] sm:$0xff] %vm1852_vm3, %v1819_v30  ;;  %v1676_v41 = vadd.f32 %v6235_v39, %v1624_v31  ;;  %v1529_v42 = vmax.f32 %v1074_v32, %v6211_v24  ;;  %2770 = vrot.lane.b32.xlu2 %v2762_v38, %s8875_s28  ;;  %2190 = vrot.lane.b32.xlu1 %v2762_v38, %s8873_s29  ;;  %v1317_v17 = vpop.f32.mrf.mxu2  ;;  %v5736_v32 = vld [vmem:[%s8846_s0 + $0x1f0] sm:$0xff] }
 0x119   :  { %1942 = vrot.lane.b32.xlu0 %v2762_v38, %s8858_s30  ;;  %2543 = vst.msk [vmem:[#allocation3 + $0x50] sm:$0xff] %vm1852_vm3, %v2538_v19  ;;  %5524 = vmatmul.msk.bf16.gmra.mxu2 %vm727_vm2, %v5736_v32 }
 0x11a   :  { %v1724_v46 = vmax.f32 %v1676_v41, 0.0  ;;  %v1577_v56 = vmax.f32 %v1529_v42, %v1314_v52  ;;  %v5760_v42 = vld [vmem:[%s8846_s0 + $0x2b0] sm:$0xff]  ;;  %v6298_v52 = vpop.f32.mrf.mxu1 }
 0x11b   :  { %5548 = vmatmul.msk.bf16.gmra.mxu3 %vm727_vm2, %v5760_v42 }
 0x11c   :  { %v1772_v54 = vpack.c.bf16 %v1724_v46, %v1724_v46 }
 0x11d   :  { %v1434_v60 = vpop.f32.mrf.mxu3 }
 0x11e   :  { %v1820_v62 = vunpack.c.l.bf16 %v1772_v54  ;;  %v1625_v24 = vmax.f32 %v1577_v56, %v1434_v60 }
 0x11f   :  { %v1077_v3 = vpop.f32.mrf.mxu0  ;;  %v2810_v4 = vld [vmem:[#allocation2 + $0x72] sm:$0xff] }
 0x120   :  { %1877 = vst.msk [vmem:[#allocation2 + $0x80] sm:$0xff] %vm1852_vm3, %v1820_v62  ;;  %v1677_v6 = vadd.f32 %v6235_v39, %v1625_v24  ;;  %2818 = vrot.lane.b32.xlu2 %v2810_v4, %s8903_s14  ;;  %2580 = vrot.lane.b32.xlu1 %v2810_v4, %s8932_s15  ;;  %v1530_v9 = vmax.f32 %v1077_v3, %v6226_v34  ;;  %v5692_v62 = vld [vmem:[%s8846_s0 + $0x90] sm:$0xff] }
 0x121   :  { %3263 = vrot.lane.b32.xlu0 %v2762_v38, %s8860_s16 }
 0x122   :  { %v1725_v12 = vmax.f32 %v1677_v6, 0.0  ;;  %5479 = vmatmul.msk.bf16.gmra.mxu0 %vm727_vm2, %v5691_v1  ;;  %v1578_v27 = vmax.f32 %v1530_v9, %v1317_v17  ;;  %v6314_v11 = vpop.f32.mrf.mxu1  ;;  %v5718_v17 = vld [vmem:[%s8846_s0 + $0x160] sm:$0xff] }
 0x123   :  { %5506 = vmatmul.msk.bf16.gmra.mxu1 %vm727_vm2, %v5718_v17 }
 0x124   :  { %v1773_v20 = vpack.c.bf16 %v1725_v12, %v1725_v12 }
 0x125   :  { %v1437_v28 = vpop.f32.mrf.mxu3 }
 0x126   :  { %v1821_v29 = vunpack.c.l.bf16 %v1773_v20  ;;  %v1626_v34 = vmax.f32 %v1578_v27, %v1437_v28 }
 0x127   :  { %v1079_v30 = vpop.f32.mrf.mxu0  ;;  %v6278_v31 = vld [vmem:[#allocation2 + $0x80] sm:$0xff] }
 0x128   :  { %v6283_v38 = vld [vmem:[#allocation2 + $0x80] sm:$0xff]  ;;  %1878 = vst.msk [vmem:[#allocation2 + $0x88] sm:$0xff] %vm1852_vm3, %v1821_v29  ;;  %3311 = vrot.lane.b32.xlu2 %v2810_v4, %s8919_s21  ;;  %1944 = vrot.lane.b32.xlu1 %v6278_v31, %s8858_s30  ;;  %v1531_v19 = vmax.f32 %v1079_v30, %v6239_v58  ;;  %v1678_v41 = vadd.f32 %v6235_v39, %v1626_v34  ;;  %v1319_v58 = vpop.f32.mrf.mxu2  ;;  %v2862_v29 = vld [vmem:[#allocation2 + $0x74] sm:$0xff] }
 0x129   :  { %8952 = vst [vmem:[#allocation19_spill] sm:$0xff] %v6283_v38  ;;  %1992 = vrot.lane.b32.xlu0 %v2810_v4, %s8877_s22  ;;  %v5693_v34 = vld [vmem:[%s8846_s0 + $0x98] sm:$0xff] }
 0x12a   :  { %2544 = vst.msk [vmem:[#allocation3 + $0x60] sm:$0xff] %vm1852_vm3, %v6283_v38  ;;  %v1726_v46 = vmax.f32 %v1678_v41, 0.0  ;;  %v1579_v56 = vmax.f32 %v1531_v19, %v1319_v58  ;;  %v5719_v19 = vld [vmem:[%s8846_s0 + $0x168] sm:$0xff] }
 0x12c   :  { %v1774_v54 = vpack.c.bf16 %v1726_v46, %v1726_v46 }
 0x12d   :  { %v1439_v60 = vpop.f32.mrf.mxu3 }
 0x12e   :  { %v1822_v24 = vunpack.c.l.bf16 %v1774_v54  ;;  %v1627_v1 = vmax.f32 %v1579_v56, %v1439_v60  ;;  %v5694_v60 = vld [vmem:[%s8846_s0 + $0xa0] sm:$0xff] }
 0x12f   :  { %v1082_v3 = vpop.f32.mrf.mxu0  ;;  %v6304_v6 = vld [vmem:[#allocation2 + $0x82] sm:$0xff] }
 0x130   :  { %2192 = vrot.lane.b32.xlu2 %v6278_v31, %s8873_s29  ;;  %1994 = vrot.lane.b32.xlu1 %v6304_v6, %s8877_s22  ;;  %1880 = vst.msk [vmem:[#allocation2 + $0x90] sm:$0xff] %vm1852_vm3, %v1822_v24  ;;  %v1679_v9 = vadd.f32 %v6235_v39, %v1627_v1  ;;  %v1532_v42 = vmax.f32 %v1082_v3, %v6247_v25  ;;  %v1322_v58 = vpop.f32.mrf.mxu2  ;;  %v2620_v24 = vld [vmem:[#allocation2 + $0x84] sm:$0xff]  ;;  %v5737_v1 = vld [vmem:[%s8846_s0 + $0x1f8] sm:$0xff] }
 0x131   :  { %2245 = vrot.lane.b32.xlu0 %v2810_v4, %s8866_s1  ;;  %v6326_v4 = vpop.f32.mrf.mxu1  ;;  %5525 = vmatmul.msk.bf16.gmra.mxu2 %vm727_vm2, %v5737_v1 }
 0x132   :  { %5480 = vmatmul.msk.bf16.gmra.mxu0 %vm727_vm2, %v5692_v62  ;;  %v1727_v12 = vmax.f32 %v1679_v9, 0.0  ;;  %v1580_v54 = vmax.f32 %v1532_v42, %v1322_v58 }
 0x133   :  { %5507 = vmatmul.msk.bf16.gmra.mxu1 %vm727_vm2, %v5719_v19 }
 0x134   :  { %v1775_v20 = vpack.c.bf16 %v1727_v12, %v1727_v12  ;;  %v5761_v12 = vld [vmem:[%s8846_s0 + $0x2b8] sm:$0xff] }
 0x135   :  { %v1442_v56 = vpop.f32.mrf.mxu3  ;;  %5549 = vmatmul.msk.bf16.gmra.mxu3 %vm727_vm2, %v5761_v12  ;;  %v5695_v12 = vld [vmem:[%s8846_s0 + $0xa8] sm:$0xff] }
 0x136   :  { %v1823_v27 = vunpack.c.l.bf16 %v1775_v20  ;;  %v1628_v62 = vmax.f32 %v1580_v54, %v1442_v56 }
 0x137   :  { %v1084_v28 = vpop.f32.mrf.mxu0  ;;  %v6389_v56 = vld [vmem:[#allocation2 + $0x90] sm:$0xff] }
 0x138   :  { %2445 = vrot.lane.b32.xlu2 %v6278_v31, %s8868_s13  ;;  %2247 = vrot.lane.b32.xlu1 %v6304_v6, %s8866_s1  ;;  %1881 = vst.msk [vmem:[#allocation2 + $0x98] sm:$0xff] %vm1852_vm3, %v1823_v27  ;;  %v1533_v3 = vmax.f32 %v1084_v28, %v6260_v48  ;;  %v1680_v9 = vadd.f32 %v6235_v39, %v1628_v62  ;;  %v1324_v20 = vpop.f32.mrf.mxu2 }
 0x139   :  { %2870 = vrot.lane.b32.xlu0 %v2862_v29, %s8879_s17  ;;  %v6337_v32 = vpop.f32.mrf.mxu1  ;;  %8953 = vst [vmem:[#allocation20_spill] sm:$0xff] %v6389_v56 }
 0x13a   :  { %v1728_v17 = vmax.f32 %v1680_v9, 0.0  ;;  %v1581_v28 = vmax.f32 %v1533_v3, %v1324_v20  ;;  %2545 = vst.msk [vmem:[#allocation3 + $0x70] sm:$0xff] %vm1852_vm3, %v6389_v56  ;;  %v6397_v9 = vld [vmem:[#allocation2 + $0x90] sm:$0xff] }
 0x13c   :  { %v1776_v27 = vpack.c.bf16 %v1728_v17, %v1728_v17 }
 0x13f   :  { %v1087_v30 = vpop.f32.mrf.mxu0 }
 0x140   :  { %3014 = vrot.lane.b32.xlu2 %v6278_v31, %s8928_s20  ;;  %2495 = vrot.lane.b32.xlu1 %v6304_v6, %s8871_s23  ;;  %v1534_v58 = vmax.f32 %v1087_v30, %v6272_v14 }
 0x141   :  { %2628 = vrot.lane.b32.xlu0 %v2862_v29, %s8926_s24  ;;  %v6352_v46 = vpop.f32.mrf.mxu1  ;;  %v1444_v29 = vpop.f32.mrf.mxu3 }
 0x142   :  { %5481 = vmatmul.msk.bf16.gmra.mxu0 %vm727_vm2, %v5693_v34  ;;  %v1824_v34 = vunpack.c.l.bf16 %v1776_v27  ;;  %v1629_v19 = vmax.f32 %v1581_v28, %v1444_v29 }
 0x144   :  { %1883 = vst.msk [vmem:[#allocation2 + $0xa0] sm:$0xff] %vm1852_vm3, %v1824_v34  ;;  %v1681_v54 = vadd.f32 %v6235_v39, %v1629_v19 }
 0x146   :  { %v1729_v14 = vmax.f32 %v1681_v54, 0.0 }
 0x147   :  { %v6343_v41 = vpop.f32.mrf.mxu0 }
 0x148   :  { %2772 = vrot.lane.b32.xlu2 %v6278_v31, %s8875_s28  ;;  %2820 = vrot.lane.b32.xlu1 %v6304_v6, %s8903_s14  ;;  %v1777_v62 = vpack.c.bf16 %v1729_v14, %v1729_v14 }
 0x149   :  { %3265 = vrot.lane.b32.xlu0 %v6278_v31, %s8860_s16  ;;  %v6373_v48 = vpop.f32.mrf.mxu1  ;;  %v1447_v3 = vpop.f32.mrf.mxu3  ;;  %s8973_s16 = smov 60  }
 0x14a   :  { %v1825_v17 = vunpack.c.l.bf16 %v1777_v62 }
 0x14c   :  { %1884 = vst.msk [vmem:[#allocation2 + $0xa8] sm:$0xff] %vm1852_vm3, %v1825_v17 }
 0x14f   :  { %v6357_v25 = vpop.f32.mrf.mxu0 }
 0x150   :  { %3507 = vrot.lane.b32.xlu2 %v6278_v31, %s8890_s25  ;;  %2872 = vrot.lane.b32.xlu1 %v2620_v24, %s8879_s17  ;;  %v5720_v31 = vld [vmem:[%s8846_s0 + $0x170] sm:$0xff]  ;;  %v1536_v62 = vmax.f32 %v6357_v25, %v6314_v11  ;;  %v5762_v11 = vld [vmem:[%s8846_s0 + $0x2c0] sm:$0xff] }
 0x151   :  { %2630 = vrot.lane.b32.xlu0 %v2620_v24, %s8926_s24  ;;  %5508 = vmatmul.msk.bf16.gmra.mxu1 %vm727_vm2, %v5720_v31  ;;  %v6395_v30 = vpop.f32.mrf.mxu1  ;;  %v1449_v19 = vpop.f32.mrf.mxu3 }
 0x152   :  { %5482 = vmatmul.msk.bf16.gmra.mxu0 %vm727_vm2, %v5694_v60  ;;  %v1327_v60 = vpop.f32.mrf.mxu2  ;;  %5550 = vmatmul.msk.bf16.gmra.mxu3 %vm727_vm2, %v5762_v11 }
 0x153   :  { %v1582_v1 = vmax.f32 %v1534_v58, %v1327_v60  ;;  %v5738_v60 = vld [vmem:[%s8846_s0 + $0x200] sm:$0xff] }
 0x154   :  { %5526 = vmatmul.msk.bf16.gmra.mxu2 %vm727_vm2, %v5738_v60 }
 0x155   :  { %v1630_v31 = vmax.f32 %v1582_v1, %v1447_v3  ;;  %v6431_v1 = vld [vmem:[#allocation2 + $0x92] sm:$0xff] }
 0x157   :  { %v6380_v42 = vpop.f32.mrf.mxu0  ;;  %v1682_v27 = vadd.f32 %v6235_v39, %v1630_v31 }
 0x158   :  { %3062 = vrot.lane.b32.xlu2 %v6304_v6, %s8886_s19  ;;  %2582 = vrot.lane.b32.xlu1 %v6304_v6, %s8932_s15 }
 0x159   :  { %3555 = vrot.lane.b32.xlu0 %v6304_v6, %s8917_s26  ;;  %v1535_v6 = vmax.f32 %v6343_v41, %v6298_v52  ;;  %v1730_v28 = vmax.f32 %v1682_v27, 0.0  ;;  %v6414_v29 = vpop.f32.mrf.mxu1  ;;  %v5721_v52 = vld [vmem:[%s8846_s0 + $0x178] sm:$0xff]  ;;  %v1452_v27 = vpop.f32.mrf.mxu3 }
 0x15a   :  { %v1329_v41 = vpop.f32.mrf.mxu2 }
 0x15b   :  { %v1583_v34 = vmax.f32 %v1535_v6, %v1329_v41 }
 0x15d   :  { %v1631_v54 = vmax.f32 %v1583_v34, %v1449_v19  ;;  %v1537_v34 = vmax.f32 %v6380_v42, %v6326_v4  ;;  %v5722_v42 = vld [vmem:[%s8846_s0 + $0x180] sm:$0xff] }
 0x15f   :  { %v6402_v20 = vpop.f32.mrf.mxu0  ;;  %v1683_v3 = vadd.f32 %v6235_v39, %v1631_v54 }
 0x160   :  { %3110 = vrot.lane.b32.xlu2 %v2620_v24, %s8924_s18  ;;  %1946 = vrot.lane.b32.xlu1 %v6397_v9, %s8858_s30  ;;  %v1778_v24 = vpack.c.bf16 %v1730_v28, %v1730_v28  ;;  %v5696_v28 = vld [vmem:[%s8846_s0 + $0xb0] sm:$0xff]  ;;  %s8893_s30 = smov 50  }
 0x161   :  { %2194 = vrot.lane.b32.xlu0 %v6397_v9, %s8873_s29  ;;  %5509 = vmatmul.msk.bf16.gmra.mxu1 %vm727_vm2, %v5721_v52  ;;  %v1731_v25 = vmax.f32 %v1683_v3, 0.0  ;;  %v1454_v11 = vpop.f32.mrf.mxu3 }
 0x162   :  { %5483 = vmatmul.msk.bf16.gmra.mxu0 %vm727_vm2, %v5695_v12  ;;  %v1826_v58 = vunpack.c.l.bf16 %v1778_v24  ;;  %v6441_v12 = vpop.f32.mrf.mxu1  ;;  %v1332_v17 = vpop.f32.mrf.mxu2 }
 0x163   :  { %v1779_v31 = vpack.c.bf16 %v1731_v25, %v1731_v25  ;;  %v1584_v6 = vmax.f32 %v1536_v62, %v1332_v17 }
 0x164   :  { %1886 = vst.msk [vmem:[#allocation2 + $0xb0] sm:$0xff] %vm1852_vm3, %v1826_v58 }
 0x165   :  { %v1827_v52 = vunpack.c.l.bf16 %v1779_v31  ;;  %v1632_v41 = vmax.f32 %v1584_v6, %v1452_v27  ;;  %v5739_v6 = vld [vmem:[%s8846_s0 + $0x208] sm:$0xff]  ;;  %v2621_v27 = vld [vmem:[#allocation2 + $0x94] sm:$0xff] }
 0x166   :  { %5527 = vmatmul.msk.bf16.gmra.mxu2 %vm727_vm2, %v5739_v6 }
 0x167   :  { %v6420_v14 = vpop.f32.mrf.mxu0  ;;  %1887 = vst.msk [vmem:[#allocation2 + $0xb8] sm:$0xff] %vm1852_vm3, %v1827_v52  ;;  %v1684_v19 = vadd.f32 %v6235_v39, %v1632_v41  ;;  %v5763_v52 = vld [vmem:[%s8846_s0 + $0x2c8] sm:$0xff] }
 0x168   :  { %2774 = vrot.lane.b32.xlu2 %v6397_v9, %s8875_s28  ;;  %2447 = vrot.lane.b32.xlu1 %v6397_v9, %s8868_s13 }
 0x169   :  { %2497 = vrot.lane.b32.xlu0 %v6431_v1, %s8871_s23  ;;  %v1732_v54 = vmax.f32 %v1684_v19, 0.0  ;;  %5551 = vmatmul.msk.bf16.gmra.mxu3 %vm727_vm2, %v5763_v52  ;;  %v6515_v52 = vld [vmem:[#allocation2 + $0xa0] sm:$0xff] }
 0x16a   :  { %v6462_v60 = vpop.f32.mrf.mxu1  ;;  %v1334_v4 = vpop.f32.mrf.mxu2 }
 0x16b   :  { %v1780_v62 = vpack.c.bf16 %v1732_v54, %v1732_v54  ;;  %v1585_v3 = vmax.f32 %v1537_v34, %v1334_v4  ;;  %v5697_v54 = vld [vmem:[%s8846_s0 + $0xb8] sm:$0xff] }
 0x16d   :  { %v1828_v25 = vunpack.c.l.bf16 %v1780_v62  ;;  %v1633_v17 = vmax.f32 %v1585_v3, %v1454_v11  ;;  %v1538_v3 = vmax.f32 %v6402_v20, %v6337_v32  ;;  %v1457_v32 = vpop.f32.mrf.mxu3 }
 0x16f   :  { %v6447_v24 = vpop.f32.mrf.mxu0  ;;  %1889 = vst.msk [vmem:[#allocation2 + $0xc0] sm:$0xff] %vm1852_vm3, %v1828_v25 }
 0x170   :  { %3016 = vrot.lane.b32.xlu1 %v6397_v9, %s8928_s20  ;;  %1996 = vrot.lane.b32.xlu2 %v6431_v1, %s8877_s22  ;;  %s9055_s22 = smov 110  }
 0x171   :  { %2822 = vrot.lane.b32.xlu0 %v6431_v1, %s8903_s14  ;;  %5510 = vmatmul.msk.bf16.gmra.mxu1 %vm727_vm2, %v5722_v42 }
 0x172   :  { %v6459_v58 = vpop.permute.xlu2 %2770  ;;  %5484 = vmatmul.msk.bf16.gmra.mxu0 %vm727_vm2, %v5696_v28  ;;  %v1685_v28 = vadd.f32 %v6235_v39, %v1633_v17  ;;  %v6486_v34 = vpop.f32.mrf.mxu1  ;;  %v5723_v17 = vld [vmem:[%s8846_s0 + $0x188] sm:$0xff] }
 0x173   :  { %8954 = vst [vmem:[#allocation21_spill] sm:$0xff] %v6459_v58  ;;  %v1337_v6 = vpop.f32.mrf.mxu2  ;;  %v2489_v58 = vld [vmem:[#allocation2 + $0xa2] sm:$0xff] }
 0x175   :  { %v1459_v62 = vpop.f32.mrf.mxu3 }
 0x177   :  { %v6468_v31 = vpop.f32.mrf.mxu0 }
 0x178   :  { %3509 = vrot.lane.b32.xlu1 %v6397_v9, %s8890_s25  ;;  %2249 = vrot.lane.b32.xlu2 %v6431_v1, %s8866_s1  ;;  %v1733_v9 = vmax.f32 %v1685_v28, 0.0  ;;  %v1586_v28 = vmax.f32 %v1538_v3, %v1337_v6 }
 0x179   :  { %2632 = vrot.lane.b32.xlu0 %v2621_v27, %s8926_s24 }
 0x17a   :  { %v6484_v41 = vpop.permute.xlu2 %2818  ;;  %v1781_v19 = vpack.c.bf16 %v1733_v9, %v1733_v9  ;;  %v6509_v25 = vpop.f32.mrf.mxu1  ;;  %v1634_v9 = vmax.f32 %v1586_v28, %v1457_v32 }
 0x17b   :  { %8955 = vst [vmem:[#allocation22_spill] sm:$0xff] %v6484_v41  ;;  %v1339_v32 = vpop.f32.mrf.mxu2 }
 0x17c   :  { %2831 = vst.msk [vmem:[#allocation3 + $0x48] sm:$0xff] %vm8896_vm4, %v6484_v41  ;;  %v1829_v4 = vunpack.c.l.bf16 %v1781_v19  ;;  %v5740_v19 = vld [vmem:[%s8846_s0 + $0x210] sm:$0xff]  ;;  %v1686_v3 = vadd.f32 %v6235_v39, %v1634_v9 }
 0x17d   :  { %5528 = vmatmul.msk.bf16.gmra.mxu2 %vm727_vm2, %v5740_v19 }
 0x17e   :  { %1890 = vst.msk [vmem:[#allocation2 + $0xc8] sm:$0xff] %vm1852_vm3, %v1829_v4  ;;  %v1539_v4 = vmax.f32 %v6420_v14, %v6352_v46  ;;  %v1734_v46 = vmax.f32 %v1686_v3, 0.0 }
 0x17f   :  { %v6494_v42 = vpop.f32.mrf.mxu0 }
 0x180   :  { %2874 = vrot.lane.b32.xlu1 %v2621_v27, %s8879_s17  ;;  %3064 = vrot.lane.b32.xlu2 %v6431_v1, %s8886_s19  ;;  %v1782_v9 = vpack.c.bf16 %v1734_v46, %v1734_v46  ;;  %v1587_v19 = vmax.f32 %v1539_v4, %v1339_v32 }
 0x181   :  { %3557 = vrot.lane.b32.xlu0 %v6431_v1, %s8917_s26  ;;  %5511 = vmatmul.msk.bf16.gmra.mxu1 %vm727_vm2, %v5723_v17  ;;  %v5764_v17 = vld [vmem:[%s8846_s0 + $0x2d0] sm:$0xff] }
 0x182   :  { %v6506_v11 = vpop.permute.xlu2 %3311  ;;  %5485 = vmatmul.msk.bf16.gmra.mxu0 %vm727_vm2, %v5697_v54  ;;  %v6543_v14 = vpop.f32.mrf.mxu1  ;;  %5552 = vmatmul.msk.bf16.gmra.mxu3 %vm727_vm2, %v5764_v17  ;;  %v5698_v54 = vld [vmem:[%s8846_s0 + $0xc0] sm:$0xff] }
 0x183   :  { %8956 = vst [vmem:[#allocation23_spill] sm:$0xff] %v6506_v11 }
 0x187   :  { %v6517_v20 = vpop.f32.mrf.mxu0 }
 0x188   :  { %2584 = vrot.lane.b32.xlu1 %v6431_v1, %s8932_s15  ;;  %3112 = vrot.lane.b32.xlu2 %v2621_v27, %s8924_s18  ;;  %v3126_v1 = vld [vmem:[#allocation2 + $0xc0] sm:$0xff] }
 0x189   :  { %2449 = vrot.lane.b32.xlu0 %v6515_v52, %s8868_s13  ;;  %3131 = vst.msk [vmem:[#allocation3 + $0x80] sm:$0xff] %vm1852_vm3, %v3126_v1  ;;  %v1635_v1 = vmax.f32 %v1587_v19, %v1459_v62  ;;  %v5724_v19 = vld [vmem:[%s8846_s0 + $0x190] sm:$0xff] }
 0x18a   :  { %v6536_v6 = vpop.permute.xlu1 %2190  ;;  %v6538_v27 = vpop.permute.xlu2 %2192 }
 0x18b   :  { %8957 = vst [vmem:[#allocation24_spill] sm:$0xff] %v6536_v6  ;;  %v6541_v28 = vpop.permute.xlu0 %1942  ;;  %v1830_v6 = vunpack.c.l.bf16 %v1782_v9  ;;  %v1687_v4 = vadd.f32 %v6235_v39, %v1635_v1  ;;  %v6566_v9 = vpop.f32.mrf.mxu1 }
 0x18c   :  { %8958 = vst [vmem:[#allocation25_spill] sm:$0xff] %v6538_v27 }
 0x18d   :  { %1892 = vst.msk [vmem:[#allocation2 + $0xd0] sm:$0xff] %vm1852_vm3, %v1830_v6  ;;  %v1735_v32 = vmax.f32 %v1687_v4, 0.0 }
 0x18f   :  { %v6549_v41 = vpop.f32.mrf.mxu0  ;;  %v1783_v3 = vpack.c.bf16 %v1735_v32, %v1735_v32 }
 0x190   :  { %2196 = vrot.lane.b32.xlu1 %v6515_v52, %s8873_s29  ;;  %2499 = vrot.lane.b32.xlu2 %v2489_v58, %s8871_s23  ;;  %s8905_s29 = smov 62  }
 0x191   :  { %2251 = vrot.lane.b32.xlu0 %v2489_v58, %s8866_s1  ;;  %5512 = vmatmul.msk.bf16.gmra.mxu1 %vm727_vm2, %v5724_v19  ;;  %v1831_v1 = vunpack.c.l.bf16 %v1783_v3  ;;  %v5699_v3 = vld [vmem:[%s8846_s0 + $0xc8] sm:$0xff]  ;;  %s8930_s1 = smov 90  }
 0x192   :  { %v6559_v17 = vpop.permute.xlu1 %2580  ;;  %v6561_v46 = vpop.permute.xlu2 %2445  ;;  %5486 = vmatmul.msk.bf16.gmra.mxu0 %vm727_vm2, %v5698_v54  ;;  %v5765_v54 = vld [vmem:[%s8846_s0 + $0x2d8] sm:$0xff] }
 0x193   :  { %8959 = vst [vmem:[#allocation26_spill] sm:$0xff] %v6559_v17  ;;  %v6564_v62 = vpop.permute.xlu0 %3263  ;;  %v6587_v38 = vpop.f32.mrf.mxu1  ;;  %5553 = vmatmul.msk.bf16.gmra.mxu3 %vm727_vm2, %v5765_v54 }
 0x194   :  { %8960 = vst [vmem:[#allocation27_spill] sm:$0xff] %v6561_v46  ;;  %v3104_v46 = vld [vmem:[#allocation2 + $0xa4] sm:$0xff]  ;;  %v3127_v11 = vld [vmem:[#allocation2 + $0xd0] sm:$0xff] }
 0x195   :  { %8961 = vst [vmem:[#allocation28_spill] sm:$0xff] %v6564_v62 }
 0x196   :  { %1893 = vst.msk [vmem:[#allocation2 + $0xd8] sm:$0xff] %vm1852_vm3, %v1831_v1  ;;  %v2440_v1 = vld [vmem:[#allocation2 + $0xb0] sm:$0xff] }
 0x197   :  { %v6572_v6 = vpop.f32.mrf.mxu0  ;;  %3132 = vst.msk [vmem:[#allocation3 + $0x90] sm:$0xff] %vm1852_vm3, %v3127_v11  ;;  %v1540_v11 = vmax.f32 %v6447_v24, %v6373_v48  ;;  %v2082_v24 = vld [vmem:[#allocation2 + $0xc2] sm:$0xff] }
 0x198   :  { %3018 = vrot.lane.b32.xlu1 %v6515_v52, %s8928_s20  ;;  %3066 = vrot.lane.b32.xlu2 %v2489_v58, %s8886_s19 }
 0x199   :  { %2824 = vrot.lane.b32.xlu0 %v2489_v58, %s8903_s14  ;;  %v5741_v58 = vld [vmem:[%s8846_s0 + $0x218] sm:$0xff] }
 0x19a   :  { %v6581_v4 = vpop.permute.xlu2 %3014  ;;  %v6583_v32 = vpop.permute.xlu1 %1944  ;;  %5529 = vmatmul.msk.bf16.gmra.mxu2 %vm727_vm2, %v5741_v58  ;;  %v5725_v58 = vld [vmem:[%s8846_s0 + $0x198] sm:$0xff] }
 0x19b   :  { %8962 = vst [vmem:[#allocation29_spill] sm:$0xff] %v6581_v4  ;;  %v6585_v19 = vpop.permute.xlu0 %1992  ;;  %v6613_v4 = vpop.f32.mrf.mxu1 }
 0x19c   :  { %8963 = vst [vmem:[#allocation30_spill] sm:$0xff] %v6585_v19  ;;  %v6619_v19 = vld [vmem:[#allocation2 + $0xc4] sm:$0xff] }
 0x19d   :  { %v6747_v8 = vld [vmem:[#allocation2 + $0xd2] sm:$0xff] }
 0x19e   :  { %v1462_v21 = vpop.f32.mrf.mxu3 }
 0x19f   :  { %v6592_v56 = vpop.f32.mrf.mxu0 }
 0x1a0   :  { %2776 = vrot.lane.b32.xlu1 %v6515_v52, %s8875_s28  ;;  %3114 = vrot.lane.b32.xlu2 %v3104_v46, %s8924_s18 }
 0x1a1   :  { %2451 = vrot.lane.b32.xlu0 %v2440_v1, %s8868_s13  ;;  %5513 = vmatmul.msk.bf16.gmra.mxu1 %vm727_vm2, %v5725_v58  ;;  %s8898_s13 = smov 70  }
 0x1a2   :  { %v6605_v27 = vpop.permute.xlu2 %2772  ;;  %v6607_v17 = vpop.permute.xlu1 %1994  ;;  %5487 = vmatmul.msk.bf16.gmra.mxu0 %vm727_vm2, %v5699_v3 }
 0x1a3   :  { %8964 = vst [vmem:[#allocation31_spill] sm:$0xff] %v6605_v27  ;;  %v6611_v62 = vpop.permute.xlu0 %2245  ;;  %v6637_v58 = vpop.f32.mrf.mxu1 }
 0x1a4   :  { %8965 = vst [vmem:[#allocation32_spill] sm:$0xff] %v6607_v17 }
 0x1a5   :  { %8966 = vst [vmem:[#allocation33_spill] sm:$0xff] %v6611_v62  ;;  %v1342_v62 = vpop.f32.mrf.mxu2 }
 0x1a6   :  { %v1588_v26 = vmax.f32 %v1540_v11, %v1342_v62  ;;  %v1541_v62 = vmax.f32 %v6468_v31, %v6395_v30 }
 0x1a7   :  { %v6622_v27 = vpop.f32.mrf.mxu0 }
 0x1a8   :  { %3511 = vrot.lane.b32.xlu1 %v6515_v52, %s8890_s25  ;;  %2140 = vrot.lane.b32.xlu2 %v6619_v19, %s8930_s1  ;;  %v5700_v52 = vld [vmem:[%s8846_s0 + $0xd0] sm:$0xff]  ;;  %v1636_v48 = vmax.f32 %v1588_v26, %v1462_v21  ;;  %v5766_v26 = vld [vmem:[%s8846_s0 + $0x2e0] sm:$0xff] }
 0x1a9   :  { %3020 = vrot.lane.b32.xlu0 %v2440_v1, %s8928_s20  ;;  %v5742_v1 = vld [vmem:[%s8846_s0 + $0x220] sm:$0xff]  ;;  %5554 = vmatmul.msk.bf16.gmra.mxu3 %vm727_vm2, %v5766_v26 }
 0x1aa   :  { %v6631_v54 = vpop.permute.xlu2 %3507  ;;  %v6633_v3 = vpop.permute.xlu1 %2247  ;;  %v1688_v11 = vadd.f32 %v6235_v39, %v1636_v48  ;;  %5530 = vmatmul.msk.bf16.gmra.mxu2 %vm727_vm2, %v5742_v1  ;;  %v5726_v48 = vld [vmem:[%s8846_s0 + $0x1a0] sm:$0xff] }
 0x1ab   :  { %8967 = vst [vmem:[#allocation34_spill] sm:$0xff] %v6631_v54  ;;  %v6635_v17 = vpop.permute.xlu0 %2870  ;;  %v6665_v31 = vpop.f32.mrf.mxu1  ;;  %v2490_v54 = vld [vmem:[#allocation2 + $0xb2] sm:$0xff] }
 0x1ac   :  { %8968 = vst [vmem:[#allocation35_spill] sm:$0xff] %v6633_v3  ;;  %v1736_v30 = vmax.f32 %v1688_v11, 0.0  ;;  %v1464_v1 = vpop.f32.mrf.mxu3 }
 0x1ad   :  { %8969 = vst [vmem:[#allocation36_spill] sm:$0xff] %v6635_v17 }
 0x1af   :  { %v6642_v23 = vpop.f32.mrf.mxu0 }
 0x1b0   :  { %2876 = vrot.lane.b32.xlu1 %v3104_v46, %s8879_s17  ;;  %2722 = vrot.lane.b32.xlu2 %v6619_v19, %s8919_s21 }
 0x1b1   :  { %2090 = vrot.lane.b32.xlu0 %v2082_v24, %s8898_s13  ;;  %5514 = vmatmul.msk.bf16.gmra.mxu1 %vm727_vm2, %v5726_v48  ;;  %v2033_v48 = vld [vmem:[#allocation2 + $0xd0] sm:$0xff] }
 0x1b2   :  { %v6654_v3 = vpop.permute.xlu2 %3062  ;;  %v6656_v21 = vpop.permute.xlu1 %2495  ;;  %5488 = vmatmul.msk.bf16.gmra.mxu0 %vm727_vm2, %v5700_v52 }
 0x1b3   :  { %8970 = vst [vmem:[#allocation37_spill] sm:$0xff] %v6654_v3  ;;  %v6663_v46 = vpop.permute.xlu0 %2628  ;;  %v1344_v3 = vpop.f32.mrf.mxu2 }
 0x1b4   :  { %8971 = vst [vmem:[#allocation38_spill] sm:$0xff] %v6656_v21  ;;  %v1784_v21 = vpack.c.bf16 %v1736_v30, %v1736_v30  ;;  %v1589_v52 = vmax.f32 %v1541_v62, %v1344_v3  ;;  %v6687_v30 = vpop.f32.mrf.mxu1 }
 0x1b5   :  { %8972 = vst [vmem:[#allocation39_spill] sm:$0xff] %v6663_v46 }
 0x1b6   :  { %v1832_v22 = vunpack.c.l.bf16 %v1784_v21  ;;  %v1637_v46 = vmax.f32 %v1589_v52, %v1464_v1 }
 0x1b7   :  { %v6672_v17 = vpop.f32.mrf.mxu0 }
 0x1b8   :  { %2501 = vrot.lane.b32.xlu1 %v2490_v54, %s8871_s23  ;;  %3167 = vrot.lane.b32.xlu2 %v2082_v24, %s8932_s15  ;;  %1895 = vst.msk [vmem:[#allocation2 + $0xe0] sm:$0xff] %vm1852_vm3, %v1832_v22  ;;  %v1689_v11 = vadd.f32 %v6235_v39, %v1637_v46  ;;  %v5701_v22 = vld [vmem:[%s8846_s0 + $0xd8] sm:$0xff]  ;;  %s9059_s23 = smov 2  }
 0x1b9   :  { %2674 = vrot.lane.b32.xlu0 %v2082_v24, %s8973_s16 }
 0x1ba   :  { %v6679_v26 = vpop.permute.xlu2 %3110  ;;  %v6681_v3 = vpop.permute.xlu1 %2820  ;;  %v1737_v21 = vmax.f32 %v1689_v11, 0.0 }
 0x1bb   :  { %8974 = vst [vmem:[#allocation40_spill] sm:$0xff] %v6679_v26  ;;  %v6683_v62 = vpop.permute.xlu0 %3265 }
 0x1bc   :  { %8975 = vst [vmem:[#allocation41_spill] sm:$0xff] %v6681_v3  ;;  %v1785_v52 = vpack.c.bf16 %v1737_v21, %v1737_v21 }
 0x1bd   :  { %8976 = vst [vmem:[#allocation42_spill] sm:$0xff] %v6683_v62  ;;  %v1347_v62 = vpop.f32.mrf.mxu2 }
 0x1be   :  { %2833 = vst.msk [vmem:[#allocation3 + $0x58] sm:$0xff] %vm8896_vm4, %v6681_v3  ;;  %v1833_v46 = vunpack.c.l.bf16 %v1785_v52  ;;  %v6706_v3 = vpop.f32.mrf.mxu1 }
 0x1bf   :  { %v6692_v24 = vpop.f32.mrf.mxu0 }
 0x1c0   :  { %3068 = vrot.lane.b32.xlu1 %v2490_v54, %s8886_s19  ;;  %2042 = vrot.lane.b32.xlu2 %v2033_v48, %s8893_s30  ;;  %1896 = vst.msk [vmem:[#allocation2 + $0xe8] sm:$0xff] %vm1852_vm3, %v1833_v46  ;;  %v3105_v54 = vld [vmem:[#allocation2 + $0xb4] sm:$0xff] }
 0x1c1   :  { %3215 = vrot.lane.b32.xlu0 %v6619_v19, %s8926_s24  ;;  %v6712_v19 = vld [vmem:[#allocation2 + $0xd4] sm:$0xff] }
 0x1c2   :  { %v6699_v1 = vpop.permute.xlu1 %2872  ;;  %v6701_v11 = vpop.permute.xlu2 %2774  ;;  %5489 = vmatmul.msk.bf16.gmra.mxu0 %vm727_vm2, %v5701_v22 }
 0x1c3   :  { %8977 = vst [vmem:[#allocation43_spill] sm:$0xff] %v6699_v1  ;;  %v6704_v21 = vpop.permute.xlu0 %2630  ;;  %v2032_v1 = vld [vmem:[#allocation2 + $0xc0] sm:$0xff] }
 0x1c4   :  { %8978 = vst [vmem:[#allocation44_spill] sm:$0xff] %v6701_v11 }
 0x1c5   :  { %8979 = vst [vmem:[#allocation45_spill] sm:$0xff] %v6704_v21 }
 0x1c6   :  { %v6722_v21 = vpop.f32.mrf.mxu1 }
 0x1c7   :  { %v6708_v52 = vpop.f32.mrf.mxu0 }
 0x1c8   :  { %3116 = vrot.lane.b32.xlu1 %v3105_v54, %s8924_s18  ;;  %2295 = vrot.lane.b32.xlu2 %v2033_v48, %s8900_s27  ;;  %v5702_v54 = vld [vmem:[%s8846_s0 + $0xe0] sm:$0xff] }
 0x1c9   :  { %2142 = vrot.lane.b32.xlu0 %v6712_v19, %s8930_s1 }
 0x1ca   :  { %v6716_v46 = vpop.permute.xlu1 %2582  ;;  %v6718_v22 = vpop.permute.xlu2 %1996 }
 0x1cb   :  { %8980 = vst [vmem:[#allocation46_spill] sm:$0xff] %v6716_v46  ;;  %v6720_v11 = vpop.permute.xlu0 %3555 }
 0x1cc   :  { %8981 = vst [vmem:[#allocation47_spill] sm:$0xff] %v6718_v22 }
 0x1cd   :  { %8982 = vst [vmem:[#allocation48_spill] sm:$0xff] %v6720_v11 }
 0x1ce   :  { %v6740_v15 = vpop.f32.mrf.mxu1 }
 0x1cf   :  { %v6727_v26 = vpop.f32.mrf.mxu0  ;;  %8985 = vst [vmem:[#allocation51_spill] sm:$0xff] %v6740_v15 }
 0x1d0   :  { %2040 = vrot.lane.b32.xlu1 %v2032_v1, %s8893_s30  ;;  %3359 = vrot.lane.b32.xlu2 %v2033_v48, %s8875_s28  ;;  %v8986_v1 = vmax.f32 %v6494_v42, %v6414_v29  ;;  %v1467_v48 = vpop.f32.mrf.mxu3  ;;  %s8934_s28 = smov 42  }
 0x1d1   :  { %2395 = vrot.lane.b32.xlu0 %v6712_v19, %s8905_s29 }
 0x1d2   :  { %v6733_v22 = vpop.permute.xlu1 %1946  ;;  %v6735_v11 = vpop.permute.xlu2 %2249  ;;  %5490 = vmatmul.msk.bf16.gmra.mxu0 %vm727_vm2, %v5702_v54  ;;  %v1590_v18 = vmax.f32 %v8986_v1, %v1347_v62  ;;  %v5743_v54 = vld [vmem:[%s8846_s0 + $0x228] sm:$0xff] }
 0x1d3   :  { %8983 = vst [vmem:[#allocation49_spill] sm:$0xff] %v6735_v11  ;;  %v6738_v46 = vpop.permute.xlu0 %2194  ;;  %5531 = vmatmul.msk.bf16.gmra.mxu2 %vm727_vm2, %v5743_v54  ;;  %v1349_v11 = vpop.f32.mrf.mxu2 }
 0x1d4   :  { %8984 = vst [vmem:[#allocation50_spill] sm:$0xff] %v6738_v46  ;;  %v1638_v13 = vmax.f32 %v1590_v18, %v1467_v48  ;;  %v5767_v18 = vld [vmem:[%s8846_s0 + $0x2e8] sm:$0xff] }
 0x1d5   :  { %5555 = vmatmul.msk.bf16.gmra.mxu3 %vm727_vm2, %v5767_v18 }
 0x1d6   :  { %v1690_v29 = vadd.f32 %v6235_v39, %v1638_v13  ;;  %v8990_v13 = vmax.f32 %v6517_v20, %v6441_v12  ;;  %v6778_v0 = vpop.f32.mrf.mxu1 }
 0x1d7   :  { %v6745_v16 = vpop.f32.mrf.mxu0  ;;  %8991 = vst [vmem:[#allocation55_spill] sm:$0xff] %v6778_v0  ;;  %v6858_v0 = vld [vmem:[#allocation2 + $0xe4] sm:$0xff] }
 0x1d8   :  { %2724 = vrot.lane.b32.xlu2 %v6712_v19, %s8919_s21  ;;  %2092 = vrot.lane.b32.xlu1 %v6747_v8, %s8898_s13  ;;  %v1738_v48 = vmax.f32 %v1690_v29, 0.0  ;;  %v1591_v15 = vmax.f32 %v8990_v13, %v1349_v11  ;;  %v1469_v54 = vpop.f32.mrf.mxu3  ;;  %v6797_v29 = vld [vmem:[#allocation2 + $0xe2] sm:$0xff] }
 0x1d9   :  { %2966 = vrot.lane.b32.xlu0 %v6712_v19, %s8917_s26  ;;  %v6801_v13 = vld [vmem:[#allocation2 + $0xe0] sm:$0xff] }
 0x1da   :  { %v6759_v42 = vpop.permute.xlu1 %2447  ;;  %v6761_v62 = vpop.permute.xlu2 %3064  ;;  %v1786_v46 = vpack.c.bf16 %v1738_v48, %v1738_v48  ;;  %8995 = vst [vmem:[#allocation59_spill] sm:$0xff] %v6801_v13 }
 0x1db   :  { %8987 = vst [vmem:[#allocation52_spill] sm:$0xff] %v6759_v42  ;;  %v6767_v1 = vpop.permute.xlu0 %2497  ;;  %v5703_v42 = vld [vmem:[%s8846_s0 + $0xe8] sm:$0xff] }
 0x1dc   :  { %8988 = vst [vmem:[#allocation53_spill] sm:$0xff] %v6761_v62  ;;  %v1834_v10 = vunpack.c.l.bf16 %v1786_v46 }
 0x1dd   :  { %8989 = vst [vmem:[#allocation54_spill] sm:$0xff] %v6767_v1  ;;  %v1639_v1 = vmax.f32 %v1591_v15, %v1469_v54 }
 0x1de   :  { %1898 = vst.msk [vmem:[#allocation2 + $0xf0] sm:$0xff] %vm1852_vm3, %v1834_v10 }
 0x1df   :  { %v6776_v62 = vpop.f32.mrf.mxu0  ;;  %v1691_v12 = vadd.f32 %v6235_v39, %v1639_v1  ;;  %v5744_v39 = vld [vmem:[%s8846_s0 + $0x230] sm:$0xff]  ;;  %3133 = vst.msk [vmem:[#allocation3 + $0xa0] sm:$0xff] %vm1852_vm3, %v6801_v13 }
 0x1e0   :  { %3459 = vrot.lane.b32.xlu2 %v6712_v19, %s8879_s17  ;;  %2345 = vrot.lane.b32.xlu1 %v6747_v8, %s8934_s28  ;;  %s9064_s17 = smov 82  }
 0x1e1   :  { %2676 = vrot.lane.b32.xlu0 %v6747_v8, %s8973_s16  ;;  %v1739_v46 = vmax.f32 %v1691_v12, 0.0  ;;  %v5768_v12 = vld [vmem:[%s8846_s0 + $0x2f0] sm:$0xff] }
 0x1e2   :  { %v6788_v20 = vpop.permute.xlu1 %3016  ;;  %v6790_v11 = vpop.permute.xlu2 %3112  ;;  %5491 = vmatmul.msk.bf16.gmra.mxu0 %vm727_vm2, %v5703_v42 }
 0x1e3   :  { %8992 = vst [vmem:[#allocation56_spill] sm:$0xff] %v6788_v20  ;;  %v6793_v15 = vpop.permute.xlu0 %2822  ;;  %v1787_v18 = vpack.c.bf16 %v1739_v46, %v1739_v46  ;;  %v6815_v42 = vpop.f32.mrf.mxu1  ;;  %5532 = vmatmul.msk.bf16.gmra.mxu2 %vm727_vm2, %v5744_v39 }
 0x1e4   :  { %8993 = vst [vmem:[#allocation57_spill] sm:$0xff] %v6790_v11  ;;  %v1472_v11 = vpop.f32.mrf.mxu3 }
 0x1e5   :  { %8994 = vst [vmem:[#allocation58_spill] sm:$0xff] %v6793_v15  ;;  %v1835_v10 = vunpack.c.l.bf16 %v1787_v18  ;;  %v1352_v18 = vpop.f32.mrf.mxu2  ;;  %5556 = vmatmul.msk.bf16.gmra.mxu3 %vm727_vm2, %v5768_v12 }
 0x1e6   :  { %2835 = vst.msk [vmem:[#allocation3 + $0x68] sm:$0xff] %vm8896_vm4, %v6793_v15  ;;  %v2034_v15 = vld [vmem:[#allocation2 + $0xe0] sm:$0xff] }
 0x1e7   :  { %v6799_v48 = vpop.f32.mrf.mxu0  ;;  %1899 = vst.msk [vmem:[#allocation2 + $0xf8] sm:$0xff] %vm1852_vm3, %v1835_v10 }
 0x1e8   :  { %2918 = vrot.lane.b32.xlu1 %v6747_v8, %s8890_s25  ;;  %2094 = vrot.lane.b32.xlu2 %v6797_v29, %s8898_s13  ;;  %8996 = vst [vmem:[#allocation60_spill] sm:$0xff] %v6815_v42 }
 0x1e9   :  { %3217 = vrot.lane.b32.xlu0 %v6712_v19, %s8926_s24  ;;  %v9000_v19 = vmax.f32 %v6549_v41, %v6462_v60  ;;  %v6844_v60 = vld [vmem:[%s8848_s2] ss:$0 sm:$0xff]  ;;  %s9032_s2 = smov 30  }
 0x1ea   :  { %v6817_v1 = vpop.permute.xlu1 %3509  ;;  %v6819_v54 = vpop.permute.xlu2 %2499 }
 0x1eb   :  { %8997 = vst [vmem:[#allocation61_spill] sm:$0xff] %v6817_v1  ;;  %v6825_v46 = vpop.permute.xlu0 %2632  ;;  %v1592_v10 = vmax.f32 %v9000_v19, %v1352_v18  ;;  %v6854_v19 = vpop.f32.mrf.mxu1 }
 0x1ec   :  { %8998 = vst [vmem:[#allocation62_spill] sm:$0xff] %v6819_v54  ;;  %v5704_v54 = vld [vmem:[%s8846_s0 + $0xf0] sm:$0xff]  ;;  %v1474_v20 = vpop.f32.mrf.mxu3 }
 0x1ed   :  { %8999 = vst [vmem:[#allocation63_spill] sm:$0xff] %v6825_v46  ;;  %v1640_v1 = vmax.f32 %v1592_v10, %v1472_v11  ;;  %v1354_v46 = vpop.f32.mrf.mxu2 }
 0x1ee   :  { %9005 = vst [vmem:[#allocation68_spill] sm:$0xff] %v6854_v19 }
 0x1ef   :  { %v6834_v39 = vpop.f32.mrf.mxu0  ;;  %v1692_v41 = vadd.f32 %v6844_v60, %v1640_v1  ;;  %v5745_v1 = vld [vmem:[%s8846_s0 + $0x238] sm:$0xff] }
 0x1f0   :  { %9001 = vst [vmem:[#allocation64_spill] sm:$0xff] %v6834_v39  ;;  %3407 = vrot.lane.b32.xlu1 %v6747_v8, %s8903_s14  ;;  %2347 = vrot.lane.b32.xlu2 %v6797_v29, %s8934_s28 }
 0x1f1   :  { %2044 = vrot.lane.b32.xlu0 %v2034_v15, %s8893_s30  ;;  %v1740_v10 = vmax.f32 %v1692_v41, 0.0 }
 0x1f2   :  { %v6847_v12 = vpop.permute.xlu1 %2874  ;;  %v6849_v18 = vpop.permute.xlu2 %3066  ;;  %5492 = vmatmul.msk.bf16.gmra.mxu0 %vm727_vm2, %v5704_v54 }
 0x1f3   :  { %9002 = vst [vmem:[#allocation65_spill] sm:$0xff] %v6847_v12  ;;  %v6852_v11 = vpop.permute.xlu0 %3557  ;;  %v1788_v13 = vpack.c.bf16 %v1740_v10, %v1740_v10  ;;  %5533 = vmatmul.msk.bf16.gmra.mxu2 %vm727_vm2, %v5745_v1 }
 0x1f4   :  { %9003 = vst [vmem:[#allocation66_spill] sm:$0xff] %v6849_v18  ;;  %v1272_v18 = vpop.f32.mrf.mxu1  ;;  %v1477_v12 = vpop.f32.mrf.mxu3 }
 0x1f5   :  { %9004 = vst [vmem:[#allocation67_spill] sm:$0xff] %v6852_v11  ;;  %v1836_v39 = vunpack.c.l.bf16 %v1788_v13  ;;  %v1357_v10 = vpop.f32.mrf.mxu2  ;;  %v9010_v11 = vmax.f32 %v6572_v6, %v6486_v34 }
 0x1f7   :  { %v6856_v42 = vpop.f32.mrf.mxu0  ;;  %1901 = vst.msk [vmem:[#allocation2 + $0x100] sm:$0xff] %vm1852_vm3, %v1836_v39  ;;  %v1593_v39 = vmax.f32 %v9010_v11, %v1354_v46 }
 0x1f8   :  { %9006 = vst [vmem:[#allocation69_spill] sm:$0xff] %v6856_v42  ;;  %3169 = vrot.lane.b32.xlu1 %v6747_v8, %s8932_s15  ;;  %2726 = vrot.lane.b32.xlu2 %v6858_v0, %s8919_s21  ;;  %v5769_v8 = vld [vmem:[%s8846_s0 + $0x2f8] sm:$0xff]  ;;  %s9023_s0 = smov 12  }
 0x1f9   :  { %2297 = vrot.lane.b32.xlu0 %v2034_v15, %s8900_s27  ;;  %5557 = vmatmul.msk.bf16.gmra.mxu3 %vm727_vm2, %v5769_v8  ;;  %v1546_v8 = vmax.f32 %v6592_v56, %v6509_v25  ;;  %v1547_v25 = vmax.f32 %v6622_v27, %v6543_v14  ;;  %vm2357_vm2 = vcmask 425296  }
 0x1fa   :  { %v6869_v54 = vpop.permute.xlu1 %2584  ;;  %v6871_v41 = vpop.permute.xlu2 %3114 }
 0x1fb   :  { %9007 = vst [vmem:[#allocation70_spill] sm:$0xff] %v6869_v54  ;;  %v6877_v13 = vpop.permute.xlu0 %2449  ;;  %v1594_v11 = vmax.f32 %v1546_v8, %v1357_v10 }
 0x1fc   :  { %9008 = vst [vmem:[#allocation71_spill] sm:$0xff] %v6871_v41  ;;  %v1641_v41 = vmax.f32 %v1593_v39, %v1474_v20  ;;  %v1479_v39 = vpop.f32.mrf.mxu3  ;;  %v1274_v42 = vpop.f32.mrf.mxu1 }
 0x1fd   :  { %9009 = vst [vmem:[#allocation72_spill] sm:$0xff] %v6877_v13  ;;  %v1359_v46 = vpop.f32.mrf.mxu2  ;;  %v1642_v56 = vmax.f32 %v1594_v11, %v1477_v12  ;;  %v6921_v12 = vld [vmem:[#allocation2 + $0xf4] sm:$0xff] }
 0x1fe   :  { %v1693_v1 = vadd.f32 %v6844_v60, %v1641_v41  ;;  %v1548_v41 = vmax.f32 %v6642_v23, %v6566_v9  ;;  %v1595_v23 = vmax.f32 %v1547_v25, %v1359_v46 }
 0x1ff   :  { %v6883_v54 = vpop.f32.mrf.mxu0  ;;  %v1694_v8 = vadd.f32 %v6844_v60, %v1642_v56 }
 0x200   :  { %9011 = vst [vmem:[#allocation73_spill] sm:$0xff] %v6883_v54  ;;  %3603 = vrot.lane.b32.xlu1 %v2034_v15, %s8928_s20  ;;  %3651 = vrot.lane.b32.xlu2 %v6797_v29, %s8886_s19  ;;  %v1741_v20 = vmax.f32 %v1693_v1, 0.0 }
 0x201   :  { %2968 = vrot.lane.b32.xlu0 %v6858_v0, %s8917_s26  ;;  %v1742_v27 = vmax.f32 %v1694_v8, 0.0 }
 0x202   :  { %v6893_v13 = vpop.permute.xlu1 %2196  ;;  %v6895_v34 = vpop.permute.xlu2 %2140  ;;  %v1789_v15 = vpack.c.bf16 %v1741_v20, %v1741_v20 }
 0x203   :  { %9012 = vst [vmem:[#allocation74_spill] sm:$0xff] %v6893_v13  ;;  %v6897_v6 = vpop.permute.xlu0 %2251 }
 0x204   :  { %9013 = vst [vmem:[#allocation75_spill] sm:$0xff] %v6895_v34  ;;  %v1837_v54 = vunpack.c.l.bf16 %v1789_v15  ;;  %v1790_v15 = vpack.c.bf16 %v1742_v27, %v1742_v27  ;;  %v1643_v34 = vmax.f32 %v1595_v23, %v1479_v39  ;;  %v1277_v8 = vpop.f32.mrf.mxu1 }
 0x205   :  { %9014 = vst [vmem:[#allocation76_spill] sm:$0xff] %v6897_v6  ;;  %v1362_v14 = vpop.f32.mrf.mxu2  ;;  %v1482_v11 = vpop.f32.mrf.mxu3 }
 0x206   :  { %1902 = vst.msk [vmem:[#allocation2 + $0x108] sm:$0xff] %vm1852_vm3, %v1837_v54  ;;  %v1596_v9 = vmax.f32 %v1548_v41, %v1362_v14  ;;  %v1838_v56 = vunpack.c.l.bf16 %v1790_v15  ;;  %v1695_v46 = vadd.f32 %v6844_v60, %v1643_v34  ;;  %v6941_v34 = vld [vmem:[#allocation2 + $0xf0] sm:$0xff] }
 0x207   :  { %v6899_v19 = vpop.f32.mrf.mxu0  ;;  %9020 = vst [vmem:[#allocation82_spill] sm:$0xff] %v6941_v34 }
 0x208   :  { %2144 = vrot.lane.b32.xlu1 %v6858_v0, %s8930_s1  ;;  %3699 = vrot.lane.b32.xlu2 %v6858_v0, %s8924_s18  ;;  %v1644_v13 = vmax.f32 %v1596_v9, %v1482_v11  ;;  %1904 = vst.msk [vmem:[#allocation2 + $0x110] sm:$0xff] %vm1852_vm3, %v1838_v56  ;;  %v1743_v14 = vmax.f32 %v1695_v46, 0.0  ;;  %v1549_v46 = vmax.f32 %v6672_v17, %v6587_v38 }
 0x209   :  { %2678 = vrot.lane.b32.xlu0 %v6797_v29, %s8973_s16  ;;  %3134 = vst.msk [vmem:[#allocation3 + $0xb0] sm:$0xff] %vm1852_vm3, %v6941_v34 }
 0x20a   :  { %v6912_v10 = vpop.permute.xlu1 %3018  ;;  %v6914_v1 = vpop.permute.xlu2 %2722  ;;  %v1696_v25 = vadd.f32 %v6844_v60, %v1644_v13  ;;  %v1791_v15 = vpack.c.bf16 %v1743_v14, %v1743_v14 }
 0x20b   :  { %9015 = vst [vmem:[#allocation77_spill] sm:$0xff] %v6912_v10  ;;  %v6917_v20 = vpop.permute.xlu0 %2824 }
 0x20c   :  { %9016 = vst [vmem:[#allocation78_spill] sm:$0xff] %v6914_v1  ;;  %v1744_v23 = vmax.f32 %v1696_v25, 0.0 }
 0x20d   :  { %9017 = vst [vmem:[#allocation79_spill] sm:$0xff] %v6917_v20  ;;  %v1364_v38 = vpop.f32.mrf.mxu2 }
 0x20e   :  { %2837 = vst.msk [vmem:[#allocation3 + $0x78] sm:$0xff] %vm8896_vm4, %v6917_v20  ;;  %v1792_v11 = vpack.c.bf16 %v1744_v23, %v1744_v23  ;;  %v1279_v23 = vpop.f32.mrf.mxu1  ;;  %v1597_v17 = vmax.f32 %v1549_v46, %v1364_v38 }
 0x20f   :  { %v1152_v54 = vpop.f32.mrf.mxu0 }
 0x210   :  { %v1512_v1 = vmax.f32 %v6063_v33, %v1152_v54  ;;  %2397 = vrot.lane.b32.xlu1 %v6858_v0, %s8905_s29  ;;  %2146 = vrot.lane.b32.xlu2 %v6921_v12, %s8930_s1 }
 0x211   :  { %3409 = vrot.lane.b32.xlu0 %v6797_v29, %s8903_s14 }
 0x212   :  { %v1560_v41 = vmax.f32 %v1512_v1, %v1272_v18  ;;  %v6932_v39 = vpop.permute.xlu1 %2776  ;;  %v6934_v27 = vpop.permute.xlu2 %3167  ;;  %v1839_v18 = vunpack.c.l.bf16 %v1791_v15  ;;  %v1840_v1 = vunpack.c.l.bf16 %v1792_v11 }
 0x213   :  { %9018 = vst [vmem:[#allocation80_spill] sm:$0xff] %v6932_v39  ;;  %v6937_v33 = vpop.permute.xlu0 %2451 }
 0x214   :  { %9019 = vst [vmem:[#allocation81_spill] sm:$0xff] %v6937_v33  ;;  %v1608_v9 = vmax.f32 %v1560_v41, %v6071_v35  ;;  %v6950_v35 = vld [vmem:[#allocation2 + $0xf2] sm:$0xff] }
 0x215   :  { %1905 = vst.msk [vmem:[#allocation2 + $0x118] sm:$0xff] %vm1852_vm3, %v1839_v18 }
 0x216   :  { %v1660_v54 = vadd.f32 %v6844_v60, %v1608_v9  ;;  %1907 = vst.msk [vmem:[#allocation2 + $0x120] sm:$0xff] %vm1852_vm3, %v1840_v1 }
 0x217   :  { %v1154_v13 = vpop.f32.mrf.mxu0 }
 0x218   :  { %v1708_v20 = vmax.f32 %v1660_v54, 0.0  ;;  %v1513_v56 = vmax.f32 %v6073_v36, %v1154_v13  ;;  %2920 = vrot.lane.b32.xlu1 %v6797_v29, %s8890_s25  ;;  %2399 = vrot.lane.b32.xlu2 %v6921_v12, %s8905_s29 }
 0x219   :  { %2096 = vrot.lane.b32.xlu0 %v6950_v35, %s8898_s13 }
 0x21a   :  { %v1756_v25 = vpack.c.bf16 %v1708_v20, %v1708_v20  ;;  %v1561_v41 = vmax.f32 %v1513_v56, %v1274_v42  ;;  %v6957_v14 = vpop.permute.xlu1 %3511  ;;  %v6959_v36 = vpop.permute.xlu2 %2042 }
 0x21b   :  { %9021 = vst [vmem:[#allocation83_spill] sm:$0xff] %v6957_v14  ;;  %v6962_v29 = vpop.permute.xlu0 %3020  ;;  %v1484_v20 = vpop.f32.mrf.mxu3 }
 0x21c   :  { %9022 = vst [vmem:[#allocation84_spill] sm:$0xff] %v6962_v29  ;;  %v1804_v9 = vunpack.c.l.bf16 %v1756_v25  ;;  %v1609_v15 = vmax.f32 %v1561_v41, %v6075_v37  ;;  %v1645_v54 = vmax.f32 %v1597_v17, %v1484_v20  ;;  %v1550_v37 = vmax.f32 %v6692_v24, %v6613_v4  ;;  %v1282_v17 = vpop.f32.mrf.mxu1 }
 0x21d   :  { %v1367_v38 = vpop.f32.mrf.mxu2 }
 0x21e   :  { %1853 = vst.msk [vmem:[#allocation2] sm:$0xff] %vm1852_vm3, %v1804_v9  ;;  %v1661_v11 = vadd.f32 %v6844_v60, %v1609_v15  ;;  %v1697_v1 = vadd.f32 %v6844_v60, %v1645_v54  ;;  %v1598_v24 = vmax.f32 %v1550_v37, %v1367_v38 }
 0x21f   :  { %v1157_v42 = vpop.f32.mrf.mxu0 }
 0x220   :  { %v1709_v13 = vmax.f32 %v1661_v11, 0.0  ;;  %v1514_v18 = vmax.f32 %v6083_v40, %v1157_v42  ;;  %3461 = vrot.lane.b32.xlu1 %v6858_v0, %s9023_s0  ;;  %2728 = vrot.lane.b32.xlu2 %v6921_v12, %s8919_s21  ;;  %v1745_v0 = vmax.f32 %v1697_v1, 0.0  ;;  %v2035_v42 = vld [vmem:[#allocation2 + $0xf0] sm:$0xff] }
 0x221   :  { %2349 = vrot.lane.b32.xlu0 %v6950_v35, %s8934_s28 }
 0x222   :  { %v1757_v56 = vpack.c.bf16 %v1709_v13, %v1709_v13  ;;  %v1562_v46 = vmax.f32 %v1514_v18, %v1277_v8  ;;  %v6977_v25 = vpop.permute.xlu1 %2876  ;;  %v6979_v41 = vpop.permute.xlu2 %2295  ;;  %v1793_v4 = vpack.c.bf16 %v1745_v0, %v1745_v0 }
 0x223   :  { %9024 = vst [vmem:[#allocation85_spill] sm:$0xff] %v6977_v25  ;;  %v6981_v40 = vpop.permute.xlu0 %2090  ;;  %v1487_v20 = vpop.f32.mrf.mxu3 }
 0x224   :  { %9025 = vst [vmem:[#allocation86_spill] sm:$0xff] %v6981_v40  ;;  %v1805_v9 = vunpack.c.l.bf16 %v1757_v56  ;;  %v1610_v15 = vmax.f32 %v1562_v46, %v6095_v43  ;;  %v1841_v54 = vunpack.c.l.bf16 %v1793_v4  ;;  %v1646_v13 = vmax.f32 %v1598_v24, %v1487_v20  ;;  %v1284_v20 = vpop.f32.mrf.mxu1 }
 0x225   :  { %v1551_v43 = vmax.f32 %v6708_v52, %v6637_v58  ;;  %v1369_v58 = vpop.f32.mrf.mxu2  ;;  %v1924_v52 = vld [vmem:[#allocation2] sm:$0xff] }
 0x226   :  { %1854 = vst.msk [vmem:[#allocation2 + $0x8] sm:$0xff] %vm1852_vm3, %v1805_v9  ;;  %v1662_v11 = vadd.f32 %v6844_v60, %v1610_v15  ;;  %v1698_v37 = vadd.f32 %v6844_v60, %v1646_v13 }
 0x227   :  { %v1159_v8 = vpop.f32.mrf.mxu0  ;;  %1908 = vst.msk [vmem:[#allocation2 + $0x128] sm:$0xff] %vm1852_vm3, %v1841_v54  ;;  %v1599_v24 = vmax.f32 %v1551_v43, %v1369_v58 }
 0x228   :  { %v1710_v18 = vmax.f32 %v1662_v11, 0.0  ;;  %v1515_v40 = vmax.f32 %v6097_v44, %v1159_v8  ;;  %2046 = vrot.lane.b32.xlu1 %v2035_v42, %s8893_s30  ;;  %3653 = vrot.lane.b32.xlu2 %v6950_v35, %s8886_s19  ;;  %v1746_v9 = vmax.f32 %v1698_v37, 0.0  ;;  %1928 = vst.msk [vmem:[#allocation3] sm:$0xff] %vm1852_vm3, %v1924_v52  ;;  %s9070_s19 = smov 102  }
 0x229   :  { %2970 = vrot.lane.b32.xlu0 %v6921_v12, %s8917_s26 }
 0x22a   :  { %v1758_v1 = vpack.c.bf16 %v1710_v18, %v1710_v18  ;;  %v1563_v56 = vmax.f32 %v1515_v40, %v1279_v23  ;;  %v6996_v46 = vpop.permute.xlu1 %2501  ;;  %v6998_v44 = vpop.permute.xlu2 %3359  ;;  %v1794_v4 = vpack.c.bf16 %v1746_v9, %v1746_v9 }
 0x22b   :  { %9026 = vst [vmem:[#allocation87_spill] sm:$0xff] %v6996_v46  ;;  %v7000_v0 = vpop.permute.xlu0 %2674  ;;  %v1489_v40 = vpop.f32.mrf.mxu3 }
 0x22c   :  { %9027 = vst [vmem:[#allocation88_spill] sm:$0xff] %v7000_v0  ;;  %v1806_v15 = vunpack.c.l.bf16 %v1758_v1  ;;  %v1611_v38 = vmax.f32 %v1563_v56, %v6099_v45  ;;  %v1842_v8 = vunpack.c.l.bf16 %v1794_v4  ;;  %v1647_v54 = vmax.f32 %v1599_v24, %v1489_v40 }
 0x22d   :  { %v1372_v52 = vpop.f32.mrf.mxu2 }
 0x22e   :  { %1856 = vst.msk [vmem:[#allocation2 + $0x10] sm:$0xff] %vm1852_vm3, %v1806_v15  ;;  %v1663_v23 = vadd.f32 %v6844_v60, %v1611_v38  ;;  %v1699_v45 = vadd.f32 %v6844_v60, %v1647_v54 }
 0x22f   :  { %v1162_v11 = vpop.f32.mrf.mxu0  ;;  %1910 = vst.msk [vmem:[#allocation2 + $0x130] sm:$0xff] %vm1852_vm3, %v1842_v8 }
 0x230   :  { %v1711_v13 = vmax.f32 %v1663_v23, 0.0  ;;  %v1516_v18 = vmax.f32 %v6104_v47, %v1162_v11  ;;  %2299 = vrot.lane.b32.xlu1 %v2035_v42, %s8900_s27  ;;  %3701 = vrot.lane.b32.xlu2 %v6921_v12, %s8924_s18  ;;  %v1747_v47 = vmax.f32 %v1699_v45, 0.0  ;;  %v2290_v23 = vld [vmem:[#allocation2 + $0x100] sm:$0xff] }
 0x231   :  { %2680 = vrot.lane.b32.xlu0 %v6950_v35, %s8973_s16 }
 0x232   :  { %v1759_v43 = vpack.c.bf16 %v1711_v13, %v1711_v13  ;;  %v1564_v37 = vmax.f32 %v1516_v18, %v1282_v17  ;;  %v7014_v1 = vpop.permute.xlu1 %3068  ;;  %v7016_v56 = vpop.permute.xlu2 %2724  ;;  %v1795_v58 = vpack.c.bf16 %v1747_v47, %v1747_v47  ;;  %v1553_v18 = vmax.f32 %v6745_v16, %v6687_v30 }
 0x233   :  { %9028 = vst [vmem:[#allocation89_spill] sm:$0xff] %v7014_v1  ;;  %v7018_v9 = vpop.permute.xlu0 %3215  ;;  %v1492_v11 = vpop.f32.mrf.mxu3 }
 0x234   :  { %v1807_v15 = vunpack.c.l.bf16 %v1759_v43  ;;  %v1612_v38 = vmax.f32 %v1564_v37, %v6111_v49  ;;  %v1843_v40 = vunpack.c.l.bf16 %v1795_v58  ;;  %v1552_v49 = vmax.f32 %v6727_v26, %v6665_v31  ;;  %v1287_v13 = vpop.f32.mrf.mxu1  ;;  %v2057_v26 = vld [vmem:[#allocation2 + $0x120] sm:$0xff] }
 0x235   :  { %v7021_v4 = vld [vmem:[#allocation2 + $0x10] sm:$0xff] }
 0x236   :  { %1857 = vst.msk [vmem:[#allocation2 + $0x18] sm:$0xff] %vm1852_vm3, %v1807_v15  ;;  %v1664_v24 = vadd.f32 %v6844_v60, %v1612_v38  ;;  %v1600_v47 = vmax.f32 %v1552_v49, %v1372_v52  ;;  %v1374_v15 = vpop.f32.mrf.mxu2 }
 0x237   :  { %v1164_v17 = vpop.f32.mrf.mxu0  ;;  %1929 = vst.msk [vmem:[#allocation3 + $0x10] sm:$0xff] %vm1852_vm3, %v7021_v4  ;;  %v1601_v58 = vmax.f32 %v1553_v18, %v1374_v15 }
 0x238   :  { %v1712_v8 = vmax.f32 %v1664_v24, 0.0  ;;  %v1517_v54 = vmax.f32 %v6113_v50, %v1164_v17  ;;  %3605 = vrot.lane.b32.xlu1 %v2035_v42, %s8928_s20  ;;  %2301 = vrot.lane.b32.xlu2 %v2290_v23, %s8900_s27  ;;  %1954 = vst.msk [vmem:[#allocation3 + $0x10] sm:$0xff] %vm8923_vm5, %v6541_v28  ;;  %v1648_v30 = vmax.f32 %v1600_v47, %v1492_v11  ;;  %v2390_v23 = vld [vmem:[#allocation2 + $0x104] sm:$0xff] }
 0x239   :  { %3411 = vrot.lane.b32.xlu0 %v6950_v35, %s8903_s14  ;;  %1911 = vst.msk [vmem:[#allocation2 + $0x138] sm:$0xff] %vm1852_vm3, %v1843_v40 }
 0x23a   :  { %v1760_v50 = vpack.c.bf16 %v1712_v8, %v1712_v8  ;;  %v1565_v45 = vmax.f32 %v1517_v54, %v1284_v20  ;;  %v7039_v42 = vpop.permute.xlu1 %3116  ;;  %v7041_v43 = vpop.permute.xlu2 %3459  ;;  %v1700_v52 = vadd.f32 %v6844_v60, %v1648_v30 }
 0x23b   :  { %9029 = vst [vmem:[#allocation90_spill] sm:$0xff] %v7039_v42  ;;  %v7043_v37 = vpop.permute.xlu0 %2142  ;;  %v1494_v20 = vpop.f32.mrf.mxu3 }
 0x23c   :  { %v1808_v28 = vunpack.c.l.bf16 %v1760_v50  ;;  %v1613_v31 = vmax.f32 %v1565_v45, %v6115_v51  ;;  %v1649_v51 = vmax.f32 %v1601_v58, %v1494_v20  ;;  %v1289_v18 = vpop.f32.mrf.mxu1 }
 0x23e   :  { %1859 = vst.msk [vmem:[#allocation2 + $0x20] sm:$0xff] %vm1852_vm3, %v1808_v28  ;;  %v1665_v38 = vadd.f32 %v6844_v60, %v1613_v31  ;;  %v1701_v49 = vadd.f32 %v6844_v60, %v1649_v51 }
 0x23f   :  { %v1167_v16 = vpop.f32.mrf.mxu0 }
 0x240   :  { %v1713_v24 = vmax.f32 %v1665_v38, 0.0  ;;  %v1518_v17 = vmax.f32 %v6120_v53, %v1167_v16  ;;  %2922 = vrot.lane.b32.xlu1 %v6950_v35, %s8890_s25  ;;  %2065 = vrot.lane.b32.xlu2 %v2057_v26, %s8973_s16  ;;  %v1748_v35 = vmax.f32 %v1700_v52, 0.0  ;;  %v1749_v28 = vmax.f32 %v1701_v49, 0.0  ;;  %v2340_v49 = vld [vmem:[#allocation2 + $0x102] sm:$0xff] }
 0x241   :  { %2401 = vrot.lane.b32.xlu0 %v2390_v23, %s8905_s29 }
 0x242   :  { %v1761_v40 = vpack.c.bf16 %v1713_v24, %v1713_v24  ;;  %v1566_v8 = vmax.f32 %v1518_v17, %v1287_v13  ;;  %v7054_v54 = vpop.permute.xlu1 %2040  ;;  %v7056_v11 = vpop.permute.xlu2 %2094  ;;  %v1796_v31 = vpack.c.bf16 %v1748_v35, %v1748_v35  ;;  %v1797_v15 = vpack.c.bf16 %v1749_v28, %v1749_v28 }
 0x243   :  { %9030 = vst [vmem:[#allocation91_spill] sm:$0xff] %v7054_v54  ;;  %v7059_v53 = vpop.permute.xlu0 %2395  ;;  %v9042_v54 = vld [vmem:[#allocation14_spill] sm:$0xff] }
 0x244   :  { %v1809_v50 = vunpack.c.l.bf16 %v1761_v40  ;;  %v1614_v45 = vmax.f32 %v1566_v8, %v6127_v55  ;;  %v1844_v58 = vunpack.c.l.bf16 %v1796_v31  ;;  %v1845_v55 = vunpack.c.l.bf16 %v1797_v15  ;;  %v2738_v40 = vld [vmem:[#allocation2 + $0x124] sm:$0xff]  ;;  %v1292_v8 = vpop.f32.mrf.mxu1 }
 0x245   :  { %v7062_v47 = vld [vmem:[#allocation2 + $0x20] sm:$0xff] }
 0x246   :  { %1860 = vst.msk [vmem:[#allocation2 + $0x28] sm:$0xff] %vm1852_vm3, %v1809_v50  ;;  %v1666_v13 = vadd.f32 %v6844_v60, %v1614_v45 }
 0x247   :  { %v1169_v38 = vpop.f32.mrf.mxu0  ;;  %1930 = vst.msk [vmem:[#allocation3 + $0x20] sm:$0xff] %vm1852_vm3, %v7062_v47 }
 0x248   :  { %v1714_v16 = vmax.f32 %v1666_v13, 0.0  ;;  %v1519_v30 = vmax.f32 %v6132_v57, %v1169_v38  ;;  %3463 = vrot.lane.b32.xlu1 %v6921_v12, %s9023_s0  ;;  %3143 = vrot.lane.b32.xlu2 %v2057_v26, %s9031_s12  ;;  %1955 = vst.msk [vmem:[#allocation3 + $0x20] sm:$0xff] %vm8923_vm5, %v6583_v32  ;;  %v7097_v38 = vld [vmem:[#allocation2 + $0x130] sm:$0xff] }
 0x249   :  { %2972 = vrot.lane.b32.xlu0 %v2390_v23, %s8917_s26  ;;  %1913 = vst.msk [vmem:[#allocation2 + $0x140] sm:$0xff] %vm1852_vm3, %v1844_v58 }
 0x24a   :  { %v1762_v20 = vpack.c.bf16 %v1714_v16, %v1714_v16  ;;  %v1567_v24 = vmax.f32 %v1519_v30, %v1289_v18  ;;  %v7076_v17 = vpop.permute.xlu1 %2092  ;;  %v7078_v51 = vpop.permute.xlu2 %2347  ;;  %1914 = vst.msk [vmem:[#allocation2 + $0x148] sm:$0xff] %vm1852_vm3, %v1845_v55  ;;  %v3715_v30 = vld [vmem:[#allocation2 + $0x120] sm:$0xff] }
 0x24b   :  { %v7081_v57 = vpop.permute.xlu0 %2966  ;;  %3720 = vst.msk [vmem:[#allocation3 + $0xc0] sm:$0xff] %vm1852_vm3, %v3715_v30 }
 0x24c   :  { %v1810_v12 = vunpack.c.l.bf16 %v1762_v20  ;;  %v1615_v52 = vmax.f32 %v1567_v24, %v6139_v59  ;;  %v1294_v16 = vpop.f32.mrf.mxu1 }
 0x24e   :  { %1862 = vst.msk [vmem:[#allocation2 + $0x30] sm:$0xff] %vm1852_vm3, %v1810_v12  ;;  %v1667_v32 = vadd.f32 %v6844_v60, %v1615_v52 }
 0x24f   :  { %v1172_v23 = vpop.f32.mrf.mxu0 }
 0x250   :  { %v1715_v18 = vmax.f32 %v1667_v32, 0.0  ;;  %v1520_v35 = vmax.f32 %v6144_v61, %v1172_v23  ;;  %2351 = vrot.lane.b32.xlu1 %v2340_v49, %s8934_s28  ;;  %2746 = vrot.lane.b32.xlu2 %v2738_v40, %s8930_s1  ;;  %v7120_v23 = vld [vmem:[#allocation2 + $0x132] sm:$0xff] }
 0x251   :  { %2650 = vrot.lane.b32.xlu0 %v2057_v26, %s8893_s30 }
 0x252   :  { %v1763_v50 = vpack.c.bf16 %v1715_v18, %v1715_v18  ;;  %v1568_v45 = vmax.f32 %v1520_v35, %v1292_v8  ;;  %v7090_v59 = vpop.permute.xlu1 %2345  ;;  %v7092_v28 = vpop.permute.xlu2 %2726 }
 0x253   :  { %v7094_v31 = vpop.permute.xlu0 %2676 }
 0x254   :  { %v1811_v13 = vunpack.c.l.bf16 %v1763_v50  ;;  %v1616_v15 = vmax.f32 %v1568_v45, %v6151_v63  ;;  %v2690_v63 = vld [vmem:[#allocation2 + $0x122] sm:$0xff] }
 0x255   :  { %v7099_v61 = vld [vmem:[#allocation2 + $0x30] sm:$0xff] }
 0x256   :  { %1863 = vst.msk [vmem:[#allocation2 + $0x38] sm:$0xff] %vm1852_vm3, %v1811_v13  ;;  %v1668_v58 = vadd.f32 %v6844_v60, %v1616_v15  ;;  %v1555_v13 = vmax.f32 %v6799_v48, %v6722_v21 }
 0x257   :  { %v1174_v26 = vpop.f32.mrf.mxu0  ;;  %1931 = vst.msk [vmem:[#allocation3 + $0x30] sm:$0xff] %vm1852_vm3, %v7099_v61 }
 0x258   :  { %v1716_v55 = vmax.f32 %v1668_v58, 0.0  ;;  %v1521_v20 = vmax.f32 %v6158_v2, %v1174_v26  ;;  %2924 = vrot.lane.b32.xlu1 %v2340_v49, %s8890_s25  ;;  %2894 = vrot.lane.b32.xlu2 %v7097_v38, %s8900_s27  ;;  %1956 = vst.msk [vmem:[#allocation3 + $0x30] sm:$0xff] %vm8923_vm5, %v6733_v22  ;;  %v1377_v49 = vpop.f32.mrf.mxu2  ;;  %v1497_v35 = vpop.f32.mrf.mxu3  ;;  %v9033_v58 = vld [vmem:[#allocation8_spill] sm:$0xff] }
 0x259   :  { %2698 = vrot.lane.b32.xlu0 %v2690_v63, %s8898_s13 }
 0x25a   :  { %v1764_v24 = vpack.c.bf16 %v1716_v55, %v1716_v55  ;;  %v1569_v12 = vmax.f32 %v1521_v20, %v1294_v16  ;;  %v7113_v52 = vpop.permute.xlu1 %2918  ;;  %v7115_v40 = vpop.permute.xlu2 %3651  ;;  %v9034_v20 = vld [vmem:[#allocation10_spill] sm:$0xff] }
 0x25b   :  { %v7117_v2 = vpop.permute.xlu0 %3217 }
 0x25c   :  { %v1812_v8 = vunpack.c.l.bf16 %v1764_v24  ;;  %v1617_v32 = vmax.f32 %v1569_v12, %v6165_v5  ;;  %v1554_v5 = vmax.f32 %v6776_v62, %v6706_v3 }
 0x25d   :  { %v7468_v10 = vld [vmem:[#allocation2 + $0x32] sm:$0xff] }
 0x25e   :  { %1865 = vst.msk [vmem:[#allocation2 + $0x40] sm:$0xff] %vm1852_vm3, %v1812_v8  ;;  %v1669_v22 = vadd.f32 %v6844_v60, %v1617_v32  ;;  %v1602_v62 = vmax.f32 %v1554_v5, %v1377_v49  ;;  %v7150_v49 = vld [vmem:[#allocation2 + $0x130] sm:$0xff]  ;;  %v9038_v5 = vld [vmem:[#allocation64_spill] sm:$0xff] }
 0x25f   :  { %v1177_v18 = vpop.f32.mrf.mxu0  ;;  %9036 = vst [vmem:[#allocation8_spill] sm:$0xff] %v7150_v49 }
 0x260   :  { %v1717_v50 = vmax.f32 %v1669_v22, 0.0  ;;  %v1522_v45 = vmax.f32 %v6170_v7, %v1177_v18  ;;  %2115 = vrot.lane.b32.xlu1 %v2690_v63, %s8919_s21  ;;  %2117 = vrot.lane.b32.xlu2 %v7120_v23, %s8919_s21  ;;  %v1650_v12 = vmax.f32 %v1602_v62, %v1497_v35  ;;  %v1499_v8 = vpop.f32.mrf.mxu3  ;;  %v9035_v22 = vld [vmem:[#allocation11_spill] sm:$0xff]  ;;  %3721 = vst.msk [vmem:[#allocation3 + $0xd0] sm:$0xff] %vm1852_vm3, %v7150_v49 }
 0x261   :  { %3191 = vrot.lane.b32.xlu0 %v2690_v63, %s9032_s2  ;;  %v1379_v63 = vpop.f32.mrf.mxu2  ;;  %v9037_v35 = vld [vmem:[#allocation51_spill] sm:$0xff] }
 0x262   :  { %v1765_v15 = vpack.c.bf16 %v1717_v50, %v1717_v50  ;;  %v1570_v26 = vmax.f32 %v1522_v45, %v9033_v58  ;;  %v7134_v16 = vpop.permute.xlu1 %3407  ;;  %v7136_v30 = vpop.permute.xlu2 %3699  ;;  %v1603_v48 = vmax.f32 %v1555_v13, %v1379_v63  ;;  %v1702_v45 = vadd.f32 %v6844_v60, %v1650_v12  ;;  %v9039_v58 = vld [vmem:[#allocation9_spill] sm:$0xff] }
 0x263   :  { %3420 = vst.msk [vmem:[#allocation3 + $0x88] sm:$0xff] %vm8896_vm4, %v7134_v16  ;;  %v7140_v7 = vpop.permute.xlu0 %2044  ;;  %v1556_v13 = vmax.f32 %v9038_v5, %v9037_v35 }
 0x264   :  { %v1813_v55 = vunpack.c.l.bf16 %v1765_v15  ;;  %v1618_v3 = vmax.f32 %v1570_v26, %v9034_v20  ;;  %v1651_v50 = vmax.f32 %v1603_v48, %v1499_v8  ;;  %v1750_v63 = vmax.f32 %v1702_v45, 0.0  ;;  %v9041_v48 = vld [vmem:[#allocation13_spill] sm:$0xff]  ;;  %v7168_v8 = vld [vmem:[#allocation2 + $0x140] sm:$0xff] }
 0x266   :  { %1866 = vst.msk [vmem:[#allocation2 + $0x48] sm:$0xff] %vm1852_vm3, %v1813_v55  ;;  %v1670_v21 = vadd.f32 %v6844_v60, %v1618_v3  ;;  %v1703_v3 = vadd.f32 %v6844_v60, %v1651_v50 }
 0x267   :  { %v1179_v24 = vpop.f32.mrf.mxu0 }
 0x268   :  { %v1718_v32 = vmax.f32 %v1670_v21, 0.0  ;;  %v1523_v18 = vmax.f32 %v9035_v22, %v1179_v24  ;;  %3145 = vrot.lane.b32.xlu1 %v7097_v38, %s9031_s12  ;;  %2370 = vrot.lane.b32.xlu2 %v7120_v23, %s8917_s26  ;;  %v1751_v12 = vmax.f32 %v1703_v3, 0.0  ;;  %v1798_v22 = vpack.c.bf16 %v1750_v63, %v1750_v63  ;;  %v1502_v50 = vpop.f32.mrf.mxu3  ;;  %v9044_v3 = vld [vmem:[#allocation69_spill] sm:$0xff] }
 0x269   :  { %2067 = vrot.lane.b32.xlu0 %v7097_v38, %s8973_s16  ;;  %v1382_v35 = vpop.f32.mrf.mxu2 }
 0x26a   :  { %v1766_v15 = vpack.c.bf16 %v1718_v32, %v1718_v32  ;;  %v1571_v26 = vmax.f32 %v1523_v18, %v9039_v58  ;;  %v7160_v55 = vpop.permute.xlu1 %3169  ;;  %v7162_v20 = vpop.permute.xlu2 %2146  ;;  %v1799_v18 = vpack.c.bf16 %v1751_v12, %v1751_v12  ;;  %v1604_v5 = vmax.f32 %v1556_v13, %v1382_v35  ;;  %v9043_v13 = vld [vmem:[#allocation55_spill] sm:$0xff] }
 0x26b   :  { %9040 = vst [vmem:[#allocation10_spill] sm:$0xff] %v7162_v20  ;;  %v7165_v62 = vpop.permute.xlu0 %2297  ;;  %v1846_v49 = vunpack.c.l.bf16 %v1798_v22  ;;  %v1557_v63 = vmax.f32 %v9044_v3, %v9043_v13  ;;  %v2982_v3 = vld [vmem:[#allocation2 + $0x134] sm:$0xff]  ;;  %v2548_v20 = vld [vmem:[#allocation2 + $0x22] sm:$0xff] }
 0x26c   :  { %v1814_v21 = vunpack.c.l.bf16 %v1766_v15  ;;  %v1619_v24 = vmax.f32 %v1571_v26, %v9041_v48  ;;  %v1847_v15 = vunpack.c.l.bf16 %v1799_v18  ;;  %v1652_v26 = vmax.f32 %v1604_v5, %v1502_v50  ;;  %v9045_v48 = vld [vmem:[#allocation12_spill] sm:$0xff] }
 0x26d   :  { %1916 = vst.msk [vmem:[#allocation2 + $0x150] sm:$0xff] %vm1852_vm3, %v1846_v49  ;;  %v9047_v18 = vld [vmem:[#allocation16_spill] sm:$0xff] }
 0x26e   :  { %1868 = vst.msk [vmem:[#allocation2 + $0x50] sm:$0xff] %vm1852_vm3, %v1814_v21  ;;  %v1671_v32 = vadd.f32 %v6844_v60, %v1619_v24  ;;  %v1704_v22 = vadd.f32 %v6844_v60, %v1652_v26 }
 0x26f   :  { %v1182_v58 = vpop.f32.mrf.mxu0  ;;  %1917 = vst.msk [vmem:[#allocation2 + $0x158] sm:$0xff] %vm1852_vm3, %v1847_v15  ;;  %v9048_v15 = vld [vmem:[#allocation17_spill] sm:$0xff] }
 0x270   :  { %v1719_v0 = vmax.f32 %v1671_v32, 0.0  ;;  %v1524_v45 = vmax.f32 %v9042_v54, %v1182_v58  ;;  %2942 = vrot.lane.b32.xlu2 %v7120_v23, %s8934_s28  ;;  %2069 = vrot.lane.b32.xlu1 %v7168_v8, %s8973_s16  ;;  %v1752_v49 = vmax.f32 %v1704_v22, 0.0  ;;  %v9051_v22 = vld [vmem:[#allocation73_spill] sm:$0xff] }
 0x271   :  { %2320 = vrot.lane.b32.xlu0 %v7097_v38, %s8890_s25  ;;  %v1384_v58 = vpop.f32.mrf.mxu2 }
 0x272   :  { %v1767_v21 = vpack.c.bf16 %v1719_v0, %v1719_v0  ;;  %v1572_v24 = vmax.f32 %v1524_v45, %v9045_v48  ;;  %v7183_v54 = vpop.permute.xlu1 %3603  ;;  %v7185_v12 = vpop.permute.xlu2 %2399  ;;  %v1800_v50 = vpack.c.bf16 %v1752_v49, %v1752_v49  ;;  %v1605_v45 = vmax.f32 %v1557_v63, %v1384_v58  ;;  %v9050_v63 = vld [vmem:[#allocation60_spill] sm:$0xff] }
 0x273   :  { %9046 = vst [vmem:[#allocation11_spill] sm:$0xff] %v7185_v12  ;;  %v7189_v35 = vpop.permute.xlu0 %2968  ;;  %v1504_v48 = vpop.f32.mrf.mxu3 }
 0x274   :  { %v1815_v32 = vunpack.c.l.bf16 %v1767_v21  ;;  %v1620_v5 = vmax.f32 %v1572_v24, %v9047_v18  ;;  %v1848_v26 = vunpack.c.l.bf16 %v1800_v50  ;;  %v1653_v21 = vmax.f32 %v1605_v45, %v1504_v48  ;;  %v7198_v24 = vld [vmem:[#allocation2 + $0x140] sm:$0xff]  ;;  %v9054_v48 = vld [vmem:[#allocation18_spill] sm:$0xff] }
 0x275   :  { %9049 = vst [vmem:[#allocation51_spill] sm:$0xff] %v7198_v24 }
 0x276   :  { %1869 = vst.msk [vmem:[#allocation2 + $0x58] sm:$0xff] %vm1852_vm3, %v1815_v32  ;;  %v1672_v0 = vadd.f32 %v6844_v60, %v1620_v5  ;;  %v1558_v32 = vmax.f32 %v9051_v22, %v9050_v63  ;;  %v9052_v5 = vld [vmem:[#allocation15_spill] sm:$0xff]  ;;  %v1705_v50 = vadd.f32 %v6844_v60, %v1653_v21 }
 0x277   :  { %v1184_v13 = vpop.f32.mrf.mxu0  ;;  %3722 = vst.msk [vmem:[#allocation3 + $0xe0] sm:$0xff] %vm1852_vm3, %v7198_v24 }
 0x278   :  { %v1720_v42 = vmax.f32 %v1672_v0, 0.0  ;;  %v1525_v1 = vmax.f32 %v9048_v15, %v1184_v13  ;;  %2990 = vrot.lane.b32.xlu2 %v2982_v3, %s8905_s29  ;;  %2322 = vrot.lane.b32.xlu1 %v7168_v8, %s8890_s25  ;;  %1919 = vst.msk [vmem:[#allocation2 + $0x160] sm:$0xff] %vm1852_vm3, %v1848_v26  ;;  %v1753_v24 = vmax.f32 %v1705_v50, 0.0 }
 0x279   :  { %2652 = vrot.lane.b32.xlu0 %v7097_v38, %s8893_s30  ;;  %v1387_v46 = vpop.f32.mrf.mxu2 }
 0x27a   :  { %v1768_v18 = vpack.c.bf16 %v1720_v42, %v1720_v42  ;;  %v1573_v49 = vmax.f32 %v1525_v1, %v9052_v5  ;;  %v7207_v58 = vpop.permute.xlu1 %2144  ;;  %v7209_v0 = vpop.permute.xlu2 %2728  ;;  %v1801_v1 = vpack.c.bf16 %v1753_v24, %v1753_v24  ;;  %v1606_v63 = vmax.f32 %v1558_v32, %v1387_v46 }
 0x27b   :  { %9053 = vst [vmem:[#allocation64_spill] sm:$0xff] %v7209_v0  ;;  %v7213_v45 = vpop.permute.xlu0 %2678 }
 0x27c   :  { %v1816_v13 = vunpack.c.l.bf16 %v1768_v18  ;;  %v1621_v15 = vmax.f32 %v1573_v49, %v9054_v48  ;;  %v1507_v22 = vpop.f32.mrf.mxu3  ;;  %v1849_v26 = vunpack.c.l.bf16 %v1801_v1  ;;  %v9056_v18 = vld [vmem:[#allocation68_spill] sm:$0xff] }
 0x27d   :  { %v1654_v21 = vmax.f32 %v1606_v63, %v1507_v22  ;;  %v1559_v49 = vmax.f32 %v6899_v19, %v9056_v18  ;;  %v2935_v1 = vld [vmem:[#allocation2 + $0x142] sm:$0xff] }
 0x27e   :  { %1871 = vst.msk [vmem:[#allocation2 + $0x60] sm:$0xff] %vm1852_vm3, %v1816_v13  ;;  %v1673_v42 = vadd.f32 %v6844_v60, %v1621_v15 }
 0x27f   :  { %1920 = vst.msk [vmem:[#allocation2 + $0x168] sm:$0xff] %vm1852_vm3, %v1849_v26  ;;  %v1706_v46 = vadd.f32 %v6844_v60, %v1654_v21 }
 0x280   :  { %v1721_v5 = vmax.f32 %v1673_v42, 0.0  ;;  %2748 = vrot.lane.b32.xlu2 %v2982_v3, %s8930_s1  ;;  %2896 = vrot.lane.b32.xlu1 %v7168_v8, %s8900_s27 }
 0x281   :  { %3383 = vrot.lane.b32.xlu0 %v7097_v38, %s9055_s22  ;;  %v1754_v48 = vmax.f32 %v1706_v46, 0.0  ;;  %v1389_v38 = vpop.f32.mrf.mxu2 }
 0x282   :  { %v1769_v50 = vpack.c.bf16 %v1721_v5, %v1721_v5  ;;  %v7225_v13 = vpop.permute.xlu1 %2397  ;;  %v7227_v24 = vpop.permute.xlu2 %3653  ;;  %v1607_v42 = vmax.f32 %v1559_v49, %v1389_v38 }
 0x283   :  { %9057 = vst [vmem:[#allocation9_spill] sm:$0xff] %v7227_v24  ;;  %v7231_v3 = vpop.permute.xlu0 %3409  ;;  %v1802_v19 = vpack.c.bf16 %v1754_v48, %v1754_v48 }
 0x284   :  { %9058 = vst [vmem:[#allocation13_spill] sm:$0xff] %v7231_v3  ;;  %v1817_v32 = vunpack.c.l.bf16 %v1769_v50  ;;  %v1509_v63 = vpop.f32.mrf.mxu3 }
 0x285   :  { %3422 = vst.msk [vmem:[#allocation3 + $0x98] sm:$0xff] %vm8896_vm4, %v7231_v3  ;;  %v7235_v15 = vld [vmem:[#allocation2 + $0x60] sm:$0xff]  ;;  %v1850_v22 = vunpack.c.l.bf16 %v1802_v19  ;;  %v1655_v5 = vmax.f32 %v1607_v42, %v1509_v63  ;;  %v2888_v19 = vld [vmem:[#allocation2 + $0x150] sm:$0xff] }
 0x286   :  { %1872 = vst.msk [vmem:[#allocation2 + $0x68] sm:$0xff] %vm1852_vm3, %v1817_v32 }
 0x287   :  { %2542 = vst.msk [vmem:[#allocation3 + $0x40] sm:$0xff] %vm1852_vm3, %v7235_v15  ;;  %v1707_v18 = vadd.f32 %v6844_v60, %v1655_v5  ;;  %v2110_v5 = vld [vmem:[#allocation2 + $0x152] sm:$0xff] }
 0x288   :  { %3435 = vrot.lane.b32.xlu2 %v7120_v23, %s9059_s23  ;;  %2944 = vrot.lane.b32.xlu1 %v2935_v1, %s8934_s28  ;;  %1922 = vst.msk [vmem:[#allocation2 + $0x170] sm:$0xff] %vm1852_vm3, %v1850_v22  ;;  %v2740_v22 = vld [vmem:[#allocation2 + $0x144] sm:$0xff] }
 0x289   :  { %2700 = vrot.lane.b32.xlu0 %v7120_v23, %s8898_s13  ;;  %v1755_v50 = vmax.f32 %v1707_v18, 0.0  ;;  %v3718_v18 = vld [vmem:[#allocation2 + $0x150] sm:$0xff] }
 0x28a   :  { %v7245_v26 = vpop.permute.xlu1 %2920  ;;  %v7247_v21 = vpop.permute.xlu2 %3701  ;;  %3723 = vst.msk [vmem:[#allocation3 + $0xf0] sm:$0xff] %vm1852_vm3, %v3718_v18 }
 0x28b   :  { %9060 = vst [vmem:[#allocation14_spill] sm:$0xff] %v7247_v21  ;;  %v7251_v49 = vpop.permute.xlu0 %2096  ;;  %v1803_v46 = vpack.c.bf16 %v1755_v50, %v1755_v50 }
 0x28c   :  { %9061 = vst [vmem:[#allocation55_spill] sm:$0xff] %v7251_v49 }
 0x28d   :  { %v1851_v32 = vunpack.c.l.bf16 %v1803_v46 }
 0x28f   :  { %1923 = vst.msk [vmem:[#allocation2 + $0x178] sm:$0xff] %vm1852_vm3, %v1851_v32  ;;  %vm8936_vm3 = vcmask 507296  }
 0x290   :  { %3193 = vrot.lane.b32.xlu2 %v7120_v23, %s9032_s2  ;;  %3437 = vrot.lane.b32.xlu1 %v2935_v1, %s9059_s23 }
 0x291   :  { %2654 = vrot.lane.b32.xlu0 %v7168_v8, %s8893_s30 }
 0x292   :  { %v7258_v48 = vpop.permute.xlu1 %3461  ;;  %v7260_v38 = vpop.permute.xlu2 %2301 }
 0x293   :  { %9062 = vst [vmem:[#allocation69_spill] sm:$0xff] %v7260_v38  ;;  %v7263_v60 = vpop.permute.xlu0 %2349  ;;  %v2985_v38 = vld [vmem:[#allocation2 + $0x164] sm:$0xff] }
 0x294   :  { %9063 = vst [vmem:[#allocation12_spill] sm:$0xff] %v7263_v60 }
 0x298   :  { %3627 = vrot.lane.b32.xlu2 %v7168_v8, %s9064_s17  ;;  %2898 = vrot.lane.b32.xlu1 %v2888_v19, %s8900_s27 }
 0x299   :  { %2119 = vrot.lane.b32.xlu0 %v2935_v1, %s8919_s21 }
 0x29a   :  { %v7269_v23 = vpop.permute.xlu1 %2046  ;;  %v7271_v42 = vpop.permute.xlu2 %2065 }
 0x29b   :  { %9065 = vst [vmem:[#allocation16_spill] sm:$0xff] %v7269_v23  ;;  %v7273_v63 = vpop.permute.xlu0 %2970 }
 0x29c   :  { %9066 = vst [vmem:[#allocation17_spill] sm:$0xff] %v7271_v42  ;;  %v2741_v42 = vld [vmem:[#allocation2 + $0x154] sm:$0xff] }
 0x29d   :  { %9067 = vst [vmem:[#allocation60_spill] sm:$0xff] %v7273_v63 }
 0x2a0   :  { %2750 = vrot.lane.b32.xlu2 %v2740_v22, %s8930_s1  ;;  %2121 = vrot.lane.b32.xlu1 %v2110_v5, %s8919_s21 }
 0x2a1   :  { %2372 = vrot.lane.b32.xlu0 %v2935_v1, %s8917_s26 }
 0x2a2   :  { %v7279_v8 = vpop.permute.xlu1 %2299  ;;  %v3144_v50 = vpop.permute.xlu2 %3143 }
 0x2a3   :  { %9068 = vst [vmem:[#allocation73_spill] sm:$0xff] %v7279_v8  ;;  %v7281_v46 = vpop.permute.xlu0 %2680 }
 0x2a4   :  { %9069 = vst [vmem:[#allocation15_spill] sm:$0xff] %v7281_v46 }
 0x2a5   :  { %3155 = vst.msk [vmem:[#allocation3 + $0x80] sm:$0xff] %vm8923_vm5, %v3144_v50 }
 0x2a6   :  { %3179 = vst.msk [vmem:[#allocation3 + $0x80] sm:$0xff] %vm8907_vm6, %v6934_v27 }
 0x2a8   :  { %3675 = vrot.lane.b32.xlu2 %v2935_v1, %s9070_s19  ;;  %2374 = vrot.lane.b32.xlu1 %v2110_v5, %s8917_s26 }
 0x2a9   :  { %2992 = vrot.lane.b32.xlu0 %v2740_v22, %s8905_s29 }
 0x2aa   :  { %v7289_v32 = vpop.permute.xlu1 %3605  ;;  %v7291_v3 = vpop.permute.xlu2 %2746 }
 0x2ab   :  { %9071 = vst [vmem:[#allocation18_spill] sm:$0xff] %v7289_v32  ;;  %v7293_v18 = vpop.permute.xlu0 %3411  ;;  %v2007_v32 = vld [vmem:[#allocation2 + $0x4] sm:$0xff] }
 0x2ac   :  { %9072 = vst [vmem:[#allocation68_spill] sm:$0xff] %v7291_v3 }
 0x2ad   :  { %9073 = vst [vmem:[#allocation92_spill] sm:$0xff] %v7293_v18 }
 0x2ae   :  { %3424 = vst.msk [vmem:[#allocation3 + $0xa8] sm:$0xff] %vm8896_vm4, %v7293_v18 }
 0x2b0   :  { %2071 = vrot.lane.b32.xlu2 %v2888_v19, %s8973_s16  ;;  %2946 = vrot.lane.b32.xlu1 %v2110_v5, %s8934_s28 }
 0x2b1   :  { %2702 = vrot.lane.b32.xlu0 %v2935_v1, %s8898_s13 }
 0x2b2   :  { %v7300_v27 = vpop.permute.xlu1 %2922  ;;  %v7302_v50 = vpop.permute.xlu2 %2894 }
 0x2b3   :  { %v7304_v22 = vpop.permute.xlu0 %2401 }
 0x2b4   :  { %9074 = vst [vmem:[#allocation93_spill] sm:$0xff] %v7304_v22  ;;  %v7324_v22 = vld [vmem:[#allocation2 + $0x160] sm:$0xff] }
 0x2b8   :  { %2324 = vrot.lane.b32.xlu2 %v2888_v19, %s8890_s25  ;;  %2752 = vrot.lane.b32.xlu1 %v2741_v42, %s8930_s1 }
 0x2b9   :  { %2656 = vrot.lane.b32.xlu0 %v2888_v19, %s8893_s30 }
 0x2ba   :  { %v7309_v18 = vpop.permute.xlu1 %3463  ;;  %v7311_v3 = vpop.permute.xlu2 %2117 }
 0x2bb   :  { %v7313_v33 = vpop.permute.xlu0 %2972 }
 0x2bc   :  { %9075 = vst [vmem:[#allocation94_spill] sm:$0xff] %v7313_v33 }
 0x2c0   :  { %3629 = vrot.lane.b32.xlu2 %v2888_v19, %s9064_s17  ;;  %3439 = vrot.lane.b32.xlu1 %v2110_v5, %s9059_s23 }
 0x2c1   :  { %2994 = vrot.lane.b32.xlu0 %v2741_v42, %s8905_s29 }
 0x2c2   :  { %v7318_v1 = vpop.permute.xlu1 %2351  ;;  %v7320_v29 = vpop.permute.xlu2 %2370 }
 0x2c3   :  { %9076 = vst [vmem:[#allocation95_spill] sm:$0xff] %v7318_v1  ;;  %v7322_v25 = vpop.permute.xlu0 %2650  ;;  %v7336_v1 = vld [vmem:[#allocation2 + $0x162] sm:$0xff] }
 0x2c4   :  { %9077 = vst [vmem:[#allocation96_spill] sm:$0xff] %v7322_v25 }
 0x2c8   :  { %3677 = vrot.lane.b32.xlu2 %v2110_v5, %s9070_s19  ;;  %2900 = vrot.lane.b32.xlu1 %v7324_v22, %s8900_s27 }
 0x2c9   :  { %2704 = vrot.lane.b32.xlu0 %v2110_v5, %s8898_s13 }
 0x2ca   :  { %v7330_v19 = vpop.permute.xlu1 %2924  ;;  %v7332_v33 = vpop.permute.xlu2 %2942 }
 0x2cb   :  { %9078 = vst [vmem:[#allocation97_spill] sm:$0xff] %v7330_v19  ;;  %v7334_v42 = vpop.permute.xlu0 %2698 }
 0x2cc   :  { %9079 = vst [vmem:[#allocation98_spill] sm:$0xff] %v7334_v42  ;;  %v2546_v42 = vld [vmem:[#allocation2 + $0x2] sm:$0xff] }
 0x2d0   :  { %2948 = vrot.lane.b32.xlu1 %v7336_v1, %s8934_s28  ;;  %2376 = vrot.lane.b32.xlu2 %v7336_v1, %s8917_s26 }
 0x2d1   :  { %2326 = vrot.lane.b32.xlu0 %v7324_v22, %s8890_s25  ;;  %s9081_s25 = smov 100  }
 0x2d2   :  { %v7344_v25 = vpop.permute.xlu1 %2115  ;;  %v7346_v5 = vpop.permute.xlu2 %2990 }
 0x2d3   :  { %9080 = vst [vmem:[#allocation99_spill] sm:$0xff] %v7344_v25  ;;  %v3192_v19 = vpop.permute.xlu0 %3191 }
 0x2d4   :  { %3203 = vst.msk [vmem:[#allocation3 + $0x80] sm:$0xff] %vm8910_vm7, %v3192_v19  ;;  %v2008_v19 = vld [vmem:[#allocation2 + $0x14] sm:$0xff] }
 0x2d5   :  { %3227 = vst.msk [vmem:[#allocation3 + $0x80] sm:$0xff] %vm8909_vm8, %v7018_v9  ;;  %v1958_v9 = vld [vmem:[#allocation2 + $0x12] sm:$0xff] }
 0x2d8   :  { %2554 = vrot.lane.b32.xlu1 %v2546_v42, %s9031_s12  ;;  %1965 = vrot.lane.b32.xlu2 %v2546_v42, %s8932_s15 }
 0x2d9   :  { %2996 = vrot.lane.b32.xlu0 %v2985_v38, %s8905_s29 }
 0x2da   :  { %v3146_v21 = vpop.permute.xlu1 %3145  ;;  %v7354_v24 = vpop.permute.xlu2 %2748 }
 0x2db   :  { %3156 = vst.msk [vmem:[#allocation3 + $0x90] sm:$0xff] %vm8923_vm5, %v3146_v21  ;;  %v7357_v25 = vpop.permute.xlu0 %2067 }
 0x2dc   :  { %3180 = vst.msk [vmem:[#allocation3 + $0x90] sm:$0xff] %vm8907_vm6, %v7160_v55 }
 0x2e0   :  { %2017 = vrot.lane.b32.xlu1 %v2008_v19, %s8926_s24  ;;  %1967 = vrot.lane.b32.xlu2 %v1958_v9, %s8932_s15 }
 0x2e1   :  { %2015 = vrot.lane.b32.xlu0 %v2007_v32, %s8926_s24 }
 0x2e2   :  { %v3436_v38 = vpop.permute.xlu2 %3435  ;;  %v7364_v42 = vpop.permute.xlu1 %2069 }
 0x2e3   :  { %v7366_v21 = vpop.permute.xlu0 %2320  ;;  %3447 = vst.msk [vmem:[#allocation3 + $0x88] sm:$0xff] %vm2257_vm9, %v3436_v38 }
 0x2e4   :  { %3471 = vst.msk [vmem:[#allocation3 + $0x88] sm:$0xff] %vm2282_vm10, %v7041_v43 }
 0x2e8   :  { %2270 = vrot.lane.b32.xlu1 %v2008_v19, %s9023_s0  ;;  %2215 = vrot.lane.b32.xlu2 %v1958_v9, %s8903_s14 }
 0x2e9   :  { %2602 = vrot.lane.b32.xlu0 %v2007_v32, %s9032_s2 }
 0x2ea   :  { %v3194_v55 = vpop.permute.xlu2 %3193  ;;  %v7374_v14 = vpop.permute.xlu1 %2322 }
 0x2eb   :  { %v7376_v12 = vpop.permute.xlu0 %2652  ;;  %3204 = vst.msk [vmem:[#allocation3 + $0x90] sm:$0xff] %vm8910_vm7, %v3194_v55 }
 0x2ec   :  { %3228 = vst.msk [vmem:[#allocation3 + $0x90] sm:$0xff] %vm8909_vm8, %v7117_v2 }
 0x2f0   :  { %2846 = vrot.lane.b32.xlu1 %v2008_v19, %s9059_s23  ;;  %2604 = vrot.lane.b32.xlu2 %v2008_v19, %s9032_s2 }
 0x2f1   :  { %2165 = vrot.lane.b32.xlu0 %v7021_v4, %s9081_s25 }
 0x2f2   :  { %v7385_v43 = vpop.permute.xlu2 %3627  ;;  %v7387_v32 = vpop.permute.xlu1 %2896 }
 0x2f3   :  { %v7389_v38 = vpop.permute.xlu0 %3383 }
 0x2f8   :  { %2556 = vrot.lane.b32.xlu1 %v1958_v9, %s9031_s12  ;;  %3335 = vrot.lane.b32.xlu2 %v2008_v19, %s8930_s1 }
 0x2f9   :  { %3239 = vrot.lane.b32.xlu0 %v7021_v4, %s8893_s30  ;;  %v7413_v4 = vld [vmem:[#allocation2 + $0x24] sm:$0xff] }
 0x2fa   :  { %v7395_v2 = vpop.permute.xlu1 %2944  ;;  %v7397_v55 = vpop.permute.xlu2 %2750 }
 0x2fb   :  { %v7399_v34 = vpop.permute.xlu0 %2700 }
 0x300   :  { %3483 = vrot.lane.b32.xlu2 %v7062_v47, %s8900_s27  ;;  %2167 = vrot.lane.b32.xlu1 %v7062_v47, %s9081_s25 }
 0x301   :  { %2794 = vrot.lane.b32.xlu0 %v1958_v9, %s9055_s22 }
 0x302   :  { %v3438_v60 = vpop.permute.xlu1 %3437  ;;  %v7406_v8 = vpop.permute.xlu2 %3675 }
 0x303   :  { %v7408_v19 = vpop.permute.xlu0 %2654  ;;  %3448 = vst.msk [vmem:[#allocation3 + $0x98] sm:$0xff] %vm2257_vm9, %v3438_v60 }
 0x304   :  { %3472 = vst.msk [vmem:[#allocation3 + $0x98] sm:$0xff] %vm2282_vm10, %v7258_v48 }
 0x308   :  { %2420 = vrot.lane.b32.xlu1 %v7062_v47, %s8928_s20  ;;  %2019 = vrot.lane.b32.xlu2 %v7413_v4, %s8926_s24 }
 0x309   :  { %3287 = vrot.lane.b32.xlu0 %v1958_v9, %s8898_s13 }
 0x30a   :  { %v7420_v39 = vpop.permute.xlu1 %2898  ;;  %v7422_v0 = vpop.permute.xlu2 %2071 }
 0x30b   :  { %9082 = vst [vmem:[#allocation100_spill] sm:$0xff] %v7422_v0  ;;  %v7424_v6 = vpop.permute.xlu0 %2119 }
 0x310   :  { %2848 = vrot.lane.b32.xlu1 %v7413_v4, %s9059_s23  ;;  %2272 = vrot.lane.b32.xlu2 %v7413_v4, %s9023_s0 }
 0x311   :  { %3241 = vrot.lane.b32.xlu0 %v7062_v47, %s8893_s30  ;;  %s9089_s30 = smov 92  }
 0x312   :  { %v7432_v48 = vpop.permute.xlu2 %2324  ;;  %v7434_v60 = vpop.permute.xlu1 %2121 }
 0x313   :  { %9083 = vst [vmem:[#allocation101_spill] sm:$0xff] %v7432_v48  ;;  %v7436_v9 = vpop.permute.xlu0 %2372 }
 0x314   :  { %9084 = vst [vmem:[#allocation102_spill] sm:$0xff] %v7434_v60 }
 0x318   :  { %2558 = vrot.lane.b32.xlu1 %v2548_v20, %s9031_s12  ;;  %2520 = vrot.lane.b32.xlu2 %v7413_v4, %s8924_s18 }
 0x319   :  { %1969 = vrot.lane.b32.xlu0 %v2548_v20, %s8932_s15 }
 0x31a   :  { %v7442_v46 = vpop.permute.xlu2 %3629  ;;  %v7444_v49 = vpop.permute.xlu1 %2374 }
 0x31b   :  { %9085 = vst [vmem:[#allocation103_spill] sm:$0xff] %v7442_v46  ;;  %v7446_v0 = vpop.permute.xlu0 %2992 }
 0x31c   :  { %9086 = vst [vmem:[#allocation104_spill] sm:$0xff] %v7444_v49 }
 0x320   :  { %3531 = vrot.lane.b32.xlu1 %v2548_v20, %s8934_s28  ;;  %3038 = vrot.lane.b32.xlu2 %v2548_v20, %s9064_s17 }
 0x321   :  { %2217 = vrot.lane.b32.xlu0 %v2548_v20, %s8903_s14 }
 0x322   :  { %v7451_v47 = vpop.permute.xlu2 %3677  ;;  %v7453_v48 = vpop.permute.xlu1 %2946 }
 0x323   :  { %9087 = vst [vmem:[#allocation105_spill] sm:$0xff] %v7451_v47  ;;  %v7455_v60 = vpop.permute.xlu0 %2702 }
 0x324   :  { %9088 = vst [vmem:[#allocation106_spill] sm:$0xff] %v7453_v48 }
 0x328   :  { %3086 = vrot.lane.b32.xlu2 %v7413_v4, %s9070_s19  ;;  %3485 = vrot.lane.b32.xlu1 %v7099_v61, %s8900_s27 }
 0x329   :  { %2470 = vrot.lane.b32.xlu0 %v2548_v20, %s9089_s30 }
 0x32a   :  { %v7462_v46 = vpop.permute.xlu1 %2752  ;;  %v7464_v49 = vpop.permute.xlu2 %2376 }
 0x32b   :  { %9090 = vst [vmem:[#allocation107_spill] sm:$0xff] %v7462_v46  ;;  %v7466_v23 = vpop.permute.xlu0 %2656 }
 0x32c   :  { %9091 = vst [vmem:[#allocation108_spill] sm:$0xff] %v7464_v49 }
 0x32d   :  { %9092 = vst [vmem:[#allocation109_spill] sm:$0xff] %v7466_v23 }
 0x330   :  { %2606 = vrot.lane.b32.xlu2 %v7413_v4, %s9032_s2  ;;  %1971 = vrot.lane.b32.xlu1 %v7468_v10, %s8932_s15 }
 0x331   :  { %2796 = vrot.lane.b32.xlu0 %v2548_v20, %s9055_s22 }
 0x332   :  { %v3440_v47 = vpop.permute.xlu1 %3439  ;;  %v7475_v63 = vpop.permute.xlu2 %1965 }
 0x333   :  { %9093 = vst [vmem:[#allocation110_spill] sm:$0xff] %v7475_v63  ;;  %v7477_v48 = vpop.permute.xlu0 %2994 }
 0x334   :  { %3449 = vst.msk [vmem:[#allocation3 + $0xa8] sm:$0xff] %vm2257_vm9, %v3440_v47  ;;  %v9096_v47 = vld [vmem:[#allocation30_spill] sm:$0xff] }
 0x335   :  { %3473 = vst.msk [vmem:[#allocation3 + $0xa8] sm:$0xff] %vm2282_vm10, %v7309_v18  ;;  %v7495_v18 = vld [vmem:[#allocation2 + $0x34] sm:$0xff] }
 0x338   :  { %2169 = vrot.lane.b32.xlu2 %v7099_v61, %s9081_s25  ;;  %2219 = vrot.lane.b32.xlu1 %v7468_v10, %s8903_s14 }
 0x339   :  { %3579 = vrot.lane.b32.xlu0 %v7413_v4, %s8905_s29 }
 0x33a   :  { %v7488_v49 = vpop.permute.xlu1 %2900  ;;  %v1968_v46 = vpop.permute.xlu2 %1967 }
 0x33b   :  { %9094 = vst [vmem:[#allocation111_spill] sm:$0xff] %v7488_v49  ;;  %v7490_v63 = vpop.permute.xlu0 %2704 }
 0x33c   :  { %9095 = vst [vmem:[#allocation112_spill] sm:$0xff] %v7490_v63 }
 0x33d   :  { %1979 = vst.msk [vmem:[#allocation3 + $0x10] sm:$0xff] %vm8907_vm6, %v1968_v46  ;;  %v9100_v46 = vld [vmem:[#allocation33_spill] sm:$0xff] }
 0x33e   :  { %2004 = vst.msk [vmem:[#allocation3 + $0x10] sm:$0xff] %vm8910_vm7, %v9096_v47 }
 0x340   :  { %2472 = vrot.lane.b32.xlu2 %v7468_v10, %s9089_s30  ;;  %2522 = vrot.lane.b32.xlu1 %v7495_v18, %s8924_s18 }
 0x341   :  { %3289 = vrot.lane.b32.xlu0 %v2548_v20, %s8898_s13  ;;  %s9137_s13 = smov 62  }
 0x342   :  { %v7502_v23 = vpop.permute.xlu1 %2948  ;;  %v7504_v49 = vpop.permute.xlu2 %2215 }
 0x343   :  { %9097 = vst [vmem:[#allocation30_spill] sm:$0xff] %v7502_v23  ;;  %v7506_v63 = vpop.permute.xlu0 %2326 }
 0x344   :  { %9098 = vst [vmem:[#allocation113_spill] sm:$0xff] %v7504_v49 }
 0x345   :  { %9099 = vst [vmem:[#allocation114_spill] sm:$0xff] %v7506_v63 }
 0x346   :  { %2230 = vst.msk [vmem:[#allocation3 + $0x8] sm:$0xff] %vm8896_vm4, %v7504_v49  ;;  %vm8902_vm4 = vcmask 589296  }
 0x347   :  { %2258 = vst.msk [vmem:[#allocation3 + $0x8] sm:$0xff] %vm2257_vm9, %v9100_v46 }
 0x348   :  { %3040 = vrot.lane.b32.xlu2 %v7468_v10, %s9064_s17  ;;  %2850 = vrot.lane.b32.xlu1 %v7495_v18, %s9059_s23 }
 0x349   :  { %2422 = vrot.lane.b32.xlu0 %v7099_v61, %s8928_s20 }
 0x34a   :  { %v2555_v20 = vpop.permute.xlu1 %2554  ;;  %v7518_v47 = vpop.permute.xlu2 %2604 }
 0x34b   :  { %v7520_v23 = vpop.permute.xlu0 %2996  ;;  %2566 = vst.msk [vmem:[#allocation3 + $0x40] sm:$0xff] %vm8923_vm5, %v2555_v20 }
 0x350   :  { %3088 = vrot.lane.b32.xlu2 %v7495_v18, %s9070_s19  ;;  %2560 = vrot.lane.b32.xlu1 %v7468_v10, %s9031_s12 }
 0x351   :  { %2021 = vrot.lane.b32.xlu0 %v7495_v18, %s8926_s24 }
 0x352   :  { %v2018_v46 = vpop.permute.xlu1 %2017  ;;  %v7529_v49 = vpop.permute.xlu2 %3335 }
 0x353   :  { %v7531_v63 = vpop.permute.xlu0 %2015  ;;  %2029 = vst.msk [vmem:[#allocation3 + $0x10] sm:$0xff] %vm8909_vm8, %v2018_v46  ;;  %v9102_v46 = vld [vmem:[#allocation36_spill] sm:$0xff] }
 0x354   :  { %2054 = vst.msk [vmem:[#allocation3 + $0x10] sm:$0xff] %vm2052_vm11, %v6959_v36 }
 0x355   :  { %2079 = vst.msk [vmem:[#allocation3 + $0x10] sm:$0xff] %vm2077_vm12, %v7357_v25 }
 0x356   :  { %2104 = vst.msk [vmem:[#allocation3 + $0x10] sm:$0xff] %vm8911_vm13, %v7076_v17 }
 0x357   :  { %2129 = vst.msk [vmem:[#allocation3 + $0x10] sm:$0xff] %vm8922_vm14, %v7311_v3  ;;  %v7560_v3 = vld [vmem:[#allocation2 + $0x40] sm:$0xff] }
 0x358   :  { %2608 = vrot.lane.b32.xlu2 %v7495_v18, %s9032_s2  ;;  %3533 = vrot.lane.b32.xlu1 %v7468_v10, %s8934_s28  ;;  %2154 = vst.msk [vmem:[#allocation3 + $0x10] sm:$0xff] %vm8897_vm15, %v7043_v37  ;;  %v9101_v37 = vld [vmem:[#allocation34_spill] sm:$0xff]  ;;  %vm8915_vm15 = vcmask 671296  }
 0x359   :  { %2274 = vrot.lane.b32.xlu0 %v7495_v18, %s9023_s0 }
 0x35a   :  { %v2271_v36 = vpop.permute.xlu1 %2270  ;;  %v3484_v25 = vpop.permute.xlu2 %3483 }
 0x35b   :  { %v7550_v17 = vpop.permute.xlu0 %2602  ;;  %2283 = vst.msk [vmem:[#allocation3 + $0x8] sm:$0xff] %vm2282_vm10, %v2271_v36  ;;  %v9104_v36 = vld [vmem:[#allocation28_spill] sm:$0xff] }
 0x35c   :  { %2308 = vst.msk [vmem:[#allocation3 + $0x8] sm:$0xff] %vm2307_vm0, %v6979_v41 }
 0x35d   :  { %2333 = vst.msk [vmem:[#allocation3 + $0x8] sm:$0xff] %vm2332_vm1, %v7366_v21 }
 0x35e   :  { %3495 = vst.msk [vmem:[#allocation3 + $0x88] sm:$0xff] %vm2307_vm0, %v3484_v25  ;;  %v4366_v25 = vld [vmem:[%s8849_s3 + $0xf0] sm:$0xff] }
 0x35f   :  { %3519 = vst.msk [vmem:[#allocation3 + $0x88] sm:$0xff] %vm2332_vm1, %v9101_v37  ;;  %v9106_v37 = vld [vmem:[#allocation39_spill] sm:$0xff] }
 0x360   :  { %3487 = vrot.lane.b32.xlu1 %v7560_v3, %s8900_s27  ;;  %2424 = vrot.lane.b32.xlu2 %v7560_v3, %s8928_s20  ;;  %2358 = vst.msk [vmem:[#allocation3 + $0x8] sm:$0xff] %vm2357_vm2, %v7090_v59  ;;  %v7587_v59 = vld [vmem:[#allocation2 + $0x42] sm:$0xff]  ;;  %s9143_s27 = smov 120  }
 0x361   :  { %2798 = vrot.lane.b32.xlu0 %v7468_v10, %s9055_s22  ;;  %2383 = vst.msk [vmem:[#allocation3 + $0x8] sm:$0xff] %vm8936_vm3, %v7320_v29  ;;  %v7585_v29 = vld [vmem:[#allocation2 + $0x44] sm:$0xff] }
 0x362   :  { %v2847_v41 = vpop.permute.xlu1 %2846  ;;  %v7572_v21 = vpop.permute.xlu2 %2019  ;;  %2408 = vst.msk [vmem:[#allocation3 + $0x8] sm:$0xff] %vm8902_vm4, %v7059_v53 }
 0x363   :  { %v7576_v20 = vpop.permute.xlu0 %2165  ;;  %2858 = vst.msk [vmem:[#allocation3 + $0x48] sm:$0xff] %vm2257_vm9, %v2847_v41 }
 0x364   :  { %2882 = vst.msk [vmem:[#allocation3 + $0x48] sm:$0xff] %vm2282_vm10, %v9102_v46 }
 0x365   :  { %2906 = vst.msk [vmem:[#allocation3 + $0x48] sm:$0xff] %vm2307_vm0, %v7302_v50  ;;  %v9103_v50 = vld [vmem:[#allocation29_spill] sm:$0xff] }
 0x366   :  { %2930 = vst.msk [vmem:[#allocation3 + $0x48] sm:$0xff] %vm2332_vm1, %v7113_v52 }
 0x367   :  { %2954 = vst.msk [vmem:[#allocation3 + $0x48] sm:$0xff] %vm2357_vm2, %v7332_v33 }
 0x368   :  { %2276 = vrot.lane.b32.xlu1 %v7585_v29, %s9023_s0  ;;  %2221 = vrot.lane.b32.xlu2 %v7587_v59, %s8903_s14  ;;  %2978 = vst.msk [vmem:[#allocation3 + $0x48] sm:$0xff] %vm8936_vm3, %v7081_v57  ;;  %v9105_v57 = vld [vmem:[#allocation26_spill] sm:$0xff]  ;;  %s9169_s14 = smov 50  }
 0x369   :  { %3581 = vrot.lane.b32.xlu0 %v7495_v18, %s8905_s29  ;;  %3002 = vst.msk [vmem:[#allocation3 + $0x48] sm:$0xff] %vm8902_vm4, %v7346_v5  ;;  %v4367_v5 = vld [vmem:[%s8849_s3 + $0xf8] sm:$0x3]  ;;  %vm8908_vm4 = vcmask 1041408   ;;  %s9167_s29 = smov 22  }
 0x36a   :  { %v2557_v53 = vpop.permute.xlu1 %2556  ;;  %v7601_v52 = vpop.permute.xlu2 %2272  ;;  %3026 = vst.msk [vmem:[#allocation3 + $0x48] sm:$0xff] %vm8915_vm15, %v9103_v50  ;;  %5558 = vmatpush.msk.msrb.mxu2 %vm8908_vm4, %v4367_v5  ;;  %vm8913_vm4 = vcmask 982896   ;;  %v9107_v50 = vld [vmem:[#allocation25_spill] sm:$0xff] }
 0x36b   :  { %v3240_v33 = vpop.permute.xlu0 %3239  ;;  %2567 = vst.msk [vmem:[#allocation3 + $0x50] sm:$0xff] %vm8923_vm5, %v2557_v53  ;;  %v7673_v5 = vld [vmem:[#allocation2 + $0x50] sm:$0xff] }
 0x36c   :  { %3251 = vst.msk [vmem:[#allocation3 + $0x80] sm:$0xff] %vm2052_vm11, %v3240_v33  ;;  %4487 = vmatpush.msrb.mxu2 %v4366_v25 }
 0x36d   :  { %3275 = vst.msk [vmem:[#allocation3 + $0x80] sm:$0xff] %vm2077_vm12, %v9104_v36  ;;  %v9110_v36 = vld [vmem:[#allocation23_spill] sm:$0xff] }
 0x36e   :  { %2591 = vst.msk [vmem:[#allocation3 + $0x50] sm:$0xff] %vm8907_vm6, %v9105_v57  ;;  %vm8921_vm6 = vcmask 900896   ;;  %v4362_v57 = vld [vmem:[%s8849_s3 + $0xd0] sm:$0xff] }
 0x36f   :  { %2615 = vst.msk [vmem:[#allocation3 + $0x50] sm:$0xff] %vm8910_vm7, %v7518_v47  ;;  %v4365_v47 = vld [vmem:[%s8849_s3 + $0xe8] sm:$0xff]  ;;  %vm9111_vm7 = vcmask 818896  }
 0x370   :  { %2639 = vst.msk [vmem:[#allocation3 + $0x50] sm:$0xff] %vm8909_vm8, %v9106_v37  ;;  %2474 = vrot.lane.b32.xlu1 %v7587_v59, %s9089_s30  ;;  %3042 = vrot.lane.b32.xlu2 %v7587_v59, %s9064_s17  ;;  %vm9108_vm8 = vcmask 818896   ;;  %v4351_v37 = vld [vmem:[%s8849_s3 + $0x78] sm:$0xff] }
 0x371   :  { %2663 = vst.msk [vmem:[#allocation3 + $0x50] sm:$0xff] %vm2052_vm11, %v7376_v12  ;;  %2171 = vrot.lane.b32.xlu0 %v7560_v3, %s9081_s25  ;;  %4488 = vmatpush.msrb.mxu2 %v4365_v47  ;;  %v9112_v47 = vld [vmem:[#allocation27_spill] sm:$0xff] }
 0x372   :  { %2687 = vst.msk [vmem:[#allocation3 + $0x50] sm:$0xff] %vm2077_vm12, %v7094_v31  ;;  %v2168_v41 = vpop.permute.xlu1 %2167  ;;  %v7635_v46 = vpop.permute.xlu2 %2520  ;;  %v9109_v31 = vld [vmem:[#allocation31_spill] sm:$0xff]  ;;  %4421 = vmatpush.msrb.mxu1 %v4351_v37 }
 0x373   :  { %v7637_v53 = vpop.permute.xlu0 %2794  ;;  %2179 = vst.msk [vmem:[#allocation3 + $0x10] sm:$0xff] %vm8921_vm6, %v2168_v41  ;;  %v9113_v41 = vld [vmem:[#allocation42_spill] sm:$0xff] }
 0x374   :  { %2204 = vst.msk [vmem:[#allocation3 + $0x10] sm:$0xff] %vm8913_vm4, %v9107_v50  ;;  %v9114_v50 = vld [vmem:[#allocation43_spill] sm:$0xff] }
 0x375   :  { %2711 = vst.msk [vmem:[#allocation3 + $0x50] sm:$0xff] %vm8911_vm13, %v7399_v34 }
 0x376   :  { %2735 = vst.msk [vmem:[#allocation3 + $0x50] sm:$0xff] %vm8922_vm14, %v7016_v56  ;;  %v4364_v56 = vld [vmem:[%s8849_s3 + $0xe0] sm:$0xff] }
 0x377   :  { %2759 = vst.msk [vmem:[#allocation3 + $0x50] sm:$0xff] %vm9108_vm8, %v7354_v24  ;;  %4489 = vmatpush.msrb.mxu2 %v4364_v56  ;;  %v4363_v24 = vld [vmem:[%s8849_s3 + $0xd8] sm:$0xff]  ;;  %vm2227_vm8 = vcmask 1048512  }
 0x378   :  { %2852 = vrot.lane.b32.xlu1 %v7585_v29, %s9059_s23  ;;  %2783 = vst.msk [vmem:[#allocation3 + $0x50] sm:$0xff] %vm8921_vm6, %v9109_v31  ;;  %3090 = vrot.lane.b32.xlu2 %v7585_v29, %s9070_s19  ;;  %v7702_v31 = vld [vmem:[#allocation2 + $0x52] sm:$0xff] }
 0x379   :  { %2524 = vrot.lane.b32.xlu0 %v7585_v29, %s8924_s18  ;;  %4490 = vmatpush.msrb.mxu2 %v4363_v24  ;;  %v9115_v56 = vld [vmem:[#allocation37_spill] sm:$0xff]  ;;  %v4360_v24 = vld [vmem:[%s8849_s3 + $0xc0] sm:$0xff] }
 0x37a   :  { %v2421_v12 = vpop.permute.xlu1 %2420  ;;  %v3039_v34 = vpop.permute.xlu2 %3038 }
 0x37b   :  { %v3288_v33 = vpop.permute.xlu0 %3287  ;;  %2433 = vst.msk [vmem:[#allocation3 + $0x8] sm:$0xff] %vm8915_vm15, %v2421_v12  ;;  %4491 = vmatpush.msrb.mxu2 %v4362_v57  ;;  %v7708_v12 = vld [vmem:[#allocation2 + $0xa2] sm:$0xff] }
 0x37c   :  { %3299 = vst.msk [vmem:[#allocation3 + $0x80] sm:$0xff] %vm8911_vm13, %v3288_v33  ;;  %vm8912_vm13 = vcmask 753296   ;;  %v4358_v57 = vld [vmem:[%s8849_s3 + $0xb0] sm:$0xff] }
 0x37d   :  { %3323 = vst.msk [vmem:[#allocation3 + $0x80] sm:$0xff] %vm8922_vm14, %v9110_v36  ;;  %v7733_v36 = vld [vmem:[#allocation2 + $0x82] sm:$0xff] }
 0x37e   :  { %3347 = vst.msk [vmem:[#allocation3 + $0x80] sm:$0xff] %vm9111_vm7, %v7529_v49  ;;  %v7681_v49 = vld [vmem:[#allocation2 + $0x54] sm:$0xff]  ;;  %vm8914_vm7 = vcmask 835296  }
 0x37f   :  { %3371 = vst.msk [vmem:[#allocation3 + $0x80] sm:$0xff] %vm8921_vm6, %v6998_v44  ;;  %v4361_v44 = vld [vmem:[%s8849_s3 + $0xc8] sm:$0xff] }
 0x380   :  { %3395 = vst.msk [vmem:[#allocation3 + $0x80] sm:$0xff] %vm8913_vm4, %v7389_v38  ;;  %2800 = vrot.lane.b32.xlu2 %v7587_v59, %s9055_s22  ;;  %2426 = vrot.lane.b32.xlu1 %v7673_v5, %s8928_s20  ;;  %vm8916_vm4 = vcmask 999296  }
 0x381   :  { %3419 = vst.msk [vmem:[#allocation3 + $0x80] sm:$0xff] %vm2227_vm8, %v7134_v16  ;;  %2526 = vrot.lane.b32.xlu0 %v7681_v49, %s8924_s18  ;;  %4492 = vmatpush.msrb.mxu2 %v4361_v44  ;;  %v9118_v44 = vld [vmem:[#allocation56_spill] sm:$0xff] }
 0x382   :  { %3050 = vst.msk [vmem:[#allocation3 + $0x48] sm:$0xff] %vm8912_vm13, %v3039_v34  ;;  %v2849_v38 = vpop.permute.xlu1 %2848  ;;  %v3087_v25 = vpop.permute.xlu2 %3086 }
 0x383   :  { %2458 = vst.msk [vmem:[#allocation3 + $0x8] sm:$0xff] %vm8912_vm13, %v9112_v47  ;;  %v3242_v16 = vpop.permute.xlu0 %3241  ;;  %vm2507_vm13 = vcmask 917296   ;;  %4493 = vmatpush.msrb.mxu2 %v4360_v24  ;;  %v4356_v47 = vld [vmem:[%s8849_s3 + $0xa0] sm:$0xff] }
 0x384   :  { %3252 = vst.msk [vmem:[#allocation3 + $0x90] sm:$0xff] %vm2052_vm11, %v3242_v16  ;;  %v9122_v16 = vld [vmem:[#allocation45_spill] sm:$0xff] }
 0x385   :  { %3276 = vst.msk [vmem:[#allocation3 + $0x90] sm:$0xff] %vm2077_vm12, %v9113_v41  ;;  %v4354_v41 = vld [vmem:[%s8849_s3 + $0x90] sm:$0xff] }
 0x386   :  { %2859 = vst.msk [vmem:[#allocation3 + $0x58] sm:$0xff] %vm2257_vm9, %v2849_v38 }
 0x387   :  { %2883 = vst.msk [vmem:[#allocation3 + $0x58] sm:$0xff] %vm2282_vm10, %v9114_v50  ;;  %v9126_v50 = vld [vmem:[#allocation32_spill] sm:$0xff] }
 0x388   :  { %2907 = vst.msk [vmem:[#allocation3 + $0x58] sm:$0xff] %vm2307_vm0, %v7387_v32  ;;  %3044 = vrot.lane.b32.xlu1 %v7702_v31, %s9064_s17  ;;  %2476 = vrot.lane.b32.xlu2 %v7702_v31, %s9089_s30 }
 0x389   :  { %2931 = vst.msk [vmem:[#allocation3 + $0x58] sm:$0xff] %vm2332_vm1, %v7245_v26  ;;  %3559 = vrot.lane.b32.xlu0 %v7708_v12, %s8917_s26  ;;  %v9116_v26 = vld [vmem:[#allocation40_spill] sm:$0xff]  ;;  %s9293_s26 = smov 20  }
 0x38a   :  { %2955 = vst.msk [vmem:[#allocation3 + $0x58] sm:$0xff] %vm2357_vm2, %v7395_v2  ;;  %v2559_v32 = vpop.permute.xlu1 %2558  ;;  %v2607_v34 = vpop.permute.xlu2 %2606  ;;  %v4359_v2 = vld [vmem:[%s8849_s3 + $0xb8] sm:$0xff] }
 0x38b   :  { %3074 = vst.msk [vmem:[#allocation3 + $0x48] sm:$0xff] %vm8914_vm7, %v9115_v56  ;;  %v1970_v33 = vpop.permute.xlu0 %1969  ;;  %4494 = vmatpush.msrb.mxu2 %v4359_v2  ;;  %vm9117_vm7 = vcmask 589296   ;;  %v9135_v56 = vld [vmem:[#allocation35_spill] sm:$0xff]  ;;  %v9138_v2 = vld [vmem:[#allocation50_spill] sm:$0xff] }
 0x38c   :  { %3098 = vst.msk [vmem:[#allocation3 + $0x48] sm:$0xff] %vm2507_vm13, %v3087_v25 }
 0x38d   :  { %3122 = vst.msk [vmem:[#allocation3 + $0x48] sm:$0xff] %vm8916_vm4, %v9116_v26  ;;  %4495 = vmatpush.msrb.mxu2 %v4358_v57  ;;  %vm9123_vm4 = vcmask 408896  }
 0x38e   :  { %2979 = vst.msk [vmem:[#allocation3 + $0x58] sm:$0xff] %vm8936_vm3, %v7189_v35  ;;  %v4357_v35 = vld [vmem:[%s8849_s3 + $0xa8] sm:$0xff] }
 0x38f   :  { %3003 = vst.msk [vmem:[#allocation3 + $0x58] sm:$0xff] %vm9117_vm7, %v7446_v0  ;;  %v9119_v0 = vld [vmem:[#allocation46_spill] sm:$0xff]  ;;  %vm9120_vm7 = vcmask 244896   ;;  %4496 = vmatpush.msrb.mxu2 %v4357_v35  ;;  %v9145_v35 = vld [vmem:[#allocation61_spill] sm:$0xff] }
 0x390   :  { %3027 = vst.msk [vmem:[#allocation3 + $0x58] sm:$0xff] %vm8915_vm15, %v9118_v44  ;;  %3092 = vrot.lane.b32.xlu1 %v7681_v49, %s9070_s19  ;;  %3313 = vrot.lane.b32.xlu2 %v7733_v36, %s8919_s21  ;;  %vm9121_vm15 = vcmask 326896   ;;  %s9174_s21 = smov 32  }
 0x391   :  { %2568 = vst.msk [vmem:[#allocation3 + $0x60] sm:$0xff] %vm8923_vm5, %v2559_v32  ;;  %1940 = vrot.lane.b32.xlu0 %v7235_v15, %s9031_s12  ;;  %v4355_v15 = vld [vmem:[%s8849_s3 + $0x98] sm:$0xff]  ;;  %4497 = vmatpush.msrb.mxu2 %v4356_v47  ;;  %vm9157_vm5 = vcmask 835296  }
 0x392   :  { %2592 = vst.msk [vmem:[#allocation3 + $0x60] sm:$0xff] %vm9120_vm7, %v9119_v0  ;;  %v3532_v38 = vpop.permute.xlu1 %3531  ;;  %v2170_v25 = vpop.permute.xlu2 %2169  ;;  %v9147_v0 = vld [vmem:[#allocation41_spill] sm:$0xff] }
 0x393   :  { %2616 = vst.msk [vmem:[#allocation3 + $0x60] sm:$0xff] %vm9121_vm15, %v2607_v34  ;;  %v2218_v37 = vpop.permute.xlu0 %2217  ;;  %vm9124_vm15 = vcmask 654896   ;;  %4498 = vmatpush.msrb.mxu2 %v4355_v15  ;;  %v3669_v15 = vld [vmem:[#allocation2 + $0x162] sm:$0xff] }
 0x394   :  { %2640 = vst.msk [vmem:[#allocation3 + $0x60] sm:$0xff] %vm9123_vm4, %v9122_v16  ;;  %vm9125_vm4 = vmmov %vm9120_vm7  ;;  %vm9127_vm7 = vcmask 326896   ;;  %v7895_v16 = vld [vmem:[#allocation2 + $0xe4] sm:$0xff] }
 0x395   :  { %2664 = vst.msk [vmem:[#allocation3 + $0x60] sm:$0xff] %vm2052_vm11, %v7408_v19  ;;  %v2570_v19 = vld [vmem:[#allocation2 + $0x62] sm:$0xff]  ;;  %4499 = vmatpush.msrb.mxu2 %v4354_v41 }
 0x396   :  { %2688 = vst.msk [vmem:[#allocation3 + $0x60] sm:$0xff] %vm2077_vm12, %v7213_v45  ;;  %v4353_v45 = vld [vmem:[%s8849_s3 + $0x88] sm:$0xff] }
 0x397   :  { %2712 = vst.msk [vmem:[#allocation3 + $0x60] sm:$0xff] %vm9124_vm15, %v7455_v60  ;;  %vm9128_vm15 = vcmask 408896   ;;  %4500 = vmatpush.msrb.mxu2 %v4353_v45  ;;  %v9165_v41 = vld [vmem:[#allocation52_spill] sm:$0xff] }
 0x398   :  { %1980 = vst.msk [vmem:[#allocation3 + $0x20] sm:$0xff] %vm9125_vm4, %v1970_v33  ;;  %3535 = vrot.lane.b32.xlu1 %v7587_v59, %s8934_s28  ;;  %3337 = vrot.lane.b32.xlu2 %v7413_v4, %s8930_s1  ;;  %v4352_v4 = vld [vmem:[%s8849_s3 + $0x80] sm:$0xff]  ;;  %v4350_v59 = vld [vmem:[%s8849_s3 + $0x70] sm:$0xff]  ;;  %vm9129_vm4 = vcmask 654896  }
 0x399   :  { %2005 = vst.msk [vmem:[#allocation3 + $0x20] sm:$0xff] %vm9127_vm7, %v9126_v50  ;;  %2578 = vrot.lane.b32.xlu0 %v2570_v19, %s8932_s15  ;;  %4422 = vmatpush.msrb.mxu1 %v4350_v59  ;;  %vm9130_vm7 = vcmask 818896   ;;  %v7820_v33 = vld [vmem:[#allocation2 + $0xe2] sm:$0xff] }
 0x39a   :  { %2030 = vst.msk [vmem:[#allocation3 + $0x20] sm:$0xff] %vm9128_vm15, %v7572_v21  ;;  %v3486_v60 = vpop.permute.xlu1 %3485  ;;  %v7783_v32 = vpop.permute.xlu2 %2472  ;;  %4501 = vmatpush.msrb.mxu2 %v4352_v4  ;;  %v7801_v21 = vld [vmem:[#allocation2 + $0x140] sm:$0xff]  ;;  %vm9132_vm15 = vmmov %vm9130_vm7 }
 0x39b   :  { %2055 = vst.msk [vmem:[#allocation3 + $0x20] sm:$0xff] %vm2052_vm11, %v7140_v7  ;;  %v2471_v34 = vpop.permute.xlu0 %2470  ;;  %v2618_v7 = vld [vmem:[#allocation2 + $0x64] sm:$0xff] }
 0x39c   :  { %2080 = vst.msk [vmem:[#allocation3 + $0x20] sm:$0xff] %vm2077_vm12, %v7364_v42  ;;  %v9131_v42 = vld [vmem:[#allocation44_spill] sm:$0xff] }
 0x39d   :  { %2736 = vst.msk [vmem:[#allocation3 + $0x60] sm:$0xff] %vm8922_vm14, %v7092_v28  ;;  %v9175_v4 = vld [vmem:[#allocation60_spill] sm:$0xff] }
 0x39e   :  { %2105 = vst.msk [vmem:[#allocation3 + $0x20] sm:$0xff] %vm9129_vm4, %v7056_v11  ;;  %vm9134_vm4 = vcmask 15360   ;;  %v9176_v59 = vld [vmem:[#allocation20_spill] sm:$0xff] }
 0x39f   :  { %2760 = vst.msk [vmem:[#allocation3 + $0x60] sm:$0xff] %vm9130_vm7, %v7397_v55  ;;  %vm9139_vm7 = vcmask 982896  }
 0x3a0   :  { %2130 = vst.msk [vmem:[#allocation3 + $0x20] sm:$0xff] %vm8922_vm14, %v7424_v6  ;;  %3147 = vrot.lane.b32.xlu1 %v7801_v21, %s9031_s12  ;;  %1990 = vrot.lane.b32.xlu2 %v2570_v19, %s9032_s2  ;;  %v9133_v6 = vld [vmem:[#allocation48_spill] sm:$0xff]  ;;  %vm9151_vm14 = vcmask 244896   ;;  %v9170_v19 = vld [vmem:[#allocation54_spill] sm:$0xff] }
 0x3a1   :  { %2784 = vst.msk [vmem:[#allocation3 + $0x60] sm:$0xff] %vm8921_vm6, %v9131_v42  ;;  %2626 = vrot.lane.b32.xlu0 %v2618_v7, %s8926_s24  ;;  %v9180_v42 = vld [vmem:[#allocation16_spill] sm:$0xff] }
 0x3a2   :  { %2155 = vst.msk [vmem:[#allocation3 + $0x20] sm:$0xff] %vm9132_vm15, %v7207_v58  ;;  %v3041_v11 = vpop.permute.xlu2 %3040  ;;  %v1972_v28 = vpop.permute.xlu1 %1971  ;;  %v9136_v58 = vld [vmem:[#allocation59_spill] sm:$0xff]  ;;  %vm9140_vm15 = vcmask 589296  }
 0x3a3   :  { %3543 = vst.msk [vmem:[#allocation3 + $0x88] sm:$0xff] %vm2357_vm2, %v3532_v38  ;;  %v2797_v55 = vpop.permute.xlu0 %2796  ;;  %v9149_v38 = vld [vmem:[#allocation53_spill] sm:$0xff] }
 0x3a4   :  { %3567 = vst.msk [vmem:[#allocation3 + $0x88] sm:$0xff] %vm8936_vm3, %v9133_v6  ;;  %v7966_v6 = vld [vmem:[#allocation2 + $0x92] sm:$0xff] }
 0x3a5   :  { %2231 = vst.msk [vmem:[#allocation3 + $0x10] sm:$0xff] %vm2227_vm8, %v2218_v37 }
 0x3a6   :  { %2232 = vst.msk [vmem:[#allocation3 + $0x18] sm:$0xff] %vm9134_vm4, %v2218_v37  ;;  %vm9141_vm4 = vcmask 835296  }
 0x3a7   :  { %2259 = vst.msk [vmem:[#allocation3 + $0x18] sm:$0xff] %vm2257_vm9, %v9135_v56  ;;  %v9185_v56 = vld [vmem:[#allocation70_spill] sm:$0xff] }
 0x3a8   :  { %2284 = vst.msk [vmem:[#allocation3 + $0x18] sm:$0xff] %vm2282_vm10, %v7601_v52  ;;  %3171 = vrot.lane.b32.xlu1 %v7820_v33, %s8932_s15  ;;  %3361 = vrot.lane.b32.xlu2 %v9136_v58, %s9081_s25  ;;  %v9190_v58 = vld [vmem:[#allocation63_spill] sm:$0xff] }
 0x3a9   :  { %2309 = vst.msk [vmem:[#allocation3 + $0x18] sm:$0xff] %vm2307_vm0, %v7165_v62  ;;  %3583 = vrot.lane.b32.xlu0 %v7585_v29, %s9137_s13  ;;  %v7843_v62 = vld [vmem:[#allocation2 + $0x100] sm:$0xff] }
 0x3aa   :  { %2334 = vst.msk [vmem:[#allocation3 + $0x18] sm:$0xff] %vm2332_vm1, %v7374_v14  ;;  %v3089_v24 = vpop.permute.xlu2 %3088  ;;  %v2220_v26 = vpop.permute.xlu1 %2219  ;;  %v7845_v14 = vld [vmem:[#allocation2 + $0x142] sm:$0xff] }
 0x3ab   :  { %2180 = vst.msk [vmem:[#allocation3 + $0x20] sm:$0xff] %vm8921_vm6, %v2170_v25  ;;  %v3580_v52 = vpop.permute.xlu0 %3579  ;;  %v3402_v29 = vld [vmem:[#allocation2 + $0x102] sm:$0xff]  ;;  %vm4368_vm6 = vcmask 998400  }
 0x3ac   :  { %2205 = vst.msk [vmem:[#allocation3 + $0x20] sm:$0xff] %vm9139_vm7, %v9138_v2  ;;  %vm9144_vm7 = vcmask 999296   ;;  %v9152_v25 = vld [vmem:[#allocation47_spill] sm:$0xff] }
 0x3ad   :  { %2359 = vst.msk [vmem:[#allocation3 + $0x18] sm:$0xff] %vm2357_vm2, %v7078_v51  ;;  %v9142_v51 = vld [vmem:[#allocation38_spill] sm:$0xff] }
 0x3ae   :  { %2384 = vst.msk [vmem:[#allocation3 + $0x18] sm:$0xff] %vm8936_vm3, %v7436_v9 }
 0x3af   :  { %2409 = vst.msk [vmem:[#allocation3 + $0x18] sm:$0xff] %vm9140_vm15, %v7225_v13  ;;  %v4349_v13 = vld [vmem:[%s8849_s3 + $0x68] sm:$0xff]  ;;  %vm9146_vm15 = vcmask 982896  }
 0x3b0   :  { %2483 = vst.msk [vmem:[#allocation3 + $0x8] sm:$0xff] %vm9141_vm4, %v2471_v34  ;;  %3607 = vrot.lane.b32.xlu1 %v7843_v62, %s8928_s20  ;;  %3195 = vrot.lane.b32.xlu2 %v7845_v14, %s9032_s2  ;;  %vm9148_vm4 = vcmask 753296   ;;  %v9178_v34 = vld [vmem:[#allocation77_spill] sm:$0xff]  ;;  %s9188_s20 = smov 80  }
 0x3b1   :  { %2508 = vst.msk [vmem:[#allocation3 + $0x8] sm:$0xff] %vm2507_vm13, %v9142_v51  ;;  %3413 = vrot.lane.b32.xlu0 %v3402_v29, %s9143_s27  ;;  %4423 = vmatpush.msrb.mxu1 %v4349_v13  ;;  %v9196_v51 = vld [vmem:[#allocation10_spill] sm:$0xff] }
 0x3b2   :  { %2533 = vst.msk [vmem:[#allocation3 + $0x8] sm:$0xff] %vm9144_vm7, %v7635_v46  ;;  %v7860_v9 = vpop.permute.xlu2 %2608  ;;  %v2523_v57 = vpop.permute.xlu1 %2522  ;;  %vm9150_vm7 = vcmask 835296   ;;  %v3550_v13 = vld [vmem:[#allocation2 + $0xb2] sm:$0xff] }
 0x3b3   :  { %3496 = vst.msk [vmem:[#allocation3 + $0x98] sm:$0xff] %vm2307_vm0, %v3486_v60  ;;  %v3290_v44 = vpop.permute.xlu0 %3289 }
 0x3b4   :  { %3520 = vst.msk [vmem:[#allocation3 + $0x98] sm:$0xff] %vm2332_vm1, %v9145_v35  ;;  %v9204_v35 = vld [vmem:[#allocation107_spill] sm:$0xff] }
 0x3b5   :  { %2807 = vst.msk [vmem:[#allocation3 + $0x50] sm:$0xff] %vm9146_vm15, %v2797_v55  ;;  %vm9153_vm15 = vcmask 326896   ;;  %v4348_v55 = vld [vmem:[%s8849_s3 + $0x60] sm:$0xff] }
 0x3b6   :  { %2832 = vst.msk [vmem:[#allocation3 + $0x50] sm:$0xff] %vm2227_vm8, %v9147_v0  ;;  %4424 = vmatpush.msrb.mxu1 %v4348_v55  ;;  %v9206_v0 = vld [vmem:[#allocation80_spill] sm:$0xff]  ;;  %v9234_v55 = vld [vmem:[#allocation105_spill] sm:$0xff] }
 0x3b7   :  { %3051 = vst.msk [vmem:[#allocation3 + $0x58] sm:$0xff] %vm9148_vm4, %v3041_v11  ;;  %vm9154_vm4 = vcmask 589296  }
 0x3b8   :  { %3075 = vst.msk [vmem:[#allocation3 + $0x58] sm:$0xff] %vm9150_vm7, %v9149_v38  ;;  %3441 = vrot.lane.b32.xlu1 %v7336_v1, %s9059_s23  ;;  %3631 = vrot.lane.b32.xlu2 %v7324_v22, %s9064_s17  ;;  %vm9155_vm7 = vcmask 671296   ;;  %v3454_v22 = vld [vmem:[#allocation2 + $0x104] sm:$0xff] }
 0x3b9   :  { %1981 = vst.msk [vmem:[#allocation3 + $0x30] sm:$0xff] %vm9151_vm14, %v1972_v28  ;;  %v4305_v46 = vld [vmem:[#allocation3 + $0x8] sm:$0xff]  ;;  %3385 = vrot.lane.b32.xlu0 %v7801_v21, %s9055_s22  ;;  %vm9156_vm14 = vcmask 753296  }
 0x3ba   :  { %2006 = vst.msk [vmem:[#allocation3 + $0x30] sm:$0xff] %vm9153_vm15, %v9152_v25  ;;  %5559 = vmatmul.msk.f32.vlgmr.msrb.gmra.mxu2 %vm4368_vm6, %v4305_v46  ;;  %v2851_v37 = vpop.permute.xlu1 %2850  ;;  %v7881_v47 = vpop.permute.xlu2 %2424  ;;  %vm9158_vm15 = vcmask 999296   ;;  %v9181_v28 = vld [vmem:[#allocation100_spill] sm:$0xff]  ;;  %v9208_v46 = vld [vmem:[#allocation73_spill] sm:$0xff] }
 0x3bb   :  { %3591 = vst.msk [vmem:[#allocation3 + $0x88] sm:$0xff] %vm9154_vm4, %v3580_v52  ;;  %v2423_v1 = vpop.permute.xlu0 %2422  ;;  %vm9161_vm4 = vcmask 15360   ;;  %v9194_v52 = vld [vmem:[#allocation15_spill] sm:$0xff]  ;;  %v9209_v25 = vld [vmem:[#allocation101_spill] sm:$0xff] }
 0x3bc   :  { %3615 = vst.msk [vmem:[#allocation3 + $0x88] sm:$0xff] %vm9155_vm7, %v7183_v54  ;;  %v9159_v54 = vld [vmem:[#allocation57_spill] sm:$0xff]  ;;  %vm9163_vm7 = vcmask 654896  }
 0x3bd   :  { %3639 = vst.msk [vmem:[#allocation3 + $0x88] sm:$0xff] %vm9156_vm14, %v7385_v43  ;;  %v9162_v43 = vld [vmem:[#allocation49_spill] sm:$0xff]  ;;  %vm9164_vm14 = vcmask 671296  }
 0x3be   :  { %3663 = vst.msk [vmem:[#allocation3 + $0x88] sm:$0xff] %vm9157_vm5, %v7115_v40  ;;  %vm9160_vm5 = vmmov %vm9158_vm15 }
 0x3bf   :  { %3687 = vst.msk [vmem:[#allocation3 + $0x88] sm:$0xff] %vm2507_vm13, %v7406_v8 }
 0x3c0   :  { %3711 = vst.msk [vmem:[#allocation3 + $0x88] sm:$0xff] %vm9158_vm15, %v7136_v30  ;;  %3465 = vrot.lane.b32.xlu1 %v3454_v22, %s9023_s0  ;;  %3655 = vrot.lane.b32.xlu2 %v3402_v29, %s9089_s30  ;;  %vm9166_vm15 = vcmask 753296   ;;  %v7990_v29 = vld [vmem:[#allocation2 + $0x150] sm:$0xff] }
 0x3c1   :  { %3099 = vst.msk [vmem:[#allocation3 + $0x58] sm:$0xff] %vm2507_vm13, %v3089_v24  ;;  %3219 = vrot.lane.b32.xlu0 %v7895_v16, %s8926_s24  ;;  %s9187_s24 = smov 70  }
 0x3c2   :  { %3123 = vst.msk [vmem:[#allocation3 + $0x58] sm:$0xff] %vm9160_vm5, %v9159_v54  ;;  %v2561_v40 = vpop.permute.xlu1 %2560  ;;  %v7903_v8 = vpop.permute.xlu2 %2221  ;;  %vm9168_vm5 = vcmask 835296   ;;  %v9211_v54 = vld [vmem:[#allocation82_spill] sm:$0xff] }
 0x3c3   :  { %2233 = vst.msk [vmem:[#allocation3 + $0x20] sm:$0xff] %vm2227_vm8, %v2220_v26  ;;  %v2022_v30 = vpop.permute.xlu0 %2021 }
 0x3c4   :  { %2234 = vst.msk [vmem:[#allocation3 + $0x28] sm:$0xff] %vm9161_vm4, %v2220_v26  ;;  %vm9171_vm4 = vcmask 999296   ;;  %v9191_v26 = vld [vmem:[#allocation109_spill] sm:$0xff] }
 0x3c5   :  { %2260 = vst.msk [vmem:[#allocation3 + $0x28] sm:$0xff] %vm2257_vm9, %v9162_v43  ;;  %v9213_v43 = vld [vmem:[#allocation11_spill] sm:$0xff] }
 0x3c6   :  { %3300 = vst.msk [vmem:[#allocation3 + $0x90] sm:$0xff] %vm9163_vm7, %v3290_v44  ;;  %vm9177_vm7 = vcmask 589296   ;;  %v9202_v44 = vld [vmem:[#allocation64_spill] sm:$0xff] }
 0x3c7   :  { %2434 = vst.msk [vmem:[#allocation3 + $0x18] sm:$0xff] %vm9164_vm14, %v2423_v1  ;;  %v9210_v1 = vld [vmem:[#allocation12_spill] sm:$0xff] }
 0x3c8   :  { %2459 = vst.msk [vmem:[#allocation3 + $0x18] sm:$0xff] %vm9166_vm15, %v9165_v41  ;;  %3489 = vrot.lane.b32.xlu1 %v7673_v5, %s9167_s29  ;;  %3679 = vrot.lane.b32.xlu2 %v3669_v15, %s9070_s19  ;;  %v9172_v5 = vld [vmem:[#allocation65_spill] sm:$0xff]  ;;  %vm9179_vm15 = vcmask 408896   ;;  %v9215_v15 = vld [vmem:[#allocation67_spill] sm:$0xff] }
 0x3c9   :  { %2484 = vst.msk [vmem:[#allocation3 + $0x18] sm:$0xff] %vm9168_vm5, %v7783_v32  ;;  %3243 = vrot.lane.b32.xlu0 %v7099_v61, %s9169_s14  ;;  %v3502_v61 = vld [vmem:[#allocation2 + $0xb0] sm:$0xff]  ;;  %vm9183_vm5 = vcmask 654896  }
 0x3ca   :  { %2509 = vst.msk [vmem:[#allocation3 + $0x18] sm:$0xff] %vm2507_vm13, %v9170_v19  ;;  %v7922_v45 = vpop.permute.xlu1 %3533  ;;  %v7925_v60 = vpop.permute.xlu2 %3042  ;;  %v9173_v32 = vld [vmem:[#allocation106_spill] sm:$0xff] }
 0x3cb   :  { %2534 = vst.msk [vmem:[#allocation3 + $0x18] sm:$0xff] %vm9171_vm4, %v2523_v57  ;;  %v2275_v50 = vpop.permute.xlu0 %2274  ;;  %vm9184_vm4 = vcmask 162896   ;;  %v9200_v57 = vld [vmem:[#allocation112_spill] sm:$0xff]  ;;  %v8047_v41 = vld [vmem:[#allocation2 + $0x132] sm:$0xff] }
 0x3cc   :  { %2860 = vst.msk [vmem:[#allocation3 + $0x68] sm:$0xff] %vm2257_vm9, %v2851_v37  ;;  %v9218_v19 = vld [vmem:[#allocation66_spill] sm:$0xff] }
 0x3cd   :  { %2884 = vst.msk [vmem:[#allocation3 + $0x68] sm:$0xff] %vm2282_vm10, %v9172_v5  ;;  %v8055_v5 = vld [vmem:[#allocation2 + $0x152] sm:$0xff] }
 0x3ce   :  { %2908 = vst.msk [vmem:[#allocation3 + $0x68] sm:$0xff] %vm2307_vm0, %v7420_v39 }
 0x3cf   :  { %2932 = vst.msk [vmem:[#allocation3 + $0x68] sm:$0xff] %vm2332_vm1, %v7300_v27 }
 0x3d0   :  { %2956 = vst.msk [vmem:[#allocation3 + $0x68] sm:$0xff] %vm2357_vm2, %v9173_v32  ;;  %3513 = vrot.lane.b32.xlu1 %v3502_v61, %s9174_s21  ;;  %3703 = vrot.lane.b32.xlu2 %v3454_v22, %s8924_s18  ;;  %s9199_s18 = smov 52   ;;  %v9220_v61 = vld [vmem:[#allocation72_spill] sm:$0xff]  ;;  %v9225_v32 = vld [vmem:[#allocation83_spill] sm:$0xff] }
 0x3d1   :  { %2980 = vst.msk [vmem:[#allocation3 + $0x68] sm:$0xff] %vm8936_vm3, %v9175_v4  ;;  %3267 = vrot.lane.b32.xlu0 %v9176_v59, %s8973_s16  ;;  %v9226_v4 = vld [vmem:[#allocation71_spill] sm:$0xff] }
 0x3d2   :  { %3004 = vst.msk [vmem:[#allocation3 + $0x68] sm:$0xff] %vm9177_vm7, %v7477_v48  ;;  %v4307_v39 = vld [vmem:[#allocation3 + $0x18] sm:$0xff]  ;;  %v7950_v7 = vpop.permute.xlu1 %3487  ;;  %v7954_v11 = vpop.permute.xlu2 %3090  ;;  %vm9186_vm7 = vcmask 244896  }
 0x3d3   :  { %3028 = vst.msk [vmem:[#allocation3 + $0x68] sm:$0xff] %vm9164_vm14, %v9178_v34  ;;  %5560 = vmatmul.msk.f32.gmra.mxu2 %vm4368_vm6, %v4307_v39  ;;  %v7947_v27 = vpop.permute.xlu0 %2798  ;;  %v9182_v48 = vld [vmem:[#allocation55_spill] sm:$0xff]  ;;  %vm9189_vm14 = vcmask 326896   ;;  %v8078_v34 = vld [vmem:[#allocation2 + $0x170] sm:$0xff] }
 0x3d4   :  { %2031 = vst.msk [vmem:[#allocation3 + $0x30] sm:$0xff] %vm9179_vm15, %v2022_v30  ;;  %v4347_v30 = vld [vmem:[%s8849_s3 + $0x58] sm:$0xff] }
 0x3d5   :  { %2056 = vst.msk [vmem:[#allocation3 + $0x30] sm:$0xff] %vm2052_vm11, %v9180_v42  ;;  %4425 = vmatpush.msrb.mxu1 %v4347_v30  ;;  %v9229_v42 = vld [vmem:[#allocation18_spill] sm:$0xff]  ;;  %v9252_v30 = vld [vmem:[#allocation85_spill] sm:$0xff] }
 0x3d6   :  { %2081 = vst.msk [vmem:[#allocation3 + $0x30] sm:$0xff] %vm2077_vm12, %v9181_v28  ;;  %v9231_v28 = vld [vmem:[#allocation103_spill] sm:$0xff] }
 0x3d7   :  { %2106 = vst.msk [vmem:[#allocation3 + $0x30] sm:$0xff] %vm9183_vm5, %v9182_v48  ;;  %vm9193_vm5 = vcmask 736896   ;;  %v9232_v48 = vld [vmem:[#allocation9_spill] sm:$0xff] }
 0x3d8   :  { %2569 = vst.msk [vmem:[#allocation3 + $0x70] sm:$0xff] %vm9184_vm4, %v2561_v40  ;;  %3537 = vrot.lane.b32.xlu1 %v7702_v31, %s8934_s28  ;;  %3315 = vrot.lane.b32.xlu2 %v7966_v6, %s9188_s20  ;;  %v9192_v31 = vld [vmem:[#allocation102_spill] sm:$0xff]  ;;  %vm9195_vm4 = vcmask 15360   ;;  %v9212_v40 = vld [vmem:[#allocation104_spill] sm:$0xff]  ;;  %s9239_s28 = smov 40  }
 0x3d9   :  { %2593 = vst.msk [vmem:[#allocation3 + $0x70] sm:$0xff] %vm9186_vm7, %v9185_v56  ;;  %3291 = vrot.lane.b32.xlu0 %v7468_v10, %s9187_s24  ;;  %vm9197_vm7 = vcmask 818896   ;;  %v9235_v56 = vld [vmem:[#allocation14_spill] sm:$0xff] }
 0x3da   :  { %2617 = vst.msk [vmem:[#allocation3 + $0x70] sm:$0xff] %vm9189_vm14, %v7860_v9  ;;  %v7984_v10 = vpop.permute.xlu1 %2276  ;;  %v7988_v2 = vpop.permute.xlu2 %2800  ;;  %v9198_v9 = vld [vmem:[#allocation76_spill] sm:$0xff]  ;;  %vm9201_vm14 = vcmask 654896  }
 0x3db   :  { %2641 = vst.msk [vmem:[#allocation3 + $0x70] sm:$0xff] %vm9179_vm15, %v9190_v58  ;;  %v3582_v24 = vpop.permute.xlu0 %3581  ;;  %vm9203_vm15 = vmmov %vm9193_vm5  ;;  %v9236_v58 = vld [vmem:[#allocation69_spill] sm:$0xff] }
 0x3dc   :  { %2665 = vst.msk [vmem:[#allocation3 + $0x70] sm:$0xff] %vm2052_vm11, %v9191_v26  ;;  %v8109_v26 = vld [vmem:[#allocation2 + $0x112] sm:$0xff] }
 0x3dd   :  { %2131 = vst.msk [vmem:[#allocation3 + $0x30] sm:$0xff] %vm9193_vm5, %v9192_v31  ;;  %vm9205_vm5 = vmmov %vm9197_vm7  ;;  %v9237_v31 = vld [vmem:[#allocation114_spill] sm:$0xff] }
 0x3de   :  { %2689 = vst.msk [vmem:[#allocation3 + $0x70] sm:$0xff] %vm2077_vm12, %v9194_v52 }
 0x3df   :  { %2236 = vst.msk [vmem:[#allocation3 + $0x38] sm:$0xff] %vm9195_vm4, %v7903_v8  ;;  %vm9207_vm4 = vcmask 900896  }
 0x3e0   :  { %2156 = vst.msk [vmem:[#allocation3 + $0x30] sm:$0xff] %vm9197_vm7, %v9196_v51  ;;  %3149 = vrot.lane.b32.xlu1 %v7990_v29, %s9031_s12  ;;  %3339 = vrot.lane.b32.xlu2 %v7495_v18, %s8930_s1  ;;  %v8014_v18 = vld [vmem:[#allocation2 + $0xf2] sm:$0xff]  ;;  %vm9214_vm7 = vcmask 589296   ;;  %s9222_s1 = smov 72  }
 0x3e1   :  { %2261 = vst.msk [vmem:[#allocation3 + $0x38] sm:$0xff] %vm2257_vm9, %v9198_v9  ;;  %3561 = vrot.lane.b32.xlu0 %v3550_v13, %s9199_s18  ;;  %v8117_v51 = vld [vmem:[#allocation2 + $0xf4] sm:$0xff] }
 0x3e2   :  { %2713 = vst.msk [vmem:[#allocation3 + $0x70] sm:$0xff] %vm9201_vm14, %v9200_v57  ;;  %v8018_v37 = vpop.permute.xlu1 %2474  ;;  %v8024_v22 = vpop.permute.xlu2 %2476  ;;  %vm9216_vm14 = vcmask 753296   ;;  %v8119_v13 = vld [vmem:[#allocation2 + $0x134] sm:$0xff]  ;;  %v4346_v57 = vld [vmem:[%s8849_s3 + $0x50] sm:$0xff] }
 0x3e3   :  { %2737 = vst.msk [vmem:[#allocation3 + $0x70] sm:$0xff] %vm9203_vm15, %v9202_v44  ;;  %v8009_v38 = vpop.permute.xlu0 %2171  ;;  %vm9217_vm15 = vcmask 671296   ;;  %4426 = vmatpush.msrb.mxu1 %v4346_v57  ;;  %v9241_v44 = vld [vmem:[#allocation79_spill] sm:$0xff] }
 0x3e4   :  { %2761 = vst.msk [vmem:[#allocation3 + $0x70] sm:$0xff] %vm9205_vm5, %v9204_v35  ;;  %vm9219_vm5 = vcmask 835296   ;;  %v9242_v35 = vld [vmem:[#allocation108_spill] sm:$0xff] }
 0x3e5   :  { %2785 = vst.msk [vmem:[#allocation3 + $0x70] sm:$0xff] %vm9207_vm4, %v9206_v0  ;;  %vm9221_vm4 = vmmov %vm9216_vm14  ;;  %v9243_v0 = vld [vmem:[#allocation93_spill] sm:$0xff] }
 0x3e6   :  { %2285 = vst.msk [vmem:[#allocation3 + $0x28] sm:$0xff] %vm2282_vm10, %v2275_v50  ;;  %v3598_v50 = vld [vmem:[#allocation2 + $0x110] sm:$0xff] }
 0x3e7   :  { %2310 = vst.msk [vmem:[#allocation3 + $0x28] sm:$0xff] %vm2307_vm0, %v9208_v46  ;;  %v9246_v46 = vld [vmem:[#allocation74_spill] sm:$0xff] }
 0x3e8   :  { %2335 = vst.msk [vmem:[#allocation3 + $0x28] sm:$0xff] %vm2332_vm1, %v9209_v25  ;;  %3173 = vrot.lane.b32.xlu1 %v8014_v18, %s8932_s15  ;;  %3363 = vrot.lane.b32.xlu2 %v9211_v54, %s9081_s25  ;;  %s9267_s15 = smov 42  }
 0x3e9   :  { %2360 = vst.msk [vmem:[#allocation3 + $0x28] sm:$0xff] %vm2357_vm2, %v9210_v1  ;;  %3585 = vrot.lane.b32.xlu0 %v7681_v49, %s9137_s13  ;;  %v8146_v1 = vld [vmem:[#allocation2 + $0x172] sm:$0xff] }
 0x3ea   :  { %2385 = vst.msk [vmem:[#allocation3 + $0x28] sm:$0xff] %vm8936_vm3, %v9212_v40  ;;  %v9250_v40 = vld [vmem:[#allocation62_spill] sm:$0xff] }
 0x3eb   :  { %3544 = vst.msk [vmem:[#allocation3 + $0x98] sm:$0xff] %vm2357_vm2, %v7922_v45  ;;  %v8041_v49 = vpop.permute.xlu0 %2524  ;;  %v8051_v45 = vpop.permute.xlu1 %2852 }
 0x3ec   :  { %2410 = vst.msk [vmem:[#allocation3 + $0x28] sm:$0xff] %vm9214_vm7, %v9213_v43  ;;  %vm9223_vm7 = vcmask 982896   ;;  %v9253_v43 = vld [vmem:[#allocation111_spill] sm:$0xff] }
 0x3ed   :  { %3568 = vst.msk [vmem:[#allocation3 + $0x98] sm:$0xff] %vm8936_vm3, %v9215_v15  ;;  %v4342_v15 = vld [vmem:[%s8849_s3 + $0x30] sm:$0xff] }
 0x3ee   :  { %3052 = vst.msk [vmem:[#allocation3 + $0x68] sm:$0xff] %vm9216_vm14, %v7925_v60  ;;  %v8059_v60 = vpop.permute.xlu2 %3313  ;;  %vm9227_vm14 = vcmask 999296  }
 0x3ef   :  { %2435 = vst.msk [vmem:[#allocation3 + $0x28] sm:$0xff] %vm9217_vm15, %v7881_v47  ;;  %v9224_v47 = vld [vmem:[#allocation58_spill] sm:$0xff]  ;;  %vm9228_vm15 = vcmask 589296  }
 0x3f0   :  { %3076 = vst.msk [vmem:[#allocation3 + $0x68] sm:$0xff] %vm9219_vm5, %v9218_v19  ;;  %3996 = vrot.lane.b32.xlu1 %v8047_v41, %s9143_s27  ;;  %3197 = vrot.lane.b32.xlu2 %v8055_v5, %s9032_s2  ;;  %vm9230_vm5 = vcmask 671296  }
 0x3f1   :  { %2460 = vst.msk [vmem:[#allocation3 + $0x28] sm:$0xff] %vm9221_vm4, %v9220_v61  ;;  %3609 = vrot.lane.b32.xlu0 %v3598_v50, %s9222_s1  ;;  %v9255_v50 = vld [vmem:[#allocation30_spill] sm:$0xff] }
 0x3f2   :  { %2808 = vst.msk [vmem:[#allocation3 + $0x60] sm:$0xff] %vm9223_vm7, %v7947_v27  ;;  %vm9233_vm7 = vcmask 835296  }
 0x3f3   :  { %2834 = vst.msk [vmem:[#allocation3 + $0x60] sm:$0xff] %vm2227_vm8, %v9224_v47  ;;  %v8076_v39 = vpop.permute.xlu0 %2526  ;;  %v8081_v27 = vpop.permute.xlu1 %2426  ;;  %v4341_v47 = vld [vmem:[%s8849_s3 + $0x28] sm:$0xff] }
 0x3f4   :  { %3497 = vst.msk [vmem:[#allocation3 + $0xa8] sm:$0xff] %vm2307_vm0, %v7950_v7  ;;  %v8085_v7 = vld [vmem:[#allocation2 + $0xd4] sm:$0xff] }
 0x3f5   :  { %3521 = vst.msk [vmem:[#allocation3 + $0xa8] sm:$0xff] %vm2332_vm1, %v9225_v32  ;;  %v8197_v32 = vld [vmem:[#allocation2 + $0xa0] sm:$0xff] }
 0x3f6   :  { %3100 = vst.msk [vmem:[#allocation3 + $0x68] sm:$0xff] %vm2507_vm13, %v7954_v11  ;;  %v8089_v11 = vpop.permute.xlu2 %3337 }
 0x3f7   :  { %3124 = vst.msk [vmem:[#allocation3 + $0x68] sm:$0xff] %vm9227_vm14, %v9226_v4 }
 0x3f8   :  { %3592 = vst.msk [vmem:[#allocation3 + $0x98] sm:$0xff] %vm9228_vm15, %v3582_v24  ;;  %3633 = vrot.lane.b32.xlu1 %v8078_v34, %s9064_s17  ;;  %4024 = vrot.lane.b32.xlu2 %v8085_v7, %s9059_s23  ;;  %vm9240_vm15 = vcmask 982896  }
 0x3f9   :  { %3616 = vst.msk [vmem:[#allocation3 + $0x98] sm:$0xff] %vm9230_vm5, %v9229_v42  ;;  %3387 = vrot.lane.b32.xlu0 %v7990_v29, %s9055_s22  ;;  %vm9244_vm5 = vcmask 589296   ;;  %v8205_v42 = vld [vmem:[#allocation2 + $0x22] sm:$0xff] }
 0x3fa   :  { %3640 = vst.msk [vmem:[#allocation3 + $0x98] sm:$0xff] %vm9221_vm4, %v9231_v28  ;;  %vm9245_vm4 = vcmask 900896   ;;  %v9258_v28 = vld [vmem:[#allocation94_spill] sm:$0xff] }
 0x3fb   :  { %3664 = vst.msk [vmem:[#allocation3 + $0x98] sm:$0xff] %vm9233_vm7, %v9232_v48  ;;  %v8107_v24 = vpop.permute.xlu0 %3559  ;;  %v8113_v52 = vpop.permute.xlu1 %3044  ;;  %vm9247_vm7 = vmmov %vm9240_vm15 }
 0x3fc   :  { %3688 = vst.msk [vmem:[#allocation3 + $0x98] sm:$0xff] %vm2507_vm13, %v9234_v55  ;;  %v4340_v55 = vld [vmem:[%s8849_s3 + $0x20] sm:$0xff] }
 0x3fd   :  { %3712 = vst.msk [vmem:[#allocation3 + $0x98] sm:$0xff] %vm9227_vm14, %v9235_v56  ;;  %vm9248_vm14 = vcmask 835296   ;;  %v4339_v56 = vld [vmem:[%s8849_s3 + $0x18] sm:$0xff] }
 0x3fe   :  { %2286 = vst.msk [vmem:[#allocation3 + $0x38] sm:$0xff] %vm2282_vm10, %v7984_v10  ;;  %v9238_v10 = vld [vmem:[#allocation95_spill] sm:$0xff]  ;;  %v8123_v9 = vpop.permute.xlu2 %1990 }
 0x3ff   :  { %2311 = vst.msk [vmem:[#allocation3 + $0x38] sm:$0xff] %vm2307_vm0, %v9236_v58  ;;  %v9263_v58 = vld [vmem:[#allocation81_spill] sm:$0xff] }
 0x400   :  { %2336 = vst.msk [vmem:[#allocation3 + $0x38] sm:$0xff] %vm2332_vm1, %v9237_v31  ;;  %3657 = vrot.lane.b32.xlu1 %v8109_v26, %s9089_s30  ;;  %4048 = vrot.lane.b32.xlu2 %v8119_v13, %s9023_s0 }
 0x401   :  { %2361 = vst.msk [vmem:[#allocation3 + $0x38] sm:$0xff] %vm2357_vm2, %v9238_v10  ;;  %3221 = vrot.lane.b32.xlu0 %v8117_v51, %s9239_s28  ;;  %v9266_v10 = vld [vmem:[#allocation87_spill] sm:$0xff] }
 0x402   :  { %2809 = vst.msk [vmem:[#allocation3 + $0x70] sm:$0xff] %vm9240_vm15, %v7988_v2  ;;  %vm9251_vm15 = vcmask 999296  }
 0x403   :  { %2836 = vst.msk [vmem:[#allocation3 + $0x70] sm:$0xff] %vm2227_vm8, %v9241_v44  ;;  %v8144_v25 = vpop.permute.xlu0 %1940  ;;  %v3093_v2 = vpop.permute.xlu1 %3092 }
 0x404   :  { %2386 = vst.msk [vmem:[#allocation3 + $0x38] sm:$0xff] %vm8936_vm3, %v9242_v35  ;;  %v9273_v35 = vld [vmem:[#allocation90_spill] sm:$0xff] }
 0x405   :  { %2411 = vst.msk [vmem:[#allocation3 + $0x38] sm:$0xff] %vm9244_vm5, %v9243_v0  ;;  %vm9257_vm5 = vcmask 736896   ;;  %v8266_v0 = vld [vmem:[#allocation2 + $0x44] sm:$0xff] }
 0x406   :  { %2181 = vst.msk [vmem:[#allocation3 + $0x30] sm:$0xff] %vm9245_vm4, %v8009_v38  ;;  %v8154_v54 = vpop.permute.xlu2 %3361  ;;  %v9249_v38 = vld [vmem:[#allocation19_spill] sm:$0xff]  ;;  %vm9259_vm4 = vcmask 589296  }
 0x407   :  { %2206 = vst.msk [vmem:[#allocation3 + $0x30] sm:$0xff] %vm9247_vm7, %v9246_v46  ;;  %vm9261_vm7 = vcmask 671296   ;;  %v9276_v46 = vld [vmem:[#allocation110_spill] sm:$0xff] }
 0x408   :  { %2235 = vst.msk [vmem:[#allocation3 + $0x30] sm:$0xff] %vm2227_vm8, %v7903_v8  ;;  %3681 = vrot.lane.b32.xlu1 %v8146_v1, %s9070_s19  ;;  %4072 = vrot.lane.b32.xlu2 %v9249_v38, %s9167_s29  ;;  %v4345_v8 = vld [vmem:[%s8849_s3 + $0x48] sm:$0xff] }
 0x409   :  { %2485 = vst.msk [vmem:[#allocation3 + $0x28] sm:$0xff] %vm9248_vm14, %v8018_v37  ;;  %3245 = vrot.lane.b32.xlu0 %v7560_v3, %s9169_s14  ;;  %4427 = vmatpush.msrb.mxu1 %v4345_v8  ;;  %v4344_v37 = vld [vmem:[%s8849_s3 + $0x40] sm:$0xff]  ;;  %v4343_v3 = vld [vmem:[%s8849_s3 + $0x38] sm:$0xff]  ;;  %vm9262_vm14 = vmmov %vm9261_vm7 }
 0x40a   :  { %2510 = vst.msk [vmem:[#allocation3 + $0x28] sm:$0xff] %vm2507_vm13, %v9250_v40  ;;  %v3724_v38 = vld [vmem:[#allocation2 + $0xc2] sm:$0xff]  ;;  %v9282_v8 = vld [vmem:[#allocation17_spill] sm:$0xff] }
 0x40b   :  { %2535 = vst.msk [vmem:[#allocation3 + $0x28] sm:$0xff] %vm9251_vm15, %v8041_v49  ;;  %4428 = vmatpush.msrb.mxu1 %v4344_v37  ;;  %v9254_v49 = vld [vmem:[#allocation97_spill] sm:$0xff]  ;;  %v8184_v19 = vpop.permute.xlu0 %2578  ;;  %v8190_v61 = vpop.permute.xlu1 %3535  ;;  %vm9264_vm15 = vcmask 753296   ;;  %v9281_v40 = vld [vmem:[#allocation91_spill] sm:$0xff]  ;;  %v9283_v37 = vld [vmem:[#allocation86_spill] sm:$0xff] }
 0x40c   :  { %2861 = vst.msk [vmem:[#allocation3 + $0x78] sm:$0xff] %vm2257_vm9, %v8051_v45  ;;  %v8186_v45 = vld [vmem:[#allocation2 + $0x114] sm:$0xff] }
 0x40d   :  { %2885 = vst.msk [vmem:[#allocation3 + $0x78] sm:$0xff] %vm2282_vm10, %v9252_v30  ;;  %4429 = vmatpush.msrb.mxu1 %v4343_v3  ;;  %v9287_v3 = vld [vmem:[#allocation75_spill] sm:$0xff] }
 0x40e   :  { %2909 = vst.msk [vmem:[#allocation3 + $0x78] sm:$0xff] %vm2307_vm0, %v9253_v43  ;;  %v8201_v4 = vpop.permute.xlu2 %3195 }
 0x40f   :  { %2933 = vst.msk [vmem:[#allocation3 + $0x78] sm:$0xff] %vm2332_vm1, %v9254_v49  ;;  %4430 = vmatpush.msrb.mxu1 %v4342_v15  ;;  %v8302_v15 = vld [vmem:[#allocation2 + $0x84] sm:$0xff] }
 0x410   :  { %2957 = vst.msk [vmem:[#allocation3 + $0x78] sm:$0xff] %vm2357_vm2, %v9255_v50  ;;  %3705 = vrot.lane.b32.xlu1 %v8186_v45, %s9256_s10  ;;  %4096 = vrot.lane.b32.xlu2 %v8205_v42, %s9174_s21  ;;  %v9290_v49 = vld [vmem:[#allocation24_spill] sm:$0xff] }
 0x411   :  { %3324 = vst.msk [vmem:[#allocation3 + $0x90] sm:$0xff] %vm9257_vm5, %v8059_v60  ;;  %3269 = vrot.lane.b32.xlu0 %v8197_v32, %s8973_s16  ;;  %4431 = vmatpush.msrb.mxu1 %v4341_v47  ;;  %v9260_v60 = vld [vmem:[#allocation84_spill] sm:$0xff]  ;;  %vm9265_vm5 = vcmask 835296  }
 0x412   :  { %2981 = vst.msk [vmem:[#allocation3 + $0x78] sm:$0xff] %vm8936_vm3, %v9258_v28  ;;  %v4309_v48 = vld [vmem:[#allocation3 + $0x28] sm:$0xff] }
 0x413   :  { %3005 = vst.msk [vmem:[#allocation3 + $0x78] sm:$0xff] %vm9259_vm4, %v7520_v23  ;;  %5561 = vmatmul.msk.f32.gmra.mxu2 %vm4368_vm6, %v4309_v48  ;;  %4432 = vmatpush.msrb.mxu1 %v4340_v55  ;;  %v4338_v23 = vld [vmem:[%s8849_s3 + $0x10] sm:$0xff]  ;;  %v8231_v31 = vpop.permute.xlu0 %2626  ;;  %v3148_v57 = vpop.permute.xlu1 %3147  ;;  %vm9268_vm4 = vcmask 999296   ;;  %v4315_v48 = vld [vmem:[#allocation3 + $0x58] sm:$0xff] }
 0x414   :  { %3029 = vst.msk [vmem:[#allocation3 + $0x78] sm:$0xff] %vm9261_vm7, %v9260_v60  ;;  %vm9269_vm7 = vcmask 818896   ;;  %v3748_v47 = vld [vmem:[#allocation2 + $0x122] sm:$0xff]  ;;  %v9292_v28 = vld [vmem:[#allocation113_spill] sm:$0xff]  ;;  %v9301_v60 = vld [vmem:[#allocation98_spill] sm:$0xff] }
 0x415   :  { %2436 = vst.msk [vmem:[#allocation3 + $0x38] sm:$0xff] %vm9262_vm14, %v8081_v27  ;;  %4433 = vmatpush.msrb.mxu1 %v4339_v56  ;;  %v8237_v27 = vld [vmem:[#allocation2 + $0x42] sm:$0xff]  ;;  %vm9270_vm14 = vmmov %vm9264_vm15  ;;  %v9303_v56 = vld [vmem:[#allocation78_spill] sm:$0xff] }
 0x416   :  { %2461 = vst.msk [vmem:[#allocation3 + $0x38] sm:$0xff] %vm9264_vm15, %v9263_v58  ;;  %v8241_v44 = vpop.permute.xlu2 %3631  ;;  %vm9272_vm15 = vmmov %vm9265_vm5  ;;  %v9305_v58 = vld [vmem:[#allocation68_spill] sm:$0xff] }
 0x417   :  { %2486 = vst.msk [vmem:[#allocation3 + $0x38] sm:$0xff] %vm9265_vm5, %v8024_v22  ;;  %4434 = vmatpush.msrb.mxu1 %v4338_v23  ;;  %v4337_v22 = vld [vmem:[%s8849_s3 + $0x8] sm:$0xff]  ;;  %vm9274_vm5 = vmmov %vm9268_vm4 }
 0x418   :  { %2511 = vst.msk [vmem:[#allocation3 + $0x38] sm:$0xff] %vm2507_vm13, %v9266_v10  ;;  %4120 = vrot.lane.b32.xlu1 %v7733_v36, %s9267_s15  ;;  %v4336_v36 = vld [vmem:[%s8849_s3] sm:$0xff]  ;;  %3317 = vrot.lane.b32.xlu2 %v7708_v12, %s9188_s20  ;;  %s9278_s3 = smov 90   ;;  %v4317_v10 = vld [vmem:[#allocation3 + $0x68] sm:$0xff] }
 0x419   :  { %2536 = vst.msk [vmem:[#allocation3 + $0x38] sm:$0xff] %vm9268_vm4, %v8076_v39  ;;  %3293 = vrot.lane.b32.xlu0 %v8237_v27, %s9187_s24  ;;  %4435 = vmatpush.msrb.mxu1 %v4337_v22  ;;  %v9271_v39 = vld [vmem:[#allocation89_spill] sm:$0xff]  ;;  %vm9275_vm4 = vcmask 162896   ;;  %v9310_v22 = vld [vmem:[#allocation22_spill] sm:$0xff] }
 0x41a   :  { %3348 = vst.msk [vmem:[#allocation3 + $0x90] sm:$0xff] %vm9269_vm7, %v8089_v11  ;;  %vm9277_vm7 = vcmask 244896  }
 0x41b   :  { %3053 = vst.msk [vmem:[#allocation3 + $0x78] sm:$0xff] %vm9270_vm14, %v8113_v52  ;;  %4436 = vmatpush.msrb.mxu1 %v4336_v36  ;;  %v8264_v11 = vpop.permute.xlu0 %3583  ;;  %v8270_v52 = vpop.permute.xlu1 %3171  ;;  %vm9279_vm14 = vcmask 326896   ;;  %v4306_v36 = vld [vmem:[#allocation3 + $0x10] sm:$0xff] }
 0x41c   :  { %3077 = vst.msk [vmem:[#allocation3 + $0x78] sm:$0xff] %vm9272_vm15, %v9271_v39  ;;  %vm9280_vm15 = vcmask 408896  }
 0x41d   :  { %3101 = vst.msk [vmem:[#allocation3 + $0x78] sm:$0xff] %vm2507_vm13, %v3093_v2  ;;  %v8274_v2 = vld [vmem:[#allocation2 + $0x24] sm:$0xff] }
 0x41e   :  { %3125 = vst.msk [vmem:[#allocation3 + $0x78] sm:$0xff] %vm9274_vm5, %v9273_v35  ;;  %vm9284_vm5 = vcmask 654896  }
 0x41f   :  { %1953 = vst.msk [vmem:[#allocation3] sm:$0xff] %vm9275_vm4, %v8144_v25  ;;  %v8279_v25 = vpop.permute.xlu2 %3655  ;;  %vm9286_vm4 = vcmask 736896  }
 0x420   :  { %v4311_v12 = vld [vmem:[#allocation3 + $0x38] sm:$0xff]  ;;  %1978 = vst.msk [vmem:[#allocation3] sm:$0xff] %vm9277_vm7, %v9276_v46  ;;  %3341 = vrot.lane.b32.xlu1 %v8266_v0, %s9278_s3  ;;  %3732 = vrot.lane.b32.xlu2 %v3724_v38, %s9031_s12  ;;  %vm9288_vm7 = vcmask 818896   ;;  %v9319_v46 = vld [vmem:[#allocation13_spill] sm:$0xff] }
 0x421   :  { %5562 = vmatmul.msk.f32.gmra.mxu2 %vm4368_vm6, %v4311_v12  ;;  %2003 = vst.msk [vmem:[#allocation3] sm:$0xff] %vm9279_vm14, %v8123_v9  ;;  %4144 = vrot.lane.b32.xlu0 %v8274_v2, %s9199_s18  ;;  %v9285_v9 = vld [vmem:[#allocation99_spill] sm:$0xff]  ;;  %vm9289_vm14 = vcmask 900896   ;;  %v4321_v38 = vld [vmem:[#allocation3 + $0x88] sm:$0xff] }
 0x422   :  { %2028 = vst.msk [vmem:[#allocation3] sm:$0xff] %vm9280_vm15, %v7531_v63  ;;  %v4313_v63 = vld [vmem:[#allocation3 + $0x48] sm:$0xff]  ;;  %vm9291_vm15 = vcmask 982896  }
 0x423   :  { %2053 = vst.msk [vmem:[#allocation3] sm:$0xff] %vm2052_vm11, %v9281_v40  ;;  %v8296_v30 = vpop.permute.xlu0 %3413  ;;  %v3608_v43 = vpop.permute.xlu1 %3607 }
 0x424   :  { %2078 = vst.msk [vmem:[#allocation3] sm:$0xff] %vm2077_vm12, %v9282_v8  ;;  %v8383_v8 = vld [vmem:[#allocation2 + $0x144] sm:$0xff] }
 0x425   :  { %2103 = vst.msk [vmem:[#allocation3] sm:$0xff] %vm9284_vm5, %v9283_v37  ;;  %vm9294_vm5 = vmmov %vm9289_vm14  ;;  %v4310_v37 = vld [vmem:[#allocation3 + $0x30] sm:$0xff] }
 0x426   :  { %2128 = vst.msk [vmem:[#allocation3] sm:$0xff] %vm9286_vm4, %v9285_v9  ;;  %vm9295_vm4 = vcmask 244896  }
 0x427   :  { %2153 = vst.msk [vmem:[#allocation3] sm:$0xff] %vm9288_vm7, %v9287_v3  ;;  %v3680_v50 = vpop.permute.xlu2 %3679  ;;  %vm9296_vm7 = vcmask 326896   ;;  %v3892_v3 = vld [vmem:[#allocation2 + $0x14] sm:$0xff] }
 0x428   :  { %2178 = vst.msk [vmem:[#allocation3] sm:$0xff] %vm9289_vm14, %v7576_v20  ;;  %3365 = vrot.lane.b32.xlu1 %v7843_v62, %s9081_s25  ;;  %3756 = vrot.lane.b32.xlu2 %v3748_v47, %s9293_s26  ;;  %v8322_v62 = vld [vmem:[#allocation2 + $0x160] sm:$0xff]  ;;  %vm9297_vm14 = vcmask 162896   ;;  %v3916_v47 = vld [vmem:[#allocation2 + $0x74] sm:$0xff] }
 0x429   :  { %2203 = vst.msk [vmem:[#allocation3] sm:$0xff] %vm9291_vm15, %v9290_v49  ;;  %5563 = vmatmul.msk.f32.gmra.mxu2 %vm4368_vm6, %v4313_v63  ;;  %4168 = vrot.lane.b32.xlu0 %v8302_v15, %s9137_s13  ;;  %vm9298_vm15 = vcmask 408896  }
 0x42a   :  { %2228 = vst.msk [vmem:[#allocation3] sm:$0xff] %vm2227_vm8, %v9292_v28 }
 0x42b   :  { %3372 = vst.msk [vmem:[#allocation3 + $0x90] sm:$0xff] %vm9294_vm5, %v8154_v54  ;;  %v3386_v20 = vpop.permute.xlu0 %3385  ;;  %v3442_v55 = vpop.permute.xlu1 %3441  ;;  %vm9302_vm5 = vcmask 654896  }
 0x42c   :  { %3545 = vst.msk [vmem:[#allocation3 + $0xa8] sm:$0xff] %vm2357_vm2, %v8190_v61  ;;  %v9300_v61 = vld [vmem:[#allocation88_spill] sm:$0xff] }
 0x42d   :  { %3569 = vst.msk [vmem:[#allocation3 + $0xa8] sm:$0xff] %vm8936_vm3, %v8107_v24  ;;  %vm9316_vm3 = vcmask 835296  }
 0x42e   :  { %2590 = vst.msk [vmem:[#allocation3 + $0x40] sm:$0xff] %vm9295_vm4, %v8184_v19  ;;  %v9299_v19 = vld [vmem:[#allocation96_spill] sm:$0xff]  ;;  %vm9304_vm4 = vcmask 736896  }
 0x42f   :  { %2614 = vst.msk [vmem:[#allocation3 + $0x40] sm:$0xff] %vm9296_vm7, %v7550_v17  ;;  %v3704_v54 = vpop.permute.xlu2 %3703  ;;  %v3772_v17 = vld [vmem:[#allocation2 + $0xc4] sm:$0xff]  ;;  %vm9306_vm7 = vcmask 818896  }
 0x430   :  { %3157 = vst.msk [vmem:[#allocation3 + $0xa0] sm:$0xff] %vm9297_vm14, %v3148_v57  ;;  %3389 = vrot.lane.b32.xlu1 %v8322_v62, %s9055_s22  ;;  %3780 = vrot.lane.b32.xlu2 %v3772_v17, %s9032_s2  ;;  %vm9308_vm14 = vcmask 900896   ;;  %v4314_v17 = vld [vmem:[#allocation3 + $0x50] sm:$0xff] }
 0x431   :  { %5564 = vmatmul.msk.f32.gmra.mxu2 %vm4368_vm6, %v4315_v48  ;;  %2638 = vst.msk [vmem:[#allocation3 + $0x40] sm:$0xff] %vm9298_vm15, %v8231_v31  ;;  %v4304_v24 = vld [vmem:[#allocation3] sm:$0xff]  ;;  %4192 = vrot.lane.b32.xlu0 %v7801_v21, %s9222_s1  ;;  %v9307_v21 = vld [vmem:[#allocation21_spill] sm:$0xff]  ;;  %vm9309_vm15 = vcmask 982896  }
 0x432   :  { %2662 = vst.msk [vmem:[#allocation3 + $0x40] sm:$0xff] %vm2052_vm11, %v9299_v19  ;;  %4437 = vmatmul.f32.vlgmr.msrb.gmra.mxu1 %v4304_v24  ;;  %v3796_v31 = vld [vmem:[#allocation2 + $0x124] sm:$0xff]  ;;  %v3964_v48 = vld [vmem:[#allocation2 + $0xd2] sm:$0xff] }
 0x433   :  { %2686 = vst.msk [vmem:[#allocation3 + $0x40] sm:$0xff] %vm2077_vm12, %v9300_v61  ;;  %v3220_v23 = vpop.permute.xlu0 %3219  ;;  %v3466_v57 = vpop.permute.xlu1 %3465 }
 0x434   :  { %2710 = vst.msk [vmem:[#allocation3 + $0x40] sm:$0xff] %vm9302_vm5, %v9301_v60  ;;  %vm9311_vm5 = vcmask 244896   ;;  %v8411_v60 = vld [vmem:[#allocation2 + $0x32] sm:$0xff] }
 0x435   :  { %2734 = vst.msk [vmem:[#allocation3 + $0x40] sm:$0xff] %vm9304_vm4, %v9303_v56  ;;  %vm9312_vm4 = vcmask 326896  }
 0x436   :  { %2758 = vst.msk [vmem:[#allocation3 + $0x40] sm:$0xff] %vm9306_vm7, %v9305_v58  ;;  %vm9313_vm7 = vcmask 589296  }
 0x437   :  { %2782 = vst.msk [vmem:[#allocation3 + $0x40] sm:$0xff] %vm9308_vm14, %v9307_v21  ;;  %v3316_v39 = vpop.permute.xlu2 %3315  ;;  %vm9314_vm14 = vcmask 671296  }
 0x438   :  { %2806 = vst.msk [vmem:[#allocation3 + $0x40] sm:$0xff] %vm9309_vm15, %v7637_v53  ;;  %3804 = vrot.lane.b32.xlu1 %v3796_v31, %s9239_s28  ;;  %4240 = vrot.lane.b32.xlu2 %v7845_v14, %s9089_s30  ;;  %vm9315_vm15 = vcmask 753296   ;;  %v4318_v31 = vld [vmem:[#allocation3 + $0x70] sm:$0xff] }
 0x439   :  { %2830 = vst.msk [vmem:[#allocation3 + $0x40] sm:$0xff] %vm2227_vm8, %v9310_v22  ;;  %5565 = vmatmul.msk.f32.gmra.mxu2 %vm4368_vm6, %v4317_v10  ;;  %4216 = vrot.lane.b32.xlu0 %v7820_v33, %s9064_s17  ;;  %v4319_v33 = vld [vmem:[#allocation3 + $0x78] sm:$0xff] }
 0x43a   :  { %3181 = vst.msk [vmem:[#allocation3 + $0xa0] sm:$0xff] %vm9311_vm5, %v8270_v52  ;;  %4440 = vmatmul.f32.gmra.mxu1 %v4306_v36  ;;  %vm9317_vm5 = vcmask 15360   ;;  %v8432_v10 = vld [vmem:[#allocation2 + $0x94] sm:$0xff]  ;;  %v4320_v36 = vld [vmem:[#allocation3 + $0x80] sm:$0xff] }
 0x43b   :  { %3205 = vst.msk [vmem:[#allocation3 + $0xa0] sm:$0xff] %vm9312_vm4, %v8201_v4  ;;  %v3244_v53 = vpop.permute.xlu0 %3243  ;;  %v3490_v35 = vpop.permute.xlu1 %3489  ;;  %v3820_v4 = vld [vmem:[#allocation2 + $0x70] sm:$0xff]  ;;  %vm9320_vm4 = vcmask 999296  }
 0x43c   :  { %3593 = vst.msk [vmem:[#allocation3 + $0xa8] sm:$0xff] %vm9313_vm7, %v8264_v11  ;;  %v4308_v11 = vld [vmem:[#allocation3 + $0x20] sm:$0xff]  ;;  %vm9321_vm7 = vcmask 408896  }
 0x43d   :  { %3617 = vst.msk [vmem:[#allocation3 + $0xa8] sm:$0xff] %vm9314_vm14, %v3608_v43  ;;  %v4323_v43 = vld [vmem:[#allocation3 + $0x98] sm:$0xff]  ;;  %vm9322_vm14 = vcmask 654896  }
 0x43e   :  { %3641 = vst.msk [vmem:[#allocation3 + $0xa8] sm:$0xff] %vm9315_vm15, %v8241_v44  ;;  %v3844_v44 = vld [vmem:[#allocation2 + $0x12] sm:$0xff]  ;;  %vm9324_vm15 = vcmask 736896  }
 0x43f   :  { %3665 = vst.msk [vmem:[#allocation3 + $0xa8] sm:$0xff] %vm9316_vm3, %v8279_v25  ;;  %v3340_v12 = vpop.permute.xlu2 %3339  ;;  %vm9318_vm3 = vcmask 982896   ;;  %v3868_v25 = vld [vmem:[#allocation2 + $0x72] sm:$0xff] }
 0x440   :  { %3426 = vst.msk [vmem:[#allocation3 + $0xb8] sm:$0xff] %vm9317_vm5, %v8296_v30  ;;  %4264 = vrot.lane.b32.xlu1 %v7895_v16, %s9070_s19  ;;  %3852 = vrot.lane.b32.xlu2 %v3844_v44, %s8973_s16  ;;  %v4312_v28 = vld [vmem:[#allocation3 + $0x40] sm:$0xff]  ;;  %vm9325_vm5 = vcmask 818896  }
 0x441   :  { %5566 = vmatmul.msk.f32.gmra.mxu2 %vm4368_vm6, %v4319_v33  ;;  %3689 = vst.msk [vmem:[#allocation3 + $0xa8] sm:$0xff] %vm2507_vm13, %v3680_v50  ;;  %3828 = vrot.lane.b32.xlu0 %v3820_v4, %s9169_s14  ;;  %v9323_v50 = vld [vmem:[#allocation8_spill] sm:$0xff] }
 0x442   :  { %4443 = vmatmul.f32.gmra.mxu1 %v4308_v11  ;;  %3450 = vst.msk [vmem:[#allocation3 + $0xb8] sm:$0xff] %vm2257_vm9, %v3442_v55 }
 0x443   :  { %3396 = vst.msk [vmem:[#allocation3 + $0x90] sm:$0xff] %vm9318_vm3, %v3386_v20  ;;  %v3268_v52 = vpop.permute.xlu0 %3267  ;;  %v3514_v40 = vpop.permute.xlu1 %3513  ;;  %vm9326_vm3 = vcmask 900896  }
 0x444   :  { %3421 = vst.msk [vmem:[#allocation3 + $0x90] sm:$0xff] %vm2227_vm8, %v9319_v46 }
 0x445   :  { %3713 = vst.msk [vmem:[#allocation3 + $0xa8] sm:$0xff] %vm9320_vm4, %v3704_v54  ;;  %vm9327_vm4 = vcmask 507296  }
 0x446   :  { %3474 = vst.msk [vmem:[#allocation3 + $0xb8] sm:$0xff] %vm2282_vm10, %v3466_v57 }
 0x447   :  { %3229 = vst.msk [vmem:[#allocation3 + $0xa0] sm:$0xff] %vm9321_vm7, %v3220_v23  ;;  %v3364_v9 = vpop.permute.xlu2 %3363  ;;  %vm9328_vm7 = vcmask 162896   ;;  %v8426_v23 = vld [vmem:[#allocation2 + $0x34] sm:$0xff] }
 0x448   :  { %3498 = vst.msk [vmem:[#allocation3 + $0xb8] sm:$0xff] %vm2307_vm0, %v3490_v35  ;;  %3876 = vrot.lane.b32.xlu1 %v3868_v25, %s9187_s24  ;;  %3900 = vrot.lane.b32.xlu2 %v3892_v3, %s9188_s20  ;;  %v9343_v3 = vld [vmem:[#allocation51_spill] sm:$0xff] }
 0x449   :  { %5567 = vmatmul.msk.f32.gmra.mxu2 %vm4368_vm6, %v4321_v38  ;;  %3253 = vst.msk [vmem:[#allocation3 + $0xa0] sm:$0xff] %vm2052_vm11, %v3244_v53  ;;  %4288 = vrot.lane.b32.xlu0 %v8383_v8, %s9256_s10  ;;  %v9336_v53 = vld [vmem:[#allocation92_spill] sm:$0xff]  ;;  %v8468_v38 = vld [vmem:[#allocation2 + $0x154] sm:$0xff] }
 0x44a   :  { %4446 = vmatmul.f32.gmra.mxu1 %v4310_v37  ;;  %3522 = vst.msk [vmem:[#allocation3 + $0xb8] sm:$0xff] %vm2332_vm1, %v3514_v40 }
 0x44b   :  { %3277 = vst.msk [vmem:[#allocation3 + $0xa0] sm:$0xff] %vm2077_vm12, %v3268_v52  ;;  %v3292_v63 = vpop.permute.xlu0 %3291  ;;  %v3538_v49 = vpop.permute.xlu1 %3537  ;;  %v4322_v4 = vld [vmem:[#allocation3 + $0x90] sm:$0xff]  ;;  %v3869_v52 = vld [vmem:[#allocation2 + $0x82] sm:$0xff] }
 0x44c   :  { %3301 = vst.msk [vmem:[#allocation3 + $0xa0] sm:$0xff] %vm9322_vm14, %v3292_v63  ;;  %v4325_v24 = vld [vmem:[#allocation3 + $0xa8] sm:$0xff]  ;;  %vm9329_vm14 = vcmask 589296  }
 0x44d   :  { %3546 = vst.msk [vmem:[#allocation3 + $0xb8] sm:$0xff] %vm2357_vm2, %v3538_v49 }
 0x44e   :  { %3325 = vst.msk [vmem:[#allocation3 + $0xa0] sm:$0xff] %vm9324_vm15, %v3316_v39  ;;  %vm9330_vm15 = vcmask 244896  }
 0x44f   :  { %v3198_v20 = vpop.permute.xlu2 %3197  ;;  %3349 = vst.msk [vmem:[#allocation3 + $0xa0] sm:$0xff] %vm9325_vm5, %v3340_v12  ;;  %vm9331_vm5 = vcmask 326896  }
 0x450   :  { %3948 = vrot.lane.b32.xlu1 %v9323_v50, %s9081_s25  ;;  %3972 = vrot.lane.b32.xlu2 %v3964_v48, %s9055_s22  ;;  %3373 = vst.msk [vmem:[#allocation3 + $0xa0] sm:$0xff] %vm9326_vm3, %v3364_v9  ;;  %vm9332_vm3 = vcmask 671296  }
 0x451   :  { %5568 = vmatmul.msk.f32.gmra.mxu2 %vm4368_vm6, %v4323_v43  ;;  %3924 = vrot.lane.b32.xlu0 %v3916_v47, %s9278_s3  ;;  %v3965_v43 = vld [vmem:[#allocation2 + $0xe2] sm:$0xff]  ;;  %v8494_v47 = vpop.f32.mrf.mxu2 }
 0x452   :  { %4449 = vmatmul.f32.gmra.mxu1 %v4312_v28 }
 0x453   :  { %v3562_v55 = vpop.permute.xlu0 %3561  ;;  %v3150_v54 = vpop.permute.xlu1 %3149 }
 0x454   :  { %3570 = vst.msk [vmem:[#allocation3 + $0xb8] sm:$0xff] %vm9327_vm4, %v3562_v55  ;;  %vm9333_vm4 = vcmask 15360  }
 0x455   :  { %3158 = vst.msk [vmem:[#allocation3 + $0xb0] sm:$0xff] %vm9328_vm7, %v3150_v54  ;;  %vm9334_vm7 = vcmask 982896  }
 0x457   :  { %v4025_v19 = vpop.permute.xlu2 %4024 }
 0x458   :  { %4026 = vrot.lane.b32.xlu1 %v7895_v16, %s9059_s23  ;;  %4050 = vrot.lane.b32.xlu2 %v8383_v8, %s9023_s0  ;;  %v4316_v16 = vld [vmem:[#allocation3 + $0x60] sm:$0xff] }
 0x459   :  { %5569 = vmatmul.msk.f32.gmra.mxu2 %vm4368_vm6, %v4325_v24  ;;  %3998 = vrot.lane.b32.xlu0 %v7845_v14, %s9143_s27  ;;  %v4506_v55 = vpop.f32.mrf.mxu2 }
 0x45a   :  { %4452 = vmatmul.f32.gmra.mxu1 %v4314_v17  ;;  %v8511_v17 = vld [vmem:[#allocation2 + $0xa4] sm:$0xff] }
 0x45b   :  { %v3586_v61 = vpop.permute.xlu0 %3585  ;;  %v3174_v56 = vpop.permute.xlu1 %3173 }
 0x45c   :  { %3594 = vst.msk [vmem:[#allocation3 + $0xb8] sm:$0xff] %vm9329_vm14, %v3586_v61  ;;  %vm9335_vm14 = vcmask 753296  }
 0x45d   :  { %3182 = vst.msk [vmem:[#allocation3 + $0xb0] sm:$0xff] %vm9330_vm15, %v3174_v56  ;;  %vm9337_vm15 = vcmask 408896  }
 0x45e   :  { %3206 = vst.msk [vmem:[#allocation3 + $0xb0] sm:$0xff] %vm9331_vm5, %v3198_v20  ;;  %vm9338_vm5 = vcmask 835296  }
 0x45f   :  { %v4049_v58 = vpop.permute.xlu2 %4048 }
 0x460   :  { %4098 = vrot.lane.b32.xlu1 %v8411_v60, %s9174_s21  ;;  %4122 = vrot.lane.b32.xlu2 %v7966_v6, %s9267_s15 }
 0x461   :  { %4074 = vrot.lane.b32.xlu0 %v9176_v59, %s9167_s29 }
 0x462   :  { %4455 = vmatmul.f32.gmra.mxu1 %v4316_v16 }
 0x463   :  { %v3610_v14 = vpop.permute.xlu0 %3609  ;;  %v8422_v21 = vpop.permute.xlu1 %3996 }
 0x464   :  { %3618 = vst.msk [vmem:[#allocation3 + $0xb8] sm:$0xff] %vm9332_vm3, %v3610_v14  ;;  %vm9339_vm3 = vcmask 162896  }
 0x465   :  { %4009 = vst.msk [vmem:[#allocation3 + $0xc8] sm:$0xff] %vm9333_vm4, %v8422_v21  ;;  %vm9340_vm4 = vcmask 999296  }
 0x466   :  { %4036 = vst.msk [vmem:[#allocation3 + $0xc8] sm:$0xff] %vm2257_vm9, %v4025_v19 }
 0x467   :  { %v4073_v59 = vpop.permute.xlu2 %4072  ;;  %4060 = vst.msk [vmem:[#allocation3 + $0xc8] sm:$0xff] %vm2282_vm10, %v4049_v58  ;;  %v3750_v58 = vld [vmem:[#allocation2 + $0x142] sm:$0xff] }
 0x468   :  { %3734 = vrot.lane.b32.xlu1 %v3964_v48, %s9031_s12  ;;  %4170 = vrot.lane.b32.xlu2 %v8432_v10, %s9137_s13  ;;  %4084 = vst.msk [vmem:[#allocation3 + $0xc8] sm:$0xff] %vm2307_vm0, %v4073_v59  ;;  %v8502_v48 = vld [vmem:[#allocation2 + $0xa2] sm:$0xff] }
 0x469   :  { %4146 = vrot.lane.b32.xlu0 %v8426_v23, %s9199_s18 }
 0x46a   :  { %4458 = vmatmul.f32.gmra.mxu1 %v4318_v31 }
 0x46b   :  { %v3388_v57 = vpop.permute.xlu0 %3387  ;;  %v3634_v22 = vpop.permute.xlu1 %3633 }
 0x46c   :  { %3397 = vst.msk [vmem:[#allocation3 + $0xa0] sm:$0xff] %vm9334_vm7, %v3388_v57  ;;  %vm9341_vm7 = vcmask 244896  }
 0x46d   :  { %3642 = vst.msk [vmem:[#allocation3 + $0xb8] sm:$0xff] %vm9335_vm14, %v3634_v22  ;;  %vm9342_vm14 = vcmask 654896  }
 0x46e   :  { %3423 = vst.msk [vmem:[#allocation3 + $0xa0] sm:$0xff] %vm2227_vm8, %v9336_v53  ;;  %v8531_v53 = vld [vmem:[#allocation2 + $0x102] sm:$0xff] }
 0x46f   :  { %v4097_v39 = vpop.permute.xlu2 %4096 }
 0x470   :  { %4194 = vrot.lane.b32.xlu1 %v7990_v29, %s9222_s1  ;;  %3782 = vrot.lane.b32.xlu2 %v8085_v7, %s9032_s2  ;;  %4108 = vst.msk [vmem:[#allocation3 + $0xc8] sm:$0xff] %vm2332_vm1, %v4097_v39 }
 0x471   :  { %3758 = vrot.lane.b32.xlu0 %v8047_v41, %s9293_s26 }
 0x472   :  { %4461 = vmatmul.f32.gmra.mxu1 %v4320_v36 }
 0x473   :  { %v3222_v33 = vpop.permute.xlu0 %3221  ;;  %v3658_v35 = vpop.permute.xlu1 %3657 }
 0x474   :  { %3230 = vst.msk [vmem:[#allocation3 + $0xb0] sm:$0xff] %vm9337_vm15, %v3222_v33  ;;  %vm9344_vm15 = vcmask 736896  }
 0x475   :  { %3666 = vst.msk [vmem:[#allocation3 + $0xb8] sm:$0xff] %vm9338_vm5, %v3658_v35  ;;  %v4324_v7 = vld [vmem:[#allocation3 + $0xa0] sm:$0xff]  ;;  %vm9345_vm5 = vcmask 326896  }
 0x476   :  { %v4234_v35 = vld [vmem:[#allocation2 + $0x162] sm:$0xff] }
 0x477   :  { %v3318_v41 = vpop.permute.xlu2 %3317 }
 0x478   :  { %3806 = vrot.lane.b32.xlu1 %v8119_v13, %s9239_s28  ;;  %4242 = vrot.lane.b32.xlu2 %v8055_v5, %s9089_s30  ;;  %v3821_v13 = vld [vmem:[#allocation2 + $0x80] sm:$0xff] }
 0x479   :  { %4218 = vrot.lane.b32.xlu0 %v8014_v18, %s9064_s17 }
 0x47a   :  { %4464 = vmatmul.f32.gmra.mxu1 %v4322_v4 }
 0x47b   :  { %v3246_v11 = vpop.permute.xlu0 %3245  ;;  %v3682_v12 = vpop.permute.xlu1 %3681 }
 0x47c   :  { %3254 = vst.msk [vmem:[#allocation3 + $0xb0] sm:$0xff] %vm2052_vm11, %v3246_v11 }
 0x47d   :  { %3690 = vst.msk [vmem:[#allocation3 + $0xb8] sm:$0xff] %vm2507_vm13, %v3682_v12 }
 0x47f   :  { %v3733_v44 = vpop.permute.xlu2 %3732 }
 0x480   :  { %4266 = vrot.lane.b32.xlu1 %v8117_v51, %s9070_s19  ;;  %3744 = vst.msk [vmem:[#allocation3 + $0xc0] sm:$0xff] %vm9339_vm3, %v3733_v44  ;;  %3854 = vrot.lane.b32.xlu2 %v8205_v42, %s8973_s16  ;;  %vm9346_vm3 = vcmask 507296  }
 0x481   :  { %3830 = vrot.lane.b32.xlu0 %v3821_v13, %s9169_s14 }
 0x482   :  { %4467 = vmatmul.f32.gmra.mxu1 %v4324_v7  ;;  %v4258_v7 = vld [vmem:[#allocation2 + $0x104] sm:$0xff] }
 0x483   :  { %v3270_v46 = vpop.permute.xlu0 %3269  ;;  %v3706_v25 = vpop.permute.xlu1 %3705 }
 0x484   :  { %3278 = vst.msk [vmem:[#allocation3 + $0xb0] sm:$0xff] %vm2077_vm12, %v3270_v46 }
 0x485   :  { %3714 = vst.msk [vmem:[#allocation3 + $0xb8] sm:$0xff] %vm9340_vm4, %v3706_v25  ;;  %vm9347_vm4 = vcmask 818896  }
 0x487   :  { %v3757_v40 = vpop.permute.xlu2 %3756 }
 0x488   :  { %3878 = vrot.lane.b32.xlu1 %v3869_v52, %s9187_s24  ;;  %3768 = vst.msk [vmem:[#allocation3 + $0xc0] sm:$0xff] %vm9341_vm7, %v3757_v40  ;;  %3902 = vrot.lane.b32.xlu2 %v8274_v2, %s9188_s20  ;;  %vm9348_vm7 = vcmask 589296  }
 0x489   :  { %4290 = vrot.lane.b32.xlu0 %v8468_v38, %s9256_s10 }
 0x48b   :  { %v3294_v42 = vpop.permute.xlu0 %3293  ;;  %v4121_v37 = vpop.permute.xlu1 %4120 }
 0x48c   :  { %3302 = vst.msk [vmem:[#allocation3 + $0xb0] sm:$0xff] %vm9342_vm14, %v3294_v42  ;;  %v4327_v9 = vld [vmem:[#allocation3 + $0xb8] sm:$0xff]  ;;  %vm9349_vm14 = vcmask 900896  }
 0x48d   :  { %4132 = vst.msk [vmem:[#allocation3 + $0xc8] sm:$0xff] %vm2357_vm2, %v4121_v37  ;;  %5570 = vmatmul.msk.f32.gmra.mxu2 %vm4368_vm6, %v4327_v9  ;;  %v4282_v37 = vld [vmem:[#allocation2 + $0x164] sm:$0xff] }
 0x48e   :  { %3326 = vst.msk [vmem:[#allocation3 + $0xb0] sm:$0xff] %vm9344_vm15, %v3318_v41  ;;  %vm9350_vm15 = vcmask 671296  }
 0x48f   :  { %v3781_v63 = vpop.permute.xlu2 %3780 }
 0x490   :  { %3950 = vrot.lane.b32.xlu1 %v9343_v3, %s9081_s25  ;;  %3974 = vrot.lane.b32.xlu2 %v3965_v43, %s9055_s22  ;;  %3792 = vst.msk [vmem:[#allocation3 + $0xc0] sm:$0xff] %vm9345_vm5, %v3781_v63  ;;  %vm9351_vm5 = vcmask 982896  }
 0x491   :  { %3926 = vrot.lane.b32.xlu0 %v8302_v15, %s9278_s3 }
 0x493   :  { %v4145_v2 = vpop.permute.xlu0 %4144  ;;  %v3342_v49 = vpop.permute.xlu1 %3341 }
 0x494   :  { %4156 = vst.msk [vmem:[#allocation3 + $0xc8] sm:$0xff] %vm9346_vm3, %v4145_v2  ;;  %vm9352_vm3 = vcmask 753296  }
 0x495   :  { %3350 = vst.msk [vmem:[#allocation3 + $0xb0] sm:$0xff] %vm9347_vm4, %v3342_v49  ;;  %vm9353_vm4 = vcmask 408896  }
 0x496   :  { %v4509_v56 = vpop.f32.mrf.mxu2 }
 0x497   :  { %v4241_v50 = vpop.permute.xlu2 %4240 }
 0x498   :  { %4028 = vrot.lane.b32.xlu1 %v8117_v51, %s9059_s23  ;;  %4052 = vrot.lane.b32.xlu2 %v8468_v38, %s9023_s0 }
 0x499   :  { %4000 = vrot.lane.b32.xlu0 %v8055_v5, %s9143_s27 }
 0x49b   :  { %v4169_v15 = vpop.permute.xlu0 %4168  ;;  %v3366_v28 = vpop.permute.xlu1 %3365 }
 0x49c   :  { %4180 = vst.msk [vmem:[#allocation3 + $0xc8] sm:$0xff] %vm9348_vm7, %v4169_v15  ;;  %vm9354_vm7 = vcmask 835296  }
 0x49d   :  { %3374 = vst.msk [vmem:[#allocation3 + $0xb0] sm:$0xff] %vm9349_vm14, %v3366_v28  ;;  %vm9355_vm14 = vcmask 999296  }
 0x49f   :  { %v3853_v20 = vpop.permute.xlu2 %3852 }
 0x4a0   :  { %4100 = vrot.lane.b32.xlu1 %v8237_v27, %s9174_s21  ;;  %4124 = vrot.lane.b32.xlu2 %v8502_v48, %s9267_s15 }
 0x4a1   :  { %4076 = vrot.lane.b32.xlu0 %v8197_v32, %s9167_s29 }
 0x4a3   :  { %v4193_v5 = vpop.permute.xlu0 %4192  ;;  %v3390_v24 = vpop.permute.xlu1 %3389 }
 0x4a4   :  { %4204 = vst.msk [vmem:[#allocation3 + $0xc8] sm:$0xff] %vm9350_vm15, %v4193_v5  ;;  %v4512_v22 = vpop.f32.mrf.mxu2  ;;  %vm9356_vm15 = vcmask 654896  }
 0x4a5   :  { %3398 = vst.msk [vmem:[#allocation3 + $0xb0] sm:$0xff] %vm9351_vm5, %v3390_v24  ;;  %vm9357_vm5 = vcmask 736896  }
 0x4a6   :  { %3425 = vst.msk [vmem:[#allocation3 + $0xb0] sm:$0xff] %vm2227_vm8, %v8296_v30  ;;  %v3774_v30 = vld [vmem:[#allocation2 + $0xe4] sm:$0xff] }
 0x4a7   :  { %v3901_v54 = vpop.permute.xlu2 %3900 }
 0x4a8   :  { %3736 = vrot.lane.b32.xlu1 %v3965_v43, %s9031_s12  ;;  %4172 = vrot.lane.b32.xlu2 %v8511_v17, %s9137_s13 }
 0x4a9   :  { %4148 = vrot.lane.b32.xlu0 %v8266_v0, %s9199_s18 }
 0x4ab   :  { %v4217_v61 = vpop.permute.xlu0 %4216  ;;  %v3805_v16 = vpop.permute.xlu1 %3804 }
 0x4ac   :  { %4228 = vst.msk [vmem:[#allocation3 + $0xc8] sm:$0xff] %vm9352_vm3, %v4217_v61  ;;  %v8544_v44 = vpop.f32.mrf.mxu2  ;;  %vm9358_vm3 = vcmask 818896  }
 0x4ad   :  { %3816 = vst.msk [vmem:[#allocation3 + $0xc0] sm:$0xff] %vm9353_vm4, %v3805_v16  ;;  %v4326_v31 = vld [vmem:[#allocation3 + $0xb0] sm:$0xff]  ;;  %vm9359_vm4 = vcmask 900896  }
 0x4ae   :  { %4252 = vst.msk [vmem:[#allocation3 + $0xc8] sm:$0xff] %vm9354_vm7, %v4241_v50  ;;  %4470 = vmatmul.f32.gmra.mxu1 %v4326_v31  ;;  %vm9360_vm7 = vcmask 982896   ;;  %v3727_v31 = vld [vmem:[#allocation2 + $0xf2] sm:$0xff] }
 0x4af   :  { %v8517_v19 = vpop.f32.mrf.mxu1  ;;  %v3973_v14 = vpop.permute.xlu2 %3972 }
 0x4b0   :  { %4196 = vrot.lane.b32.xlu1 %v8322_v62, %s9222_s1  ;;  %3784 = vrot.lane.b32.xlu2 %v3774_v30, %s9032_s2 }
 0x4b1   :  { %3760 = vrot.lane.b32.xlu0 %v3750_v58, %s9293_s26 }
 0x4b3   :  { %v3829_v57 = vpop.permute.xlu0 %3828  ;;  %v4265_v39 = vpop.permute.xlu1 %4264 }
 0x4b4   :  { %3840 = vst.msk [vmem:[#allocation3 + $0xc0] sm:$0xff] %vm2052_vm11, %v3829_v57  ;;  %v4139_v57 = vld [vmem:[#allocation2 + $0x54] sm:$0xff] }
 0x4b5   :  { %4276 = vst.msk [vmem:[#allocation3 + $0xc8] sm:$0xff] %vm2507_vm13, %v4265_v39 }
 0x4b6   :  { %3864 = vst.msk [vmem:[#allocation3 + $0xc0] sm:$0xff] %vm2077_vm12, %v3853_v20  ;;  %v4091_v20 = vld [vmem:[#allocation2 + $0x52] sm:$0xff] }
 0x4b7   :  { %v4441_v59 = vpop.f32.mrf.mxu1  ;;  %v4051_v33 = vpop.permute.xlu2 %4050 }
 0x4b8   :  { %v8526_v36 = vadd.f32 %v4506_v55, %v4441_v59  ;;  %3808 = vrot.lane.b32.xlu1 %v8383_v8, %s9239_s28  ;;  %4244 = vrot.lane.b32.xlu2 %v4234_v35, %s9089_s30  ;;  %v3822_v8 = vld [vmem:[#allocation2 + $0x90] sm:$0xff] }
 0x4b9   :  { %4220 = vrot.lane.b32.xlu0 %v8531_v53, %s9064_s17 }
 0x4bb   :  { %v4289_v41 = vpop.permute.xlu0 %4288  ;;  %v3877_v12 = vpop.permute.xlu1 %3876 }
 0x4bc   :  { %4300 = vst.msk [vmem:[#allocation3 + $0xc8] sm:$0xff] %vm9355_vm14, %v4289_v41  ;;  %vm9361_vm14 = vcmask 15360  }
 0x4bd   :  { %3888 = vst.msk [vmem:[#allocation3 + $0xc0] sm:$0xff] %vm9356_vm15, %v3877_v12  ;;  %vm9362_vm15 = vcmask 507296  }
 0x4be   :  { %3912 = vst.msk [vmem:[#allocation3 + $0xc0] sm:$0xff] %vm9357_vm5, %v3901_v54  ;;  %v4067_v54 = vld [vmem:[#allocation2 + $0xb0] sm:$0xff]  ;;  %vm9363_vm5 = vcmask 162896  }
 0x4bf   :  { %v4444_v4 = vpop.f32.mrf.mxu1  ;;  %v4123_v13 = vpop.permute.xlu2 %4122 }
 0x4c0   :  { %v8538_v11 = vadd.f32 %v4509_v56, %v4444_v4  ;;  %4268 = vrot.lane.b32.xlu1 %v4258_v7, %s9070_s19  ;;  %3856 = vrot.lane.b32.xlu2 %v8411_v60, %s8973_s16  ;;  %v4518_v60 = vpop.f32.mrf.mxu2  ;;  %v4115_v56 = vld [vmem:[#allocation2 + $0xb2] sm:$0xff] }
 0x4c1   :  { %3832 = vrot.lane.b32.xlu0 %v3822_v8, %s9169_s14 }
 0x4c3   :  { %v3925_v52 = vpop.permute.xlu0 %3924  ;;  %v4329_v25 = vld [vmem:[#allocation3 + $0xc8] sm:$0xff]  ;;  %v3949_v42 = vpop.permute.xlu1 %3948 }
 0x4c4   :  { %3936 = vst.msk [vmem:[#allocation3 + $0xc0] sm:$0xff] %vm9358_vm3, %v3925_v52  ;;  %5571 = vmatmul.msk.f32.gmra.mxu2 %vm4368_vm6, %v4329_v25  ;;  %vm9364_vm3 = vcmask 589296  }
 0x4c5   :  { %3960 = vst.msk [vmem:[#allocation3 + $0xc0] sm:$0xff] %vm9359_vm4, %v3949_v42  ;;  %vm9365_vm4 = vcmask 244896  }
 0x4c6   :  { %3984 = vst.msk [vmem:[#allocation3 + $0xc0] sm:$0xff] %vm9360_vm7, %v3973_v14  ;;  %vm9366_vm7 = vcmask 671296  }
 0x4c7   :  { %v4447_v46 = vpop.f32.mrf.mxu1  ;;  %v4171_v9 = vpop.permute.xlu2 %4170  ;;  %4008 = vst.msk [vmem:[#allocation3 + $0xc0] sm:$0xff] %vm2227_vm8, %v8422_v21 }
 0x4c8   :  { %v8549_v40 = vadd.f32 %v4512_v22, %v4447_v46  ;;  %3880 = vrot.lane.b32.xlu1 %v7966_v6, %s9187_s24  ;;  %3904 = vrot.lane.b32.xlu2 %v8426_v23, %s9188_s20  ;;  %v4521_v23 = vpop.f32.mrf.mxu2 }
 0x4c9   :  { %4292 = vrot.lane.b32.xlu0 %v4282_v37, %s9256_s10 }
 0x4cb   :  { %v8564_v63 = vpop.permute.xlu0 %3998  ;;  %v4027_v6 = vpop.permute.xlu1 %4026 }
 0x4cc   :  { %4011 = vst.msk [vmem:[#allocation3 + $0xd8] sm:$0xff] %vm9361_vm14, %v8564_v63  ;;  %vm9367_vm14 = vcmask 326896  }
 0x4cd   :  { %4037 = vst.msk [vmem:[#allocation3 + $0xd8] sm:$0xff] %vm2257_vm9, %v4027_v6 }
 0x4ce   :  { %4061 = vst.msk [vmem:[#allocation3 + $0xd8] sm:$0xff] %vm2282_vm10, %v4051_v33  ;;  %v4328_v21 = vld [vmem:[#allocation3 + $0xc0] sm:$0xff] }
 0x4cf   :  { %v8562_v3 = vpop.f32.mrf.mxu1  ;;  %v3783_v43 = vpop.permute.xlu2 %3782  ;;  %4473 = vmatmul.f32.gmra.mxu1 %v4328_v21 }
 0x4d0   :  { %3952 = vrot.lane.b32.xlu1 %v7990_v29, %s9081_s25  ;;  %3976 = vrot.lane.b32.xlu2 %v8014_v18, %s9055_s22  ;;  %v4524_v5 = vpop.f32.mrf.mxu2 }
 0x4d1   :  { %3928 = vrot.lane.b32.xlu0 %v8432_v10, %s9278_s3 }
 0x4d3   :  { %v4075_v49 = vpop.permute.xlu0 %4074  ;;  %v4099_v15 = vpop.permute.xlu1 %4098 }
 0x4d4   :  { %4085 = vst.msk [vmem:[#allocation3 + $0xd8] sm:$0xff] %vm2307_vm0, %v4075_v49 }
 0x4d5   :  { %4109 = vst.msk [vmem:[#allocation3 + $0xd8] sm:$0xff] %vm2332_vm1, %v4099_v15 }
 0x4d6   :  { %4133 = vst.msk [vmem:[#allocation3 + $0xd8] sm:$0xff] %vm2357_vm2, %v4123_v13 }
 0x4d7   :  { %v4453_v2 = vpop.f32.mrf.mxu1  ;;  %v4243_v29 = vpop.permute.xlu2 %4242 }
 0x4d8   :  { %v8576_v50 = vadd.f32 %v4518_v60, %v4453_v2  ;;  %4030 = vrot.lane.b32.xlu1 %v4258_v7, %s9059_s23  ;;  %4054 = vrot.lane.b32.xlu2 %v4282_v37, %s9023_s0  ;;  %v8602_v39 = vpop.f32.mrf.mxu2  ;;  %v3751_v7 = vld [vmem:[#allocation2 + $0x152] sm:$0xff] }
 0x4d9   :  { %4002 = vrot.lane.b32.xlu0 %v4234_v35, %s9143_s27 }
 0x4da   :  { %v4552_v10 = vmax.f32 %v8526_v36, %v8576_v50  ;;  %v4163_v36 = vld [vmem:[#allocation2 + $0xb4] sm:$0xff] }
 0x4db   :  { %v4147_v28 = vpop.permute.xlu0 %4146  ;;  %v3735_v24 = vpop.permute.xlu1 %3734 }
 0x4dc   :  { %4157 = vst.msk [vmem:[#allocation3 + $0xd8] sm:$0xff] %vm9362_vm15, %v4147_v28  ;;  %vm9368_vm15 = vcmask 753296  }
 0x4dd   :  { %3745 = vst.msk [vmem:[#allocation3 + $0xd0] sm:$0xff] %vm9363_vm5, %v3735_v24  ;;  %vm9369_vm5 = vcmask 408896  }
 0x4de   :  { %4181 = vst.msk [vmem:[#allocation3 + $0xd8] sm:$0xff] %vm9364_vm3, %v4171_v9  ;;  %vm9370_vm3 = vcmask 835296  }
 0x4df   :  { %v4456_v18 = vpop.f32.mrf.mxu1  ;;  %v3855_v61 = vpop.permute.xlu2 %3854 }
 0x4e0   :  { %v8586_v55 = vadd.f32 %v4521_v23, %v4456_v18  ;;  %4102 = vrot.lane.b32.xlu1 %v4091_v20, %s9174_s21  ;;  %4126 = vrot.lane.b32.xlu2 %v4115_v56, %s9267_s15  ;;  %v4530_v12 = vpop.f32.mrf.mxu2 }
 0x4e1   :  { %4078 = vrot.lane.b32.xlu0 %v4067_v54, %s9167_s29  ;;  %s9413_s29 = sld [smem:[#allocation118_spill]] }
 0x4e2   :  { %v4553_v16 = vmax.f32 %v8538_v11, %v8586_v55 }
 0x4e3   :  { %v3759_v14 = vpop.permute.xlu0 %3758  ;;  %v4195_v59 = vpop.permute.xlu1 %4194 }
 0x4e4   :  { %3769 = vst.msk [vmem:[#allocation3 + $0xd0] sm:$0xff] %vm9365_vm4, %v3759_v14  ;;  %vm9371_vm4 = vcmask 999296  }
 0x4e5   :  { %4205 = vst.msk [vmem:[#allocation3 + $0xd8] sm:$0xff] %vm9366_vm7, %v4195_v59  ;;  %vm9372_vm7 = vcmask 654896   ;;  %v5778_v59 = vld [vmem:[%s8851_s5 + $0x30] sm:$0xff] }
 0x4e6   :  { %3793 = vst.msk [vmem:[#allocation3 + $0xd0] sm:$0xff] %vm9367_vm14, %v3783_v43  ;;  %vm9373_vm14 = vcmask 736896  }
 0x4e7   :  { %v4459_v58 = vpop.f32.mrf.mxu1  ;;  %v3903_v22 = vpop.permute.xlu2 %3902 }
 0x4e8   :  { %v8596_v30 = vadd.f32 %v4524_v5, %v4459_v58  ;;  %3738 = vrot.lane.b32.xlu1 %v3727_v31, %s9031_s12  ;;  %4174 = vrot.lane.b32.xlu2 %v4163_v36, %s9137_s13  ;;  %s9410_s12 = sld [smem:[#allocation115_spill]] }
 0x4e9   :  { %4150 = vrot.lane.b32.xlu0 %v4139_v57, %s9199_s18  ;;  %v4504_v57 = vadd.f32 %v8494_v47, %v8517_v19  ;;  %v8708_v47 = vld [vmem:[%s8850_s4] ss:$0 sm:$0xff]  ;;  %s9412_s4 = sld [smem:[#allocation117_spill]] }
 0x4ea   :  { %v4554_v33 = vmax.f32 %v8549_v40, %v8596_v30  ;;  %v4516_v30 = vadd.f32 %v8544_v44, %v8562_v3 }
 0x4eb   :  { %v4219_v4 = vpop.permute.xlu0 %4218  ;;  %v3807_v41 = vpop.permute.xlu1 %3806 }
 0x4ec   :  { %4229 = vst.msk [vmem:[#allocation3 + $0xd8] sm:$0xff] %vm9368_vm15, %v4219_v4  ;;  %vm9374_vm15 = vcmask 818896  }
 0x4ed   :  { %3817 = vst.msk [vmem:[#allocation3 + $0xd0] sm:$0xff] %vm9369_vm5, %v3807_v41  ;;  %vm9375_vm5 = vcmask 900896  }
 0x4ee   :  { %4253 = vst.msk [vmem:[#allocation3 + $0xd8] sm:$0xff] %vm9370_vm3, %v4243_v29  ;;  %vm9376_vm3 = vcmask 982896  }
 0x4ef   :  { %v8608_v35 = vpop.f32.mrf.mxu1  ;;  %v3975_v11 = vpop.permute.xlu2 %3974 }
 0x4f0   :  { %4198 = vrot.lane.b32.xlu1 %v8078_v34, %s9222_s1  ;;  %3786 = vrot.lane.b32.xlu2 %v8117_v51, %s9032_s2  ;;  %v4533_v51 = vpop.f32.mrf.mxu2 }
 0x4f1   :  { %3762 = vrot.lane.b32.xlu0 %v3751_v7, %s9293_s26 }
 0x4f3   :  { %v3831_v13 = vpop.permute.xlu0 %3830  ;;  %v4267_v52 = vpop.permute.xlu1 %4266 }
 0x4f4   :  { %3841 = vst.msk [vmem:[#allocation3 + $0xd0] sm:$0xff] %vm2052_vm11, %v3831_v13 }
 0x4f5   :  { %4277 = vst.msk [vmem:[#allocation3 + $0xd8] sm:$0xff] %vm2507_vm13, %v4267_v52 }
 0x4f6   :  { %3865 = vst.msk [vmem:[#allocation3 + $0xd0] sm:$0xff] %vm2077_vm12, %v3855_v61 }
 0x4f7   :  { %v4465_v8 = vpop.f32.mrf.mxu1  ;;  %v4053_v34 = vpop.permute.xlu2 %4052 }
 0x4f8   :  { %v4531_v46 = vadd.f32 %v4530_v12, %v4465_v8  ;;  %3810 = vrot.lane.b32.xlu1 %v8468_v38, %s9239_s28  ;;  %4246 = vrot.lane.b32.xlu2 %v8146_v1, %s9089_s30 }
 0x4f9   :  { %4222 = vrot.lane.b32.xlu0 %v8109_v26, %s9064_s17 }
 0x4fa   :  { %v8624_v25 = vmax.f32 %v4552_v10, %v4531_v46 }
 0x4fb   :  { %v4291_v37 = vpop.permute.xlu0 %4290  ;;  %v3879_v60 = vpop.permute.xlu1 %3878 }
 0x4fc   :  { %4301 = vst.msk [vmem:[#allocation3 + $0xd8] sm:$0xff] %vm9371_vm4, %v4291_v37  ;;  %vm9377_vm4 = vcmask 15360  }
 0x4fd   :  { %3889 = vst.msk [vmem:[#allocation3 + $0xd0] sm:$0xff] %vm9372_vm7, %v3879_v60  ;;  %vm9378_vm7 = vcmask 507296  }
 0x4fe   :  { %3913 = vst.msk [vmem:[#allocation3 + $0xd0] sm:$0xff] %vm9373_vm14, %v3903_v22  ;;  %vm9379_vm14 = vcmask 162896   ;;  %v4528_v22 = vadd.f32 %v8602_v39, %v8608_v35 }
 0x4ff   :  { %v4468_v42 = vpop.f32.mrf.mxu1  ;;  %v4125_v26 = vpop.permute.xlu2 %4124 }
 0x500   :  { %v4534_v9 = vadd.f32 %v4533_v51, %v4468_v42  ;;  %4270 = vrot.lane.b32.xlu1 %v8186_v45, %s9070_s19  ;;  %3858 = vrot.lane.b32.xlu2 %v8237_v27, %s8973_s16  ;;  %v4283_v45 = vld [vmem:[#allocation2 + $0x174] sm:$0xff] }
 0x501   :  { %3834 = vrot.lane.b32.xlu0 %v8197_v32, %s9169_s14 }
 0x502   :  { %v8635_v38 = vmax.f32 %v4553_v16, %v4534_v9 }
 0x503   :  { %v3927_v1 = vpop.permute.xlu0 %3926  ;;  %v4331_v6 = vld [vmem:[#allocation3 + $0xd8] sm:$0xff]  ;;  %v3951_v43 = vpop.permute.xlu1 %3950 }
 0x504   :  { %3937 = vst.msk [vmem:[#allocation3 + $0xd0] sm:$0xff] %vm9374_vm15, %v3927_v1  ;;  %5572 = vmatmul.msk.f32.gmra.mxu2 %vm4368_vm6, %v4331_v6  ;;  %vm9380_vm15 = vcmask 589296  }
 0x505   :  { %3961 = vst.msk [vmem:[#allocation3 + $0xd0] sm:$0xff] %vm9375_vm5, %v3951_v43  ;;  %vm9381_vm5 = vcmask 244896  }
 0x506   :  { %3985 = vst.msk [vmem:[#allocation3 + $0xd0] sm:$0xff] %vm9376_vm3, %v3975_v11  ;;  %vm9382_vm3 = vcmask 671296  }
 0x507   :  { %v4173_v32 = vpop.permute.xlu2 %4172  ;;  %4010 = vst.msk [vmem:[#allocation3 + $0xd0] sm:$0xff] %vm2227_vm8, %v8564_v63 }
 0x508   :  { %3882 = vrot.lane.b32.xlu1 %v8502_v48, %s9187_s24  ;;  %3906 = vrot.lane.b32.xlu2 %v8266_v0, %s9188_s20 }
 0x509   :  { %4294 = vrot.lane.b32.xlu0 %v4283_v45, %s9256_s10 }
 0x50b   :  { %v4001_v27 = vpop.permute.xlu0 %4000  ;;  %v4029_v21 = vpop.permute.xlu1 %4028 }
 0x50c   :  { %4013 = vst.msk [vmem:[#allocation3 + $0xe8] sm:$0xff] %vm9377_vm4, %v4001_v27  ;;  %vm9383_vm4 = vcmask 326896  }
 0x50d   :  { %4038 = vst.msk [vmem:[#allocation3 + $0xe8] sm:$0xff] %vm2257_vm9, %v4029_v21 }
 0x50e   :  { %4062 = vst.msk [vmem:[#allocation3 + $0xe8] sm:$0xff] %vm2282_vm10, %v4053_v34  ;;  %v4330_v23 = vld [vmem:[#allocation3 + $0xd0] sm:$0xff] }
 0x50f   :  { %v3785_v48 = vpop.permute.xlu2 %3784  ;;  %4476 = vmatmul.f32.gmra.mxu1 %v4330_v23 }
 0x510   :  { %3954 = vrot.lane.b32.xlu1 %v8322_v62, %s9081_s25  ;;  %3978 = vrot.lane.b32.xlu2 %v8531_v53, %s9055_s22  ;;  %v4536_v29 = vpop.f32.mrf.mxu2  ;;  %s9411_s22 = sld [smem:[#allocation116_spill]] }
 0x511   :  { %3930 = vrot.lane.b32.xlu0 %v8511_v17, %s9278_s3  ;;  %v5779_v17 = vld [vmem:[%s8851_s5 + $0x38] sm:$0xff] }
 0x512   :  { %4909 = vmatpush.bf16.msrb.mxu3 %v5779_v17 }
 0x513   :  { %v4077_v0 = vpop.permute.xlu0 %4076  ;;  %v4101_v63 = vpop.permute.xlu1 %4100 }
 0x514   :  { %4086 = vst.msk [vmem:[#allocation3 + $0xe8] sm:$0xff] %vm2307_vm0, %v4077_v0 }
 0x515   :  { %4110 = vst.msk [vmem:[#allocation3 + $0xe8] sm:$0xff] %vm2332_vm1, %v4101_v63 }
 0x516   :  { %4134 = vst.msk [vmem:[#allocation3 + $0xe8] sm:$0xff] %vm2357_vm2, %v4125_v26  ;;  %4910 = vmatpush.bf16.msrb.mxu3 %v5778_v59 }
 0x517   :  { %v4245_v62 = vpop.permute.xlu2 %4244 }
 0x51b   :  { %v4149_v2 = vpop.permute.xlu0 %4148  ;;  %v3737_v49 = vpop.permute.xlu1 %3736 }
 0x51c   :  { %4158 = vst.msk [vmem:[#allocation3 + $0xe8] sm:$0xff] %vm9378_vm7, %v4149_v2  ;;  %vm9384_vm7 = vcmask 753296  }
 0x51d   :  { %3746 = vst.msk [vmem:[#allocation3 + $0xe0] sm:$0xff] %vm9379_vm14, %v3737_v49  ;;  %vm9385_vm14 = vcmask 408896   ;;  %v5777_v49 = vld [vmem:[%s8851_s5 + $0x28] sm:$0xff] }
 0x51e   :  { %4182 = vst.msk [vmem:[#allocation3 + $0xe8] sm:$0xff] %vm9380_vm15, %v4173_v32  ;;  %vm9386_vm15 = vcmask 835296   ;;  %4911 = vmatpush.bf16.msrb.mxu3 %v5777_v49  ;;  %v5782_v49 = vld [vmem:[%s8851_s5 + $0x50] sm:$0xff] }
 0x51f   :  { %v3857_v53 = vpop.permute.xlu2 %3856 }
 0x523   :  { %v3761_v50 = vpop.permute.xlu0 %3760  ;;  %v4197_v15 = vpop.permute.xlu1 %4196 }
 0x524   :  { %3770 = vst.msk [vmem:[#allocation3 + $0xe0] sm:$0xff] %vm9381_vm5, %v3761_v50  ;;  %vm9387_vm5 = vcmask 999296  }
 0x525   :  { %4206 = vst.msk [vmem:[#allocation3 + $0xe8] sm:$0xff] %vm9382_vm3, %v4197_v15  ;;  %vm9388_vm3 = vcmask 654896  }
 0x526   :  { %3794 = vst.msk [vmem:[#allocation3 + $0xe0] sm:$0xff] %vm9383_vm4, %v3785_v48  ;;  %vm9389_vm4 = vcmask 736896  }
 0x527   :  { %v3905_v10 = vpop.permute.xlu2 %3904 }
 0x52b   :  { %v4471_v18 = vpop.f32.mrf.mxu1  ;;  %v4221_v28 = vpop.permute.xlu0 %4220 }
 0x52c   :  { %v4537_v20 = vadd.f32 %v4536_v29, %v4471_v18  ;;  %v3809_v5 = vpop.permute.xlu1 %3808  ;;  %4230 = vst.msk [vmem:[#allocation3 + $0xe8] sm:$0xff] %vm9384_vm7, %v4221_v28  ;;  %vm9390_vm7 = vcmask 818896  }
 0x52d   :  { %3818 = vst.msk [vmem:[#allocation3 + $0xe0] sm:$0xff] %vm9385_vm14, %v3809_v5  ;;  %vm9391_vm14 = vcmask 900896  }
 0x52e   :  { %v8677_v55 = vmax.f32 %v4554_v33, %v4537_v20  ;;  %4254 = vst.msk [vmem:[#allocation3 + $0xe8] sm:$0xff] %vm9386_vm15, %v4245_v62  ;;  %vm9392_vm15 = vcmask 982896   ;;  %v4551_v33 = vmax.f32 %v4504_v57, %v4516_v30 }
 0x52f   :  { %v3977_v61 = vpop.permute.xlu2 %3976 }
 0x530   :  { %v4555_v3 = vmax.f32 %v4551_v33, %v4528_v22 }
 0x533   :  { %v3833_v24 = vpop.permute.xlu0 %3832 }
 0x534   :  { %v4269_v54 = vpop.permute.xlu1 %4268  ;;  %3842 = vst.msk [vmem:[#allocation3 + $0xe0] sm:$0xff] %vm2052_vm11, %v3833_v24 }
 0x535   :  { %4278 = vst.msk [vmem:[#allocation3 + $0xe8] sm:$0xff] %vm2507_vm13, %v4269_v54 }
 0x536   :  { %3866 = vst.msk [vmem:[#allocation3 + $0xe0] sm:$0xff] %vm2077_vm12, %v3857_v53 }
 0x537   :  { %v4055_v40 = vpop.permute.xlu2 %4054 }
 0x53b   :  { %v4293_v56 = vpop.permute.xlu0 %4292 }
 0x53c   :  { %v3881_v16 = vpop.permute.xlu1 %3880  ;;  %4302 = vst.msk [vmem:[#allocation3 + $0xe8] sm:$0xff] %vm9387_vm5, %v4293_v56  ;;  %vm9393_vm5 = vcmask 15360  }
 0x53d   :  { %3890 = vst.msk [vmem:[#allocation3 + $0xe0] sm:$0xff] %vm9388_vm3, %v3881_v16  ;;  %vm9395_vm3 = vcmask 162896  }
 0x53e   :  { %3914 = vst.msk [vmem:[#allocation3 + $0xe0] sm:$0xff] %vm9389_vm4, %v3905_v10  ;;  %vm9396_vm4 = vcmask 589296  }
 0x53f   :  { %v4127_v36 = vpop.permute.xlu2 %4126 }
 0x543   :  { %v3929_v58 = vpop.permute.xlu0 %3928  ;;  %v4333_v14 = vld [vmem:[#allocation3 + $0xe8] sm:$0xff] }
 0x544   :  { %v3953_v31 = vpop.permute.xlu1 %3952  ;;  %3938 = vst.msk [vmem:[#allocation3 + $0xe0] sm:$0xff] %vm9390_vm7, %v3929_v58  ;;  %5573 = vmatmul.msk.f32.gmra.mxu2 %vm4368_vm6, %v4333_v14  ;;  %vm9400_vm7 = vcmask 753296   ;;  %v5775_v14 = vld [vmem:[%s8851_s5 + $0x18] sm:$0xff] }
 0x545   :  { %3962 = vst.msk [vmem:[#allocation3 + $0xe0] sm:$0xff] %vm9391_vm14, %v3953_v31  ;;  %vm9401_vm14 = vcmask 408896  }
 0x546   :  { %3986 = vst.msk [vmem:[#allocation3 + $0xe0] sm:$0xff] %vm9392_vm15, %v3977_v61  ;;  %vm9402_vm15 = vcmask 835296  }
 0x547   :  { %4012 = vst.msk [vmem:[#allocation3 + $0xe0] sm:$0xff] %vm2227_vm8, %v4001_v27  ;;  %v4539_v4 = vpop.f32.mrf.mxu2  ;;  %v4175_v12 = vpop.permute.xlu2 %4174 }
 0x54b   :  { %v8700_v41 = vpop.permute.xlu0 %4002 }
 0x54c   :  { %v4031_v7 = vpop.permute.xlu1 %4030  ;;  %4015 = vst.msk [vmem:[#allocation3 + $0xf8] sm:$0xff] %vm9393_vm5, %v8700_v41  ;;  %v4474_v44 = vpop.f32.mrf.mxu1  ;;  %vm9403_vm5 = vcmask 999296  }
 0x54d   :  { %4039 = vst.msk [vmem:[#allocation3 + $0xf8] sm:$0xff] %vm2257_vm9, %v4031_v7  ;;  %v4540_v11 = vadd.f32 %v4539_v4, %v4474_v44  ;;  %vm4579_vm9 = vcmask 155648  }
 0x54e   :  { %4063 = vst.msk [vmem:[#allocation3 + $0xf8] sm:$0xff] %vm2282_vm10, %v4055_v40  ;;  %v4332_v19 = vld [vmem:[#allocation3 + $0xe0] sm:$0xff]  ;;  %vm9394_vm10 = vcmask 507296  }
 0x54f   :  { %v4559_v39 = vmax.f32 %v4555_v3, %v4540_v11  ;;  %4479 = vmatmul.f32.gmra.mxu1 %v4332_v19  ;;  %v3787_v42 = vpop.permute.xlu2 %3786  ;;  %v5774_v3 = vld [vmem:[%s8851_s5 + $0x10] sm:$0xff] }
 0x551   :  { %v4567_v35 = vadd.f32 %v8708_v47, %v4559_v39 }
 0x553   :  { %v4571_v8 = vmax.f32 %v4567_v35, 0.0  ;;  %v4079_v13 = vpop.permute.xlu0 %4078 }
 0x554   :  { %v4103_v46 = vpop.permute.xlu1 %4102  ;;  %4087 = vst.msk [vmem:[#allocation3 + $0xf8] sm:$0xff] %vm2307_vm0, %v4079_v13  ;;  %vm9397_vm0 = vcmask 244896  }
 0x555   :  { %v4575_v52 = vpack.c.bf16 %v4571_v8, %v4571_v8  ;;  %4111 = vst.msk [vmem:[#allocation3 + $0xf8] sm:$0xff] %vm2332_vm1, %v4103_v46  ;;  %vm9398_vm1 = vcmask 671296  }
 0x556   :  { %4135 = vst.msk [vmem:[#allocation3 + $0xf8] sm:$0xff] %vm2357_vm2, %v4127_v36  ;;  %vm9399_vm2 = vcmask 326896  }
 0x557   :  { %4582 = vst [vmem:[#allocation1] sm:$0xff] %v4575_v52  ;;  %v4247_v1 = vpop.permute.xlu2 %4246 }
 0x558   :  { %4580 = vst.msk [vmem:[#allocation4] sm:$0x1] %vm4579_vm9, %v4575_v52  ;;  %vm9404_vm9 = vcmask 654896  }
 0x55b   :  { %v4151_v34 = vpop.permute.xlu0 %4150 }
 0x55c   :  { %v3739_v51 = vpop.permute.xlu1 %3738  ;;  %4159 = vst.msk [vmem:[#allocation3 + $0xf8] sm:$0xff] %vm9394_vm10, %v4151_v34  ;;  %vm9405_vm10 = vcmask 736896  }
 0x55d   :  { %3747 = vst.msk [vmem:[#allocation3 + $0xf0] sm:$0xff] %vm9395_vm3, %v3739_v51  ;;  %vm9406_vm3 = vcmask 818896  }
 0x55e   :  { %v4584_v37 = vld [vmem:[#allocation1 + $0x1] ss:$4 sm:$0xff]  ;;  %4183 = vst.msk [vmem:[#allocation3 + $0xf8] sm:$0xff] %vm9396_vm4, %v4175_v12  ;;  %vm4607_vm4 = vcmask 647648  }
 0x55f   :  { %4591 = vst [vmem:[#allocation1] sm:$0xff] %v4575_v52  ;;  %4586 = vrot.lane.b32.xlu0 %v4584_v37, %s9293_s26  ;;  %v3859_v32 = vpop.permute.xlu2 %3858 }
 0x563   :  { %v3763_v9 = vpop.permute.xlu0 %3762 }
 0x564   :  { %v4199_v60 = vpop.permute.xlu1 %4198  ;;  %3771 = vst.msk [vmem:[#allocation3 + $0xf0] sm:$0xff] %vm9397_vm0, %v3763_v9  ;;  %vm4619_vm0 = vcmask 811648   ;;  %v5772_v9 = vld [vmem:[%s8851_s5] sm:$0xff] }
 0x565   :  { %4207 = vst.msk [vmem:[#allocation3 + $0xf8] sm:$0xff] %vm9398_vm1, %v4199_v60  ;;  %vm4628_vm1 = vcmask 975648  }
 0x566   :  { %v4593_v26 = vld [vmem:[#allocation1 + $0x2] ss:$4 sm:$0xff]  ;;  %3795 = vst.msk [vmem:[#allocation3 + $0xf0] sm:$0xff] %vm9399_vm2, %v3787_v42  ;;  %vm4640_vm2 = vcmask 1041344  }
 0x567   :  { %4600 = vst [vmem:[#allocation1] sm:$0xff] %v4575_v52  ;;  %4595 = vrot.lane.b32.xlu1 %v4593_v26, %s9239_s28  ;;  %v3907_v48 = vpop.permute.xlu2 %3906  ;;  %v5787_v26 = vld [vmem:[%s8851_s5 + $0x78] sm:$0xff] }
 0x56b   :  { %v4223_v6 = vpop.permute.xlu0 %4222 }
 0x56c   :  { %v3811_v43 = vpop.permute.xlu1 %3810  ;;  %4231 = vst.msk [vmem:[#allocation3 + $0xf8] sm:$0xff] %vm9400_vm7, %v4223_v6  ;;  %vm4641_vm7 = vcmask 91137  }
 0x56d   :  { %3819 = vst.msk [vmem:[#allocation3 + $0xf0] sm:$0xff] %vm9401_vm14, %v3811_v43  ;;  %vm4637_vm14 = vcmask 982016  }
 0x56e   :  { %4255 = vst.msk [vmem:[#allocation3 + $0xf8] sm:$0xff] %vm9402_vm15, %v4247_v1  ;;  %v4602_v45 = vld [vmem:[#allocation1 + $0x3] ss:$4 sm:$0xff]  ;;  %vm4642_vm15 = vmor %vm4641_vm7, %vm4640_vm2  ;;  %vm4732_vm2 = vcmask 516448   ;;  %vm4906_vm7 = vcmask 523264  }
 0x56f   :  { %4604 = vrot.lane.b32.xlu2 %v4602_v45, %s8973_s16  ;;  %v3979_v2 = vpop.permute.xlu2 %3978  ;;  %v5786_v1 = vld [vmem:[%s8851_s5 + $0x70] sm:$0xff]  ;;  %s5895_s16 = smov [#allocation5]  }
 0x570   :  { %s5059_s28 = sshll.u32 %s5895_s16, 4  ;;  %s5060_s28 = int_to_ptr.vmem [resolvable:$true] %s5059_s28 }
 0x573   :  { %v3835_v27 = vpop.permute.xlu0 %3834 }
 0x574   :  { %v4271_v21 = vpop.permute.xlu1 %4270  ;;  %3843 = vst.msk [vmem:[#allocation3 + $0xf0] sm:$0xff] %vm2052_vm11, %v3835_v27  ;;  %vm9407_vm11 = vcmask 900896  }
 0x575   :  { %4279 = vst.msk [vmem:[#allocation3 + $0xf8] sm:$0xff] %vm2507_vm13, %v4271_v21  ;;  %vm4589_vm13 = vcmask 319648  }
 0x576   :  { %3867 = vst.msk [vmem:[#allocation3 + $0xf0] sm:$0xff] %vm2077_vm12, %v3859_v32  ;;  %vm9408_vm12 = vcmask 982896   ;;  %v5785_v32 = vld [vmem:[%s8851_s5 + $0x68] sm:$0xff] }
 0x57b   :  { %v4295_v23 = vpop.permute.xlu0 %4294 }
 0x57c   :  { %v3883_v0 = vpop.permute.xlu1 %3882  ;;  %4303 = vst.msk [vmem:[#allocation3 + $0xf8] sm:$0xff] %vm9403_vm5, %v4295_v23  ;;  %vm4651_vm5 = vcmask 254048  }
 0x57d   :  { %3891 = vst.msk [vmem:[#allocation3 + $0xf0] sm:$0xff] %vm9404_vm9, %v3883_v0  ;;  %vm4662_vm9 = vcmask 418048  }
 0x57e   :  { %3915 = vst.msk [vmem:[#allocation3 + $0xf0] sm:$0xff] %vm9405_vm10, %v3907_v48  ;;  %v5784_v48 = vld [vmem:[%s8851_s5 + $0x60] sm:$0xff]  ;;  %vm4671_vm10 = vcmask 582048  }
 0x583   :  { %v3931_v63 = vpop.permute.xlu0 %3930  ;;  %v4335_v62 = vld [vmem:[#allocation3 + $0xf8] sm:$0xff] }
 0x584   :  { %v3955_v17 = vpop.permute.xlu1 %3954  ;;  %3939 = vst.msk [vmem:[#allocation3 + $0xf0] sm:$0xff] %vm9406_vm3, %v3931_v63  ;;  %5574 = vmatmul.msk.f32.gmra.mxu2 %vm4368_vm6, %v4335_v62  ;;  %vm4611_vm6 = vcmask 1040384   ;;  %vm4703_vm3 = vcmask 1041280   ;;  %v5783_v62 = vld [vmem:[%s8851_s5 + $0x58] sm:$0xff] }
 0x585   :  { %3963 = vst.msk [vmem:[#allocation3 + $0xf0] sm:$0xff] %vm9407_vm11, %v3955_v17  ;;  %vm4704_vm11 = vcmask 25601  }
 0x586   :  { %3987 = vst.msk [vmem:[#allocation3 + $0xf0] sm:$0xff] %vm9408_vm12, %v3979_v2  ;;  %vm4680_vm12 = vcmask 746048  }
 0x587   :  { %4014 = vst.msk [vmem:[#allocation3 + $0xf0] sm:$0xff] %vm2227_vm8, %v8700_v41  ;;  %v4542_v53 = vpop.f32.mrf.mxu2  ;;  %vm4598_vm8 = vcmask 483648  }
 0x58c   :  { %v4477_v50 = vpop.f32.mrf.mxu1 }
 0x58d   :  { %v4543_v15 = vadd.f32 %v4542_v53, %v4477_v50 }
 0x58e   :  { %v4334_v29 = vld [vmem:[#allocation3 + $0xf0] sm:$0xff] }
 0x58f   :  { %v4560_v10 = vmax.f32 %v8624_v25, %v4543_v15  ;;  %4482 = vmatmul.f32.gmra.mxu1 %v4334_v29  ;;  %v5776_v25 = vld [vmem:[%s8851_s5 + $0x20] sm:$0xff]  ;;  %v5781_v15 = vld [vmem:[%s8851_s5 + $0x48] sm:$0xff] }
 0x590   :  { %4912 = vmatpush.bf16.msrb.mxu3 %v5776_v25 }
 0x591   :  { %v4568_v18 = vadd.f32 %v8708_v47, %v4560_v10  ;;  %v5780_v10 = vld [vmem:[%s8851_s5 + $0x40] sm:$0xff] }
 0x593   :  { %v4572_v28 = vmax.f32 %v4568_v18, 0.0 }
 0x594   :  { %4913 = vmatpush.bf16.msrb.mxu3 %v5775_v14  ;;  %v5794_v14 = vld [vmem:[%s8853_s7 + $0x10] sm:$0xff] }
 0x595   :  { %v4576_v20 = vpack.c.bf16 %v4572_v28, %v4572_v28  ;;  %v5791_v28 = vld [vmem:[%s8851_s5 + $0x98] sm:$0xff] }
 0x597   :  { %4621 = vst [vmem:[#allocation1] sm:$0xff] %v4576_v20  ;;  %v4610_v5 = vrot.slane %v4576_v20, 3 }
 0x598   :  { %4914 = vmatpush.bf16.msrb.mxu3 %v5774_v3 }
 0x599   :  { %v4614_v24 = vsel %vm4611_vm6, %v4576_v20, %v4610_v5  ;;  %v5790_v5 = vld [vmem:[%s8851_s5 + $0x90] sm:$0xff] }
 0x59a   :  { %4616 = vrot.lane.b32.xlu1 %v4614_v24, %s9188_s20  ;;  %v5789_v24 = vld [vmem:[%s8851_s5 + $0x88] sm:$0xff]  ;;  %s5061_s20 = sshll.u32 %s9413_s29, 4  ;;  %s5062_s20 = int_to_ptr.hbm [resolvable:$true] %s5061_s20 }
 0x59e   :  { %v4623_v54 = vld [vmem:[#allocation1 + $0x1] ss:$4 sm:$0xff] }
 0x59f   :  { %4630 = vst [vmem:[#allocation1] sm:$0xff] %v4576_v20  ;;  %4625 = vrot.lane.b32.xlu2 %v4623_v54, %s9081_s25  ;;  %v5788_v54 = vld [vmem:[%s8851_s5 + $0x80] sm:$0xff] }
 0x5a6   :  { %v4632_v61 = vld [vmem:[#allocation1 + $0x2] ss:$4 sm:$0xff] }
 0x5a7   :  { %4644 = vst [vmem:[#allocation1] sm:$0xff] %v4576_v20 }
 0x5ae   :  { %v4646_v22 = vld [vmem:[#allocation1 + $0x3] ss:$4 sm:$0xff] }
 0x5c7   :  { %v4545_v56 = vpop.f32.mrf.mxu2 }
 0x5cc   :  { %v4480_v16 = vpop.f32.mrf.mxu1 }
 0x5cd   :  { %v4546_v40 = vadd.f32 %v4545_v56, %v4480_v16  ;;  %v4956_v56 = vld [vmem:[%s8853_s7 + $0x18] sm:$0x1] }
 0x5ce   :  { %v4974_v16 = vunpack.c.l.b16 %v4956_v56 }
 0x5cf   :  { %v4561_v58 = vmax.f32 %v8635_v38, %v4546_v40  ;;  %v4605_v38 = vpop.permute.xlu2 %4604 }
 0x5d0   :  { %v4978_v40 = vpack.c.b16 %v4974_v16, %v4974_v16 }
 0x5d1   :  { %v4569_v31 = vadd.f32 %v8708_v47, %v4561_v58  ;;  %v4587_v30 = vpop.permute.xlu0 %4586 }
 0x5d2   :  { %4590 = vst.msk [vmem:[#allocation4] sm:$0x1] %vm4589_vm13, %v4587_v30  ;;  %vm4700_vm13 = vcmask 916480   ;;  %v4987_v58 = vsel %vm4611_vm6, %v4978_v40, 0  ;;  %v5793_v30 = vld [vmem:[%s8853_s7 + $0x8] sm:$0xff] }
 0x5d3   :  { %v4573_v59 = vmax.f32 %v4569_v31, 0.0  ;;  %v5005_v31 = vld [vmem:[%s8855_s9 + $0x8] sm:$0x3] }
 0x5d5   :  { %v4577_v57 = vpack.c.bf16 %v4573_v59, %v4573_v59  ;;  %v5015_v59 = vunpack.c.l.b16 %v5005_v31 }
 0x5d7   :  { %4664 = vst [vmem:[#allocation1] sm:$0xff] %v4577_v57  ;;  %v4654_v36 = vrot.slane %v4577_v57, 3 }
 0x5d9   :  { %v4596_v33 = vpop.permute.xlu1 %4595  ;;  %v4657_v4 = vsel %vm4611_vm6, %v4577_v57, %v4654_v36 }
 0x5da   :  { %4599 = vst.msk [vmem:[#allocation4] sm:$0x1] %vm4598_vm8, %v4596_v33  ;;  %4659 = vrot.lane.b32.xlu1 %v4657_v4, %s9174_s21  ;;  %vm4689_vm8 = vcmask 910048   ;;  %v5792_v33 = vld [vmem:[%s8853_s7] sm:$0xff] }
 0x5db   :  { %4608 = vst.msk [vmem:[#allocation4] sm:$0x1] %vm4607_vm4, %v4605_v38  ;;  %vm4705_vm4 = vmor %vm4704_vm11, %vm4703_vm3  ;;  %v5795_v38 = vld [vmem:[%s8855_s9] sm:$0xff] }
 0x5de   :  { %v4666_v41 = vld [vmem:[#allocation1 + $0x1] ss:$4 sm:$0xff] }
 0x5df   :  { %4668 = vrot.lane.b32.xlu2 %v4666_v41, %s9199_s18  ;;  %4673 = vst [vmem:[#allocation1] sm:$0xff] %v4577_v57  ;;  %s5893_s18 = smov 44  }
 0x5e6   :  { %v4675_v7 = vld [vmem:[#allocation1 + $0x2] ss:$4 sm:$0xff] }
 0x5e7   :  { %4682 = vst [vmem:[#allocation1] sm:$0xff] %v4577_v57  ;;  %4677 = vrot.lane.b32.xlu1 %v4675_v7, %s9222_s1  ;;  %s5894_s1 = smov 4  }
 0x5ee   :  { %v4684_v44 = vld [vmem:[#allocation1 + $0x3] ss:$4 sm:$0xff] }
 0x5ef   :  { %4686 = vrot.lane.b32.xlu2 %v4684_v44, %s9089_s30  ;;  %s5892_s30 = smov 24   ;;  %v5833_v44 = vld [vmem:[%s9410_s12] ss:$0 sm:$0xff] }
 0x5f9   :  { %v4626_v35 = vpop.permute.xlu2 %4625 }
 0x607   :  { %v4548_v11 = vpop.f32.mrf.mxu2 }
 0x60c   :  { %v4617_v19 = vpop.permute.xlu1 %4616  ;;  %v4483_v39 = vpop.f32.mrf.mxu1 }
 0x60d   :  { %4620 = vst.msk [vmem:[#allocation4] sm:$0x1] %vm4619_vm0, %v4617_v19  ;;  %v4549_v12 = vadd.f32 %v4548_v11, %v4483_v39  ;;  %vm4714_vm0 = vcmask 188448  }
 0x60e   :  { %4629 = vst.msk [vmem:[#allocation4] sm:$0x1] %vm4628_vm1, %v4626_v35  ;;  %vm4723_vm1 = vcmask 352448  }
 0x60f   :  { %v4562_v8 = vmax.f32 %v8677_v55, %v4549_v12  ;;  %v5773_v55 = vld [vmem:[%s8851_s5 + $0x8] sm:$0xff] }
 0x610   :  { %4915 = vmatpush.bf16.msrb.mxu3 %v5773_v55 }
 0x611   :  { %v4570_v13 = vadd.f32 %v8708_v47, %v4562_v8 }
 0x613   :  { %v4574_v46 = vmax.f32 %v4570_v13, 0.0  ;;  %v5834_v13 = vld [vmem:[%s9411_s22] ss:$0 sm:$0xff] }
 0x614   :  { %4916 = vmatpush.bf16.msrb.mxu3 %v5772_v9 }
 0x615   :  { %v4578_v52 = vpack.c.bf16 %v4574_v46, %v4574_v46 }
 0x617   :  { %4707 = vst [vmem:[#allocation1] sm:$0xff] %v4578_v52  ;;  %v4692_v34 = vrot.slane %v4578_v52, 3 }
 0x618   :  { %4922 = vmatpush.bf16.msra.mxu3 %v5787_v26 }
 0x619   :  { %v4695_v51 = vsel %vm4611_vm6, %v4578_v52, %v4692_v34  ;;  %vm4982_vm6 = vcmask 408576  }
 0x61a   :  { %4697 = vrot.lane.b32.xlu0 %v4695_v51, %s9256_s10 }
 0x61c   :  { %4923 = vmatpush.bf16.msra.mxu3 %v5786_v1 }
 0x61e   :  { %v4709_v42 = vld [vmem:[#allocation1 + $0x1] ss:$4 sm:$0xff] }
 0x61f   :  { %4716 = vst [vmem:[#allocation1] sm:$0xff] %v4578_v52 }
 0x620   :  { %4924 = vmatpush.bf16.msra.mxu3 %v5785_v32 }
 0x622   :  { %4634 = vrot.lane.b32.xlu0 %v4632_v61, %s9143_s27 }
 0x624   :  { %4925 = vmatpush.bf16.msra.mxu3 %v5784_v48 }
 0x626   :  { %v4718_v37 = vld [vmem:[#allocation1 + $0x2] ss:$4 sm:$0xff] }
 0x627   :  { %4720 = vrot.lane.b32.xlu1 %v4718_v37, %s5892_s30  ;;  %4725 = vst [vmem:[#allocation1] sm:$0xff] %v4578_v52 }
 0x628   :  { %4926 = vmatpush.bf16.msra.mxu3 %v5783_v62 }
 0x62a   :  { %4648 = vrot.lane.b32.xlu0 %v4646_v22, %s9023_s0  ;;  %v5017_v22 = vpack.c.b16 %v5015_v59, %v5015_v59 }
 0x62c   :  { %4927 = vmatpush.bf16.msra.mxu3 %v5782_v49 }
 0x62e   :  { %v4727_v47 = vld [vmem:[#allocation1 + $0x3] ss:$4 sm:$0xff] }
 0x62f   :  { %4729 = vrot.lane.b32.xlu2 %v4727_v47, %s5893_s18 }
 0x630   :  { %4928 = vmatpush.bf16.msra.mxu3 %v5781_v15 }
 0x632   :  { %4711 = vrot.lane.b32.xlu0 %v4709_v42, %s5894_s1  ;;  %v5835_v42 = vld [vmem:[%s9412_s4] ss:$0 sm:$0xff] }
 0x634   :  { %4929 = vmatpush.bf16.msra.mxu3 %v5780_v10 }
 0x639   :  { %v4669_v27 = vpop.permute.xlu2 %4668 }
 0x649   :  { %v4687_v17 = vpop.permute.xlu2 %4686 }
 0x64c   :  { %v4660_v43 = vpop.permute.xlu1 %4659 }
 0x659   :  { %v4678_v0 = vpop.permute.xlu1 %4677 }
 0x689   :  { %v4730_v29 = vpop.permute.xlu2 %4729 }
 0x68c   :  { %v4698_v60 = vpop.permute.xlu0 %4697 }
 0x68d   :  { %v4699_v63 = vrot.slane %v4698_v60, 7 }
 0x68f   :  { %v4701_v2 = vsel %vm4700_vm13, %v4699_v63, %v4698_v60 }
 0x694   :  { %v4635_v6 = vpop.permute.xlu0 %4634 }
 0x695   :  { %v4636_v45 = vrot.slane %v4635_v6, 7 }
 0x697   :  { %v4638_v21 = vsel %vm4637_vm14, %v4636_v45, %v4635_v6  ;;  %vm9409_vm14 = vcmask 1041408  }
 0x698   :  { %4643 = vst.msk [vmem:[#allocation4] sm:$0x3] %vm4642_vm15, %v4638_v21  ;;  %v5024_v36 = vsel %vm9409_vm14, %v5017_v22, 0  ;;  %vm5019_vm15 = vcmask 162816  }
 0x699   :  { %v4721_v50 = vpop.permute.xlu1 %4720 }
 0x69c   :  { %v4649_v23 = vpop.permute.xlu0 %4648 }
 0x69d   :  { %4652 = vst.msk [vmem:[#allocation4 + $0x1] sm:$0x1] %vm4651_vm5, %v4649_v23  ;;  %vm5039_vm5 = vcmask 9216  }
 0x69e   :  { %4663 = vst.msk [vmem:[#allocation4 + $0x1] sm:$0x1] %vm4662_vm9, %v4660_v43 }
 0x69f   :  { %4672 = vst.msk [vmem:[#allocation4 + $0x1] sm:$0x1] %vm4671_vm10, %v4669_v27 }
 0x6a0   :  { %4681 = vst.msk [vmem:[#allocation4 + $0x1] sm:$0x1] %vm4680_vm12, %v4678_v0 }
 0x6a1   :  { %4690 = vst.msk [vmem:[#allocation4 + $0x1] sm:$0x1] %vm4689_vm8, %v4687_v17 }
 0x6a2   :  { %4706 = vst.msk [vmem:[#allocation4 + $0x1] sm:$0x3] %vm4705_vm4, %v4701_v2 }
 0x6a4   :  { %v4712_v53 = vpop.permute.xlu0 %4711 }
 0x6a5   :  { %4715 = vst.msk [vmem:[#allocation4 + $0x2] sm:$0x1] %vm4714_vm0, %v4712_v53 }
 0x6a6   :  { %4724 = vst.msk [vmem:[#allocation4 + $0x2] sm:$0x1] %vm4723_vm1, %v4721_v50 }
 0x6a7   :  { %4733 = vst.msk [vmem:[#allocation4 + $0x2] sm:$0x1] %vm4732_vm2, %v4730_v29 }
 0x6ae   :  { %v4734_v18 = vld [vmem:[#allocation4] sm:$0x7] }
 0x6af   :  { %4780 = vst [vmem:[#allocation1] ss:$9 sm:$0xff] %v4734_v18 }
 0x6b6   :  { %v4781_v20 = vld [vmem:[#allocation1] sm:$0xff]  ;;  %v4782_v61 = vld [vmem:[#allocation1 + $0x9] sm:$0xff]  ;;  %v4783_v25 = vld [vmem:[#allocation1 + $0x12] sm:$0xff] }
 0x6b7   :  { %4917 = vmatmul.bf16.vlgmr.msrb.gmra.mxu3 %v4781_v20 }
 0x6b8   :  { %4939 = vmatpush.bf16.msrb.mxu3 %v5791_v28 }
 0x6bc   :  { %4940 = vmatpush.bf16.msrb.mxu3 %v5790_v5 }
 0x6c0   :  { %4941 = vmatpush.bf16.msrb.mxu3 %v5789_v24 }
 0x6c4   :  { %4942 = vmatpush.bf16.msrb.mxu3 %v5788_v54 }
 0x6c7   :  { %4930 = vmatmul.bf16.vlgmr.msra.gmra.mxu3 %v4782_v61 }
 0x6c8   :  { %4993 = vmatpush.bf16.msra.mxu3 %v4987_v58 }
 0x6cc   :  { %4994 = vmatpush.bf16.msra.mxu3 %v5794_v14 }
 0x6d0   :  { %4995 = vmatpush.bf16.msra.mxu3 %v5793_v30 }
 0x6d4   :  { %4996 = vmatpush.bf16.msra.mxu3 %v5792_v33 }
 0x6d7   :  { %5655 = vmatmul.msk.bf16.vlgmr.msrb.gmra.mxu3 %vm4906_vm7, %v4783_v25 }
 0x6d8   :  { %5032 = vmatpush.bf16.msrb.mxu3 %v5024_v36 }
 0x6dc   :  { %5033 = vmatpush.bf16.msrb.mxu3 %v5795_v38 }
 0x73a   :  { %v4918_v57 = vpop.f32.mrf.mxu3 }
 0x73b   :  { %v4919_v3 = vadd.f32 %v5833_v44, %v4918_v57 }
 0x742   :  { %v4920_v4 = vpop.f32.mrf.mxu3 }
 0x74a   :  { %v4931_v41 = vpop.f32.mrf.mxu3 }
 0x74b   :  { %v4932_v11 = vadd.f32 %v4931_v41, %v4919_v3 }
 0x752   :  { %v4933_v7 = vpop.f32.mrf.mxu3 }
 0x75a   :  { %v4944_v19 = vpop.f32.mrf.mxu3 }
 0x75b   :  { %v4945_v39 = vadd.f32 %v4944_v19, %v4932_v11 }
 0x75d   :  { %v4948_v35 = vmax.f32 %v4945_v39, 0.0 }
 0x75f   :  { %v4949_v12 = vpack.c.bf16 %v4948_v35, %v4948_v35 }
 0x761   :  { %5668 = vmatmul.msk.bf16.vlgmr.msra.gmra.mxu3 %vm4982_vm6, %v4949_v12 }
 0x762   :  { %v4946_v8 = vpop.f32.mrf.mxu3 }
 0x7e4   :  { %v4998_v46 = vpop.f32.mrf.mxu3 }
 0x7e5   :  { %v4999_v52 = vadd.f32 %v5834_v13, %v4998_v46 }
 0x7e7   :  { %v5002_v34 = vpack.c.bf16 %v4999_v52, %v4999_v52 }
 0x7e9   :  { %5673 = vmatmul.msk.bf16.vlgmr.msrb.gmra.mxu3 %vm5019_vm15, %v5002_v34 }
 0x7ec   :  { %v5000_v51 = vpop.f32.mrf.mxu3 }
 0x86c   :  { %v5035_v37 = vpop.f32.mrf.mxu3 }
 0x86d   :  { %v5036_v55 = vadd.f32 %v5835_v42, %v5035_v37 }
 0x86f   :  { %v5040_v47 = vsel %vm5039_vm5, %v5036_v55, -inf }
 0x870   :  { %5041 = vmax.xlane.f32.xlu0 %v5040_v47 }
 0x874   :  { %v5037_v9 = vpop.f32.mrf.mxu3 }
 0x8e3   :  { %v5042_v60 = vpop.xlane.xlu0 %5041 }
 0x8e4   :  { %v5043_v26 = vsub.f32 %v5036_v55, %v5042_v60 }
 0x8e6   :  { %v5044_v1 = vmul.f32 1.442695, %v5043_v26 }
 0x8e8   :  { %5836 = vpow2.f32 %v5044_v1 }
 0x8ee   :  { %v5837_v6 = vpop.eup %5836 }
 0x8ef   :  { %v5046_v43 = vsel %vm5039_vm5, %v5837_v6, 0.0 }
 0x8f0   :  { %5047 = vadd.xlane.f32.xlu1 %v5046_v43 }
 0x963   :  { %v5048_v45 = vpop.xlane.xlu1 %5047 }
 0x964   :  { %5838 = vlog2.f32 %v5048_v45 }
 0x96a   :  { %v5839_v32 = vpop.eup %5838 }
 0x96b   :  { %v5050_v27 = vmul.f32 0.6931472, %v5839_v32 }
 0x96d   :  { %v5051_v21 = vadd.f32 %v5050_v27, %v5042_v60 }
 0x96f   :  { %v5052_v48 = vsub.f32 %v5036_v55, %v5051_v21 }
 0x971   :  { %5053 = vst.msk [vmem:[#allocation5] sm:$0x3] %vm5039_vm5, %v5052_v48 }
 0x972   :  { %5064 = dma.vmem_to_hbm [thread:$0]  %s5060_s28, 32, %s5062_s20, [#allocation6]  }
 0x973   :  { %5865 = dma.done.wait [#allocation6], 32  }
 0x974   :  { %5866 = vsyncadd [#allocation6], 4294967264 }
 0x975   :  { %5069 = vsyncpa [#allocation6], 1 }

</bundles_post_ra>
